<compile_context>
chip_gen: v5e
topology: v5e:2x2
jax: 0.10.0
libtpu: 0.0.40
codegen_flags: <defaults>
</compile_context>

<pallas_src>
import functools

import jax
import jax.numpy as jnp
from jax.experimental import pallas as pl
from jax.experimental.pallas import tpu as pltpu

_BN_EPS = 1e-5
_VMEM_LIMIT_BYTES = 48 * 1024 * 1024   # explicit scoped-VMEM budget (fits v5e/v6e/v7x)
_TARGET_ROWS = 256                      # target rows per tile for row-tiled kernels


def _compiler_params(semantics):
    return pltpu.CompilerParams(dimension_semantics=semantics,
                                vmem_limit_bytes=_VMEM_LIMIT_BYTES)


def _largest_divisor_leq(n, target):
    target = max(1, min(n, target))
    for d in range(target, 0, -1):
        if n % d == 0:
            return d
    return 1


def _row_block(m, target=512):
    """Largest row block <= target that divides m and is a multiple of 8 (or m itself)."""
    if m <= target:
        return m
    d = (target // 8) * 8
    while d >= 8:
        if m % d == 0:
            return d
        d -= 8
    return m


# ---------------------------------------------------------------------------
# Pallas kernels
# ---------------------------------------------------------------------------
def _conv_stats_kernel(x_ref, w_ref, y_ref, stats_ref, *, khp, kwp, ow):
    """One output row of a stride-1 conv (post space-to-depth) + BN partial stats.

    x_ref:     (1, Hq, Wq, Ck)      bf16  full padded image of one batch item
    w_ref:     (khp, kwp, Ck, Cout) bf16
    y_ref:     (1, 1, OW, Cout)     f32   pre-BN conv output for this output row
    stats_ref: (1, 1, 2, Cout)      f32   [sum, sum_of_squares] over this row
    """
    r = pl.program_id(1)                      # which output row this grid step handles
    ck = x_ref.shape[3]
    cout = w_ref.shape[3]
    acc = jnp.zeros((ow, cout), jnp.float32)
    for i in range(khp):                      # in-kernel im2col: shifted window loads,
        for j in range(kwp):                  # no patch matrix ever hits HBM
            win = x_ref[0, pl.ds(r + i, 1), pl.ds(j, ow), :].reshape(ow, ck)
            acc = acc + jnp.dot(win, w_ref[i, j],
                                preferred_element_type=jnp.float32)
    y_ref[...] = acc[None, None]
    ssum = jnp.sum(acc, axis=0, keepdims=True)
    ssq = jnp.sum(acc * acc, axis=0, keepdims=True)
    stats_ref[...] = jnp.concatenate([ssum, ssq], axis=0)[None, None]


def _bn_act_kernel(*refs, relu, has_res):
    """y*scale + shift (+residual) (+ReLU); BN folded into one scale/shift."""
    if has_res:
        y_ref, scale_ref, shift_ref, res_ref, o_ref = refs
    else:
        y_ref, scale_ref, shift_ref, o_ref = refs
        res_ref = None
    y = y_ref[...] * scale_ref[...] + shift_ref[...]
    if res_ref is not None:
        y = y + res_ref[...].astype(jnp.float32)
    if relu:
        y = jnp.maximum(y, 0.0)
    o_ref[...] = y.astype(o_ref.dtype)


def _maxpool_kernel(p00_ref, p01_ref, p10_ref, p11_ref, o_ref, *, oh_blk, ow):
    """3x3 / stride-2 max-pool from the four stride-2 phases (in-kernel shifted max)."""
    row0 = pl.program_id(1) * oh_blk

    def win(ref, di, dj):
        return ref[0, pl.ds(row0 + di, oh_blk), pl.ds(dj, ow), :]

    out = win(p00_ref, 0, 0)
    for ref, offsets in ((p00_ref, ((0, 1), (1, 0), (1, 1))),
                         (p01_ref, ((0, 0), (1, 0))),
                         (p10_ref, ((0, 0), (0, 1))),
                         (p11_ref, ((0, 0),))):
        for di, dj in offsets:
            out = jnp.maximum(out, win(ref, di, dj))
    o_ref[...] = out[None]


# ---------------------------------------------------------------------------
# JAX-side layout helpers (pad / 1x space-to-depth; no data blow-up)
# ---------------------------------------------------------------------------
def _space_to_depth(x, stride, pad, khp, kwp, oh, ow):
    """Pad + rearrange so a stride-s conv becomes stride-1 with Ck = s*s*C (1x data)."""
    n, h, w, c = x.shape
    s = stride
    hq = oh + khp - 1
    wq = ow + kwp - 1
    ph = s * hq - h - pad
    pw = s * wq - w - pad
    assert ph >= 0 and pw >= 0
    xp = jnp.pad(x, ((0, 0), (pad, ph), (pad, pw), (0, 0)))
    if s == 1:
        return xp
    xp = xp.reshape(n, hq, s, wq, s, c)
    xp = jnp.transpose(xp, (0, 1, 3, 2, 4, 5))
    return xp.reshape(n, hq, wq, s * s * c)


def _space_to_depth_weights(w_pt, stride):
    """(Cout, Cin, KH, KW) -> (KH', KW', s*s*Cin, Cout), matching _space_to_depth."""
    cout, cin, kh, kw = w_pt.shape
    s = stride
    khp = -(-kh // s)
    kwp = -(-kw // s)
    w = jnp.transpose(w_pt, (2, 3, 1, 0))                          # (KH, KW, Cin, Cout)
    w = jnp.pad(w, ((0, khp * s - kh), (0, kwp * s - kw), (0, 0), (0, 0)))
    w = w.reshape(khp, s, kwp, s, cin, cout)
    w = jnp.transpose(w, (0, 2, 1, 3, 4, 5))                       # (KH',KW',p,q,Cin,Cout)
    return w.reshape(khp, kwp, s * s * cin, cout)


# ---------------------------------------------------------------------------
# Fused conv -> BN(train-mode batch stats) -> [+residual] -> [ReLU]
# ---------------------------------------------------------------------------
def _bn_act(y, scale, shift, res, relu):
    """Apply the folded BN scale/shift (+residual) (+ReLU); bf16, lane-dense output."""
    m, c = y.shape
    fold = 1
    if c < 128 and 128 % c == 0 and m % (128 // c) == 0:
        fold = 128 // c                  # pack rows so the store lane width is >= 128
    mf, cf = m // fold, c * fold
    scale_f = jnp.tile(scale.reshape(1, c), (1, fold))
    shift_f = jnp.tile(shift.reshape(1, c), (1, fold))
    args = [y.reshape(mf, cf), scale_f, shift_f]
    bm = _row_block(mf)
    in_specs = [
        pl.BlockSpec((bm, cf), lambda i: (i, 0)),
        pl.BlockSpec((1, cf), lambda i: (0, 0)),
        pl.BlockSpec((1, cf), lambda i: (0, 0)),
    ]
    has_res = res is not None
    if has_res:
        args.append(res.reshape(mf, cf))
        in_specs.append(pl.BlockSpec((bm, cf), lambda i: (i, 0)))

    flops = (4 if has_res else 3) * mf * cf
    bytes_acc = mf * cf * 4 + mf * cf * 2 + 2 * cf * 4 + (mf * cf * 2 if has_res else 0)
    out = pl.pallas_call(
        functools.partial(_bn_act_kernel, relu=relu, has_res=has_res),
        grid=(mf // bm,),
        in_specs=in_specs,
        out_specs=pl.BlockSpec((bm, cf), lambda i: (i, 0)),
        out_shape=jax.ShapeDtypeStruct((mf, cf), jnp.bfloat16),
        compiler_params=_compiler_params(("parallel",)),
        cost_estimate=pl.CostEstimate(flops=int(flops), transcendentals=0,
                                      bytes_accessed=int(bytes_acc)),
    )(*args)
    return out.reshape(m, c)


def conv_bn(x, w_pt, gamma, beta, *, stride, pad, relu=True, residual=None):
    """conv (PyTorch weight (Cout,Cin,KH,KW), no bias) -> train-mode BN -> [+res] -> [ReLU]."""
    cout, cin, kh, kw = w_pt.shape
    if kh == 1 and kw == 1 and stride > 1:   # 1x1 strided conv == 1x1 conv on phase (0,0)
        x = x[:, ::stride, ::stride, :]
        stride = 1
    n, h, w, _ = x.shape
    oh = (h + 2 * pad - kh) // stride + 1
    ow = (w + 2 * pad - kw) // stride + 1
    khp = -(-kh // stride)
    kwp = -(-kw // stride)
    ck = stride * stride * cin

    xs = _space_to_depth(x.astype(jnp.bfloat16), stride, pad, khp, kwp, oh, ow)
    wk = _space_to_depth_weights(w_pt, stride).astype(jnp.bfloat16)
    hq, wq = xs.shape[1], xs.shape[2]

    m_total = n * oh * ow
    flops = 2 * m_total * khp * kwp * ck * cout
    bytes_acc = xs.size * 2 + wk.size * 2 + m_total * cout * 4 + n * oh * 2 * cout * 4

    y, stats = pl.pallas_call(
        functools.partial(_conv_stats_kernel, khp=khp, kwp=kwp, ow=ow),
        grid=(n, oh),
        in_specs=[
            pl.BlockSpec((1, hq, wq, ck), lambda b, r: (b, 0, 0, 0)),
            pl.BlockSpec((khp, kwp, ck, cout), lambda b, r: (0, 0, 0, 0)),
        ],
        out_specs=(
            pl.BlockSpec((1, 1, ow, cout), lambda b, r: (b, r, 0, 0)),
            pl.BlockSpec((1, 1, 2, cout), lambda b, r: (b, r, 0, 0)),
        ),
        out_shape=(
            jax.ShapeDtypeStruct((n, oh, ow, cout), jnp.float32),
            jax.ShapeDtypeStruct((n, oh, 2, cout), jnp.float32),
        ),
        compiler_params=_compiler_params(("parallel", "parallel")),
        cost_estimate=pl.CostEstimate(flops=int(flops), transcendentals=0,
                                      bytes_accessed=int(bytes_acc)),
    )(xs, wk)

    # Cross-tile BN batch statistics (biased variance, matching train-mode PyTorch BN),
    # folded into one per-channel scale/shift.
    ssum = jnp.sum(stats[:, :, 0, :], axis=(0, 1))
    ssq = jnp.sum(stats[:, :, 1, :], axis=(0, 1))
    mean = ssum / m_total
    var = jnp.maximum(ssq / m_total - mean * mean, 0.0)
    scale = gamma.astype(jnp.float32) * jax.lax.rsqrt(var + _BN_EPS)
    shift = beta.astype(jnp.float32) - mean * scale

    res2 = None if residual is None else residual.reshape(m_total, cout)
    out = _bn_act(y.reshape(m_total, cout), scale, shift, res2, relu)
    return out.reshape(n, oh, ow, cout)


def maxpool_3x3_s2_p1(x):
    """3x3 / stride-2 / pad-1 max-pool (NHWC bf16) via the four stride-2 phases (1x data)."""
    n, h, w, c = x.shape
    oh = (h + 2 - 3) // 2 + 1
    ow = (w + 2 - 3) // 2 + 1
    hq, wq = oh + 1, ow + 1
    xp = jnp.pad(x, ((0, 0), (1, 2 * hq - h - 1), (1, 2 * wq - w - 1), (0, 0)),
                 constant_values=-jnp.inf)    # every 3x3 window contains >=1 real pixel
    phases = [xp[:, p::2, q::2, :] for p in (0, 1) for q in (0, 1)]   # each (N, hq, wq, C)

    oh_blk = _largest_divisor_leq(oh, max(1, _TARGET_ROWS // ow))
    in_spec = pl.BlockSpec((1, hq, wq, c), lambda b, t: (b, 0, 0, 0))
    out = pl.pallas_call(
        functools.partial(_maxpool_kernel, oh_blk=oh_blk, ow=ow),
        grid=(n, oh // oh_blk),
        in_specs=[in_spec, in_spec, in_spec, in_spec],
        out_specs=pl.BlockSpec((1, oh_blk, ow, c), lambda b, t: (b, t, 0, 0)),
        out_shape=jax.ShapeDtypeStruct((n, oh, ow, c), x.dtype),
        compiler_params=_compiler_params(("parallel", "parallel")),
        cost_estimate=pl.CostEstimate(flops=int(9 * n * oh * ow * c), transcendentals=0,
                                      bytes_accessed=int(4 * n * hq * wq * c * 2
                                                         + n * oh * ow * c * 2)),
    )(*phases)
    return out


# ---------------------------------------------------------------------------
# ResNet18 features (children[:-3]): conv1,bn1,relu,maxpool,layer1,layer2,layer3
# ---------------------------------------------------------------------------
def basic_block(x, p, *, stride, downsample):
    out = conv_bn(x, p["conv1_w"], p["bn1_g"], p["bn1_b"],
                  stride=stride, pad=1, relu=True)
    if downsample:
        identity = conv_bn(x, p["ds_w"], p["ds_g"], p["ds_b"],
                           stride=stride, pad=0, relu=False)
    else:
        identity = x
    # conv2 -> bn2 -> (+identity) -> relu; residual add + ReLU fused in the BN-apply kernel
    out = conv_bn(out, p["conv2_w"], p["bn2_g"], p["bn2_b"],
                  stride=1, pad=1, relu=True, residual=identity)
    return out


def resnet18_features(x_nchw, params):
    x = jnp.transpose(x_nchw, (0, 2, 3, 1)).astype(jnp.bfloat16)   # NCHW -> NHWC, bf16
    x = conv_bn(x, params["conv1_w"], params["bn1_g"], params["bn1_b"],
                stride=2, pad=3, relu=True)
    x = maxpool_3x3_s2_p1(x)
    x = basic_block(x, params["layer1"][0], stride=1, downsample=False)
    x = basic_block(x, params["layer1"][1], stride=1, downsample=False)
    x = basic_block(x, params["layer2"][0], stride=2, downsample=True)
    x = basic_block(x, params["layer2"][1], stride=1, downsample=False)
    x = basic_block(x, params["layer3"][0], stride=2, downsample=True)
    x = basic_block(x, params["layer3"][1], stride=1, downsample=False)
    return jnp.transpose(x, (0, 3, 1, 2)).astype(jnp.float32)      # back to NCHW f32


# ---------------------------------------------------------------------------
# Deterministic synthetic parameter init (pretrained checkpoint not loadable here)
# ---------------------------------------------------------------------------
def _init_conv(key, cout, cin, kh, kw):
    fan_in = cin * kh * kw
    return jax.random.normal(key, (cout, cin, kh, kw), jnp.float32) / jnp.sqrt(fan_in)


def _init_bn(key, c):
    k1, k2 = jax.random.split(key)
    gamma = 1.0 + 0.1 * jax.random.normal(k1, (c,), jnp.float32)
    beta = 0.1 * jax.random.normal(k2, (c,), jnp.float32)
    return gamma, beta


def _init_block(key, cin, cout, downsample):
    ks = jax.random.split(key, 6)
    p = {}
    p["conv1_w"] = _init_conv(ks[0], cout, cin, 3, 3)
    p["bn1_g"], p["bn1_b"] = _init_bn(ks[1], cout)
    p["conv2_w"] = _init_conv(ks[2], cout, cout, 3, 3)
    p["bn2_g"], p["bn2_b"] = _init_bn(ks[3], cout)
    if downsample:
        p["ds_w"] = _init_conv(ks[4], cout, cin, 1, 1)
        p["ds_g"], p["ds_b"] = _init_bn(ks[5], cout)
    return p


def init_params(key):
    ks = jax.random.split(key, 8)
    params = {}
    params["conv1_w"] = _init_conv(ks[0], 64, 3, 7, 7)
    params["bn1_g"], params["bn1_b"] = _init_bn(ks[1], 64)
    params["layer1"] = [_init_block(ks[2], 64, 64, False),
                        _init_block(ks[3], 64, 64, False)]
    params["layer2"] = [_init_block(ks[4], 64, 128, True),
                        _init_block(ks[5], 128, 128, False)]
    params["layer3"] = [_init_block(ks[6], 128, 256, True),
                        _init_block(ks[7], 256, 256, False)]
    return params


if __name__ == "__main__":
    key = jax.random.PRNGKey(0)
    k_in, k_par = jax.random.split(key)
    # TODO(synk): torchvision pretrained weights cannot be loaded in-script (no file /
    # network access); parameters are synthesized deterministically with resnet18 shapes.
    x = jax.random.normal(k_in, (2, 3, 32, 32), jnp.float32)   # NCHW input
    params = init_params(k_par)

    out = jax.jit(resnet18_features)(x, params)
    out = jax.block_until_ready(out)

    # conv1(s2): 16x16 -> maxpool(s2): 8x8 -> layer2(s2): 4x4 -> layer3(s2): 2x2
    assert out.shape == (2, 256, 2, 2), out.shape
    assert out.dtype == jnp.float32
    assert bool(jnp.all(jnp.isfinite(out)))
    print("KERNEL_OK")
</pallas_src>

<mosaic_0001>
module attributes {stable_mosaic.version = 11 : i64} {
  func.func @_conv_stats_kernel(%arg0: i32, %arg1: i32, %arg2: memref<1x19x19x12xbf16, #tpu.memory_space<vmem>>, %arg3: memref<4x4x12x64xbf16, #tpu.memory_space<vmem>>, %arg4: memref<1x1x16x64xf32, #tpu.memory_space<vmem>>, %arg5: memref<1x1x2x64xf32, #tpu.memory_space<vmem>>) attributes {dimension_semantics = [#tpu.dimension_semantics<parallel>, #tpu.dimension_semantics<parallel>], iteration_bounds = array<i64: 2, 16>, scalar_prefetch = 0 : i64, scratch_operands = 0 : i64, tpu.core_type = #tpu.core_type<tc>, window_params = [{transform_indices = @transform_0, window_bounds = array<i64: 1, 19, 19, 12>}, {pipeline_mode = #tpu.pipeline_mode<synchronous>, transform_indices = @transform_1, window_bounds = array<i64: 4, 4, 12, 64>}, {transform_indices = @transform_2, window_bounds = array<i64: 1, 1, 16, 64>}, {transform_indices = @transform_3, window_bounds = array<i64: 1, 1, 2, 64>}]} {
    %cst = arith.constant 0.000000e+00 : f32
    %0 = vector.broadcast %cst : f32 to vector<16x64xf32>
    %c0_i32 = arith.constant 0 : i32
    %1 = arith.addi %arg1, %c0_i32 : i32
    %c0 = arith.constant 0 : index
    %2 = arith.index_cast %1 : i32 to index
    %c0_0 = arith.constant 0 : index
    %c0_1 = arith.constant 0 : index
    %3 = vector.load %arg2[%c0, %2, %c0_0, %c0_1] : memref<1x19x19x12xbf16, #tpu.memory_space<vmem>>, vector<1x1x16x12xbf16>
    %4 = vector.shape_cast %3 : vector<1x1x16x12xbf16> to vector<1x16x12xbf16>
    %5 = vector.shape_cast %4 : vector<1x16x12xbf16> to vector<16x12xbf16>
    %c0_2 = arith.constant 0 : index
    %c0_3 = arith.constant 0 : index
    %c0_4 = arith.constant 0 : index
    %c0_5 = arith.constant 0 : index
    %6 = vector.load %arg3[%c0_2, %c0_3, %c0_4, %c0_5] : memref<4x4x12x64xbf16, #tpu.memory_space<vmem>>, vector<1x1x12x64xbf16>
    %7 = vector.shape_cast %6 : vector<1x1x12x64xbf16> to vector<12x64xbf16>
    %cst_6 = arith.constant dense<0.000000e+00> : vector<16x64xf32>
    %8 = tpu.matmul %5, %7, %cst_6 {dimension_numbers = #tpu.dot_dimension_numbers<[1], [0], [0], [1], [0, 0, 1, 1], [], []>} : vector<16x12xbf16>, vector<12x64xbf16>, vector<16x64xf32> -> vector<16x64xf32>
    %9 = arith.addf %0, %8 : vector<16x64xf32>
    %c0_i32_7 = arith.constant 0 : i32
    %10 = arith.addi %arg1, %c0_i32_7 : i32
    %c0_8 = arith.constant 0 : index
    %11 = arith.index_cast %10 : i32 to index
    %c1 = arith.constant 1 : index
    %c0_9 = arith.constant 0 : index
    %12 = vector.load %arg2[%c0_8, %11, %c1, %c0_9] : memref<1x19x19x12xbf16, #tpu.memory_space<vmem>>, vector<1x1x16x12xbf16>
    %13 = vector.shape_cast %12 : vector<1x1x16x12xbf16> to vector<1x16x12xbf16>
    %14 = vector.shape_cast %13 : vector<1x16x12xbf16> to vector<16x12xbf16>
    %c0_10 = arith.constant 0 : index
    %c1_11 = arith.constant 1 : index
    %c0_12 = arith.constant 0 : index
    %c0_13 = arith.constant 0 : index
    %15 = vector.load %arg3[%c0_10, %c1_11, %c0_12, %c0_13] : memref<4x4x12x64xbf16, #tpu.memory_space<vmem>>, vector<1x1x12x64xbf16>
    %16 = vector.shape_cast %15 : vector<1x1x12x64xbf16> to vector<12x64xbf16>
    %cst_14 = arith.constant dense<0.000000e+00> : vector<16x64xf32>
    %17 = tpu.matmul %14, %16, %cst_14 {dimension_numbers = #tpu.dot_dimension_numbers<[1], [0], [0], [1], [0, 0, 1, 1], [], []>} : vector<16x12xbf16>, vector<12x64xbf16>, vector<16x64xf32> -> vector<16x64xf32>
    %18 = arith.addf %9, %17 : vector<16x64xf32>
    %c0_i32_15 = arith.constant 0 : i32
    %19 = arith.addi %arg1, %c0_i32_15 : i32
    %c0_16 = arith.constant 0 : index
    %20 = arith.index_cast %19 : i32 to index
    %c2 = arith.constant 2 : index
    %c0_17 = arith.constant 0 : index
    %21 = vector.load %arg2[%c0_16, %20, %c2, %c0_17] : memref<1x19x19x12xbf16, #tpu.memory_space<vmem>>, vector<1x1x16x12xbf16>
    %22 = vector.shape_cast %21 : vector<1x1x16x12xbf16> to vector<1x16x12xbf16>
    %23 = vector.shape_cast %22 : vector<1x16x12xbf16> to vector<16x12xbf16>
    %c0_18 = arith.constant 0 : index
    %c2_19 = arith.constant 2 : index
    %c0_20 = arith.constant 0 : index
    %c0_21 = arith.constant 0 : index
    %24 = vector.load %arg3[%c0_18, %c2_19, %c0_20, %c0_21] : memref<4x4x12x64xbf16, #tpu.memory_space<vmem>>, vector<1x1x12x64xbf16>
    %25 = vector.shape_cast %24 : vector<1x1x12x64xbf16> to vector<12x64xbf16>
    %cst_22 = arith.constant dense<0.000000e+00> : vector<16x64xf32>
    %26 = tpu.matmul %23, %25, %cst_22 {dimension_numbers = #tpu.dot_dimension_numbers<[1], [0], [0], [1], [0, 0, 1, 1], [], []>} : vector<16x12xbf16>, vector<12x64xbf16>, vector<16x64xf32> -> vector<16x64xf32>
    %27 = arith.addf %18, %26 : vector<16x64xf32>
    %c0_i32_23 = arith.constant 0 : i32
    %28 = arith.addi %arg1, %c0_i32_23 : i32
    %c0_24 = arith.constant 0 : index
    %29 = arith.index_cast %28 : i32 to index
    %c3 = arith.constant 3 : index
    %c0_25 = arith.constant 0 : index
    %30 = vector.load %arg2[%c0_24, %29, %c3, %c0_25] : memref<1x19x19x12xbf16, #tpu.memory_space<vmem>>, vector<1x1x16x12xbf16>
    %31 = vector.shape_cast %30 : vector<1x1x16x12xbf16> to vector<1x16x12xbf16>
    %32 = vector.shape_cast %31 : vector<1x16x12xbf16> to vector<16x12xbf16>
    %c0_26 = arith.constant 0 : index
    %c3_27 = arith.constant 3 : index
    %c0_28 = arith.constant 0 : index
    %c0_29 = arith.constant 0 : index
    %33 = vector.load %arg3[%c0_26, %c3_27, %c0_28, %c0_29] : memref<4x4x12x64xbf16, #tpu.memory_space<vmem>>, vector<1x1x12x64xbf16>
    %34 = vector.shape_cast %33 : vector<1x1x12x64xbf16> to vector<12x64xbf16>
    %cst_30 = arith.constant dense<0.000000e+00> : vector<16x64xf32>
    %35 = tpu.matmul %32, %34, %cst_30 {dimension_numbers = #tpu.dot_dimension_numbers<[1], [0], [0], [1], [0, 0, 1, 1], [], []>} : vector<16x12xbf16>, vector<12x64xbf16>, vector<16x64xf32> -> vector<16x64xf32>
    %36 = arith.addf %27, %35 : vector<16x64xf32>
    %c1_i32 = arith.constant 1 : i32
    %37 = arith.addi %arg1, %c1_i32 : i32
    %c0_31 = arith.constant 0 : index
    %38 = arith.index_cast %37 : i32 to index
    %c0_32 = arith.constant 0 : index
    %c0_33 = arith.constant 0 : index
    %39 = vector.load %arg2[%c0_31, %38, %c0_32, %c0_33] : memref<1x19x19x12xbf16, #tpu.memory_space<vmem>>, vector<1x1x16x12xbf16>
    %40 = vector.shape_cast %39 : vector<1x1x16x12xbf16> to vector<1x16x12xbf16>
    %41 = vector.shape_cast %40 : vector<1x16x12xbf16> to vector<16x12xbf16>
    %c1_34 = arith.constant 1 : index
    %c0_35 = arith.constant 0 : index
    %c0_36 = arith.constant 0 : index
    %c0_37 = arith.constant 0 : index
    %42 = vector.load %arg3[%c1_34, %c0_35, %c0_36, %c0_37] : memref<4x4x12x64xbf16, #tpu.memory_space<vmem>>, vector<1x1x12x64xbf16>
    %43 = vector.shape_cast %42 : vector<1x1x12x64xbf16> to vector<12x64xbf16>
    %cst_38 = arith.constant dense<0.000000e+00> : vector<16x64xf32>
    %44 = tpu.matmul %41, %43, %cst_38 {dimension_numbers = #tpu.dot_dimension_numbers<[1], [0], [0], [1], [0, 0, 1, 1], [], []>} : vector<16x12xbf16>, vector<12x64xbf16>, vector<16x64xf32> -> vector<16x64xf32>
    %45 = arith.addf %36, %44 : vector<16x64xf32>
    %c1_i32_39 = arith.constant 1 : i32
    %46 = arith.addi %arg1, %c1_i32_39 : i32
    %c0_40 = arith.constant 0 : index
    %47 = arith.index_cast %46 : i32 to index
    %c1_41 = arith.constant 1 : index
    %c0_42 = arith.constant 0 : index
    %48 = vector.load %arg2[%c0_40, %47, %c1_41, %c0_42] : memref<1x19x19x12xbf16, #tpu.memory_space<vmem>>, vector<1x1x16x12xbf16>
    %49 = vector.shape_cast %48 : vector<1x1x16x12xbf16> to vector<1x16x12xbf16>
    %50 = vector.shape_cast %49 : vector<1x16x12xbf16> to vector<16x12xbf16>
    %c1_43 = arith.constant 1 : index
    %c1_44 = arith.constant 1 : index
    %c0_45 = arith.constant 0 : index
    %c0_46 = arith.constant 0 : index
    %51 = vector.load %arg3[%c1_43, %c1_44, %c0_45, %c0_46] : memref<4x4x12x64xbf16, #tpu.memory_space<vmem>>, vector<1x1x12x64xbf16>
    %52 = vector.shape_cast %51 : vector<1x1x12x64xbf16> to vector<12x64xbf16>
    %cst_47 = arith.constant dense<0.000000e+00> : vector<16x64xf32>
    %53 = tpu.matmul %50, %52, %cst_47 {dimension_numbers = #tpu.dot_dimension_numbers<[1], [0], [0], [1], [0, 0, 1, 1], [], []>} : vector<16x12xbf16>, vector<12x64xbf16>, vector<16x64xf32> -> vector<16x64xf32>
    %54 = arith.addf %45, %53 : vector<16x64xf32>
    %c1_i32_48 = arith.constant 1 : i32
    %55 = arith.addi %arg1, %c1_i32_48 : i32
    %c0_49 = arith.constant 0 : index
    %56 = arith.index_cast %55 : i32 to index
    %c2_50 = arith.constant 2 : index
    %c0_51 = arith.constant 0 : index
    %57 = vector.load %arg2[%c0_49, %56, %c2_50, %c0_51] : memref<1x19x19x12xbf16, #tpu.memory_space<vmem>>, vector<1x1x16x12xbf16>
    %58 = vector.shape_cast %57 : vector<1x1x16x12xbf16> to vector<1x16x12xbf16>
    %59 = vector.shape_cast %58 : vector<1x16x12xbf16> to vector<16x12xbf16>
    %c1_52 = arith.constant 1 : index
    %c2_53 = arith.constant 2 : index
    %c0_54 = arith.constant 0 : index
    %c0_55 = arith.constant 0 : index
    %60 = vector.load %arg3[%c1_52, %c2_53, %c0_54, %c0_55] : memref<4x4x12x64xbf16, #tpu.memory_space<vmem>>, vector<1x1x12x64xbf16>
    %61 = vector.shape_cast %60 : vector<1x1x12x64xbf16> to vector<12x64xbf16>
    %cst_56 = arith.constant dense<0.000000e+00> : vector<16x64xf32>
    %62 = tpu.matmul %59, %61, %cst_56 {dimension_numbers = #tpu.dot_dimension_numbers<[1], [0], [0], [1], [0, 0, 1, 1], [], []>} : vector<16x12xbf16>, vector<12x64xbf16>, vector<16x64xf32> -> vector<16x64xf32>
    %63 = arith.addf %54, %62 : vector<16x64xf32>
    %c1_i32_57 = arith.constant 1 : i32
    %64 = arith.addi %arg1, %c1_i32_57 : i32
    %c0_58 = arith.constant 0 : index
    %65 = arith.index_cast %64 : i32 to index
    %c3_59 = arith.constant 3 : index
    %c0_60 = arith.constant 0 : index
    %66 = vector.load %arg2[%c0_58, %65, %c3_59, %c0_60] : memref<1x19x19x12xbf16, #tpu.memory_space<vmem>>, vector<1x1x16x12xbf16>
    %67 = vector.shape_cast %66 : vector<1x1x16x12xbf16> to vector<1x16x12xbf16>
    %68 = vector.shape_cast %67 : vector<1x16x12xbf16> to vector<16x12xbf16>
    %c1_61 = arith.constant 1 : index
    %c3_62 = arith.constant 3 : index
    %c0_63 = arith.constant 0 : index
    %c0_64 = arith.constant 0 : index
    %69 = vector.load %arg3[%c1_61, %c3_62, %c0_63, %c0_64] : memref<4x4x12x64xbf16, #tpu.memory_space<vmem>>, vector<1x1x12x64xbf16>
    %70 = vector.shape_cast %69 : vector<1x1x12x64xbf16> to vector<12x64xbf16>
    %cst_65 = arith.constant dense<0.000000e+00> : vector<16x64xf32>
    %71 = tpu.matmul %68, %70, %cst_65 {dimension_numbers = #tpu.dot_dimension_numbers<[1], [0], [0], [1], [0, 0, 1, 1], [], []>} : vector<16x12xbf16>, vector<12x64xbf16>, vector<16x64xf32> -> vector<16x64xf32>
    %72 = arith.addf %63, %71 : vector<16x64xf32>
    %c2_i32 = arith.constant 2 : i32
    %73 = arith.addi %arg1, %c2_i32 : i32
    %c0_66 = arith.constant 0 : index
    %74 = arith.index_cast %73 : i32 to index
    %c0_67 = arith.constant 0 : index
    %c0_68 = arith.constant 0 : index
    %75 = vector.load %arg2[%c0_66, %74, %c0_67, %c0_68] : memref<1x19x19x12xbf16, #tpu.memory_space<vmem>>, vector<1x1x16x12xbf16>
    %76 = vector.shape_cast %75 : vector<1x1x16x12xbf16> to vector<1x16x12xbf16>
    %77 = vector.shape_cast %76 : vector<1x16x12xbf16> to vector<16x12xbf16>
    %c2_69 = arith.constant 2 : index
    %c0_70 = arith.constant 0 : index
    %c0_71 = arith.constant 0 : index
    %c0_72 = arith.constant 0 : index
    %78 = vector.load %arg3[%c2_69, %c0_70, %c0_71, %c0_72] : memref<4x4x12x64xbf16, #tpu.memory_space<vmem>>, vector<1x1x12x64xbf16>
    %79 = vector.shape_cast %78 : vector<1x1x12x64xbf16> to vector<12x64xbf16>
    %cst_73 = arith.constant dense<0.000000e+00> : vector<16x64xf32>
    %80 = tpu.matmul %77, %79, %cst_73 {dimension_numbers = #tpu.dot_dimension_numbers<[1], [0], [0], [1], [0, 0, 1, 1], [], []>} : vector<16x12xbf16>, vector<12x64xbf16>, vector<16x64xf32> -> vector<16x64xf32>
    %81 = arith.addf %72, %80 : vector<16x64xf32>
    %c2_i32_74 = arith.constant 2 : i32
    %82 = arith.addi %arg1, %c2_i32_74 : i32
    %c0_75 = arith.constant 0 : index
    %83 = arith.index_cast %82 : i32 to index
    %c1_76 = arith.constant 1 : index
    %c0_77 = arith.constant 0 : index
    %84 = vector.load %arg2[%c0_75, %83, %c1_76, %c0_77] : memref<1x19x19x12xbf16, #tpu.memory_space<vmem>>, vector<1x1x16x12xbf16>
    %85 = vector.shape_cast %84 : vector<1x1x16x12xbf16> to vector<1x16x12xbf16>
    %86 = vector.shape_cast %85 : vector<1x16x12xbf16> to vector<16x12xbf16>
    %c2_78 = arith.constant 2 : index
    %c1_79 = arith.constant 1 : index
    %c0_80 = arith.constant 0 : index
    %c0_81 = arith.constant 0 : index
    %87 = vector.load %arg3[%c2_78, %c1_79, %c0_80, %c0_81] : memref<4x4x12x64xbf16, #tpu.memory_space<vmem>>, vector<1x1x12x64xbf16>
    %88 = vector.shape_cast %87 : vector<1x1x12x64xbf16> to vector<12x64xbf16>
    %cst_82 = arith.constant dense<0.000000e+00> : vector<16x64xf32>
    %89 = tpu.matmul %86, %88, %cst_82 {dimension_numbers = #tpu.dot_dimension_numbers<[1], [0], [0], [1], [0, 0, 1, 1], [], []>} : vector<16x12xbf16>, vector<12x64xbf16>, vector<16x64xf32> -> vector<16x64xf32>
    %90 = arith.addf %81, %89 : vector<16x64xf32>
    %c2_i32_83 = arith.constant 2 : i32
    %91 = arith.addi %arg1, %c2_i32_83 : i32
    %c0_84 = arith.constant 0 : index
    %92 = arith.index_cast %91 : i32 to index
    %c2_85 = arith.constant 2 : index
    %c0_86 = arith.constant 0 : index
    %93 = vector.load %arg2[%c0_84, %92, %c2_85, %c0_86] : memref<1x19x19x12xbf16, #tpu.memory_space<vmem>>, vector<1x1x16x12xbf16>
    %94 = vector.shape_cast %93 : vector<1x1x16x12xbf16> to vector<1x16x12xbf16>
    %95 = vector.shape_cast %94 : vector<1x16x12xbf16> to vector<16x12xbf16>
    %c2_87 = arith.constant 2 : index
    %c2_88 = arith.constant 2 : index
    %c0_89 = arith.constant 0 : index
    %c0_90 = arith.constant 0 : index
    %96 = vector.load %arg3[%c2_87, %c2_88, %c0_89, %c0_90] : memref<4x4x12x64xbf16, #tpu.memory_space<vmem>>, vector<1x1x12x64xbf16>
    %97 = vector.shape_cast %96 : vector<1x1x12x64xbf16> to vector<12x64xbf16>
    %cst_91 = arith.constant dense<0.000000e+00> : vector<16x64xf32>
    %98 = tpu.matmul %95, %97, %cst_91 {dimension_numbers = #tpu.dot_dimension_numbers<[1], [0], [0], [1], [0, 0, 1, 1], [], []>} : vector<16x12xbf16>, vector<12x64xbf16>, vector<16x64xf32> -> vector<16x64xf32>
    %99 = arith.addf %90, %98 : vector<16x64xf32>
    %c2_i32_92 = arith.constant 2 : i32
    %100 = arith.addi %arg1, %c2_i32_92 : i32
    %c0_93 = arith.constant 0 : index
    %101 = arith.index_cast %100 : i32 to index
    %c3_94 = arith.constant 3 : index
    %c0_95 = arith.constant 0 : index
    %102 = vector.load %arg2[%c0_93, %101, %c3_94, %c0_95] : memref<1x19x19x12xbf16, #tpu.memory_space<vmem>>, vector<1x1x16x12xbf16>
    %103 = vector.shape_cast %102 : vector<1x1x16x12xbf16> to vector<1x16x12xbf16>
    %104 = vector.shape_cast %103 : vector<1x16x12xbf16> to vector<16x12xbf16>
    %c2_96 = arith.constant 2 : index
    %c3_97 = arith.constant 3 : index
    %c0_98 = arith.constant 0 : index
    %c0_99 = arith.constant 0 : index
    %105 = vector.load %arg3[%c2_96, %c3_97, %c0_98, %c0_99] : memref<4x4x12x64xbf16, #tpu.memory_space<vmem>>, vector<1x1x12x64xbf16>
    %106 = vector.shape_cast %105 : vector<1x1x12x64xbf16> to vector<12x64xbf16>
    %cst_100 = arith.constant dense<0.000000e+00> : vector<16x64xf32>
    %107 = tpu.matmul %104, %106, %cst_100 {dimension_numbers = #tpu.dot_dimension_numbers<[1], [0], [0], [1], [0, 0, 1, 1], [], []>} : vector<16x12xbf16>, vector<12x64xbf16>, vector<16x64xf32> -> vector<16x64xf32>
    %108 = arith.addf %99, %107 : vector<16x64xf32>
    %c3_i32 = arith.constant 3 : i32
    %109 = arith.addi %arg1, %c3_i32 : i32
    %c0_101 = arith.constant 0 : index
    %110 = arith.index_cast %109 : i32 to index
    %c0_102 = arith.constant 0 : index
    %c0_103 = arith.constant 0 : index
    %111 = vector.load %arg2[%c0_101, %110, %c0_102, %c0_103] : memref<1x19x19x12xbf16, #tpu.memory_space<vmem>>, vector<1x1x16x12xbf16>
    %112 = vector.shape_cast %111 : vector<1x1x16x12xbf16> to vector<1x16x12xbf16>
    %113 = vector.shape_cast %112 : vector<1x16x12xbf16> to vector<16x12xbf16>
    %c3_104 = arith.constant 3 : index
    %c0_105 = arith.constant 0 : index
    %c0_106 = arith.constant 0 : index
    %c0_107 = arith.constant 0 : index
    %114 = vector.load %arg3[%c3_104, %c0_105, %c0_106, %c0_107] : memref<4x4x12x64xbf16, #tpu.memory_space<vmem>>, vector<1x1x12x64xbf16>
    %115 = vector.shape_cast %114 : vector<1x1x12x64xbf16> to vector<12x64xbf16>
    %cst_108 = arith.constant dense<0.000000e+00> : vector<16x64xf32>
    %116 = tpu.matmul %113, %115, %cst_108 {dimension_numbers = #tpu.dot_dimension_numbers<[1], [0], [0], [1], [0, 0, 1, 1], [], []>} : vector<16x12xbf16>, vector<12x64xbf16>, vector<16x64xf32> -> vector<16x64xf32>
    %117 = arith.addf %108, %116 : vector<16x64xf32>
    %c3_i32_109 = arith.constant 3 : i32
    %118 = arith.addi %arg1, %c3_i32_109 : i32
    %c0_110 = arith.constant 0 : index
    %119 = arith.index_cast %118 : i32 to index
    %c1_111 = arith.constant 1 : index
    %c0_112 = arith.constant 0 : index
    %120 = vector.load %arg2[%c0_110, %119, %c1_111, %c0_112] : memref<1x19x19x12xbf16, #tpu.memory_space<vmem>>, vector<1x1x16x12xbf16>
    %121 = vector.shape_cast %120 : vector<1x1x16x12xbf16> to vector<1x16x12xbf16>
    %122 = vector.shape_cast %121 : vector<1x16x12xbf16> to vector<16x12xbf16>
    %c3_113 = arith.constant 3 : index
    %c1_114 = arith.constant 1 : index
    %c0_115 = arith.constant 0 : index
    %c0_116 = arith.constant 0 : index
    %123 = vector.load %arg3[%c3_113, %c1_114, %c0_115, %c0_116] : memref<4x4x12x64xbf16, #tpu.memory_space<vmem>>, vector<1x1x12x64xbf16>
    %124 = vector.shape_cast %123 : vector<1x1x12x64xbf16> to vector<12x64xbf16>
    %cst_117 = arith.constant dense<0.000000e+00> : vector<16x64xf32>
    %125 = tpu.matmul %122, %124, %cst_117 {dimension_numbers = #tpu.dot_dimension_numbers<[1], [0], [0], [1], [0, 0, 1, 1], [], []>} : vector<16x12xbf16>, vector<12x64xbf16>, vector<16x64xf32> -> vector<16x64xf32>
    %126 = arith.addf %117, %125 : vector<16x64xf32>
    %c3_i32_118 = arith.constant 3 : i32
    %127 = arith.addi %arg1, %c3_i32_118 : i32
    %c0_119 = arith.constant 0 : index
    %128 = arith.index_cast %127 : i32 to index
    %c2_120 = arith.constant 2 : index
    %c0_121 = arith.constant 0 : index
    %129 = vector.load %arg2[%c0_119, %128, %c2_120, %c0_121] : memref<1x19x19x12xbf16, #tpu.memory_space<vmem>>, vector<1x1x16x12xbf16>
    %130 = vector.shape_cast %129 : vector<1x1x16x12xbf16> to vector<1x16x12xbf16>
    %131 = vector.shape_cast %130 : vector<1x16x12xbf16> to vector<16x12xbf16>
    %c3_122 = arith.constant 3 : index
    %c2_123 = arith.constant 2 : index
    %c0_124 = arith.constant 0 : index
    %c0_125 = arith.constant 0 : index
    %132 = vector.load %arg3[%c3_122, %c2_123, %c0_124, %c0_125] : memref<4x4x12x64xbf16, #tpu.memory_space<vmem>>, vector<1x1x12x64xbf16>
    %133 = vector.shape_cast %132 : vector<1x1x12x64xbf16> to vector<12x64xbf16>
    %cst_126 = arith.constant dense<0.000000e+00> : vector<16x64xf32>
    %134 = tpu.matmul %131, %133, %cst_126 {dimension_numbers = #tpu.dot_dimension_numbers<[1], [0], [0], [1], [0, 0, 1, 1], [], []>} : vector<16x12xbf16>, vector<12x64xbf16>, vector<16x64xf32> -> vector<16x64xf32>
    %135 = arith.addf %126, %134 : vector<16x64xf32>
    %c3_i32_127 = arith.constant 3 : i32
    %136 = arith.addi %arg1, %c3_i32_127 : i32
    %c0_128 = arith.constant 0 : index
    %137 = arith.index_cast %136 : i32 to index
    %c3_129 = arith.constant 3 : index
    %c0_130 = arith.constant 0 : index
    %138 = vector.load %arg2[%c0_128, %137, %c3_129, %c0_130] : memref<1x19x19x12xbf16, #tpu.memory_space<vmem>>, vector<1x1x16x12xbf16>
    %139 = vector.shape_cast %138 : vector<1x1x16x12xbf16> to vector<1x16x12xbf16>
    %140 = vector.shape_cast %139 : vector<1x16x12xbf16> to vector<16x12xbf16>
    %c3_131 = arith.constant 3 : index
    %c3_132 = arith.constant 3 : index
    %c0_133 = arith.constant 0 : index
    %c0_134 = arith.constant 0 : index
    %141 = vector.load %arg3[%c3_131, %c3_132, %c0_133, %c0_134] : memref<4x4x12x64xbf16, #tpu.memory_space<vmem>>, vector<1x1x12x64xbf16>
    %142 = vector.shape_cast %141 : vector<1x1x12x64xbf16> to vector<12x64xbf16>
    %cst_135 = arith.constant dense<0.000000e+00> : vector<16x64xf32>
    %143 = tpu.matmul %140, %142, %cst_135 {dimension_numbers = #tpu.dot_dimension_numbers<[1], [0], [0], [1], [0, 0, 1, 1], [], []>} : vector<16x12xbf16>, vector<12x64xbf16>, vector<16x64xf32> -> vector<16x64xf32>
    %144 = arith.addf %135, %143 : vector<16x64xf32>
    %145 = vector.shape_cast %144 : vector<16x64xf32> to vector<1x1x16x64xf32>
    %c0_136 = arith.constant 0 : index
    %c0_137 = arith.constant 0 : index
    %c0_138 = arith.constant 0 : index
    %c0_139 = arith.constant 0 : index
    %146 = vector.load %arg4[%c0_136, %c0_137, %c0_138, %c0_139] : memref<1x1x16x64xf32, #tpu.memory_space<vmem>>, vector<1x1x16x64xf32>
    tpu.vector_store %arg4[%c0_136, %c0_137, %c0_138, %c0_139], %145 {strides = array<i32>} : memref<1x1x16x64xf32, #tpu.memory_space<vmem>>, vector<1x1x16x64xf32>,
    %cst_140 = arith.constant dense<0.000000e+00> : vector<64xf32>
    %147 = vector.multi_reduction <add>, %144, %cst_140 [0] : vector<16x64xf32> to vector<64xf32>
    %148 = vector.shape_cast %147 : vector<64xf32> to vector<1x64xf32>
    %149 = arith.mulf %144, %144 : vector<16x64xf32>
    %cst_141 = arith.constant dense<0.000000e+00> : vector<64xf32>
    %150 = vector.multi_reduction <add>, %149, %cst_141 [0] : vector<16x64xf32> to vector<64xf32>
    %151 = vector.shape_cast %150 : vector<64xf32> to vector<1x64xf32>
    %152 = tpu.concatenate %148, %151 in 0 : vector<1x64xf32>, vector<1x64xf32> -> vector<2x64xf32>
    %153 = vector.shape_cast %152 : vector<2x64xf32> to vector<1x1x2x64xf32>
    %c0_142 = arith.constant 0 : index
    %c0_143 = arith.constant 0 : index
    %c0_144 = arith.constant 0 : index
    %c0_145 = arith.constant 0 : index
    %154 = vector.load %arg5[%c0_142, %c0_143, %c0_144, %c0_145] : memref<1x1x2x64xf32, #tpu.memory_space<vmem>>, vector<1x1x2x64xf32>
    tpu.vector_store %arg5[%c0_142, %c0_143, %c0_144, %c0_145], %153 {strides = array<i32>} : memref<1x1x2x64xf32, #tpu.memory_space<vmem>>, vector<1x1x2x64xf32>,
    return
  }
  func.func @transform_0(%arg0: i32, %arg1: i32) -> (i32, i32, i32, i32) {
    %c0_i32 = arith.constant 0 : i32
    %c0_i32_0 = arith.constant 0 : i32
    %c0_i32_1 = arith.constant 0 : i32
    %c0_i32_2 = arith.constant 0 : i32
    return %arg0, %c0_i32, %c0_i32_0, %c0_i32_1 : i32, i32, i32, i32
  }
  func.func @transform_1(%arg0: i32, %arg1: i32) -> (i32, i32, i32, i32) {
    %c0_i32 = arith.constant 0 : i32
    %c0_i32_0 = arith.constant 0 : i32
    %c0_i32_1 = arith.constant 0 : i32
    %c0_i32_2 = arith.constant 0 : i32
    %c0_i32_3 = arith.constant 0 : i32
    return %c0_i32, %c0_i32_0, %c0_i32_1, %c0_i32_2 : i32, i32, i32, i32
  }
  func.func @transform_2(%arg0: i32, %arg1: i32) -> (i32, i32, i32, i32) {
    %c0_i32 = arith.constant 0 : i32
    %c0_i32_0 = arith.constant 0 : i32
    %c0_i32_1 = arith.constant 0 : i32
    return %arg0, %arg1, %c0_i32, %c0_i32_0 : i32, i32, i32, i32
  }
  func.func @transform_3(%arg0: i32, %arg1: i32) -> (i32, i32, i32, i32) {
    %c0_i32 = arith.constant 0 : i32
    %c0_i32_0 = arith.constant 0 : i32
    %c0_i32_1 = arith.constant 0 : i32
    return %arg0, %arg1, %c0_i32, %c0_i32_0 : i32, i32, i32, i32
  }
}

module attributes {stable_mosaic.version = 11 : i64} {
  func.func @_bn_act_kernel(%arg0: i32, %arg1: memref<256x128xf32, #tpu.memory_space<vmem>>, %arg2: memref<1x128xf32, #tpu.memory_space<vmem>>, %arg3: memref<1x128xf32, #tpu.memory_space<vmem>>, %arg4: memref<256x128xbf16, #tpu.memory_space<vmem>>) attributes {dimension_semantics = [#tpu.dimension_semantics<parallel>], iteration_bounds = array<i64: 1>, scalar_prefetch = 0 : i64, scratch_operands = 0 : i64, tpu.core_type = #tpu.core_type<tc>, window_params = [{transform_indices = @transform_0, window_bounds = array<i64: 256, 128>}, {pipeline_mode = #tpu.pipeline_mode<synchronous>, transform_indices = @transform_1, window_bounds = array<i64: 1, 128>}, {pipeline_mode = #tpu.pipeline_mode<synchronous>, transform_indices = @transform_2, window_bounds = array<i64: 1, 128>}, {transform_indices = @transform_3, window_bounds = array<i64: 256, 128>}]} {
    %c0 = arith.constant 0 : index
    %c0_0 = arith.constant 0 : index
    %0 = vector.load %arg1[%c0, %c0_0] : memref<256x128xf32, #tpu.memory_space<vmem>>, vector<256x128xf32>
    %c0_1 = arith.constant 0 : index
    %c0_2 = arith.constant 0 : index
    %1 = vector.load %arg2[%c0_1, %c0_2] : memref<1x128xf32, #tpu.memory_space<vmem>>, vector<1x128xf32>
    %2 = vector.broadcast %1 : vector<1x128xf32> to vector<256x128xf32>
    %3 = arith.mulf %0, %2 : vector<256x128xf32>
    %c0_3 = arith.constant 0 : index
    %c0_4 = arith.constant 0 : index
    %4 = vector.load %arg3[%c0_3, %c0_4] : memref<1x128xf32, #tpu.memory_space<vmem>>, vector<1x128xf32>
    %5 = vector.broadcast %4 : vector<1x128xf32> to vector<256x128xf32>
    %6 = arith.addf %3, %5 : vector<256x128xf32>
    %cst = arith.constant 0.000000e+00 : f32
    %7 = vector.broadcast %cst : f32 to vector<256x128xf32>
    %8 = arith.maximumf %6, %7 : vector<256x128xf32>
    %9 = arith.truncf %8 : vector<256x128xf32> to vector<256x128xbf16>
    %c0_5 = arith.constant 0 : index
    %c0_6 = arith.constant 0 : index
    %10 = vector.load %arg4[%c0_5, %c0_6] : memref<256x128xbf16, #tpu.memory_space<vmem>>, vector<256x128xbf16>
    tpu.vector_store %arg4[%c0_5, %c0_6], %9 {strides = array<i32>} : memref<256x128xbf16, #tpu.memory_space<vmem>>, vector<256x128xbf16>,
    return
  }
  func.func @transform_0(%arg0: i32) -> (i32, i32) {
    %c0_i32 = arith.constant 0 : i32
    %c0_i32_0 = arith.constant 0 : i32
    return %arg0, %c0_i32 : i32, i32
  }
  func.func @transform_1(%arg0: i32) -> (i32, i32) {
    %c0_i32 = arith.constant 0 : i32
    %c0_i32_0 = arith.constant 0 : i32
    %c0_i32_1 = arith.constant 0 : i32
    return %c0_i32, %c0_i32_0 : i32, i32
  }
  func.func @transform_2(%arg0: i32) -> (i32, i32) {
    %c0_i32 = arith.constant 0 : i32
    %c0_i32_0 = arith.constant 0 : i32
    %c0_i32_1 = arith.constant 0 : i32
    return %c0_i32, %c0_i32_0 : i32, i32
  }
  func.func @transform_3(%arg0: i32) -> (i32, i32) {
    %c0_i32 = arith.constant 0 : i32
    %c0_i32_0 = arith.constant 0 : i32
    return %arg0, %c0_i32 : i32, i32
  }
}

module attributes {stable_mosaic.version = 11 : i64} {
  func.func @_maxpool_kernel(%arg0: i32, %arg1: i32, %arg2: memref<1x9x9x64xbf16, #tpu.memory_space<vmem>>, %arg3: memref<1x9x9x64xbf16, #tpu.memory_space<vmem>>, %arg4: memref<1x9x9x64xbf16, #tpu.memory_space<vmem>>, %arg5: memref<1x9x9x64xbf16, #tpu.memory_space<vmem>>, %arg6: memref<1x8x8x64xbf16, #tpu.memory_space<vmem>>) attributes {dimension_semantics = [#tpu.dimension_semantics<parallel>, #tpu.dimension_semantics<parallel>], iteration_bounds = array<i64: 2, 1>, scalar_prefetch = 0 : i64, scratch_operands = 0 : i64, tpu.core_type = #tpu.core_type<tc>, window_params = [{transform_indices = @transform_0, window_bounds = array<i64: 1, 9, 9, 64>}, {transform_indices = @transform_1, window_bounds = array<i64: 1, 9, 9, 64>}, {transform_indices = @transform_2, window_bounds = array<i64: 1, 9, 9, 64>}, {transform_indices = @transform_3, window_bounds = array<i64: 1, 9, 9, 64>}, {transform_indices = @transform_4, window_bounds = array<i64: 1, 8, 8, 64>}]} {
    %c8_i32 = arith.constant 8 : i32
    %0 = arith.muli %arg1, %c8_i32 : i32
    %c0_i32 = arith.constant 0 : i32
    %1 = arith.addi %0, %c0_i32 : i32
    %c0 = arith.constant 0 : index
    %2 = arith.index_cast %1 : i32 to index
    %c0_0 = arith.constant 0 : index
    %c0_1 = arith.constant 0 : index
    %3 = vector.load %arg2[%c0, %2, %c0_0, %c0_1] : memref<1x9x9x64xbf16, #tpu.memory_space<vmem>>, vector<1x8x8x64xbf16>
    %4 = vector.shape_cast %3 : vector<1x8x8x64xbf16> to vector<8x8x64xbf16>
    %c0_i32_2 = arith.constant 0 : i32
    %5 = arith.addi %0, %c0_i32_2 : i32
    %c0_3 = arith.constant 0 : index
    %6 = arith.index_cast %5 : i32 to index
    %c1 = arith.constant 1 : index
    %c0_4 = arith.constant 0 : index
    %7 = vector.load %arg2[%c0_3, %6, %c1, %c0_4] : memref<1x9x9x64xbf16, #tpu.memory_space<vmem>>, vector<1x8x8x64xbf16>
    %8 = vector.shape_cast %7 : vector<1x8x8x64xbf16> to vector<8x8x64xbf16>
    %9 = arith.maximumf %4, %8 : vector<8x8x64xbf16>
    %c1_i32 = arith.constant 1 : i32
    %10 = arith.addi %0, %c1_i32 : i32
    %c0_5 = arith.constant 0 : index
    %11 = arith.index_cast %10 : i32 to index
    %c0_6 = arith.constant 0 : index
    %c0_7 = arith.constant 0 : index
    %12 = vector.load %arg2[%c0_5, %11, %c0_6, %c0_7] : memref<1x9x9x64xbf16, #tpu.memory_space<vmem>>, vector<1x8x8x64xbf16>
    %13 = vector.shape_cast %12 : vector<1x8x8x64xbf16> to vector<8x8x64xbf16>
    %14 = arith.maximumf %9, %13 : vector<8x8x64xbf16>
    %c1_i32_8 = arith.constant 1 : i32
    %15 = arith.addi %0, %c1_i32_8 : i32
    %c0_9 = arith.constant 0 : index
    %16 = arith.index_cast %15 : i32 to index
    %c1_10 = arith.constant 1 : index
    %c0_11 = arith.constant 0 : index
    %17 = vector.load %arg2[%c0_9, %16, %c1_10, %c0_11] : memref<1x9x9x64xbf16, #tpu.memory_space<vmem>>, vector<1x8x8x64xbf16>
    %18 = vector.shape_cast %17 : vector<1x8x8x64xbf16> to vector<8x8x64xbf16>
    %19 = arith.maximumf %14, %18 : vector<8x8x64xbf16>
    %c0_i32_12 = arith.constant 0 : i32
    %20 = arith.addi %0, %c0_i32_12 : i32
    %c0_13 = arith.constant 0 : index
    %21 = arith.index_cast %20 : i32 to index
    %c0_14 = arith.constant 0 : index
    %c0_15 = arith.constant 0 : index
    %22 = vector.load %arg3[%c0_13, %21, %c0_14, %c0_15] : memref<1x9x9x64xbf16, #tpu.memory_space<vmem>>, vector<1x8x8x64xbf16>
    %23 = vector.shape_cast %22 : vector<1x8x8x64xbf16> to vector<8x8x64xbf16>
    %24 = arith.maximumf %19, %23 : vector<8x8x64xbf16>
    %c1_i32_16 = arith.constant 1 : i32
    %25 = arith.addi %0, %c1_i32_16 : i32
    %c0_17 = arith.constant 0 : index
    %26 = arith.index_cast %25 : i32 to index
    %c0_18 = arith.constant 0 : index
    %c0_19 = arith.constant 0 : index
    %27 = vector.load %arg3[%c0_17, %26, %c0_18, %c0_19] : memref<1x9x9x64xbf16, #tpu.memory_space<vmem>>, vector<1x8x8x64xbf16>
    %28 = vector.shape_cast %27 : vector<1x8x8x64xbf16> to vector<8x8x64xbf16>
    %29 = arith.maximumf %24, %28 : vector<8x8x64xbf16>
    %c0_i32_20 = arith.constant 0 : i32
    %30 = arith.addi %0, %c0_i32_20 : i32
    %c0_21 = arith.constant 0 : index
    %31 = arith.index_cast %30 : i32 to index
    %c0_22 = arith.constant 0 : index
    %c0_23 = arith.constant 0 : index
    %32 = vector.load %arg4[%c0_21, %31, %c0_22, %c0_23] : memref<1x9x9x64xbf16, #tpu.memory_space<vmem>>, vector<1x8x8x64xbf16>
    %33 = vector.shape_cast %32 : vector<1x8x8x64xbf16> to vector<8x8x64xbf16>
    %34 = arith.maximumf %29, %33 : vector<8x8x64xbf16>
    %c0_i32_24 = arith.constant 0 : i32
    %35 = arith.addi %0, %c0_i32_24 : i32
    %c0_25 = arith.constant 0 : index
    %36 = arith.index_cast %35 : i32 to index
    %c1_26 = arith.constant 1 : index
    %c0_27 = arith.constant 0 : index
    %37 = vector.load %arg4[%c0_25, %36, %c1_26, %c0_27] : memref<1x9x9x64xbf16, #tpu.memory_space<vmem>>, vector<1x8x8x64xbf16>
    %38 = vector.shape_cast %37 : vector<1x8x8x64xbf16> to vector<8x8x64xbf16>
    %39 = arith.maximumf %34, %38 : vector<8x8x64xbf16>
    %c0_i32_28 = arith.constant 0 : i32
    %40 = arith.addi %0, %c0_i32_28 : i32
    %c0_29 = arith.constant 0 : index
    %41 = arith.index_cast %40 : i32 to index
    %c0_30 = arith.constant 0 : index
    %c0_31 = arith.constant 0 : index
    %42 = vector.load %arg5[%c0_29, %41, %c0_30, %c0_31] : memref<1x9x9x64xbf16, #tpu.memory_space<vmem>>, vector<1x8x8x64xbf16>
    %43 = vector.shape_cast %42 : vector<1x8x8x64xbf16> to vector<8x8x64xbf16>
    %44 = arith.maximumf %39, %43 : vector<8x8x64xbf16>
    %45 = vector.shape_cast %44 : vector<8x8x64xbf16> to vector<1x8x8x64xbf16>
    %c0_32 = arith.constant 0 : index
    %c0_33 = arith.constant 0 : index
    %c0_34 = arith.constant 0 : index
    %c0_35 = arith.constant 0 : index
    %46 = vector.load %arg6[%c0_32, %c0_33, %c0_34, %c0_35] : memref<1x8x8x64xbf16, #tpu.memory_space<vmem>>, vector<1x8x8x64xbf16>
    tpu.vector_store %arg6[%c0_32, %c0_33, %c0_34, %c0_35], %45 {strides = array<i32>} : memref<1x8x8x64xbf16, #tpu.memory_space<vmem>>, vector<1x8x8x64xbf16>,
    return
  }
  func.func @transform_0(%arg0: i32, %arg1: i32) -> (i32, i32, i32, i32) {
    %c0_i32 = arith.constant 0 : i32
    %c0_i32_0 = arith.constant 0 : i32
    %c0_i32_1 = arith.constant 0 : i32
    %c0_i32_2 = arith.constant 0 : i32
    return %arg0, %c0_i32, %c0_i32_0, %c0_i32_1 : i32, i32, i32, i32
  }
  func.func @transform_1(%arg0: i32, %arg1: i32) -> (i32, i32, i32, i32) {
    %c0_i32 = arith.constant 0 : i32
    %c0_i32_0 = arith.constant 0 : i32
    %c0_i32_1 = arith.constant 0 : i32
    %c0_i32_2 = arith.constant 0 : i32
    return %arg0, %c0_i32, %c0_i32_0, %c0_i32_1 : i32, i32, i32, i32
  }
  func.func @transform_2(%arg0: i32, %arg1: i32) -> (i32, i32, i32, i32) {
    %c0_i32 = arith.constant 0 : i32
    %c0_i32_0 = arith.constant 0 : i32
    %c0_i32_1 = arith.constant 0 : i32
    %c0_i32_2 = arith.constant 0 : i32
    return %arg0, %c0_i32, %c0_i32_0, %c0_i32_1 : i32, i32, i32, i32
  }
  func.func @transform_3(%arg0: i32, %arg1: i32) -> (i32, i32, i32, i32) {
    %c0_i32 = arith.constant 0 : i32
    %c0_i32_0 = arith.constant 0 : i32
    %c0_i32_1 = arith.constant 0 : i32
    %c0_i32_2 = arith.constant 0 : i32
    return %arg0, %c0_i32, %c0_i32_0, %c0_i32_1 : i32, i32, i32, i32
  }
  func.func @transform_4(%arg0: i32, %arg1: i32) -> (i32, i32, i32, i32) {
    %c0_i32 = arith.constant 0 : i32
    %c0_i32_0 = arith.constant 0 : i32
    %c0_i32_1 = arith.constant 0 : i32
    return %arg0, %arg1, %c0_i32, %c0_i32_0 : i32, i32, i32, i32
  }
}

module attributes {stable_mosaic.version = 11 : i64} {
  func.func @_conv_stats_kernel(%arg0: i32, %arg1: i32, %arg2: memref<1x10x10x64xbf16, #tpu.memory_space<vmem>>, %arg3: memref<3x3x64x64xbf16, #tpu.memory_space<vmem>>, %arg4: memref<1x1x8x64xf32, #tpu.memory_space<vmem>>, %arg5: memref<1x1x2x64xf32, #tpu.memory_space<vmem>>) attributes {dimension_semantics = [#tpu.dimension_semantics<parallel>, #tpu.dimension_semantics<parallel>], iteration_bounds = array<i64: 2, 8>, scalar_prefetch = 0 : i64, scratch_operands = 0 : i64, tpu.core_type = #tpu.core_type<tc>, window_params = [{transform_indices = @transform_0, window_bounds = array<i64: 1, 10, 10, 64>}, {pipeline_mode = #tpu.pipeline_mode<synchronous>, transform_indices = @transform_1, window_bounds = array<i64: 3, 3, 64, 64>}, {transform_indices = @transform_2, window_bounds = array<i64: 1, 1, 8, 64>}, {transform_indices = @transform_3, window_bounds = array<i64: 1, 1, 2, 64>}]} {
    %cst = arith.constant 0.000000e+00 : f32
    %0 = vector.broadcast %cst : f32 to vector<8x64xf32>
    %c0_i32 = arith.constant 0 : i32
    %1 = arith.addi %arg1, %c0_i32 : i32
    %c0 = arith.constant 0 : index
    %2 = arith.index_cast %1 : i32 to index
    %c0_0 = arith.constant 0 : index
    %c0_1 = arith.constant 0 : index
    %3 = vector.load %arg2[%c0, %2, %c0_0, %c0_1] : memref<1x10x10x64xbf16, #tpu.memory_space<vmem>>, vector<1x1x8x64xbf16>
    %4 = vector.shape_cast %3 : vector<1x1x8x64xbf16> to vector<1x8x64xbf16>
    %5 = vector.shape_cast %4 : vector<1x8x64xbf16> to vector<8x64xbf16>
    %c0_2 = arith.constant 0 : index
    %c0_3 = arith.constant 0 : index
    %c0_4 = arith.constant 0 : index
    %c0_5 = arith.constant 0 : index
    %6 = vector.load %arg3[%c0_2, %c0_3, %c0_4, %c0_5] : memref<3x3x64x64xbf16, #tpu.memory_space<vmem>>, vector<1x1x64x64xbf16>
    %7 = vector.shape_cast %6 : vector<1x1x64x64xbf16> to vector<64x64xbf16>
    %cst_6 = arith.constant dense<0.000000e+00> : vector<8x64xf32>
    %8 = tpu.matmul %5, %7, %cst_6 {dimension_numbers = #tpu.dot_dimension_numbers<[1], [0], [0], [1], [0, 0, 1, 1], [], []>} : vector<8x64xbf16>, vector<64x64xbf16>, vector<8x64xf32> -> vector<8x64xf32>
    %9 = arith.addf %0, %8 : vector<8x64xf32>
    %c0_i32_7 = arith.constant 0 : i32
    %10 = arith.addi %arg1, %c0_i32_7 : i32
    %c0_8 = arith.constant 0 : index
    %11 = arith.index_cast %10 : i32 to index
    %c1 = arith.constant 1 : index
    %c0_9 = arith.constant 0 : index
    %12 = vector.load %arg2[%c0_8, %11, %c1, %c0_9] : memref<1x10x10x64xbf16, #tpu.memory_space<vmem>>, vector<1x1x8x64xbf16>
    %13 = vector.shape_cast %12 : vector<1x1x8x64xbf16> to vector<1x8x64xbf16>
    %14 = vector.shape_cast %13 : vector<1x8x64xbf16> to vector<8x64xbf16>
    %c0_10 = arith.constant 0 : index
    %c1_11 = arith.constant 1 : index
    %c0_12 = arith.constant 0 : index
    %c0_13 = arith.constant 0 : index
    %15 = vector.load %arg3[%c0_10, %c1_11, %c0_12, %c0_13] : memref<3x3x64x64xbf16, #tpu.memory_space<vmem>>, vector<1x1x64x64xbf16>
    %16 = vector.shape_cast %15 : vector<1x1x64x64xbf16> to vector<64x64xbf16>
    %cst_14 = arith.constant dense<0.000000e+00> : vector<8x64xf32>
    %17 = tpu.matmul %14, %16, %cst_14 {dimension_numbers = #tpu.dot_dimension_numbers<[1], [0], [0], [1], [0, 0, 1, 1], [], []>} : vector<8x64xbf16>, vector<64x64xbf16>, vector<8x64xf32> -> vector<8x64xf32>
    %18 = arith.addf %9, %17 : vector<8x64xf32>
    %c0_i32_15 = arith.constant 0 : i32
    %19 = arith.addi %arg1, %c0_i32_15 : i32
    %c0_16 = arith.constant 0 : index
    %20 = arith.index_cast %19 : i32 to index
    %c2 = arith.constant 2 : index
    %c0_17 = arith.constant 0 : index
    %21 = vector.load %arg2[%c0_16, %20, %c2, %c0_17] : memref<1x10x10x64xbf16, #tpu.memory_space<vmem>>, vector<1x1x8x64xbf16>
    %22 = vector.shape_cast %21 : vector<1x1x8x64xbf16> to vector<1x8x64xbf16>
    %23 = vector.shape_cast %22 : vector<1x8x64xbf16> to vector<8x64xbf16>
    %c0_18 = arith.constant 0 : index
    %c2_19 = arith.constant 2 : index
    %c0_20 = arith.constant 0 : index
    %c0_21 = arith.constant 0 : index
    %24 = vector.load %arg3[%c0_18, %c2_19, %c0_20, %c0_21] : memref<3x3x64x64xbf16, #tpu.memory_space<vmem>>, vector<1x1x64x64xbf16>
    %25 = vector.shape_cast %24 : vector<1x1x64x64xbf16> to vector<64x64xbf16>
    %cst_22 = arith.constant dense<0.000000e+00> : vector<8x64xf32>
    %26 = tpu.matmul %23, %25, %cst_22 {dimension_numbers = #tpu.dot_dimension_numbers<[1], [0], [0], [1], [0, 0, 1, 1], [], []>} : vector<8x64xbf16>, vector<64x64xbf16>, vector<8x64xf32> -> vector<8x64xf32>
    %27 = arith.addf %18, %26 : vector<8x64xf32>
    %c1_i32 = arith.constant 1 : i32
    %28 = arith.addi %arg1, %c1_i32 : i32
    %c0_23 = arith.constant 0 : index
    %29 = arith.index_cast %28 : i32 to index
    %c0_24 = arith.constant 0 : index
    %c0_25 = arith.constant 0 : index
    %30 = vector.load %arg2[%c0_23, %29, %c0_24, %c0_25] : memref<1x10x10x64xbf16, #tpu.memory_space<vmem>>, vector<1x1x8x64xbf16>
    %31 = vector.shape_cast %30 : vector<1x1x8x64xbf16> to vector<1x8x64xbf16>
    %32 = vector.shape_cast %31 : vector<1x8x64xbf16> to vector<8x64xbf16>
    %c1_26 = arith.constant 1 : index
    %c0_27 = arith.constant 0 : index
    %c0_28 = arith.constant 0 : index
    %c0_29 = arith.constant 0 : index
    %33 = vector.load %arg3[%c1_26, %c0_27, %c0_28, %c0_29] : memref<3x3x64x64xbf16, #tpu.memory_space<vmem>>, vector<1x1x64x64xbf16>
    %34 = vector.shape_cast %33 : vector<1x1x64x64xbf16> to vector<64x64xbf16>
    %cst_30 = arith.constant dense<0.000000e+00> : vector<8x64xf32>
    %35 = tpu.matmul %32, %34, %cst_30 {dimension_numbers = #tpu.dot_dimension_numbers<[1], [0], [0], [1], [0, 0, 1, 1], [], []>} : vector<8x64xbf16>, vector<64x64xbf16>, vector<8x64xf32> -> vector<8x64xf32>
    %36 = arith.addf %27, %35 : vector<8x64xf32>
    %c1_i32_31 = arith.constant 1 : i32
    %37 = arith.addi %arg1, %c1_i32_31 : i32
    %c0_32 = arith.constant 0 : index
    %38 = arith.index_cast %37 : i32 to index
    %c1_33 = arith.constant 1 : index
    %c0_34 = arith.constant 0 : index
    %39 = vector.load %arg2[%c0_32, %38, %c1_33, %c0_34] : memref<1x10x10x64xbf16, #tpu.memory_space<vmem>>, vector<1x1x8x64xbf16>
    %40 = vector.shape_cast %39 : vector<1x1x8x64xbf16> to vector<1x8x64xbf16>
    %41 = vector.shape_cast %40 : vector<1x8x64xbf16> to vector<8x64xbf16>
    %c1_35 = arith.constant 1 : index
    %c1_36 = arith.constant 1 : index
    %c0_37 = arith.constant 0 : index
    %c0_38 = arith.constant 0 : index
    %42 = vector.load %arg3[%c1_35, %c1_36, %c0_37, %c0_38] : memref<3x3x64x64xbf16, #tpu.memory_space<vmem>>, vector<1x1x64x64xbf16>
    %43 = vector.shape_cast %42 : vector<1x1x64x64xbf16> to vector<64x64xbf16>
    %cst_39 = arith.constant dense<0.000000e+00> : vector<8x64xf32>
    %44 = tpu.matmul %41, %43, %cst_39 {dimension_numbers = #tpu.dot_dimension_numbers<[1], [0], [0], [1], [0, 0, 1, 1], [], []>} : vector<8x64xbf16>, vector<64x64xbf16>, vector<8x64xf32> -> vector<8x64xf32>
    %45 = arith.addf %36, %44 : vector<8x64xf32>
    %c1_i32_40 = arith.constant 1 : i32
    %46 = arith.addi %arg1, %c1_i32_40 : i32
    %c0_41 = arith.constant 0 : index
    %47 = arith.index_cast %46 : i32 to index
    %c2_42 = arith.constant 2 : index
    %c0_43 = arith.constant 0 : index
    %48 = vector.load %arg2[%c0_41, %47, %c2_42, %c0_43] : memref<1x10x10x64xbf16, #tpu.memory_space<vmem>>, vector<1x1x8x64xbf16>
    %49 = vector.shape_cast %48 : vector<1x1x8x64xbf16> to vector<1x8x64xbf16>
    %50 = vector.shape_cast %49 : vector<1x8x64xbf16> to vector<8x64xbf16>
    %c1_44 = arith.constant 1 : index
    %c2_45 = arith.constant 2 : index
    %c0_46 = arith.constant 0 : index
    %c0_47 = arith.constant 0 : index
    %51 = vector.load %arg3[%c1_44, %c2_45, %c0_46, %c0_47] : memref<3x3x64x64xbf16, #tpu.memory_space<vmem>>, vector<1x1x64x64xbf16>
    %52 = vector.shape_cast %51 : vector<1x1x64x64xbf16> to vector<64x64xbf16>
    %cst_48 = arith.constant dense<0.000000e+00> : vector<8x64xf32>
    %53 = tpu.matmul %50, %52, %cst_48 {dimension_numbers = #tpu.dot_dimension_numbers<[1], [0], [0], [1], [0, 0, 1, 1], [], []>} : vector<8x64xbf16>, vector<64x64xbf16>, vector<8x64xf32> -> vector<8x64xf32>
    %54 = arith.addf %45, %53 : vector<8x64xf32>
    %c2_i32 = arith.constant 2 : i32
    %55 = arith.addi %arg1, %c2_i32 : i32
    %c0_49 = arith.constant 0 : index
    %56 = arith.index_cast %55 : i32 to index
    %c0_50 = arith.constant 0 : index
    %c0_51 = arith.constant 0 : index
    %57 = vector.load %arg2[%c0_49, %56, %c0_50, %c0_51] : memref<1x10x10x64xbf16, #tpu.memory_space<vmem>>, vector<1x1x8x64xbf16>
    %58 = vector.shape_cast %57 : vector<1x1x8x64xbf16> to vector<1x8x64xbf16>
    %59 = vector.shape_cast %58 : vector<1x8x64xbf16> to vector<8x64xbf16>
    %c2_52 = arith.constant 2 : index
    %c0_53 = arith.constant 0 : index
    %c0_54 = arith.constant 0 : index
    %c0_55 = arith.constant 0 : index
    %60 = vector.load %arg3[%c2_52, %c0_53, %c0_54, %c0_55] : memref<3x3x64x64xbf16, #tpu.memory_space<vmem>>, vector<1x1x64x64xbf16>
    %61 = vector.shape_cast %60 : vector<1x1x64x64xbf16> to vector<64x64xbf16>
    %cst_56 = arith.constant dense<0.000000e+00> : vector<8x64xf32>
    %62 = tpu.matmul %59, %61, %cst_56 {dimension_numbers = #tpu.dot_dimension_numbers<[1], [0], [0], [1], [0, 0, 1, 1], [], []>} : vector<8x64xbf16>, vector<64x64xbf16>, vector<8x64xf32> -> vector<8x64xf32>
    %63 = arith.addf %54, %62 : vector<8x64xf32>
    %c2_i32_57 = arith.constant 2 : i32
    %64 = arith.addi %arg1, %c2_i32_57 : i32
    %c0_58 = arith.constant 0 : index
    %65 = arith.index_cast %64 : i32 to index
    %c1_59 = arith.constant 1 : index
    %c0_60 = arith.constant 0 : index
    %66 = vector.load %arg2[%c0_58, %65, %c1_59, %c0_60] : memref<1x10x10x64xbf16, #tpu.memory_space<vmem>>, vector<1x1x8x64xbf16>
    %67 = vector.shape_cast %66 : vector<1x1x8x64xbf16> to vector<1x8x64xbf16>
    %68 = vector.shape_cast %67 : vector<1x8x64xbf16> to vector<8x64xbf16>
    %c2_61 = arith.constant 2 : index
    %c1_62 = arith.constant 1 : index
    %c0_63 = arith.constant 0 : index
    %c0_64 = arith.constant 0 : index
    %69 = vector.load %arg3[%c2_61, %c1_62, %c0_63, %c0_64] : memref<3x3x64x64xbf16, #tpu.memory_space<vmem>>, vector<1x1x64x64xbf16>
    %70 = vector.shape_cast %69 : vector<1x1x64x64xbf16> to vector<64x64xbf16>
    %cst_65 = arith.constant dense<0.000000e+00> : vector<8x64xf32>
    %71 = tpu.matmul %68, %70, %cst_65 {dimension_numbers = #tpu.dot_dimension_numbers<[1], [0], [0], [1], [0, 0, 1, 1], [], []>} : vector<8x64xbf16>, vector<64x64xbf16>, vector<8x64xf32> -> vector<8x64xf32>
    %72 = arith.addf %63, %71 : vector<8x64xf32>
    %c2_i32_66 = arith.constant 2 : i32
    %73 = arith.addi %arg1, %c2_i32_66 : i32
    %c0_67 = arith.constant 0 : index
    %74 = arith.index_cast %73 : i32 to index
    %c2_68 = arith.constant 2 : index
    %c0_69 = arith.constant 0 : index
    %75 = vector.load %arg2[%c0_67, %74, %c2_68, %c0_69] : memref<1x10x10x64xbf16, #tpu.memory_space<vmem>>, vector<1x1x8x64xbf16>
    %76 = vector.shape_cast %75 : vector<1x1x8x64xbf16> to vector<1x8x64xbf16>
    %77 = vector.shape_cast %76 : vector<1x8x64xbf16> to vector<8x64xbf16>
    %c2_70 = arith.constant 2 : index
    %c2_71 = arith.constant 2 : index
    %c0_72 = arith.constant 0 : index
    %c0_73 = arith.constant 0 : index
    %78 = vector.load %arg3[%c2_70, %c2_71, %c0_72, %c0_73] : memref<3x3x64x64xbf16, #tpu.memory_space<vmem>>, vector<1x1x64x64xbf16>
    %79 = vector.shape_cast %78 : vector<1x1x64x64xbf16> to vector<64x64xbf16>
    %cst_74 = arith.constant dense<0.000000e+00> : vector<8x64xf32>
    %80 = tpu.matmul %77, %79, %cst_74 {dimension_numbers = #tpu.dot_dimension_numbers<[1], [0], [0], [1], [0, 0, 1, 1], [], []>} : vector<8x64xbf16>, vector<64x64xbf16>, vector<8x64xf32> -> vector<8x64xf32>
    %81 = arith.addf %72, %80 : vector<8x64xf32>
    %82 = vector.shape_cast %81 : vector<8x64xf32> to vector<1x1x8x64xf32>
    %c0_75 = arith.constant 0 : index
    %c0_76 = arith.constant 0 : index
    %c0_77 = arith.constant 0 : index
    %c0_78 = arith.constant 0 : index
    %83 = vector.load %arg4[%c0_75, %c0_76, %c0_77, %c0_78] : memref<1x1x8x64xf32, #tpu.memory_space<vmem>>, vector<1x1x8x64xf32>
    tpu.vector_store %arg4[%c0_75, %c0_76, %c0_77, %c0_78], %82 {strides = array<i32>} : memref<1x1x8x64xf32, #tpu.memory_space<vmem>>, vector<1x1x8x64xf32>,
    %cst_79 = arith.constant dense<0.000000e+00> : vector<64xf32>
    %84 = vector.multi_reduction <add>, %81, %cst_79 [0] : vector<8x64xf32> to vector<64xf32>
    %85 = vector.shape_cast %84 : vector<64xf32> to vector<1x64xf32>
    %86 = arith.mulf %81, %81 : vector<8x64xf32>
    %cst_80 = arith.constant dense<0.000000e+00> : vector<64xf32>
    %87 = vector.multi_reduction <add>, %86, %cst_80 [0] : vector<8x64xf32> to vector<64xf32>
    %88 = vector.shape_cast %87 : vector<64xf32> to vector<1x64xf32>
    %89 = tpu.concatenate %85, %88 in 0 : vector<1x64xf32>, vector<1x64xf32> -> vector<2x64xf32>
    %90 = vector.shape_cast %89 : vector<2x64xf32> to vector<1x1x2x64xf32>
    %c0_81 = arith.constant 0 : index
    %c0_82 = arith.constant 0 : index
    %c0_83 = arith.constant 0 : index
    %c0_84 = arith.constant 0 : index
    %91 = vector.load %arg5[%c0_81, %c0_82, %c0_83, %c0_84] : memref<1x1x2x64xf32, #tpu.memory_space<vmem>>, vector<1x1x2x64xf32>
    tpu.vector_store %arg5[%c0_81, %c0_82, %c0_83, %c0_84], %90 {strides = array<i32>} : memref<1x1x2x64xf32, #tpu.memory_space<vmem>>, vector<1x1x2x64xf32>,
    return
  }
  func.func @transform_0(%arg0: i32, %arg1: i32) -> (i32, i32, i32, i32) {
    %c0_i32 = arith.constant 0 : i32
    %c0_i32_0 = arith.constant 0 : i32
    %c0_i32_1 = arith.constant 0 : i32
    %c0_i32_2 = arith.constant 0 : i32
    return %arg0, %c0_i32, %c0_i32_0, %c0_i32_1 : i32, i32, i32, i32
  }
  func.func @transform_1(%arg0: i32, %arg1: i32) -> (i32, i32, i32, i32) {
    %c0_i32 = arith.constant 0 : i32
    %c0_i32_0 = arith.constant 0 : i32
    %c0_i32_1 = arith.constant 0 : i32
    %c0_i32_2 = arith.constant 0 : i32
    %c0_i32_3 = arith.constant 0 : i32
    return %c0_i32, %c0_i32_0, %c0_i32_1, %c0_i32_2 : i32, i32, i32, i32
  }
  func.func @transform_2(%arg0: i32, %arg1: i32) -> (i32, i32, i32, i32) {
    %c0_i32 = arith.constant 0 : i32
    %c0_i32_0 = arith.constant 0 : i32
    %c0_i32_1 = arith.constant 0 : i32
    return %arg0, %arg1, %c0_i32, %c0_i32_0 : i32, i32, i32, i32
  }
  func.func @transform_3(%arg0: i32, %arg1: i32) -> (i32, i32, i32, i32) {
    %c0_i32 = arith.constant 0 : i32
    %c0_i32_0 = arith.constant 0 : i32
    %c0_i32_1 = arith.constant 0 : i32
    return %arg0, %arg1, %c0_i32, %c0_i32_0 : i32, i32, i32, i32
  }
}

module attributes {stable_mosaic.version = 11 : i64} {
  func.func @_bn_act_kernel(%arg0: i32, %arg1: memref<64x128xf32, #tpu.memory_space<vmem>>, %arg2: memref<1x128xf32, #tpu.memory_space<vmem>>, %arg3: memref<1x128xf32, #tpu.memory_space<vmem>>, %arg4: memref<64x128xbf16, #tpu.memory_space<vmem>>) attributes {dimension_semantics = [#tpu.dimension_semantics<parallel>], iteration_bounds = array<i64: 1>, scalar_prefetch = 0 : i64, scratch_operands = 0 : i64, tpu.core_type = #tpu.core_type<tc>, window_params = [{transform_indices = @transform_0, window_bounds = array<i64: 64, 128>}, {pipeline_mode = #tpu.pipeline_mode<synchronous>, transform_indices = @transform_1, window_bounds = array<i64: 1, 128>}, {pipeline_mode = #tpu.pipeline_mode<synchronous>, transform_indices = @transform_2, window_bounds = array<i64: 1, 128>}, {transform_indices = @transform_3, window_bounds = array<i64: 64, 128>}]} {
    %c0 = arith.constant 0 : index
    %c0_0 = arith.constant 0 : index
    %0 = vector.load %arg1[%c0, %c0_0] : memref<64x128xf32, #tpu.memory_space<vmem>>, vector<64x128xf32>
    %c0_1 = arith.constant 0 : index
    %c0_2 = arith.constant 0 : index
    %1 = vector.load %arg2[%c0_1, %c0_2] : memref<1x128xf32, #tpu.memory_space<vmem>>, vector<1x128xf32>
    %2 = vector.broadcast %1 : vector<1x128xf32> to vector<64x128xf32>
    %3 = arith.mulf %0, %2 : vector<64x128xf32>
    %c0_3 = arith.constant 0 : index
    %c0_4 = arith.constant 0 : index
    %4 = vector.load %arg3[%c0_3, %c0_4] : memref<1x128xf32, #tpu.memory_space<vmem>>, vector<1x128xf32>
    %5 = vector.broadcast %4 : vector<1x128xf32> to vector<64x128xf32>
    %6 = arith.addf %3, %5 : vector<64x128xf32>
    %cst = arith.constant 0.000000e+00 : f32
    %7 = vector.broadcast %cst : f32 to vector<64x128xf32>
    %8 = arith.maximumf %6, %7 : vector<64x128xf32>
    %9 = arith.truncf %8 : vector<64x128xf32> to vector<64x128xbf16>
    %c0_5 = arith.constant 0 : index
    %c0_6 = arith.constant 0 : index
    %10 = vector.load %arg4[%c0_5, %c0_6] : memref<64x128xbf16, #tpu.memory_space<vmem>>, vector<64x128xbf16>
    tpu.vector_store %arg4[%c0_5, %c0_6], %9 {strides = array<i32>} : memref<64x128xbf16, #tpu.memory_space<vmem>>, vector<64x128xbf16>,
    return
  }
  func.func @transform_0(%arg0: i32) -> (i32, i32) {
    %c0_i32 = arith.constant 0 : i32
    %c0_i32_0 = arith.constant 0 : i32
    return %arg0, %c0_i32 : i32, i32
  }
  func.func @transform_1(%arg0: i32) -> (i32, i32) {
    %c0_i32 = arith.constant 0 : i32
    %c0_i32_0 = arith.constant 0 : i32
    %c0_i32_1 = arith.constant 0 : i32
    return %c0_i32, %c0_i32_0 : i32, i32
  }
  func.func @transform_2(%arg0: i32) -> (i32, i32) {
    %c0_i32 = arith.constant 0 : i32
    %c0_i32_0 = arith.constant 0 : i32
    %c0_i32_1 = arith.constant 0 : i32
    return %c0_i32, %c0_i32_0 : i32, i32
  }
  func.func @transform_3(%arg0: i32) -> (i32, i32) {
    %c0_i32 = arith.constant 0 : i32
    %c0_i32_0 = arith.constant 0 : i32
    return %arg0, %c0_i32 : i32, i32
  }
}

module attributes {stable_mosaic.version = 11 : i64} {
  func.func @_bn_act_kernel(%arg0: i32, %arg1: memref<64x128xf32, #tpu.memory_space<vmem>>, %arg2: memref<1x128xf32, #tpu.memory_space<vmem>>, %arg3: memref<1x128xf32, #tpu.memory_space<vmem>>, %arg4: memref<64x128xbf16, #tpu.memory_space<vmem>>, %arg5: memref<64x128xbf16, #tpu.memory_space<vmem>>) attributes {dimension_semantics = [#tpu.dimension_semantics<parallel>], iteration_bounds = array<i64: 1>, scalar_prefetch = 0 : i64, scratch_operands = 0 : i64, tpu.core_type = #tpu.core_type<tc>, window_params = [{transform_indices = @transform_0, window_bounds = array<i64: 64, 128>}, {pipeline_mode = #tpu.pipeline_mode<synchronous>, transform_indices = @transform_1, window_bounds = array<i64: 1, 128>}, {pipeline_mode = #tpu.pipeline_mode<synchronous>, transform_indices = @transform_2, window_bounds = array<i64: 1, 128>}, {transform_indices = @transform_3, window_bounds = array<i64: 64, 128>}, {transform_indices = @transform_4, window_bounds = array<i64: 64, 128>}]} {
    %c0 = arith.constant 0 : index
    %c0_0 = arith.constant 0 : index
    %0 = vector.load %arg1[%c0, %c0_0] : memref<64x128xf32, #tpu.memory_space<vmem>>, vector<64x128xf32>
    %c0_1 = arith.constant 0 : index
    %c0_2 = arith.constant 0 : index
    %1 = vector.load %arg2[%c0_1, %c0_2] : memref<1x128xf32, #tpu.memory_space<vmem>>, vector<1x128xf32>
    %2 = vector.broadcast %1 : vector<1x128xf32> to vector<64x128xf32>
    %3 = arith.mulf %0, %2 : vector<64x128xf32>
    %c0_3 = arith.constant 0 : index
    %c0_4 = arith.constant 0 : index
    %4 = vector.load %arg3[%c0_3, %c0_4] : memref<1x128xf32, #tpu.memory_space<vmem>>, vector<1x128xf32>
    %5 = vector.broadcast %4 : vector<1x128xf32> to vector<64x128xf32>
    %6 = arith.addf %3, %5 : vector<64x128xf32>
    %c0_5 = arith.constant 0 : index
    %c0_6 = arith.constant 0 : index
    %7 = vector.load %arg4[%c0_5, %c0_6] : memref<64x128xbf16, #tpu.memory_space<vmem>>, vector<64x128xbf16>
    %8 = arith.extf %7 : vector<64x128xbf16> to vector<64x128xf32>
    %9 = arith.addf %6, %8 : vector<64x128xf32>
    %cst = arith.constant 0.000000e+00 : f32
    %10 = vector.broadcast %cst : f32 to vector<64x128xf32>
    %11 = arith.maximumf %9, %10 : vector<64x128xf32>
    %12 = arith.truncf %11 : vector<64x128xf32> to vector<64x128xbf16>
    %c0_7 = arith.constant 0 : index
    %c0_8 = arith.constant 0 : index
    %13 = vector.load %arg5[%c0_7, %c0_8] : memref<64x128xbf16, #tpu.memory_space<vmem>>, vector<64x128xbf16>
    tpu.vector_store %arg5[%c0_7, %c0_8], %12 {strides = array<i32>} : memref<64x128xbf16, #tpu.memory_space<vmem>>, vector<64x128xbf16>,
    return
  }
  func.func @transform_0(%arg0: i32) -> (i32, i32) {
    %c0_i32 = arith.constant 0 : i32
    %c0_i32_0 = arith.constant 0 : i32
    return %arg0, %c0_i32 : i32, i32
  }
  func.func @transform_1(%arg0: i32) -> (i32, i32) {
    %c0_i32 = arith.constant 0 : i32
    %c0_i32_0 = arith.constant 0 : i32
    %c0_i32_1 = arith.constant 0 : i32
    return %c0_i32, %c0_i32_0 : i32, i32
  }
  func.func @transform_2(%arg0: i32) -> (i32, i32) {
    %c0_i32 = arith.constant 0 : i32
    %c0_i32_0 = arith.constant 0 : i32
    %c0_i32_1 = arith.constant 0 : i32
    return %c0_i32, %c0_i32_0 : i32, i32
  }
  func.func @transform_3(%arg0: i32) -> (i32, i32) {
    %c0_i32 = arith.constant 0 : i32
    %c0_i32_0 = arith.constant 0 : i32
    return %arg0, %c0_i32 : i32, i32
  }
  func.func @transform_4(%arg0: i32) -> (i32, i32) {
    %c0_i32 = arith.constant 0 : i32
    %c0_i32_0 = arith.constant 0 : i32
    return %arg0, %c0_i32 : i32, i32
  }
}

module attributes {stable_mosaic.version = 11 : i64} {
  func.func @_conv_stats_kernel(%arg0: i32, %arg1: i32, %arg2: memref<1x4x4x64xbf16, #tpu.memory_space<vmem>>, %arg3: memref<1x1x64x128xbf16, #tpu.memory_space<vmem>>, %arg4: memref<1x1x4x128xf32, #tpu.memory_space<vmem>>, %arg5: memref<1x1x2x128xf32, #tpu.memory_space<vmem>>) attributes {dimension_semantics = [#tpu.dimension_semantics<parallel>, #tpu.dimension_semantics<parallel>], iteration_bounds = array<i64: 2, 4>, scalar_prefetch = 0 : i64, scratch_operands = 0 : i64, tpu.core_type = #tpu.core_type<tc>, window_params = [{transform_indices = @transform_0, window_bounds = array<i64: 1, 4, 4, 64>}, {pipeline_mode = #tpu.pipeline_mode<synchronous>, transform_indices = @transform_1, window_bounds = array<i64: 1, 1, 64, 128>}, {transform_indices = @transform_2, window_bounds = array<i64: 1, 1, 4, 128>}, {transform_indices = @transform_3, window_bounds = array<i64: 1, 1, 2, 128>}]} {
    %cst = arith.constant 0.000000e+00 : f32
    %0 = vector.broadcast %cst : f32 to vector<4x128xf32>
    %c0_i32 = arith.constant 0 : i32
    %1 = arith.addi %arg1, %c0_i32 : i32
    %c0 = arith.constant 0 : index
    %2 = arith.index_cast %1 : i32 to index
    %c0_0 = arith.constant 0 : index
    %c0_1 = arith.constant 0 : index
    %3 = vector.load %arg2[%c0, %2, %c0_0, %c0_1] : memref<1x4x4x64xbf16, #tpu.memory_space<vmem>>, vector<1x1x4x64xbf16>
    %4 = vector.shape_cast %3 : vector<1x1x4x64xbf16> to vector<1x4x64xbf16>
    %5 = vector.shape_cast %4 : vector<1x4x64xbf16> to vector<4x64xbf16>
    %c0_2 = arith.constant 0 : index
    %c0_3 = arith.constant 0 : index
    %c0_4 = arith.constant 0 : index
    %c0_5 = arith.constant 0 : index
    %6 = vector.load %arg3[%c0_2, %c0_3, %c0_4, %c0_5] : memref<1x1x64x128xbf16, #tpu.memory_space<vmem>>, vector<1x1x64x128xbf16>
    %7 = vector.shape_cast %6 : vector<1x1x64x128xbf16> to vector<64x128xbf16>
    %cst_6 = arith.constant dense<0.000000e+00> : vector<4x128xf32>
    %8 = tpu.matmul %5, %7, %cst_6 {dimension_numbers = #tpu.dot_dimension_numbers<[1], [0], [0], [1], [0, 0, 1, 1], [], []>} : vector<4x64xbf16>, vector<64x128xbf16>, vector<4x128xf32> -> vector<4x128xf32>
    %9 = arith.addf %0, %8 : vector<4x128xf32>
    %10 = vector.shape_cast %9 : vector<4x128xf32> to vector<1x1x4x128xf32>
    %c0_7 = arith.constant 0 : index
    %c0_8 = arith.constant 0 : index
    %c0_9 = arith.constant 0 : index
    %c0_10 = arith.constant 0 : index
    %11 = vector.load %arg4[%c0_7, %c0_8, %c0_9, %c0_10] : memref<1x1x4x128xf32, #tpu.memory_space<vmem>>, vector<1x1x4x128xf32>
    tpu.vector_store %arg4[%c0_7, %c0_8, %c0_9, %c0_10], %10 {strides = array<i32>} : memref<1x1x4x128xf32, #tpu.memory_space<vmem>>, vector<1x1x4x128xf32>,
    %cst_11 = arith.constant dense<0.000000e+00> : vector<128xf32>
    %12 = vector.multi_reduction <add>, %9, %cst_11 [0] : vector<4x128xf32> to vector<128xf32>
    %13 = vector.shape_cast %12 : vector<128xf32> to vector<1x128xf32>
    %14 = arith.mulf %9, %9 : vector<4x128xf32>
    %cst_12 = arith.constant dense<0.000000e+00> : vector<128xf32>
    %15 = vector.multi_reduction <add>, %14, %cst_12 [0] : vector<4x128xf32> to vector<128xf32>
    %16 = vector.shape_cast %15 : vector<128xf32> to vector<1x128xf32>
    %17 = tpu.concatenate %13, %16 in 0 : vector<1x128xf32>, vector<1x128xf32> -> vector<2x128xf32>
    %18 = vector.shape_cast %17 : vector<2x128xf32> to vector<1x1x2x128xf32>
    %c0_13 = arith.constant 0 : index
    %c0_14 = arith.constant 0 : index
    %c0_15 = arith.constant 0 : index
    %c0_16 = arith.constant 0 : index
    %19 = vector.load %arg5[%c0_13, %c0_14, %c0_15, %c0_16] : memref<1x1x2x128xf32, #tpu.memory_space<vmem>>, vector<1x1x2x128xf32>
    tpu.vector_store %arg5[%c0_13, %c0_14, %c0_15, %c0_16], %18 {strides = array<i32>} : memref<1x1x2x128xf32, #tpu.memory_space<vmem>>, vector<1x1x2x128xf32>,
    return
  }
  func.func @transform_0(%arg0: i32, %arg1: i32) -> (i32, i32, i32, i32) {
    %c0_i32 = arith.constant 0 : i32
    %c0_i32_0 = arith.constant 0 : i32
    %c0_i32_1 = arith.constant 0 : i32
    %c0_i32_2 = arith.constant 0 : i32
    return %arg0, %c0_i32, %c0_i32_0, %c0_i32_1 : i32, i32, i32, i32
  }
  func.func @transform_1(%arg0: i32, %arg1: i32) -> (i32, i32, i32, i32) {
    %c0_i32 = arith.constant 0 : i32
    %c0_i32_0 = arith.constant 0 : i32
    %c0_i32_1 = arith.constant 0 : i32
    %c0_i32_2 = arith.constant 0 : i32
    %c0_i32_3 = arith.constant 0 : i32
    return %c0_i32, %c0_i32_0, %c0_i32_1, %c0_i32_2 : i32, i32, i32, i32
  }
  func.func @transform_2(%arg0: i32, %arg1: i32) -> (i32, i32, i32, i32) {
    %c0_i32 = arith.constant 0 : i32
    %c0_i32_0 = arith.constant 0 : i32
    %c0_i32_1 = arith.constant 0 : i32
    return %arg0, %arg1, %c0_i32, %c0_i32_0 : i32, i32, i32, i32
  }
  func.func @transform_3(%arg0: i32, %arg1: i32) -> (i32, i32, i32, i32) {
    %c0_i32 = arith.constant 0 : i32
    %c0_i32_0 = arith.constant 0 : i32
    %c0_i32_1 = arith.constant 0 : i32
    return %arg0, %arg1, %c0_i32, %c0_i32_0 : i32, i32, i32, i32
  }
}

module attributes {stable_mosaic.version = 11 : i64} {
  func.func @_bn_act_kernel(%arg0: i32, %arg1: memref<32x128xf32, #tpu.memory_space<vmem>>, %arg2: memref<1x128xf32, #tpu.memory_space<vmem>>, %arg3: memref<1x128xf32, #tpu.memory_space<vmem>>, %arg4: memref<32x128xbf16, #tpu.memory_space<vmem>>) attributes {dimension_semantics = [#tpu.dimension_semantics<parallel>], iteration_bounds = array<i64: 1>, scalar_prefetch = 0 : i64, scratch_operands = 0 : i64, tpu.core_type = #tpu.core_type<tc>, window_params = [{transform_indices = @transform_0, window_bounds = array<i64: 32, 128>}, {pipeline_mode = #tpu.pipeline_mode<synchronous>, transform_indices = @transform_1, window_bounds = array<i64: 1, 128>}, {pipeline_mode = #tpu.pipeline_mode<synchronous>, transform_indices = @transform_2, window_bounds = array<i64: 1, 128>}, {transform_indices = @transform_3, window_bounds = array<i64: 32, 128>}]} {
    %c0 = arith.constant 0 : index
    %c0_0 = arith.constant 0 : index
    %0 = vector.load %arg1[%c0, %c0_0] : memref<32x128xf32, #tpu.memory_space<vmem>>, vector<32x128xf32>
    %c0_1 = arith.constant 0 : index
    %c0_2 = arith.constant 0 : index
    %1 = vector.load %arg2[%c0_1, %c0_2] : memref<1x128xf32, #tpu.memory_space<vmem>>, vector<1x128xf32>
    %2 = vector.broadcast %1 : vector<1x128xf32> to vector<32x128xf32>
    %3 = arith.mulf %0, %2 : vector<32x128xf32>
    %c0_3 = arith.constant 0 : index
    %c0_4 = arith.constant 0 : index
    %4 = vector.load %arg3[%c0_3, %c0_4] : memref<1x128xf32, #tpu.memory_space<vmem>>, vector<1x128xf32>
    %5 = vector.broadcast %4 : vector<1x128xf32> to vector<32x128xf32>
    %6 = arith.addf %3, %5 : vector<32x128xf32>
    %7 = arith.truncf %6 : vector<32x128xf32> to vector<32x128xbf16>
    %c0_5 = arith.constant 0 : index
    %c0_6 = arith.constant 0 : index
    %8 = vector.load %arg4[%c0_5, %c0_6] : memref<32x128xbf16, #tpu.memory_space<vmem>>, vector<32x128xbf16>
    tpu.vector_store %arg4[%c0_5, %c0_6], %7 {strides = array<i32>} : memref<32x128xbf16, #tpu.memory_space<vmem>>, vector<32x128xbf16>,
    return
  }
  func.func @transform_0(%arg0: i32) -> (i32, i32) {
    %c0_i32 = arith.constant 0 : i32
    %c0_i32_0 = arith.constant 0 : i32
    return %arg0, %c0_i32 : i32, i32
  }
  func.func @transform_1(%arg0: i32) -> (i32, i32) {
    %c0_i32 = arith.constant 0 : i32
    %c0_i32_0 = arith.constant 0 : i32
    %c0_i32_1 = arith.constant 0 : i32
    return %c0_i32, %c0_i32_0 : i32, i32
  }
  func.func @transform_2(%arg0: i32) -> (i32, i32) {
    %c0_i32 = arith.constant 0 : i32
    %c0_i32_0 = arith.constant 0 : i32
    %c0_i32_1 = arith.constant 0 : i32
    return %c0_i32, %c0_i32_0 : i32, i32
  }
  func.func @transform_3(%arg0: i32) -> (i32, i32) {
    %c0_i32 = arith.constant 0 : i32
    %c0_i32_0 = arith.constant 0 : i32
    return %arg0, %c0_i32 : i32, i32
  }
}

module attributes {stable_mosaic.version = 11 : i64} {
  func.func @_conv_stats_kernel(%arg0: i32, %arg1: i32, %arg2: memref<1x5x5x256xbf16, #tpu.memory_space<vmem>>, %arg3: memref<2x2x256x128xbf16, #tpu.memory_space<vmem>>, %arg4: memref<1x1x4x128xf32, #tpu.memory_space<vmem>>, %arg5: memref<1x1x2x128xf32, #tpu.memory_space<vmem>>) attributes {dimension_semantics = [#tpu.dimension_semantics<parallel>, #tpu.dimension_semantics<parallel>], iteration_bounds = array<i64: 2, 4>, scalar_prefetch = 0 : i64, scratch_operands = 0 : i64, tpu.core_type = #tpu.core_type<tc>, window_params = [{transform_indices = @transform_0, window_bounds = array<i64: 1, 5, 5, 256>}, {pipeline_mode = #tpu.pipeline_mode<synchronous>, transform_indices = @transform_1, window_bounds = array<i64: 2, 2, 256, 128>}, {transform_indices = @transform_2, window_bounds = array<i64: 1, 1, 4, 128>}, {transform_indices = @transform_3, window_bounds = array<i64: 1, 1, 2, 128>}]} {
    %cst = arith.constant 0.000000e+00 : f32
    %0 = vector.broadcast %cst : f32 to vector<4x128xf32>
    %c0_i32 = arith.constant 0 : i32
    %1 = arith.addi %arg1, %c0_i32 : i32
    %c0 = arith.constant 0 : index
    %2 = arith.index_cast %1 : i32 to index
    %c0_0 = arith.constant 0 : index
    %c0_1 = arith.constant 0 : index
    %3 = vector.load %arg2[%c0, %2, %c0_0, %c0_1] : memref<1x5x5x256xbf16, #tpu.memory_space<vmem>>, vector<1x1x4x256xbf16>
    %4 = vector.shape_cast %3 : vector<1x1x4x256xbf16> to vector<1x4x256xbf16>
    %5 = vector.shape_cast %4 : vector<1x4x256xbf16> to vector<4x256xbf16>
    %c0_2 = arith.constant 0 : index
    %c0_3 = arith.constant 0 : index
    %c0_4 = arith.constant 0 : index
    %c0_5 = arith.constant 0 : index
    %6 = vector.load %arg3[%c0_2, %c0_3, %c0_4, %c0_5] : memref<2x2x256x128xbf16, #tpu.memory_space<vmem>>, vector<1x1x256x128xbf16>
    %7 = vector.shape_cast %6 : vector<1x1x256x128xbf16> to vector<256x128xbf16>
    %cst_6 = arith.constant dense<0.000000e+00> : vector<4x128xf32>
    %8 = tpu.matmul %5, %7, %cst_6 {dimension_numbers = #tpu.dot_dimension_numbers<[1], [0], [0], [1], [0, 0, 1, 1], [], []>} : vector<4x256xbf16>, vector<256x128xbf16>, vector<4x128xf32> -> vector<4x128xf32>
    %9 = arith.addf %0, %8 : vector<4x128xf32>
    %c0_i32_7 = arith.constant 0 : i32
    %10 = arith.addi %arg1, %c0_i32_7 : i32
    %c0_8 = arith.constant 0 : index
    %11 = arith.index_cast %10 : i32 to index
    %c1 = arith.constant 1 : index
    %c0_9 = arith.constant 0 : index
    %12 = vector.load %arg2[%c0_8, %11, %c1, %c0_9] : memref<1x5x5x256xbf16, #tpu.memory_space<vmem>>, vector<1x1x4x256xbf16>
    %13 = vector.shape_cast %12 : vector<1x1x4x256xbf16> to vector<1x4x256xbf16>
    %14 = vector.shape_cast %13 : vector<1x4x256xbf16> to vector<4x256xbf16>
    %c0_10 = arith.constant 0 : index
    %c1_11 = arith.constant 1 : index
    %c0_12 = arith.constant 0 : index
    %c0_13 = arith.constant 0 : index
    %15 = vector.load %arg3[%c0_10, %c1_11, %c0_12, %c0_13] : memref<2x2x256x128xbf16, #tpu.memory_space<vmem>>, vector<1x1x256x128xbf16>
    %16 = vector.shape_cast %15 : vector<1x1x256x128xbf16> to vector<256x128xbf16>
    %cst_14 = arith.constant dense<0.000000e+00> : vector<4x128xf32>
    %17 = tpu.matmul %14, %16, %cst_14 {dimension_numbers = #tpu.dot_dimension_numbers<[1], [0], [0], [1], [0, 0, 1, 1], [], []>} : vector<4x256xbf16>, vector<256x128xbf16>, vector<4x128xf32> -> vector<4x128xf32>
    %18 = arith.addf %9, %17 : vector<4x128xf32>
    %c1_i32 = arith.constant 1 : i32
    %19 = arith.addi %arg1, %c1_i32 : i32
    %c0_15 = arith.constant 0 : index
    %20 = arith.index_cast %19 : i32 to index
    %c0_16 = arith.constant 0 : index
    %c0_17 = arith.constant 0 : index
    %21 = vector.load %arg2[%c0_15, %20, %c0_16, %c0_17] : memref<1x5x5x256xbf16, #tpu.memory_space<vmem>>, vector<1x1x4x256xbf16>
    %22 = vector.shape_cast %21 : vector<1x1x4x256xbf16> to vector<1x4x256xbf16>
    %23 = vector.shape_cast %22 : vector<1x4x256xbf16> to vector<4x256xbf16>
    %c1_18 = arith.constant 1 : index
    %c0_19 = arith.constant 0 : index
    %c0_20 = arith.constant 0 : index
    %c0_21 = arith.constant 0 : index
    %24 = vector.load %arg3[%c1_18, %c0_19, %c0_20, %c0_21] : memref<2x2x256x128xbf16, #tpu.memory_space<vmem>>, vector<1x1x256x128xbf16>
    %25 = vector.shape_cast %24 : vector<1x1x256x128xbf16> to vector<256x128xbf16>
    %cst_22 = arith.constant dense<0.000000e+00> : vector<4x128xf32>
    %26 = tpu.matmul %23, %25, %cst_22 {dimension_numbers = #tpu.dot_dimension_numbers<[1], [0], [0], [1], [0, 0, 1, 1], [], []>} : vector<4x256xbf16>, vector<256x128xbf16>, vector<4x128xf32> -> vector<4x128xf32>
    %27 = arith.addf %18, %26 : vector<4x128xf32>
    %c1_i32_23 = arith.constant 1 : i32
    %28 = arith.addi %arg1, %c1_i32_23 : i32
    %c0_24 = arith.constant 0 : index
    %29 = arith.index_cast %28 : i32 to index
    %c1_25 = arith.constant 1 : index
    %c0_26 = arith.constant 0 : index
    %30 = vector.load %arg2[%c0_24, %29, %c1_25, %c0_26] : memref<1x5x5x256xbf16, #tpu.memory_space<vmem>>, vector<1x1x4x256xbf16>
    %31 = vector.shape_cast %30 : vector<1x1x4x256xbf16> to vector<1x4x256xbf16>
    %32 = vector.shape_cast %31 : vector<1x4x256xbf16> to vector<4x256xbf16>
    %c1_27 = arith.constant 1 : index
    %c1_28 = arith.constant 1 : index
    %c0_29 = arith.constant 0 : index
    %c0_30 = arith.constant 0 : index
    %33 = vector.load %arg3[%c1_27, %c1_28, %c0_29, %c0_30] : memref<2x2x256x128xbf16, #tpu.memory_space<vmem>>, vector<1x1x256x128xbf16>
    %34 = vector.shape_cast %33 : vector<1x1x256x128xbf16> to vector<256x128xbf16>
    %cst_31 = arith.constant dense<0.000000e+00> : vector<4x128xf32>
    %35 = tpu.matmul %32, %34, %cst_31 {dimension_numbers = #tpu.dot_dimension_numbers<[1], [0], [0], [1], [0, 0, 1, 1], [], []>} : vector<4x256xbf16>, vector<256x128xbf16>, vector<4x128xf32> -> vector<4x128xf32>
    %36 = arith.addf %27, %35 : vector<4x128xf32>
    %37 = vector.shape_cast %36 : vector<4x128xf32> to vector<1x1x4x128xf32>
    %c0_32 = arith.constant 0 : index
    %c0_33 = arith.constant 0 : index
    %c0_34 = arith.constant 0 : index
    %c0_35 = arith.constant 0 : index
    %38 = vector.load %arg4[%c0_32, %c0_33, %c0_34, %c0_35] : memref<1x1x4x128xf32, #tpu.memory_space<vmem>>, vector<1x1x4x128xf32>
    tpu.vector_store %arg4[%c0_32, %c0_33, %c0_34, %c0_35], %37 {strides = array<i32>} : memref<1x1x4x128xf32, #tpu.memory_space<vmem>>, vector<1x1x4x128xf32>,
    %cst_36 = arith.constant dense<0.000000e+00> : vector<128xf32>
    %39 = vector.multi_reduction <add>, %36, %cst_36 [0] : vector<4x128xf32> to vector<128xf32>
    %40 = vector.shape_cast %39 : vector<128xf32> to vector<1x128xf32>
    %41 = arith.mulf %36, %36 : vector<4x128xf32>
    %cst_37 = arith.constant dense<0.000000e+00> : vector<128xf32>
    %42 = vector.multi_reduction <add>, %41, %cst_37 [0] : vector<4x128xf32> to vector<128xf32>
    %43 = vector.shape_cast %42 : vector<128xf32> to vector<1x128xf32>
    %44 = tpu.concatenate %40, %43 in 0 : vector<1x128xf32>, vector<1x128xf32> -> vector<2x128xf32>
    %45 = vector.shape_cast %44 : vector<2x128xf32> to vector<1x1x2x128xf32>
    %c0_38 = arith.constant 0 : index
    %c0_39 = arith.constant 0 : index
    %c0_40 = arith.constant 0 : index
    %c0_41 = arith.constant 0 : index
    %46 = vector.load %arg5[%c0_38, %c0_39, %c0_40, %c0_41] : memref<1x1x2x128xf32, #tpu.memory_space<vmem>>, vector<1x1x2x128xf32>
    tpu.vector_store %arg5[%c0_38, %c0_39, %c0_40, %c0_41], %45 {strides = array<i32>} : memref<1x1x2x128xf32, #tpu.memory_space<vmem>>, vector<1x1x2x128xf32>,
    return
  }
  func.func @transform_0(%arg0: i32, %arg1: i32) -> (i32, i32, i32, i32) {
    %c0_i32 = arith.constant 0 : i32
    %c0_i32_0 = arith.constant 0 : i32
    %c0_i32_1 = arith.constant 0 : i32
    %c0_i32_2 = arith.constant 0 : i32
    return %arg0, %c0_i32, %c0_i32_0, %c0_i32_1 : i32, i32, i32, i32
  }
  func.func @transform_1(%arg0: i32, %arg1: i32) -> (i32, i32, i32, i32) {
    %c0_i32 = arith.constant 0 : i32
    %c0_i32_0 = arith.constant 0 : i32
    %c0_i32_1 = arith.constant 0 : i32
    %c0_i32_2 = arith.constant 0 : i32
    %c0_i32_3 = arith.constant 0 : i32
    return %c0_i32, %c0_i32_0, %c0_i32_1, %c0_i32_2 : i32, i32, i32, i32
  }
  func.func @transform_2(%arg0: i32, %arg1: i32) -> (i32, i32, i32, i32) {
    %c0_i32 = arith.constant 0 : i32
    %c0_i32_0 = arith.constant 0 : i32
    %c0_i32_1 = arith.constant 0 : i32
    return %arg0, %arg1, %c0_i32, %c0_i32_0 : i32, i32, i32, i32
  }
  func.func @transform_3(%arg0: i32, %arg1: i32) -> (i32, i32, i32, i32) {
    %c0_i32 = arith.constant 0 : i32
    %c0_i32_0 = arith.constant 0 : i32
    %c0_i32_1 = arith.constant 0 : i32
    return %arg0, %arg1, %c0_i32, %c0_i32_0 : i32, i32, i32, i32
  }
}

module attributes {stable_mosaic.version = 11 : i64} {
  func.func @_bn_act_kernel(%arg0: i32, %arg1: memref<32x128xf32, #tpu.memory_space<vmem>>, %arg2: memref<1x128xf32, #tpu.memory_space<vmem>>, %arg3: memref<1x128xf32, #tpu.memory_space<vmem>>, %arg4: memref<32x128xbf16, #tpu.memory_space<vmem>>) attributes {dimension_semantics = [#tpu.dimension_semantics<parallel>], iteration_bounds = array<i64: 1>, scalar_prefetch = 0 : i64, scratch_operands = 0 : i64, tpu.core_type = #tpu.core_type<tc>, window_params = [{transform_indices = @transform_0, window_bounds = array<i64: 32, 128>}, {pipeline_mode = #tpu.pipeline_mode<synchronous>, transform_indices = @transform_1, window_bounds = array<i64: 1, 128>}, {pipeline_mode = #tpu.pipeline_mode<synchronous>, transform_indices = @transform_2, window_bounds = array<i64: 1, 128>}, {transform_indices = @transform_3, window_bounds = array<i64: 32, 128>}]} {
    %c0 = arith.constant 0 : index
    %c0_0 = arith.constant 0 : index
    %0 = vector.load %arg1[%c0, %c0_0] : memref<32x128xf32, #tpu.memory_space<vmem>>, vector<32x128xf32>
    %c0_1 = arith.constant 0 : index
    %c0_2 = arith.constant 0 : index
    %1 = vector.load %arg2[%c0_1, %c0_2] : memref<1x128xf32, #tpu.memory_space<vmem>>, vector<1x128xf32>
    %2 = vector.broadcast %1 : vector<1x128xf32> to vector<32x128xf32>
    %3 = arith.mulf %0, %2 : vector<32x128xf32>
    %c0_3 = arith.constant 0 : index
    %c0_4 = arith.constant 0 : index
    %4 = vector.load %arg3[%c0_3, %c0_4] : memref<1x128xf32, #tpu.memory_space<vmem>>, vector<1x128xf32>
    %5 = vector.broadcast %4 : vector<1x128xf32> to vector<32x128xf32>
    %6 = arith.addf %3, %5 : vector<32x128xf32>
    %cst = arith.constant 0.000000e+00 : f32
    %7 = vector.broadcast %cst : f32 to vector<32x128xf32>
    %8 = arith.maximumf %6, %7 : vector<32x128xf32>
    %9 = arith.truncf %8 : vector<32x128xf32> to vector<32x128xbf16>
    %c0_5 = arith.constant 0 : index
    %c0_6 = arith.constant 0 : index
    %10 = vector.load %arg4[%c0_5, %c0_6] : memref<32x128xbf16, #tpu.memory_space<vmem>>, vector<32x128xbf16>
    tpu.vector_store %arg4[%c0_5, %c0_6], %9 {strides = array<i32>} : memref<32x128xbf16, #tpu.memory_space<vmem>>, vector<32x128xbf16>,
    return
  }
  func.func @transform_0(%arg0: i32) -> (i32, i32) {
    %c0_i32 = arith.constant 0 : i32
    %c0_i32_0 = arith.constant 0 : i32
    return %arg0, %c0_i32 : i32, i32
  }
  func.func @transform_1(%arg0: i32) -> (i32, i32) {
    %c0_i32 = arith.constant 0 : i32
    %c0_i32_0 = arith.constant 0 : i32
    %c0_i32_1 = arith.constant 0 : i32
    return %c0_i32, %c0_i32_0 : i32, i32
  }
  func.func @transform_2(%arg0: i32) -> (i32, i32) {
    %c0_i32 = arith.constant 0 : i32
    %c0_i32_0 = arith.constant 0 : i32
    %c0_i32_1 = arith.constant 0 : i32
    return %c0_i32, %c0_i32_0 : i32, i32
  }
  func.func @transform_3(%arg0: i32) -> (i32, i32) {
    %c0_i32 = arith.constant 0 : i32
    %c0_i32_0 = arith.constant 0 : i32
    return %arg0, %c0_i32 : i32, i32
  }
}

module attributes {stable_mosaic.version = 11 : i64} {
  func.func @_conv_stats_kernel(%arg0: i32, %arg1: i32, %arg2: memref<1x6x6x128xbf16, #tpu.memory_space<vmem>>, %arg3: memref<3x3x128x128xbf16, #tpu.memory_space<vmem>>, %arg4: memref<1x1x4x128xf32, #tpu.memory_space<vmem>>, %arg5: memref<1x1x2x128xf32, #tpu.memory_space<vmem>>) attributes {dimension_semantics = [#tpu.dimension_semantics<parallel>, #tpu.dimension_semantics<parallel>], iteration_bounds = array<i64: 2, 4>, scalar_prefetch = 0 : i64, scratch_operands = 0 : i64, tpu.core_type = #tpu.core_type<tc>, window_params = [{transform_indices = @transform_0, window_bounds = array<i64: 1, 6, 6, 128>}, {pipeline_mode = #tpu.pipeline_mode<synchronous>, transform_indices = @transform_1, window_bounds = array<i64: 3, 3, 128, 128>}, {transform_indices = @transform_2, window_bounds = array<i64: 1, 1, 4, 128>}, {transform_indices = @transform_3, window_bounds = array<i64: 1, 1, 2, 128>}]} {
    %cst = arith.constant 0.000000e+00 : f32
    %0 = vector.broadcast %cst : f32 to vector<4x128xf32>
    %c0_i32 = arith.constant 0 : i32
    %1 = arith.addi %arg1, %c0_i32 : i32
    %c0 = arith.constant 0 : index
    %2 = arith.index_cast %1 : i32 to index
    %c0_0 = arith.constant 0 : index
    %c0_1 = arith.constant 0 : index
    %3 = vector.load %arg2[%c0, %2, %c0_0, %c0_1] : memref<1x6x6x128xbf16, #tpu.memory_space<vmem>>, vector<1x1x4x128xbf16>
    %4 = vector.shape_cast %3 : vector<1x1x4x128xbf16> to vector<1x4x128xbf16>
    %5 = vector.shape_cast %4 : vector<1x4x128xbf16> to vector<4x128xbf16>
    %c0_2 = arith.constant 0 : index
    %c0_3 = arith.constant 0 : index
    %c0_4 = arith.constant 0 : index
    %c0_5 = arith.constant 0 : index
    %6 = vector.load %arg3[%c0_2, %c0_3, %c0_4, %c0_5] : memref<3x3x128x128xbf16, #tpu.memory_space<vmem>>, vector<1x1x128x128xbf16>
    %7 = vector.shape_cast %6 : vector<1x1x128x128xbf16> to vector<128x128xbf16>
    %cst_6 = arith.constant dense<0.000000e+00> : vector<4x128xf32>
    %8 = tpu.matmul %5, %7, %cst_6 {dimension_numbers = #tpu.dot_dimension_numbers<[1], [0], [0], [1], [0, 0, 1, 1], [], []>} : vector<4x128xbf16>, vector<128x128xbf16>, vector<4x128xf32> -> vector<4x128xf32>
    %9 = arith.addf %0, %8 : vector<4x128xf32>
    %c0_i32_7 = arith.constant 0 : i32
    %10 = arith.addi %arg1, %c0_i32_7 : i32
    %c0_8 = arith.constant 0 : index
    %11 = arith.index_cast %10 : i32 to index
    %c1 = arith.constant 1 : index
    %c0_9 = arith.constant 0 : index
    %12 = vector.load %arg2[%c0_8, %11, %c1, %c0_9] : memref<1x6x6x128xbf16, #tpu.memory_space<vmem>>, vector<1x1x4x128xbf16>
    %13 = vector.shape_cast %12 : vector<1x1x4x128xbf16> to vector<1x4x128xbf16>
    %14 = vector.shape_cast %13 : vector<1x4x128xbf16> to vector<4x128xbf16>
    %c0_10 = arith.constant 0 : index
    %c1_11 = arith.constant 1 : index
    %c0_12 = arith.constant 0 : index
    %c0_13 = arith.constant 0 : index
    %15 = vector.load %arg3[%c0_10, %c1_11, %c0_12, %c0_13] : memref<3x3x128x128xbf16, #tpu.memory_space<vmem>>, vector<1x1x128x128xbf16>
    %16 = vector.shape_cast %15 : vector<1x1x128x128xbf16> to vector<128x128xbf16>
    %cst_14 = arith.constant dense<0.000000e+00> : vector<4x128xf32>
    %17 = tpu.matmul %14, %16, %cst_14 {dimension_numbers = #tpu.dot_dimension_numbers<[1], [0], [0], [1], [0, 0, 1, 1], [], []>} : vector<4x128xbf16>, vector<128x128xbf16>, vector<4x128xf32> -> vector<4x128xf32>
    %18 = arith.addf %9, %17 : vector<4x128xf32>
    %c0_i32_15 = arith.constant 0 : i32
    %19 = arith.addi %arg1, %c0_i32_15 : i32
    %c0_16 = arith.constant 0 : index
    %20 = arith.index_cast %19 : i32 to index
    %c2 = arith.constant 2 : index
    %c0_17 = arith.constant 0 : index
    %21 = vector.load %arg2[%c0_16, %20, %c2, %c0_17] : memref<1x6x6x128xbf16, #tpu.memory_space<vmem>>, vector<1x1x4x128xbf16>
    %22 = vector.shape_cast %21 : vector<1x1x4x128xbf16> to vector<1x4x128xbf16>
    %23 = vector.shape_cast %22 : vector<1x4x128xbf16> to vector<4x128xbf16>
    %c0_18 = arith.constant 0 : index
    %c2_19 = arith.constant 2 : index
    %c0_20 = arith.constant 0 : index
    %c0_21 = arith.constant 0 : index
    %24 = vector.load %arg3[%c0_18, %c2_19, %c0_20, %c0_21] : memref<3x3x128x128xbf16, #tpu.memory_space<vmem>>, vector<1x1x128x128xbf16>
    %25 = vector.shape_cast %24 : vector<1x1x128x128xbf16> to vector<128x128xbf16>
    %cst_22 = arith.constant dense<0.000000e+00> : vector<4x128xf32>
    %26 = tpu.matmul %23, %25, %cst_22 {dimension_numbers = #tpu.dot_dimension_numbers<[1], [0], [0], [1], [0, 0, 1, 1], [], []>} : vector<4x128xbf16>, vector<128x128xbf16>, vector<4x128xf32> -> vector<4x128xf32>
    %27 = arith.addf %18, %26 : vector<4x128xf32>
    %c1_i32 = arith.constant 1 : i32
    %28 = arith.addi %arg1, %c1_i32 : i32
    %c0_23 = arith.constant 0 : index
    %29 = arith.index_cast %28 : i32 to index
    %c0_24 = arith.constant 0 : index
    %c0_25 = arith.constant 0 : index
    %30 = vector.load %arg2[%c0_23, %29, %c0_24, %c0_25] : memref<1x6x6x128xbf16, #tpu.memory_space<vmem>>, vector<1x1x4x128xbf16>
    %31 = vector.shape_cast %30 : vector<1x1x4x128xbf16> to vector<1x4x128xbf16>
    %32 = vector.shape_cast %31 : vector<1x4x128xbf16> to vector<4x128xbf16>
    %c1_26 = arith.constant 1 : index
    %c0_27 = arith.constant 0 : index
    %c0_28 = arith.constant 0 : index
    %c0_29 = arith.constant 0 : index
    %33 = vector.load %arg3[%c1_26, %c0_27, %c0_28, %c0_29] : memref<3x3x128x128xbf16, #tpu.memory_space<vmem>>, vector<1x1x128x128xbf16>
    %34 = vector.shape_cast %33 : vector<1x1x128x128xbf16> to vector<128x128xbf16>
    %cst_30 = arith.constant dense<0.000000e+00> : vector<4x128xf32>
    %35 = tpu.matmul %32, %34, %cst_30 {dimension_numbers = #tpu.dot_dimension_numbers<[1], [0], [0], [1], [0, 0, 1, 1], [], []>} : vector<4x128xbf16>, vector<128x128xbf16>, vector<4x128xf32> -> vector<4x128xf32>
    %36 = arith.addf %27, %35 : vector<4x128xf32>
    %c1_i32_31 = arith.constant 1 : i32
    %37 = arith.addi %arg1, %c1_i32_31 : i32
    %c0_32 = arith.constant 0 : index
    %38 = arith.index_cast %37 : i32 to index
    %c1_33 = arith.constant 1 : index
    %c0_34 = arith.constant 0 : index
    %39 = vector.load %arg2[%c0_32, %38, %c1_33, %c0_34] : memref<1x6x6x128xbf16, #tpu.memory_space<vmem>>, vector<1x1x4x128xbf16>
    %40 = vector.shape_cast %39 : vector<1x1x4x128xbf16> to vector<1x4x128xbf16>
    %41 = vector.shape_cast %40 : vector<1x4x128xbf16> to vector<4x128xbf16>
    %c1_35 = arith.constant 1 : index
    %c1_36 = arith.constant 1 : index
    %c0_37 = arith.constant 0 : index
    %c0_38 = arith.constant 0 : index
    %42 = vector.load %arg3[%c1_35, %c1_36, %c0_37, %c0_38] : memref<3x3x128x128xbf16, #tpu.memory_space<vmem>>, vector<1x1x128x128xbf16>
    %43 = vector.shape_cast %42 : vector<1x1x128x128xbf16> to vector<128x128xbf16>
    %cst_39 = arith.constant dense<0.000000e+00> : vector<4x128xf32>
    %44 = tpu.matmul %41, %43, %cst_39 {dimension_numbers = #tpu.dot_dimension_numbers<[1], [0], [0], [1], [0, 0, 1, 1], [], []>} : vector<4x128xbf16>, vector<128x128xbf16>, vector<4x128xf32> -> vector<4x128xf32>
    %45 = arith.addf %36, %44 : vector<4x128xf32>
    %c1_i32_40 = arith.constant 1 : i32
    %46 = arith.addi %arg1, %c1_i32_40 : i32
    %c0_41 = arith.constant 0 : index
    %47 = arith.index_cast %46 : i32 to index
    %c2_42 = arith.constant 2 : index
    %c0_43 = arith.constant 0 : index
    %48 = vector.load %arg2[%c0_41, %47, %c2_42, %c0_43] : memref<1x6x6x128xbf16, #tpu.memory_space<vmem>>, vector<1x1x4x128xbf16>
    %49 = vector.shape_cast %48 : vector<1x1x4x128xbf16> to vector<1x4x128xbf16>
    %50 = vector.shape_cast %49 : vector<1x4x128xbf16> to vector<4x128xbf16>
    %c1_44 = arith.constant 1 : index
    %c2_45 = arith.constant 2 : index
    %c0_46 = arith.constant 0 : index
    %c0_47 = arith.constant 0 : index
    %51 = vector.load %arg3[%c1_44, %c2_45, %c0_46, %c0_47] : memref<3x3x128x128xbf16, #tpu.memory_space<vmem>>, vector<1x1x128x128xbf16>
    %52 = vector.shape_cast %51 : vector<1x1x128x128xbf16> to vector<128x128xbf16>
    %cst_48 = arith.constant dense<0.000000e+00> : vector<4x128xf32>
    %53 = tpu.matmul %50, %52, %cst_48 {dimension_numbers = #tpu.dot_dimension_numbers<[1], [0], [0], [1], [0, 0, 1, 1], [], []>} : vector<4x128xbf16>, vector<128x128xbf16>, vector<4x128xf32> -> vector<4x128xf32>
    %54 = arith.addf %45, %53 : vector<4x128xf32>
    %c2_i32 = arith.constant 2 : i32
    %55 = arith.addi %arg1, %c2_i32 : i32
    %c0_49 = arith.constant 0 : index
    %56 = arith.index_cast %55 : i32 to index
    %c0_50 = arith.constant 0 : index
    %c0_51 = arith.constant 0 : index
    %57 = vector.load %arg2[%c0_49, %56, %c0_50, %c0_51] : memref<1x6x6x128xbf16, #tpu.memory_space<vmem>>, vector<1x1x4x128xbf16>
    %58 = vector.shape_cast %57 : vector<1x1x4x128xbf16> to vector<1x4x128xbf16>
    %59 = vector.shape_cast %58 : vector<1x4x128xbf16> to vector<4x128xbf16>
    %c2_52 = arith.constant 2 : index
    %c0_53 = arith.constant 0 : index
    %c0_54 = arith.constant 0 : index
    %c0_55 = arith.constant 0 : index
    %60 = vector.load %arg3[%c2_52, %c0_53, %c0_54, %c0_55] : memref<3x3x128x128xbf16, #tpu.memory_space<vmem>>, vector<1x1x128x128xbf16>
    %61 = vector.shape_cast %60 : vector<1x1x128x128xbf16> to vector<128x128xbf16>
    %cst_56 = arith.constant dense<0.000000e+00> : vector<4x128xf32>
    %62 = tpu.matmul %59, %61, %cst_56 {dimension_numbers = #tpu.dot_dimension_numbers<[1], [0], [0], [1], [0, 0, 1, 1], [], []>} : vector<4x128xbf16>, vector<128x128xbf16>, vector<4x128xf32> -> vector<4x128xf32>
    %63 = arith.addf %54, %62 : vector<4x128xf32>
    %c2_i32_57 = arith.constant 2 : i32
    %64 = arith.addi %arg1, %c2_i32_57 : i32
    %c0_58 = arith.constant 0 : index
    %65 = arith.index_cast %64 : i32 to index
    %c1_59 = arith.constant 1 : index
    %c0_60 = arith.constant 0 : index
    %66 = vector.load %arg2[%c0_58, %65, %c1_59, %c0_60] : memref<1x6x6x128xbf16, #tpu.memory_space<vmem>>, vector<1x1x4x128xbf16>
    %67 = vector.shape_cast %66 : vector<1x1x4x128xbf16> to vector<1x4x128xbf16>
    %68 = vector.shape_cast %67 : vector<1x4x128xbf16> to vector<4x128xbf16>
    %c2_61 = arith.constant 2 : index
    %c1_62 = arith.constant 1 : index
    %c0_63 = arith.constant 0 : index
    %c0_64 = arith.constant 0 : index
    %69 = vector.load %arg3[%c2_61, %c1_62, %c0_63, %c0_64] : memref<3x3x128x128xbf16, #tpu.memory_space<vmem>>, vector<1x1x128x128xbf16>
    %70 = vector.shape_cast %69 : vector<1x1x128x128xbf16> to vector<128x128xbf16>
    %cst_65 = arith.constant dense<0.000000e+00> : vector<4x128xf32>
    %71 = tpu.matmul %68, %70, %cst_65 {dimension_numbers = #tpu.dot_dimension_numbers<[1], [0], [0], [1], [0, 0, 1, 1], [], []>} : vector<4x128xbf16>, vector<128x128xbf16>, vector<4x128xf32> -> vector<4x128xf32>
    %72 = arith.addf %63, %71 : vector<4x128xf32>
    %c2_i32_66 = arith.constant 2 : i32
    %73 = arith.addi %arg1, %c2_i32_66 : i32
    %c0_67 = arith.constant 0 : index
    %74 = arith.index_cast %73 : i32 to index
    %c2_68 = arith.constant 2 : index
    %c0_69 = arith.constant 0 : index
    %75 = vector.load %arg2[%c0_67, %74, %c2_68, %c0_69] : memref<1x6x6x128xbf16, #tpu.memory_space<vmem>>, vector<1x1x4x128xbf16>
    %76 = vector.shape_cast %75 : vector<1x1x4x128xbf16> to vector<1x4x128xbf16>
    %77 = vector.shape_cast %76 : vector<1x4x128xbf16> to vector<4x128xbf16>
    %c2_70 = arith.constant 2 : index
    %c2_71 = arith.constant 2 : index
    %c0_72 = arith.constant 0 : index
    %c0_73 = arith.constant 0 : index
    %78 = vector.load %arg3[%c2_70, %c2_71, %c0_72, %c0_73] : memref<3x3x128x128xbf16, #tpu.memory_space<vmem>>, vector<1x1x128x128xbf16>
    %79 = vector.shape_cast %78 : vector<1x1x128x128xbf16> to vector<128x128xbf16>
    %cst_74 = arith.constant dense<0.000000e+00> : vector<4x128xf32>
    %80 = tpu.matmul %77, %79, %cst_74 {dimension_numbers = #tpu.dot_dimension_numbers<[1], [0], [0], [1], [0, 0, 1, 1], [], []>} : vector<4x128xbf16>, vector<128x128xbf16>, vector<4x128xf32> -> vector<4x128xf32>
    %81 = arith.addf %72, %80 : vector<4x128xf32>
    %82 = vector.shape_cast %81 : vector<4x128xf32> to vector<1x1x4x128xf32>
    %c0_75 = arith.constant 0 : index
    %c0_76 = arith.constant 0 : index
    %c0_77 = arith.constant 0 : index
    %c0_78 = arith.constant 0 : index
    %83 = vector.load %arg4[%c0_75, %c0_76, %c0_77, %c0_78] : memref<1x1x4x128xf32, #tpu.memory_space<vmem>>, vector<1x1x4x128xf32>
    tpu.vector_store %arg4[%c0_75, %c0_76, %c0_77, %c0_78], %82 {strides = array<i32>} : memref<1x1x4x128xf32, #tpu.memory_space<vmem>>, vector<1x1x4x128xf32>,
    %cst_79 = arith.constant dense<0.000000e+00> : vector<128xf32>
    %84 = vector.multi_reduction <add>, %81, %cst_79 [0] : vector<4x128xf32> to vector<128xf32>
    %85 = vector.shape_cast %84 : vector<128xf32> to vector<1x128xf32>
    %86 = arith.mulf %81, %81 : vector<4x128xf32>
    %cst_80 = arith.constant dense<0.000000e+00> : vector<128xf32>
    %87 = vector.multi_reduction <add>, %86, %cst_80 [0] : vector<4x128xf32> to vector<128xf32>
    %88 = vector.shape_cast %87 : vector<128xf32> to vector<1x128xf32>
    %89 = tpu.concatenate %85, %88 in 0 : vector<1x128xf32>, vector<1x128xf32> -> vector<2x128xf32>
    %90 = vector.shape_cast %89 : vector<2x128xf32> to vector<1x1x2x128xf32>
    %c0_81 = arith.constant 0 : index
    %c0_82 = arith.constant 0 : index
    %c0_83 = arith.constant 0 : index
    %c0_84 = arith.constant 0 : index
    %91 = vector.load %arg5[%c0_81, %c0_82, %c0_83, %c0_84] : memref<1x1x2x128xf32, #tpu.memory_space<vmem>>, vector<1x1x2x128xf32>
    tpu.vector_store %arg5[%c0_81, %c0_82, %c0_83, %c0_84], %90 {strides = array<i32>} : memref<1x1x2x128xf32, #tpu.memory_space<vmem>>, vector<1x1x2x128xf32>,
    return
  }
  func.func @transform_0(%arg0: i32, %arg1: i32) -> (i32, i32, i32, i32) {
    %c0_i32 = arith.constant 0 : i32
    %c0_i32_0 = arith.constant 0 : i32
    %c0_i32_1 = arith.constant 0 : i32
    %c0_i32_2 = arith.constant 0 : i32
    return %arg0, %c0_i32, %c0_i32_0, %c0_i32_1 : i32, i32, i32, i32
  }
  func.func @transform_1(%arg0: i32, %arg1: i32) -> (i32, i32, i32, i32) {
    %c0_i32 = arith.constant 0 : i32
    %c0_i32_0 = arith.constant 0 : i32
    %c0_i32_1 = arith.constant 0 : i32
    %c0_i32_2 = arith.constant 0 : i32
    %c0_i32_3 = arith.constant 0 : i32
    return %c0_i32, %c0_i32_0, %c0_i32_1, %c0_i32_2 : i32, i32, i32, i32
  }
  func.func @transform_2(%arg0: i32, %arg1: i32) -> (i32, i32, i32, i32) {
    %c0_i32 = arith.constant 0 : i32
    %c0_i32_0 = arith.constant 0 : i32
    %c0_i32_1 = arith.constant 0 : i32
    return %arg0, %arg1, %c0_i32, %c0_i32_0 : i32, i32, i32, i32
  }
  func.func @transform_3(%arg0: i32, %arg1: i32) -> (i32, i32, i32, i32) {
    %c0_i32 = arith.constant 0 : i32
    %c0_i32_0 = arith.constant 0 : i32
    %c0_i32_1 = arith.constant 0 : i32
    return %arg0, %arg1, %c0_i32, %c0_i32_0 : i32, i32, i32, i32
  }
}

module attributes {stable_mosaic.version = 11 : i64} {
  func.func @_bn_act_kernel(%arg0: i32, %arg1: memref<32x128xf32, #tpu.memory_space<vmem>>, %arg2: memref<1x128xf32, #tpu.memory_space<vmem>>, %arg3: memref<1x128xf32, #tpu.memory_space<vmem>>, %arg4: memref<32x128xbf16, #tpu.memory_space<vmem>>, %arg5: memref<32x128xbf16, #tpu.memory_space<vmem>>) attributes {dimension_semantics = [#tpu.dimension_semantics<parallel>], iteration_bounds = array<i64: 1>, scalar_prefetch = 0 : i64, scratch_operands = 0 : i64, tpu.core_type = #tpu.core_type<tc>, window_params = [{transform_indices = @transform_0, window_bounds = array<i64: 32, 128>}, {pipeline_mode = #tpu.pipeline_mode<synchronous>, transform_indices = @transform_1, window_bounds = array<i64: 1, 128>}, {pipeline_mode = #tpu.pipeline_mode<synchronous>, transform_indices = @transform_2, window_bounds = array<i64: 1, 128>}, {transform_indices = @transform_3, window_bounds = array<i64: 32, 128>}, {transform_indices = @transform_4, window_bounds = array<i64: 32, 128>}]} {
    %c0 = arith.constant 0 : index
    %c0_0 = arith.constant 0 : index
    %0 = vector.load %arg1[%c0, %c0_0] : memref<32x128xf32, #tpu.memory_space<vmem>>, vector<32x128xf32>
    %c0_1 = arith.constant 0 : index
    %c0_2 = arith.constant 0 : index
    %1 = vector.load %arg2[%c0_1, %c0_2] : memref<1x128xf32, #tpu.memory_space<vmem>>, vector<1x128xf32>
    %2 = vector.broadcast %1 : vector<1x128xf32> to vector<32x128xf32>
    %3 = arith.mulf %0, %2 : vector<32x128xf32>
    %c0_3 = arith.constant 0 : index
    %c0_4 = arith.constant 0 : index
    %4 = vector.load %arg3[%c0_3, %c0_4] : memref<1x128xf32, #tpu.memory_space<vmem>>, vector<1x128xf32>
    %5 = vector.broadcast %4 : vector<1x128xf32> to vector<32x128xf32>
    %6 = arith.addf %3, %5 : vector<32x128xf32>
    %c0_5 = arith.constant 0 : index
    %c0_6 = arith.constant 0 : index
    %7 = vector.load %arg4[%c0_5, %c0_6] : memref<32x128xbf16, #tpu.memory_space<vmem>>, vector<32x128xbf16>
    %8 = arith.extf %7 : vector<32x128xbf16> to vector<32x128xf32>
    %9 = arith.addf %6, %8 : vector<32x128xf32>
    %cst = arith.constant 0.000000e+00 : f32
    %10 = vector.broadcast %cst : f32 to vector<32x128xf32>
    %11 = arith.maximumf %9, %10 : vector<32x128xf32>
    %12 = arith.truncf %11 : vector<32x128xf32> to vector<32x128xbf16>
    %c0_7 = arith.constant 0 : index
    %c0_8 = arith.constant 0 : index
    %13 = vector.load %arg5[%c0_7, %c0_8] : memref<32x128xbf16, #tpu.memory_space<vmem>>, vector<32x128xbf16>
    tpu.vector_store %arg5[%c0_7, %c0_8], %12 {strides = array<i32>} : memref<32x128xbf16, #tpu.memory_space<vmem>>, vector<32x128xbf16>,
    return
  }
  func.func @transform_0(%arg0: i32) -> (i32, i32) {
    %c0_i32 = arith.constant 0 : i32
    %c0_i32_0 = arith.constant 0 : i32
    return %arg0, %c0_i32 : i32, i32
  }
  func.func @transform_1(%arg0: i32) -> (i32, i32) {
    %c0_i32 = arith.constant 0 : i32
    %c0_i32_0 = arith.constant 0 : i32
    %c0_i32_1 = arith.constant 0 : i32
    return %c0_i32, %c0_i32_0 : i32, i32
  }
  func.func @transform_2(%arg0: i32) -> (i32, i32) {
    %c0_i32 = arith.constant 0 : i32
    %c0_i32_0 = arith.constant 0 : i32
    %c0_i32_1 = arith.constant 0 : i32
    return %c0_i32, %c0_i32_0 : i32, i32
  }
  func.func @transform_3(%arg0: i32) -> (i32, i32) {
    %c0_i32 = arith.constant 0 : i32
    %c0_i32_0 = arith.constant 0 : i32
    return %arg0, %c0_i32 : i32, i32
  }
  func.func @transform_4(%arg0: i32) -> (i32, i32) {
    %c0_i32 = arith.constant 0 : i32
    %c0_i32_0 = arith.constant 0 : i32
    return %arg0, %c0_i32 : i32, i32
  }
}

module attributes {stable_mosaic.version = 11 : i64} {
  func.func @_conv_stats_kernel(%arg0: i32, %arg1: i32, %arg2: memref<1x2x2x128xbf16, #tpu.memory_space<vmem>>, %arg3: memref<1x1x128x256xbf16, #tpu.memory_space<vmem>>, %arg4: memref<1x1x2x256xf32, #tpu.memory_space<vmem>>, %arg5: memref<1x1x2x256xf32, #tpu.memory_space<vmem>>) attributes {dimension_semantics = [#tpu.dimension_semantics<parallel>, #tpu.dimension_semantics<parallel>], iteration_bounds = array<i64: 2, 2>, scalar_prefetch = 0 : i64, scratch_operands = 0 : i64, tpu.core_type = #tpu.core_type<tc>, window_params = [{transform_indices = @transform_0, window_bounds = array<i64: 1, 2, 2, 128>}, {pipeline_mode = #tpu.pipeline_mode<synchronous>, transform_indices = @transform_1, window_bounds = array<i64: 1, 1, 128, 256>}, {transform_indices = @transform_2, window_bounds = array<i64: 1, 1, 2, 256>}, {transform_indices = @transform_3, window_bounds = array<i64: 1, 1, 2, 256>}]} {
    %cst = arith.constant 0.000000e+00 : f32
    %0 = vector.broadcast %cst : f32 to vector<2x256xf32>
    %c0_i32 = arith.constant 0 : i32
    %1 = arith.addi %arg1, %c0_i32 : i32
    %c0 = arith.constant 0 : index
    %2 = arith.index_cast %1 : i32 to index
    %c0_0 = arith.constant 0 : index
    %c0_1 = arith.constant 0 : index
    %3 = vector.load %arg2[%c0, %2, %c0_0, %c0_1] : memref<1x2x2x128xbf16, #tpu.memory_space<vmem>>, vector<1x1x2x128xbf16>
    %4 = vector.shape_cast %3 : vector<1x1x2x128xbf16> to vector<1x2x128xbf16>
    %5 = vector.shape_cast %4 : vector<1x2x128xbf16> to vector<2x128xbf16>
    %c0_2 = arith.constant 0 : index
    %c0_3 = arith.constant 0 : index
    %c0_4 = arith.constant 0 : index
    %c0_5 = arith.constant 0 : index
    %6 = vector.load %arg3[%c0_2, %c0_3, %c0_4, %c0_5] : memref<1x1x128x256xbf16, #tpu.memory_space<vmem>>, vector<1x1x128x256xbf16>
    %7 = vector.shape_cast %6 : vector<1x1x128x256xbf16> to vector<128x256xbf16>
    %cst_6 = arith.constant dense<0.000000e+00> : vector<2x256xf32>
    %8 = tpu.matmul %5, %7, %cst_6 {dimension_numbers = #tpu.dot_dimension_numbers<[1], [0], [0], [1], [0, 0, 1, 1], [], []>} : vector<2x128xbf16>, vector<128x256xbf16>, vector<2x256xf32> -> vector<2x256xf32>
    %9 = arith.addf %0, %8 : vector<2x256xf32>
    %10 = vector.shape_cast %9 : vector<2x256xf32> to vector<1x1x2x256xf32>
    %c0_7 = arith.constant 0 : index
    %c0_8 = arith.constant 0 : index
    %c0_9 = arith.constant 0 : index
    %c0_10 = arith.constant 0 : index
    %11 = vector.load %arg4[%c0_7, %c0_8, %c0_9, %c0_10] : memref<1x1x2x256xf32, #tpu.memory_space<vmem>>, vector<1x1x2x256xf32>
    tpu.vector_store %arg4[%c0_7, %c0_8, %c0_9, %c0_10], %10 {strides = array<i32>} : memref<1x1x2x256xf32, #tpu.memory_space<vmem>>, vector<1x1x2x256xf32>,
    %cst_11 = arith.constant dense<0.000000e+00> : vector<256xf32>
    %12 = vector.multi_reduction <add>, %9, %cst_11 [0] : vector<2x256xf32> to vector<256xf32>
    %13 = vector.shape_cast %12 : vector<256xf32> to vector<1x256xf32>
    %14 = arith.mulf %9, %9 : vector<2x256xf32>
    %cst_12 = arith.constant dense<0.000000e+00> : vector<256xf32>
    %15 = vector.multi_reduction <add>, %14, %cst_12 [0] : vector<2x256xf32> to vector<256xf32>
    %16 = vector.shape_cast %15 : vector<256xf32> to vector<1x256xf32>
    %17 = tpu.concatenate %13, %16 in 0 : vector<1x256xf32>, vector<1x256xf32> -> vector<2x256xf32>
    %18 = vector.shape_cast %17 : vector<2x256xf32> to vector<1x1x2x256xf32>
    %c0_13 = arith.constant 0 : index
    %c0_14 = arith.constant 0 : index
    %c0_15 = arith.constant 0 : index
    %c0_16 = arith.constant 0 : index
    %19 = vector.load %arg5[%c0_13, %c0_14, %c0_15, %c0_16] : memref<1x1x2x256xf32, #tpu.memory_space<vmem>>, vector<1x1x2x256xf32>
    tpu.vector_store %arg5[%c0_13, %c0_14, %c0_15, %c0_16], %18 {strides = array<i32>} : memref<1x1x2x256xf32, #tpu.memory_space<vmem>>, vector<1x1x2x256xf32>,
    return
  }
  func.func @transform_0(%arg0: i32, %arg1: i32) -> (i32, i32, i32, i32) {
    %c0_i32 = arith.constant 0 : i32
    %c0_i32_0 = arith.constant 0 : i32
    %c0_i32_1 = arith.constant 0 : i32
    %c0_i32_2 = arith.constant 0 : i32
    return %arg0, %c0_i32, %c0_i32_0, %c0_i32_1 : i32, i32, i32, i32
  }
  func.func @transform_1(%arg0: i32, %arg1: i32) -> (i32, i32, i32, i32) {
    %c0_i32 = arith.constant 0 : i32
    %c0_i32_0 = arith.constant 0 : i32
    %c0_i32_1 = arith.constant 0 : i32
    %c0_i32_2 = arith.constant 0 : i32
    %c0_i32_3 = arith.constant 0 : i32
    return %c0_i32, %c0_i32_0, %c0_i32_1, %c0_i32_2 : i32, i32, i32, i32
  }
  func.func @transform_2(%arg0: i32, %arg1: i32) -> (i32, i32, i32, i32) {
    %c0_i32 = arith.constant 0 : i32
    %c0_i32_0 = arith.constant 0 : i32
    %c0_i32_1 = arith.constant 0 : i32
    return %arg0, %arg1, %c0_i32, %c0_i32_0 : i32, i32, i32, i32
  }
  func.func @transform_3(%arg0: i32, %arg1: i32) -> (i32, i32, i32, i32) {
    %c0_i32 = arith.constant 0 : i32
    %c0_i32_0 = arith.constant 0 : i32
    %c0_i32_1 = arith.constant 0 : i32
    return %arg0, %arg1, %c0_i32, %c0_i32_0 : i32, i32, i32, i32
  }
}

module attributes {stable_mosaic.version = 11 : i64} {
  func.func @_bn_act_kernel(%arg0: i32, %arg1: memref<8x256xf32, #tpu.memory_space<vmem>>, %arg2: memref<1x256xf32, #tpu.memory_space<vmem>>, %arg3: memref<1x256xf32, #tpu.memory_space<vmem>>, %arg4: memref<8x256xbf16, #tpu.memory_space<vmem>>) attributes {dimension_semantics = [#tpu.dimension_semantics<parallel>], iteration_bounds = array<i64: 1>, scalar_prefetch = 0 : i64, scratch_operands = 0 : i64, tpu.core_type = #tpu.core_type<tc>, window_params = [{transform_indices = @transform_0, window_bounds = array<i64: 8, 256>}, {pipeline_mode = #tpu.pipeline_mode<synchronous>, transform_indices = @transform_1, window_bounds = array<i64: 1, 256>}, {pipeline_mode = #tpu.pipeline_mode<synchronous>, transform_indices = @transform_2, window_bounds = array<i64: 1, 256>}, {transform_indices = @transform_3, window_bounds = array<i64: 8, 256>}]} {
    %c0 = arith.constant 0 : index
    %c0_0 = arith.constant 0 : index
    %0 = vector.load %arg1[%c0, %c0_0] : memref<8x256xf32, #tpu.memory_space<vmem>>, vector<8x256xf32>
    %c0_1 = arith.constant 0 : index
    %c0_2 = arith.constant 0 : index
    %1 = vector.load %arg2[%c0_1, %c0_2] : memref<1x256xf32, #tpu.memory_space<vmem>>, vector<1x256xf32>
    %2 = vector.broadcast %1 : vector<1x256xf32> to vector<8x256xf32>
    %3 = arith.mulf %0, %2 : vector<8x256xf32>
    %c0_3 = arith.constant 0 : index
    %c0_4 = arith.constant 0 : index
    %4 = vector.load %arg3[%c0_3, %c0_4] : memref<1x256xf32, #tpu.memory_space<vmem>>, vector<1x256xf32>
    %5 = vector.broadcast %4 : vector<1x256xf32> to vector<8x256xf32>
    %6 = arith.addf %3, %5 : vector<8x256xf32>
    %7 = arith.truncf %6 : vector<8x256xf32> to vector<8x256xbf16>
    %c0_5 = arith.constant 0 : index
    %c0_6 = arith.constant 0 : index
    %8 = vector.load %arg4[%c0_5, %c0_6] : memref<8x256xbf16, #tpu.memory_space<vmem>>, vector<8x256xbf16>
    tpu.vector_store %arg4[%c0_5, %c0_6], %7 {strides = array<i32>} : memref<8x256xbf16, #tpu.memory_space<vmem>>, vector<8x256xbf16>,
    return
  }
  func.func @transform_0(%arg0: i32) -> (i32, i32) {
    %c0_i32 = arith.constant 0 : i32
    %c0_i32_0 = arith.constant 0 : i32
    return %arg0, %c0_i32 : i32, i32
  }
  func.func @transform_1(%arg0: i32) -> (i32, i32) {
    %c0_i32 = arith.constant 0 : i32
    %c0_i32_0 = arith.constant 0 : i32
    %c0_i32_1 = arith.constant 0 : i32
    return %c0_i32, %c0_i32_0 : i32, i32
  }
  func.func @transform_2(%arg0: i32) -> (i32, i32) {
    %c0_i32 = arith.constant 0 : i32
    %c0_i32_0 = arith.constant 0 : i32
    %c0_i32_1 = arith.constant 0 : i32
    return %c0_i32, %c0_i32_0 : i32, i32
  }
  func.func @transform_3(%arg0: i32) -> (i32, i32) {
    %c0_i32 = arith.constant 0 : i32
    %c0_i32_0 = arith.constant 0 : i32
    return %arg0, %c0_i32 : i32, i32
  }
}

module attributes {stable_mosaic.version = 11 : i64} {
  func.func @_conv_stats_kernel(%arg0: i32, %arg1: i32, %arg2: memref<1x3x3x512xbf16, #tpu.memory_space<vmem>>, %arg3: memref<2x2x512x256xbf16, #tpu.memory_space<vmem>>, %arg4: memref<1x1x2x256xf32, #tpu.memory_space<vmem>>, %arg5: memref<1x1x2x256xf32, #tpu.memory_space<vmem>>) attributes {dimension_semantics = [#tpu.dimension_semantics<parallel>, #tpu.dimension_semantics<parallel>], iteration_bounds = array<i64: 2, 2>, scalar_prefetch = 0 : i64, scratch_operands = 0 : i64, tpu.core_type = #tpu.core_type<tc>, window_params = [{transform_indices = @transform_0, window_bounds = array<i64: 1, 3, 3, 512>}, {pipeline_mode = #tpu.pipeline_mode<synchronous>, transform_indices = @transform_1, window_bounds = array<i64: 2, 2, 512, 256>}, {transform_indices = @transform_2, window_bounds = array<i64: 1, 1, 2, 256>}, {transform_indices = @transform_3, window_bounds = array<i64: 1, 1, 2, 256>}]} {
    %cst = arith.constant 0.000000e+00 : f32
    %0 = vector.broadcast %cst : f32 to vector<2x256xf32>
    %c0_i32 = arith.constant 0 : i32
    %1 = arith.addi %arg1, %c0_i32 : i32
    %c0 = arith.constant 0 : index
    %2 = arith.index_cast %1 : i32 to index
    %c0_0 = arith.constant 0 : index
    %c0_1 = arith.constant 0 : index
    %3 = vector.load %arg2[%c0, %2, %c0_0, %c0_1] : memref<1x3x3x512xbf16, #tpu.memory_space<vmem>>, vector<1x1x2x512xbf16>
    %4 = vector.shape_cast %3 : vector<1x1x2x512xbf16> to vector<1x2x512xbf16>
    %5 = vector.shape_cast %4 : vector<1x2x512xbf16> to vector<2x512xbf16>
    %c0_2 = arith.constant 0 : index
    %c0_3 = arith.constant 0 : index
    %c0_4 = arith.constant 0 : index
    %c0_5 = arith.constant 0 : index
    %6 = vector.load %arg3[%c0_2, %c0_3, %c0_4, %c0_5] : memref<2x2x512x256xbf16, #tpu.memory_space<vmem>>, vector<1x1x512x256xbf16>
    %7 = vector.shape_cast %6 : vector<1x1x512x256xbf16> to vector<512x256xbf16>
    %cst_6 = arith.constant dense<0.000000e+00> : vector<2x256xf32>
    %8 = tpu.matmul %5, %7, %cst_6 {dimension_numbers = #tpu.dot_dimension_numbers<[1], [0], [0], [1], [0, 0, 1, 1], [], []>} : vector<2x512xbf16>, vector<512x256xbf16>, vector<2x256xf32> -> vector<2x256xf32>
    %9 = arith.addf %0, %8 : vector<2x256xf32>
    %c0_i32_7 = arith.constant 0 : i32
    %10 = arith.addi %arg1, %c0_i32_7 : i32
    %c0_8 = arith.constant 0 : index
    %11 = arith.index_cast %10 : i32 to index
    %c1 = arith.constant 1 : index
    %c0_9 = arith.constant 0 : index
    %12 = vector.load %arg2[%c0_8, %11, %c1, %c0_9] : memref<1x3x3x512xbf16, #tpu.memory_space<vmem>>, vector<1x1x2x512xbf16>
    %13 = vector.shape_cast %12 : vector<1x1x2x512xbf16> to vector<1x2x512xbf16>
    %14 = vector.shape_cast %13 : vector<1x2x512xbf16> to vector<2x512xbf16>
    %c0_10 = arith.constant 0 : index
    %c1_11 = arith.constant 1 : index
    %c0_12 = arith.constant 0 : index
    %c0_13 = arith.constant 0 : index
    %15 = vector.load %arg3[%c0_10, %c1_11, %c0_12, %c0_13] : memref<2x2x512x256xbf16, #tpu.memory_space<vmem>>, vector<1x1x512x256xbf16>
    %16 = vector.shape_cast %15 : vector<1x1x512x256xbf16> to vector<512x256xbf16>
    %cst_14 = arith.constant dense<0.000000e+00> : vector<2x256xf32>
    %17 = tpu.matmul %14, %16, %cst_14 {dimension_numbers = #tpu.dot_dimension_numbers<[1], [0], [0], [1], [0, 0, 1, 1], [], []>} : vector<2x512xbf16>, vector<512x256xbf16>, vector<2x256xf32> -> vector<2x256xf32>
    %18 = arith.addf %9, %17 : vector<2x256xf32>
    %c1_i32 = arith.constant 1 : i32
    %19 = arith.addi %arg1, %c1_i32 : i32
    %c0_15 = arith.constant 0 : index
    %20 = arith.index_cast %19 : i32 to index
    %c0_16 = arith.constant 0 : index
    %c0_17 = arith.constant 0 : index
    %21 = vector.load %arg2[%c0_15, %20, %c0_16, %c0_17] : memref<1x3x3x512xbf16, #tpu.memory_space<vmem>>, vector<1x1x2x512xbf16>
    %22 = vector.shape_cast %21 : vector<1x1x2x512xbf16> to vector<1x2x512xbf16>
    %23 = vector.shape_cast %22 : vector<1x2x512xbf16> to vector<2x512xbf16>
    %c1_18 = arith.constant 1 : index
    %c0_19 = arith.constant 0 : index
    %c0_20 = arith.constant 0 : index
    %c0_21 = arith.constant 0 : index
    %24 = vector.load %arg3[%c1_18, %c0_19, %c0_20, %c0_21] : memref<2x2x512x256xbf16, #tpu.memory_space<vmem>>, vector<1x1x512x256xbf16>
    %25 = vector.shape_cast %24 : vector<1x1x512x256xbf16> to vector<512x256xbf16>
    %cst_22 = arith.constant dense<0.000000e+00> : vector<2x256xf32>
    %26 = tpu.matmul %23, %25, %cst_22 {dimension_numbers = #tpu.dot_dimension_numbers<[1], [0], [0], [1], [0, 0, 1, 1], [], []>} : vector<2x512xbf16>, vector<512x256xbf16>, vector<2x256xf32> -> vector<2x256xf32>
    %27 = arith.addf %18, %26 : vector<2x256xf32>
    %c1_i32_23 = arith.constant 1 : i32
    %28 = arith.addi %arg1, %c1_i32_23 : i32
    %c0_24 = arith.constant 0 : index
    %29 = arith.index_cast %28 : i32 to index
    %c1_25 = arith.constant 1 : index
    %c0_26 = arith.constant 0 : index
    %30 = vector.load %arg2[%c0_24, %29, %c1_25, %c0_26] : memref<1x3x3x512xbf16, #tpu.memory_space<vmem>>, vector<1x1x2x512xbf16>
    %31 = vector.shape_cast %30 : vector<1x1x2x512xbf16> to vector<1x2x512xbf16>
    %32 = vector.shape_cast %31 : vector<1x2x512xbf16> to vector<2x512xbf16>
    %c1_27 = arith.constant 1 : index
    %c1_28 = arith.constant 1 : index
    %c0_29 = arith.constant 0 : index
    %c0_30 = arith.constant 0 : index
    %33 = vector.load %arg3[%c1_27, %c1_28, %c0_29, %c0_30] : memref<2x2x512x256xbf16, #tpu.memory_space<vmem>>, vector<1x1x512x256xbf16>
    %34 = vector.shape_cast %33 : vector<1x1x512x256xbf16> to vector<512x256xbf16>
    %cst_31 = arith.constant dense<0.000000e+00> : vector<2x256xf32>
    %35 = tpu.matmul %32, %34, %cst_31 {dimension_numbers = #tpu.dot_dimension_numbers<[1], [0], [0], [1], [0, 0, 1, 1], [], []>} : vector<2x512xbf16>, vector<512x256xbf16>, vector<2x256xf32> -> vector<2x256xf32>
    %36 = arith.addf %27, %35 : vector<2x256xf32>
    %37 = vector.shape_cast %36 : vector<2x256xf32> to vector<1x1x2x256xf32>
    %c0_32 = arith.constant 0 : index
    %c0_33 = arith.constant 0 : index
    %c0_34 = arith.constant 0 : index
    %c0_35 = arith.constant 0 : index
    %38 = vector.load %arg4[%c0_32, %c0_33, %c0_34, %c0_35] : memref<1x1x2x256xf32, #tpu.memory_space<vmem>>, vector<1x1x2x256xf32>
    tpu.vector_store %arg4[%c0_32, %c0_33, %c0_34, %c0_35], %37 {strides = array<i32>} : memref<1x1x2x256xf32, #tpu.memory_space<vmem>>, vector<1x1x2x256xf32>,
    %cst_36 = arith.constant dense<0.000000e+00> : vector<256xf32>
    %39 = vector.multi_reduction <add>, %36, %cst_36 [0] : vector<2x256xf32> to vector<256xf32>
    %40 = vector.shape_cast %39 : vector<256xf32> to vector<1x256xf32>
    %41 = arith.mulf %36, %36 : vector<2x256xf32>
    %cst_37 = arith.constant dense<0.000000e+00> : vector<256xf32>
    %42 = vector.multi_reduction <add>, %41, %cst_37 [0] : vector<2x256xf32> to vector<256xf32>
    %43 = vector.shape_cast %42 : vector<256xf32> to vector<1x256xf32>
    %44 = tpu.concatenate %40, %43 in 0 : vector<1x256xf32>, vector<1x256xf32> -> vector<2x256xf32>
    %45 = vector.shape_cast %44 : vector<2x256xf32> to vector<1x1x2x256xf32>
    %c0_38 = arith.constant 0 : index
    %c0_39 = arith.constant 0 : index
    %c0_40 = arith.constant 0 : index
    %c0_41 = arith.constant 0 : index
    %46 = vector.load %arg5[%c0_38, %c0_39, %c0_40, %c0_41] : memref<1x1x2x256xf32, #tpu.memory_space<vmem>>, vector<1x1x2x256xf32>
    tpu.vector_store %arg5[%c0_38, %c0_39, %c0_40, %c0_41], %45 {strides = array<i32>} : memref<1x1x2x256xf32, #tpu.memory_space<vmem>>, vector<1x1x2x256xf32>,
    return
  }
  func.func @transform_0(%arg0: i32, %arg1: i32) -> (i32, i32, i32, i32) {
    %c0_i32 = arith.constant 0 : i32
    %c0_i32_0 = arith.constant 0 : i32
    %c0_i32_1 = arith.constant 0 : i32
    %c0_i32_2 = arith.constant 0 : i32
    return %arg0, %c0_i32, %c0_i32_0, %c0_i32_1 : i32, i32, i32, i32
  }
  func.func @transform_1(%arg0: i32, %arg1: i32) -> (i32, i32, i32, i32) {
    %c0_i32 = arith.constant 0 : i32
    %c0_i32_0 = arith.constant 0 : i32
    %c0_i32_1 = arith.constant 0 : i32
    %c0_i32_2 = arith.constant 0 : i32
    %c0_i32_3 = arith.constant 0 : i32
    return %c0_i32, %c0_i32_0, %c0_i32_1, %c0_i32_2 : i32, i32, i32, i32
  }
  func.func @transform_2(%arg0: i32, %arg1: i32) -> (i32, i32, i32, i32) {
    %c0_i32 = arith.constant 0 : i32
    %c0_i32_0 = arith.constant 0 : i32
    %c0_i32_1 = arith.constant 0 : i32
    return %arg0, %arg1, %c0_i32, %c0_i32_0 : i32, i32, i32, i32
  }
  func.func @transform_3(%arg0: i32, %arg1: i32) -> (i32, i32, i32, i32) {
    %c0_i32 = arith.constant 0 : i32
    %c0_i32_0 = arith.constant 0 : i32
    %c0_i32_1 = arith.constant 0 : i32
    return %arg0, %arg1, %c0_i32, %c0_i32_0 : i32, i32, i32, i32
  }
}

module attributes {stable_mosaic.version = 11 : i64} {
  func.func @_bn_act_kernel(%arg0: i32, %arg1: memref<8x256xf32, #tpu.memory_space<vmem>>, %arg2: memref<1x256xf32, #tpu.memory_space<vmem>>, %arg3: memref<1x256xf32, #tpu.memory_space<vmem>>, %arg4: memref<8x256xbf16, #tpu.memory_space<vmem>>) attributes {dimension_semantics = [#tpu.dimension_semantics<parallel>], iteration_bounds = array<i64: 1>, scalar_prefetch = 0 : i64, scratch_operands = 0 : i64, tpu.core_type = #tpu.core_type<tc>, window_params = [{transform_indices = @transform_0, window_bounds = array<i64: 8, 256>}, {pipeline_mode = #tpu.pipeline_mode<synchronous>, transform_indices = @transform_1, window_bounds = array<i64: 1, 256>}, {pipeline_mode = #tpu.pipeline_mode<synchronous>, transform_indices = @transform_2, window_bounds = array<i64: 1, 256>}, {transform_indices = @transform_3, window_bounds = array<i64: 8, 256>}]} {
    %c0 = arith.constant 0 : index
    %c0_0 = arith.constant 0 : index
    %0 = vector.load %arg1[%c0, %c0_0] : memref<8x256xf32, #tpu.memory_space<vmem>>, vector<8x256xf32>
    %c0_1 = arith.constant 0 : index
    %c0_2 = arith.constant 0 : index
    %1 = vector.load %arg2[%c0_1, %c0_2] : memref<1x256xf32, #tpu.memory_space<vmem>>, vector<1x256xf32>
    %2 = vector.broadcast %1 : vector<1x256xf32> to vector<8x256xf32>
    %3 = arith.mulf %0, %2 : vector<8x256xf32>
    %c0_3 = arith.constant 0 : index
    %c0_4 = arith.constant 0 : index
    %4 = vector.load %arg3[%c0_3, %c0_4] : memref<1x256xf32, #tpu.memory_space<vmem>>, vector<1x256xf32>
    %5 = vector.broadcast %4 : vector<1x256xf32> to vector<8x256xf32>
    %6 = arith.addf %3, %5 : vector<8x256xf32>
    %cst = arith.constant 0.000000e+00 : f32
    %7 = vector.broadcast %cst : f32 to vector<8x256xf32>
    %8 = arith.maximumf %6, %7 : vector<8x256xf32>
    %9 = arith.truncf %8 : vector<8x256xf32> to vector<8x256xbf16>
    %c0_5 = arith.constant 0 : index
    %c0_6 = arith.constant 0 : index
    %10 = vector.load %arg4[%c0_5, %c0_6] : memref<8x256xbf16, #tpu.memory_space<vmem>>, vector<8x256xbf16>
    tpu.vector_store %arg4[%c0_5, %c0_6], %9 {strides = array<i32>} : memref<8x256xbf16, #tpu.memory_space<vmem>>, vector<8x256xbf16>,
    return
  }
  func.func @transform_0(%arg0: i32) -> (i32, i32) {
    %c0_i32 = arith.constant 0 : i32
    %c0_i32_0 = arith.constant 0 : i32
    return %arg0, %c0_i32 : i32, i32
  }
  func.func @transform_1(%arg0: i32) -> (i32, i32) {
    %c0_i32 = arith.constant 0 : i32
    %c0_i32_0 = arith.constant 0 : i32
    %c0_i32_1 = arith.constant 0 : i32
    return %c0_i32, %c0_i32_0 : i32, i32
  }
  func.func @transform_2(%arg0: i32) -> (i32, i32) {
    %c0_i32 = arith.constant 0 : i32
    %c0_i32_0 = arith.constant 0 : i32
    %c0_i32_1 = arith.constant 0 : i32
    return %c0_i32, %c0_i32_0 : i32, i32
  }
  func.func @transform_3(%arg0: i32) -> (i32, i32) {
    %c0_i32 = arith.constant 0 : i32
    %c0_i32_0 = arith.constant 0 : i32
    return %arg0, %c0_i32 : i32, i32
  }
}

module attributes {stable_mosaic.version = 11 : i64} {
  func.func @_conv_stats_kernel(%arg0: i32, %arg1: i32, %arg2: memref<1x4x4x256xbf16, #tpu.memory_space<vmem>>, %arg3: memref<3x3x256x256xbf16, #tpu.memory_space<vmem>>, %arg4: memref<1x1x2x256xf32, #tpu.memory_space<vmem>>, %arg5: memref<1x1x2x256xf32, #tpu.memory_space<vmem>>) attributes {dimension_semantics = [#tpu.dimension_semantics<parallel>, #tpu.dimension_semantics<parallel>], iteration_bounds = array<i64: 2, 2>, scalar_prefetch = 0 : i64, scratch_operands = 0 : i64, tpu.core_type = #tpu.core_type<tc>, window_params = [{transform_indices = @transform_0, window_bounds = array<i64: 1, 4, 4, 256>}, {pipeline_mode = #tpu.pipeline_mode<synchronous>, transform_indices = @transform_1, window_bounds = array<i64: 3, 3, 256, 256>}, {transform_indices = @transform_2, window_bounds = array<i64: 1, 1, 2, 256>}, {transform_indices = @transform_3, window_bounds = array<i64: 1, 1, 2, 256>}]} {
    %cst = arith.constant 0.000000e+00 : f32
    %0 = vector.broadcast %cst : f32 to vector<2x256xf32>
    %c0_i32 = arith.constant 0 : i32
    %1 = arith.addi %arg1, %c0_i32 : i32
    %c0 = arith.constant 0 : index
    %2 = arith.index_cast %1 : i32 to index
    %c0_0 = arith.constant 0 : index
    %c0_1 = arith.constant 0 : index
    %3 = vector.load %arg2[%c0, %2, %c0_0, %c0_1] : memref<1x4x4x256xbf16, #tpu.memory_space<vmem>>, vector<1x1x2x256xbf16>
    %4 = vector.shape_cast %3 : vector<1x1x2x256xbf16> to vector<1x2x256xbf16>
    %5 = vector.shape_cast %4 : vector<1x2x256xbf16> to vector<2x256xbf16>
    %c0_2 = arith.constant 0 : index
    %c0_3 = arith.constant 0 : index
    %c0_4 = arith.constant 0 : index
    %c0_5 = arith.constant 0 : index
    %6 = vector.load %arg3[%c0_2, %c0_3, %c0_4, %c0_5] : memref<3x3x256x256xbf16, #tpu.memory_space<vmem>>, vector<1x1x256x256xbf16>
    %7 = vector.shape_cast %6 : vector<1x1x256x256xbf16> to vector<256x256xbf16>
    %cst_6 = arith.constant dense<0.000000e+00> : vector<2x256xf32>
    %8 = tpu.matmul %5, %7, %cst_6 {dimension_numbers = #tpu.dot_dimension_numbers<[1], [0], [0], [1], [0, 0, 1, 1], [], []>} : vector<2x256xbf16>, vector<256x256xbf16>, vector<2x256xf32> -> vector<2x256xf32>
    %9 = arith.addf %0, %8 : vector<2x256xf32>
    %c0_i32_7 = arith.constant 0 : i32
    %10 = arith.addi %arg1, %c0_i32_7 : i32
    %c0_8 = arith.constant 0 : index
    %11 = arith.index_cast %10 : i32 to index
    %c1 = arith.constant 1 : index
    %c0_9 = arith.constant 0 : index
    %12 = vector.load %arg2[%c0_8, %11, %c1, %c0_9] : memref<1x4x4x256xbf16, #tpu.memory_space<vmem>>, vector<1x1x2x256xbf16>
    %13 = vector.shape_cast %12 : vector<1x1x2x256xbf16> to vector<1x2x256xbf16>
    %14 = vector.shape_cast %13 : vector<1x2x256xbf16> to vector<2x256xbf16>
    %c0_10 = arith.constant 0 : index
    %c1_11 = arith.constant 1 : index
    %c0_12 = arith.constant 0 : index
    %c0_13 = arith.constant 0 : index
    %15 = vector.load %arg3[%c0_10, %c1_11, %c0_12, %c0_13] : memref<3x3x256x256xbf16, #tpu.memory_space<vmem>>, vector<1x1x256x256xbf16>
    %16 = vector.shape_cast %15 : vector<1x1x256x256xbf16> to vector<256x256xbf16>
    %cst_14 = arith.constant dense<0.000000e+00> : vector<2x256xf32>
    %17 = tpu.matmul %14, %16, %cst_14 {dimension_numbers = #tpu.dot_dimension_numbers<[1], [0], [0], [1], [0, 0, 1, 1], [], []>} : vector<2x256xbf16>, vector<256x256xbf16>, vector<2x256xf32> -> vector<2x256xf32>
    %18 = arith.addf %9, %17 : vector<2x256xf32>
    %c0_i32_15 = arith.constant 0 : i32
    %19 = arith.addi %arg1, %c0_i32_15 : i32
    %c0_16 = arith.constant 0 : index
    %20 = arith.index_cast %19 : i32 to index
    %c2 = arith.constant 2 : index
    %c0_17 = arith.constant 0 : index
    %21 = vector.load %arg2[%c0_16, %20, %c2, %c0_17] : memref<1x4x4x256xbf16, #tpu.memory_space<vmem>>, vector<1x1x2x256xbf16>
    %22 = vector.shape_cast %21 : vector<1x1x2x256xbf16> to vector<1x2x256xbf16>
    %23 = vector.shape_cast %22 : vector<1x2x256xbf16> to vector<2x256xbf16>
    %c0_18 = arith.constant 0 : index
    %c2_19 = arith.constant 2 : index
    %c0_20 = arith.constant 0 : index
    %c0_21 = arith.constant 0 : index
    %24 = vector.load %arg3[%c0_18, %c2_19, %c0_20, %c0_21] : memref<3x3x256x256xbf16, #tpu.memory_space<vmem>>, vector<1x1x256x256xbf16>
    %25 = vector.shape_cast %24 : vector<1x1x256x256xbf16> to vector<256x256xbf16>
    %cst_22 = arith.constant dense<0.000000e+00> : vector<2x256xf32>
    %26 = tpu.matmul %23, %25, %cst_22 {dimension_numbers = #tpu.dot_dimension_numbers<[1], [0], [0], [1], [0, 0, 1, 1], [], []>} : vector<2x256xbf16>, vector<256x256xbf16>, vector<2x256xf32> -> vector<2x256xf32>
    %27 = arith.addf %18, %26 : vector<2x256xf32>
    %c1_i32 = arith.constant 1 : i32
    %28 = arith.addi %arg1, %c1_i32 : i32
    %c0_23 = arith.constant 0 : index
    %29 = arith.index_cast %28 : i32 to index
    %c0_24 = arith.constant 0 : index
    %c0_25 = arith.constant 0 : index
    %30 = vector.load %arg2[%c0_23, %29, %c0_24, %c0_25] : memref<1x4x4x256xbf16, #tpu.memory_space<vmem>>, vector<1x1x2x256xbf16>
    %31 = vector.shape_cast %30 : vector<1x1x2x256xbf16> to vector<1x2x256xbf16>
    %32 = vector.shape_cast %31 : vector<1x2x256xbf16> to vector<2x256xbf16>
    %c1_26 = arith.constant 1 : index
    %c0_27 = arith.constant 0 : index
    %c0_28 = arith.constant 0 : index
    %c0_29 = arith.constant 0 : index
    %33 = vector.load %arg3[%c1_26, %c0_27, %c0_28, %c0_29] : memref<3x3x256x256xbf16, #tpu.memory_space<vmem>>, vector<1x1x256x256xbf16>
    %34 = vector.shape_cast %33 : vector<1x1x256x256xbf16> to vector<256x256xbf16>
    %cst_30 = arith.constant dense<0.000000e+00> : vector<2x256xf32>
    %35 = tpu.matmul %32, %34, %cst_30 {dimension_numbers = #tpu.dot_dimension_numbers<[1], [0], [0], [1], [0, 0, 1, 1], [], []>} : vector<2x256xbf16>, vector<256x256xbf16>, vector<2x256xf32> -> vector<2x256xf32>
    %36 = arith.addf %27, %35 : vector<2x256xf32>
    %c1_i32_31 = arith.constant 1 : i32
    %37 = arith.addi %arg1, %c1_i32_31 : i32
    %c0_32 = arith.constant 0 : index
    %38 = arith.index_cast %37 : i32 to index
    %c1_33 = arith.constant 1 : index
    %c0_34 = arith.constant 0 : index
    %39 = vector.load %arg2[%c0_32, %38, %c1_33, %c0_34] : memref<1x4x4x256xbf16, #tpu.memory_space<vmem>>, vector<1x1x2x256xbf16>
    %40 = vector.shape_cast %39 : vector<1x1x2x256xbf16> to vector<1x2x256xbf16>
    %41 = vector.shape_cast %40 : vector<1x2x256xbf16> to vector<2x256xbf16>
    %c1_35 = arith.constant 1 : index
    %c1_36 = arith.constant 1 : index
    %c0_37 = arith.constant 0 : index
    %c0_38 = arith.constant 0 : index
    %42 = vector.load %arg3[%c1_35, %c1_36, %c0_37, %c0_38] : memref<3x3x256x256xbf16, #tpu.memory_space<vmem>>, vector<1x1x256x256xbf16>
    %43 = vector.shape_cast %42 : vector<1x1x256x256xbf16> to vector<256x256xbf16>
    %cst_39 = arith.constant dense<0.000000e+00> : vector<2x256xf32>
    %44 = tpu.matmul %41, %43, %cst_39 {dimension_numbers = #tpu.dot_dimension_numbers<[1], [0], [0], [1], [0, 0, 1, 1], [], []>} : vector<2x256xbf16>, vector<256x256xbf16>, vector<2x256xf32> -> vector<2x256xf32>
    %45 = arith.addf %36, %44 : vector<2x256xf32>
    %c1_i32_40 = arith.constant 1 : i32
    %46 = arith.addi %arg1, %c1_i32_40 : i32
    %c0_41 = arith.constant 0 : index
    %47 = arith.index_cast %46 : i32 to index
    %c2_42 = arith.constant 2 : index
    %c0_43 = arith.constant 0 : index
    %48 = vector.load %arg2[%c0_41, %47, %c2_42, %c0_43] : memref<1x4x4x256xbf16, #tpu.memory_space<vmem>>, vector<1x1x2x256xbf16>
    %49 = vector.shape_cast %48 : vector<1x1x2x256xbf16> to vector<1x2x256xbf16>
    %50 = vector.shape_cast %49 : vector<1x2x256xbf16> to vector<2x256xbf16>
    %c1_44 = arith.constant 1 : index
    %c2_45 = arith.constant 2 : index
    %c0_46 = arith.constant 0 : index
    %c0_47 = arith.constant 0 : index
    %51 = vector.load %arg3[%c1_44, %c2_45, %c0_46, %c0_47] : memref<3x3x256x256xbf16, #tpu.memory_space<vmem>>, vector<1x1x256x256xbf16>
    %52 = vector.shape_cast %51 : vector<1x1x256x256xbf16> to vector<256x256xbf16>
    %cst_48 = arith.constant dense<0.000000e+00> : vector<2x256xf32>
    %53 = tpu.matmul %50, %52, %cst_48 {dimension_numbers = #tpu.dot_dimension_numbers<[1], [0], [0], [1], [0, 0, 1, 1], [], []>} : vector<2x256xbf16>, vector<256x256xbf16>, vector<2x256xf32> -> vector<2x256xf32>
    %54 = arith.addf %45, %53 : vector<2x256xf32>
    %c2_i32 = arith.constant 2 : i32
    %55 = arith.addi %arg1, %c2_i32 : i32
    %c0_49 = arith.constant 0 : index
    %56 = arith.index_cast %55 : i32 to index
    %c0_50 = arith.constant 0 : index
    %c0_51 = arith.constant 0 : index
    %57 = vector.load %arg2[%c0_49, %56, %c0_50, %c0_51] : memref<1x4x4x256xbf16, #tpu.memory_space<vmem>>, vector<1x1x2x256xbf16>
    %58 = vector.shape_cast %57 : vector<1x1x2x256xbf16> to vector<1x2x256xbf16>
    %59 = vector.shape_cast %58 : vector<1x2x256xbf16> to vector<2x256xbf16>
    %c2_52 = arith.constant 2 : index
    %c0_53 = arith.constant 0 : index
    %c0_54 = arith.constant 0 : index
    %c0_55 = arith.constant 0 : index
    %60 = vector.load %arg3[%c2_52, %c0_53, %c0_54, %c0_55] : memref<3x3x256x256xbf16, #tpu.memory_space<vmem>>, vector<1x1x256x256xbf16>
    %61 = vector.shape_cast %60 : vector<1x1x256x256xbf16> to vector<256x256xbf16>
    %cst_56 = arith.constant dense<0.000000e+00> : vector<2x256xf32>
    %62 = tpu.matmul %59, %61, %cst_56 {dimension_numbers = #tpu.dot_dimension_numbers<[1], [0], [0], [1], [0, 0, 1, 1], [], []>} : vector<2x256xbf16>, vector<256x256xbf16>, vector<2x256xf32> -> vector<2x256xf32>
    %63 = arith.addf %54, %62 : vector<2x256xf32>
    %c2_i32_57 = arith.constant 2 : i32
    %64 = arith.addi %arg1, %c2_i32_57 : i32
    %c0_58 = arith.constant 0 : index
    %65 = arith.index_cast %64 : i32 to index
    %c1_59 = arith.constant 1 : index
    %c0_60 = arith.constant 0 : index
    %66 = vector.load %arg2[%c0_58, %65, %c1_59, %c0_60] : memref<1x4x4x256xbf16, #tpu.memory_space<vmem>>, vector<1x1x2x256xbf16>
    %67 = vector.shape_cast %66 : vector<1x1x2x256xbf16> to vector<1x2x256xbf16>
    %68 = vector.shape_cast %67 : vector<1x2x256xbf16> to vector<2x256xbf16>
    %c2_61 = arith.constant 2 : index
    %c1_62 = arith.constant 1 : index
    %c0_63 = arith.constant 0 : index
    %c0_64 = arith.constant 0 : index
    %69 = vector.load %arg3[%c2_61, %c1_62, %c0_63, %c0_64] : memref<3x3x256x256xbf16, #tpu.memory_space<vmem>>, vector<1x1x256x256xbf16>
    %70 = vector.shape_cast %69 : vector<1x1x256x256xbf16> to vector<256x256xbf16>
    %cst_65 = arith.constant dense<0.000000e+00> : vector<2x256xf32>
    %71 = tpu.matmul %68, %70, %cst_65 {dimension_numbers = #tpu.dot_dimension_numbers<[1], [0], [0], [1], [0, 0, 1, 1], [], []>} : vector<2x256xbf16>, vector<256x256xbf16>, vector<2x256xf32> -> vector<2x256xf32>
    %72 = arith.addf %63, %71 : vector<2x256xf32>
    %c2_i32_66 = arith.constant 2 : i32
    %73 = arith.addi %arg1, %c2_i32_66 : i32
    %c0_67 = arith.constant 0 : index
    %74 = arith.index_cast %73 : i32 to index
    %c2_68 = arith.constant 2 : index
    %c0_69 = arith.constant 0 : index
    %75 = vector.load %arg2[%c0_67, %74, %c2_68, %c0_69] : memref<1x4x4x256xbf16, #tpu.memory_space<vmem>>, vector<1x1x2x256xbf16>
    %76 = vector.shape_cast %75 : vector<1x1x2x256xbf16> to vector<1x2x256xbf16>
    %77 = vector.shape_cast %76 : vector<1x2x256xbf16> to vector<2x256xbf16>
    %c2_70 = arith.constant 2 : index
    %c2_71 = arith.constant 2 : index
    %c0_72 = arith.constant 0 : index
    %c0_73 = arith.constant 0 : index
    %78 = vector.load %arg3[%c2_70, %c2_71, %c0_72, %c0_73] : memref<3x3x256x256xbf16, #tpu.memory_space<vmem>>, vector<1x1x256x256xbf16>
    %79 = vector.shape_cast %78 : vector<1x1x256x256xbf16> to vector<256x256xbf16>
    %cst_74 = arith.constant dense<0.000000e+00> : vector<2x256xf32>
    %80 = tpu.matmul %77, %79, %cst_74 {dimension_numbers = #tpu.dot_dimension_numbers<[1], [0], [0], [1], [0, 0, 1, 1], [], []>} : vector<2x256xbf16>, vector<256x256xbf16>, vector<2x256xf32> -> vector<2x256xf32>
    %81 = arith.addf %72, %80 : vector<2x256xf32>
    %82 = vector.shape_cast %81 : vector<2x256xf32> to vector<1x1x2x256xf32>
    %c0_75 = arith.constant 0 : index
    %c0_76 = arith.constant 0 : index
    %c0_77 = arith.constant 0 : index
    %c0_78 = arith.constant 0 : index
    %83 = vector.load %arg4[%c0_75, %c0_76, %c0_77, %c0_78] : memref<1x1x2x256xf32, #tpu.memory_space<vmem>>, vector<1x1x2x256xf32>
    tpu.vector_store %arg4[%c0_75, %c0_76, %c0_77, %c0_78], %82 {strides = array<i32>} : memref<1x1x2x256xf32, #tpu.memory_space<vmem>>, vector<1x1x2x256xf32>,
    %cst_79 = arith.constant dense<0.000000e+00> : vector<256xf32>
    %84 = vector.multi_reduction <add>, %81, %cst_79 [0] : vector<2x256xf32> to vector<256xf32>
    %85 = vector.shape_cast %84 : vector<256xf32> to vector<1x256xf32>
    %86 = arith.mulf %81, %81 : vector<2x256xf32>
    %cst_80 = arith.constant dense<0.000000e+00> : vector<256xf32>
    %87 = vector.multi_reduction <add>, %86, %cst_80 [0] : vector<2x256xf32> to vector<256xf32>
    %88 = vector.shape_cast %87 : vector<256xf32> to vector<1x256xf32>
    %89 = tpu.concatenate %85, %88 in 0 : vector<1x256xf32>, vector<1x256xf32> -> vector<2x256xf32>
    %90 = vector.shape_cast %89 : vector<2x256xf32> to vector<1x1x2x256xf32>
    %c0_81 = arith.constant 0 : index
    %c0_82 = arith.constant 0 : index
    %c0_83 = arith.constant 0 : index
    %c0_84 = arith.constant 0 : index
    %91 = vector.load %arg5[%c0_81, %c0_82, %c0_83, %c0_84] : memref<1x1x2x256xf32, #tpu.memory_space<vmem>>, vector<1x1x2x256xf32>
    tpu.vector_store %arg5[%c0_81, %c0_82, %c0_83, %c0_84], %90 {strides = array<i32>} : memref<1x1x2x256xf32, #tpu.memory_space<vmem>>, vector<1x1x2x256xf32>,
    return
  }
  func.func @transform_0(%arg0: i32, %arg1: i32) -> (i32, i32, i32, i32) {
    %c0_i32 = arith.constant 0 : i32
    %c0_i32_0 = arith.constant 0 : i32
    %c0_i32_1 = arith.constant 0 : i32
    %c0_i32_2 = arith.constant 0 : i32
    return %arg0, %c0_i32, %c0_i32_0, %c0_i32_1 : i32, i32, i32, i32
  }
  func.func @transform_1(%arg0: i32, %arg1: i32) -> (i32, i32, i32, i32) {
    %c0_i32 = arith.constant 0 : i32
    %c0_i32_0 = arith.constant 0 : i32
    %c0_i32_1 = arith.constant 0 : i32
    %c0_i32_2 = arith.constant 0 : i32
    %c0_i32_3 = arith.constant 0 : i32
    return %c0_i32, %c0_i32_0, %c0_i32_1, %c0_i32_2 : i32, i32, i32, i32
  }
  func.func @transform_2(%arg0: i32, %arg1: i32) -> (i32, i32, i32, i32) {
    %c0_i32 = arith.constant 0 : i32
    %c0_i32_0 = arith.constant 0 : i32
    %c0_i32_1 = arith.constant 0 : i32
    return %arg0, %arg1, %c0_i32, %c0_i32_0 : i32, i32, i32, i32
  }
  func.func @transform_3(%arg0: i32, %arg1: i32) -> (i32, i32, i32, i32) {
    %c0_i32 = arith.constant 0 : i32
    %c0_i32_0 = arith.constant 0 : i32
    %c0_i32_1 = arith.constant 0 : i32
    return %arg0, %arg1, %c0_i32, %c0_i32_0 : i32, i32, i32, i32
  }
}

module attributes {stable_mosaic.version = 11 : i64} {
  func.func @_bn_act_kernel(%arg0: i32, %arg1: memref<8x256xf32, #tpu.memory_space<vmem>>, %arg2: memref<1x256xf32, #tpu.memory_space<vmem>>, %arg3: memref<1x256xf32, #tpu.memory_space<vmem>>, %arg4: memref<8x256xbf16, #tpu.memory_space<vmem>>, %arg5: memref<8x256xbf16, #tpu.memory_space<vmem>>) attributes {dimension_semantics = [#tpu.dimension_semantics<parallel>], iteration_bounds = array<i64: 1>, scalar_prefetch = 0 : i64, scratch_operands = 0 : i64, tpu.core_type = #tpu.core_type<tc>, window_params = [{transform_indices = @transform_0, window_bounds = array<i64: 8, 256>}, {pipeline_mode = #tpu.pipeline_mode<synchronous>, transform_indices = @transform_1, window_bounds = array<i64: 1, 256>}, {pipeline_mode = #tpu.pipeline_mode<synchronous>, transform_indices = @transform_2, window_bounds = array<i64: 1, 256>}, {transform_indices = @transform_3, window_bounds = array<i64: 8, 256>}, {transform_indices = @transform_4, window_bounds = array<i64: 8, 256>}]} {
    %c0 = arith.constant 0 : index
    %c0_0 = arith.constant 0 : index
    %0 = vector.load %arg1[%c0, %c0_0] : memref<8x256xf32, #tpu.memory_space<vmem>>, vector<8x256xf32>
    %c0_1 = arith.constant 0 : index
    %c0_2 = arith.constant 0 : index
    %1 = vector.load %arg2[%c0_1, %c0_2] : memref<1x256xf32, #tpu.memory_space<vmem>>, vector<1x256xf32>
    %2 = vector.broadcast %1 : vector<1x256xf32> to vector<8x256xf32>
    %3 = arith.mulf %0, %2 : vector<8x256xf32>
    %c0_3 = arith.constant 0 : index
    %c0_4 = arith.constant 0 : index
    %4 = vector.load %arg3[%c0_3, %c0_4] : memref<1x256xf32, #tpu.memory_space<vmem>>, vector<1x256xf32>
    %5 = vector.broadcast %4 : vector<1x256xf32> to vector<8x256xf32>
    %6 = arith.addf %3, %5 : vector<8x256xf32>
    %c0_5 = arith.constant 0 : index
    %c0_6 = arith.constant 0 : index
    %7 = vector.load %arg4[%c0_5, %c0_6] : memref<8x256xbf16, #tpu.memory_space<vmem>>, vector<8x256xbf16>
    %8 = arith.extf %7 : vector<8x256xbf16> to vector<8x256xf32>
    %9 = arith.addf %6, %8 : vector<8x256xf32>
    %cst = arith.constant 0.000000e+00 : f32
    %10 = vector.broadcast %cst : f32 to vector<8x256xf32>
    %11 = arith.maximumf %9, %10 : vector<8x256xf32>
    %12 = arith.truncf %11 : vector<8x256xf32> to vector<8x256xbf16>
    %c0_7 = arith.constant 0 : index
    %c0_8 = arith.constant 0 : index
    %13 = vector.load %arg5[%c0_7, %c0_8] : memref<8x256xbf16, #tpu.memory_space<vmem>>, vector<8x256xbf16>
    tpu.vector_store %arg5[%c0_7, %c0_8], %12 {strides = array<i32>} : memref<8x256xbf16, #tpu.memory_space<vmem>>, vector<8x256xbf16>,
    return
  }
  func.func @transform_0(%arg0: i32) -> (i32, i32) {
    %c0_i32 = arith.constant 0 : i32
    %c0_i32_0 = arith.constant 0 : i32
    return %arg0, %c0_i32 : i32, i32
  }
  func.func @transform_1(%arg0: i32) -> (i32, i32) {
    %c0_i32 = arith.constant 0 : i32
    %c0_i32_0 = arith.constant 0 : i32
    %c0_i32_1 = arith.constant 0 : i32
    return %c0_i32, %c0_i32_0 : i32, i32
  }
  func.func @transform_2(%arg0: i32) -> (i32, i32) {
    %c0_i32 = arith.constant 0 : i32
    %c0_i32_0 = arith.constant 0 : i32
    %c0_i32_1 = arith.constant 0 : i32
    return %c0_i32, %c0_i32_0 : i32, i32
  }
  func.func @transform_3(%arg0: i32) -> (i32, i32) {
    %c0_i32 = arith.constant 0 : i32
    %c0_i32_0 = arith.constant 0 : i32
    return %arg0, %c0_i32 : i32, i32
  }
  func.func @transform_4(%arg0: i32) -> (i32, i32) {
    %c0_i32 = arith.constant 0 : i32
    %c0_i32_0 = arith.constant 0 : i32
    return %arg0, %c0_i32 : i32, i32
  }
}

</mosaic_0001>

<bundles_post_ra>
// kernel: resnet18_features.32
= control target key start
LH: loop header
LB: loop body
LE: loop exit
PB: predicated region body
PF: predicated region fallthrough
CT: control target
= control target key end

     0   :  { %s553_s0 = inlined_call_operand.vmem [shape: f32[256,128], index: 0, kind: input, shape index: {}]   ;;  %s554_s1 = inlined_call_operand.vmem [shape: f32[1,128], index: 1, kind: input, shape index: {}]   ;;  %s555_s2 = inlined_call_operand.vmem [shape: f32[1,128], index: 2, kind: input, shape index: {}]   ;;  %s556_s3 = inlined_call_operand.vmem [shape: bf16[256,128], index: 3, kind: output, shape index: {}]  }
   0x1   :  { %v14_v0 = vld [vmem:[%s553_s0] sm:$0xff]  ;;  %v15_v1 = vld [vmem:[%s553_s0 + $0x8] sm:$0xff]  ;;  %v16_v4 = vld [vmem:[%s553_s0 + $0x10] sm:$0xff] }
   0x2   :  { %v344_v2 = vld [vmem:[%s554_s1] ss:$0 sm:$0xff]  ;;  %v17_v5 = vld [vmem:[%s553_s0 + $0x18] sm:$0xff]  ;;  %v19_v11 = vld [vmem:[%s553_s0 + $0x28] sm:$0xff] }
   0x3   :  { %v349_v3 = vld [vmem:[%s555_s2] ss:$0 sm:$0xff]  ;;  %v50_v7 = vmul.f32 %v344_v2, %v14_v0  ;;  %v51_v8 = vmul.f32 %v344_v2, %v15_v1  ;;  %v52_v9 = vmul.f32 %v344_v2, %v16_v4  ;;  %v53_v10 = vmul.f32 %v344_v2, %v17_v5  ;;  %v20_v12 = vld [vmem:[%s553_s0 + $0x30] sm:$0xff]  ;;  %v21_v13 = vld [vmem:[%s553_s0 + $0x38] sm:$0xff] }
   0x4   :  { %v18_v6 = vld [vmem:[%s553_s0 + $0x20] sm:$0xff]  ;;  %v55_v15 = vmul.f32 %v344_v2, %v19_v11  ;;  %v56_v16 = vmul.f32 %v344_v2, %v20_v12  ;;  %v57_v17 = vmul.f32 %v344_v2, %v21_v13  ;;  %v23_v27 = vld [vmem:[%s553_s0 + $0x48] sm:$0xff]  ;;  %v24_v32 = vld [vmem:[%s553_s0 + $0x50] sm:$0xff] }
   0x5   :  { %v54_v14 = vmul.f32 %v344_v2, %v18_v6  ;;  %v86_v18 = vadd.f32 %v349_v3, %v50_v7  ;;  %v87_v19 = vadd.f32 %v349_v3, %v51_v8  ;;  %v88_v20 = vadd.f32 %v349_v3, %v52_v9  ;;  %v22_v26 = vld [vmem:[%s553_s0 + $0x40] sm:$0xff]  ;;  %v25_v33 = vld [vmem:[%s553_s0 + $0x58] sm:$0xff]  ;;  %v27_v39 = vld [vmem:[%s553_s0 + $0x68] sm:$0xff] }
   0x6   :  { %v89_v21 = vadd.f32 %v349_v3, %v53_v10  ;;  %v91_v23 = vadd.f32 %v349_v3, %v55_v15  ;;  %v92_v24 = vadd.f32 %v349_v3, %v56_v16  ;;  %v93_v25 = vadd.f32 %v349_v3, %v57_v17  ;;  %v26_v38 = vld [vmem:[%s553_s0 + $0x60] sm:$0xff]  ;;  %v28_v44 = vld [vmem:[%s553_s0 + $0x70] sm:$0xff]  ;;  %v29_v45 = vld [vmem:[%s553_s0 + $0x78] sm:$0xff] }
   0x7   :  { %v90_v22 = vadd.f32 %v349_v3, %v54_v14  ;;  %v118_v28 = vmax.f32 %v86_v18, 0.0  ;;  %v119_v29 = vmax.f32 %v87_v19, 0.0  ;;  %v120_v30 = vmax.f32 %v88_v20, 0.0  ;;  %v30_v58 = vld [vmem:[%s553_s0 + $0x80] sm:$0xff]  ;;  %v31_v63 = vld [vmem:[%s553_s0 + $0x88] sm:$0xff]  ;;  %v32_v6 = vld [vmem:[%s553_s0 + $0x90] sm:$0xff] }
   0x8   :  { %v121_v31 = vmax.f32 %v89_v21, 0.0  ;;  %v123_v35 = vmax.f32 %v91_v23, 0.0  ;;  %v124_v36 = vmax.f32 %v92_v24, 0.0  ;;  %v125_v37 = vmax.f32 %v93_v25, 0.0  ;;  %v33_v7 = vld [vmem:[%s553_s0 + $0x98] sm:$0xff]  ;;  %v34_v12 = vld [vmem:[%s553_s0 + $0xa0] sm:$0xff] }
   0x9   :  { %v122_v34 = vmax.f32 %v90_v22, 0.0  ;;  %v221_v40 = vpack.c.bf16 %v119_v29, %v118_v28  ;;  %v58_v42 = vmul.f32 %v344_v2, %v22_v26  ;;  %v59_v43 = vmul.f32 %v344_v2, %v23_v27  ;;  %v35_v13 = vld [vmem:[%s553_s0 + $0xa8] sm:$0xff]  ;;  %v36_v18 = vld [vmem:[%s553_s0 + $0xb0] sm:$0xff]  ;;  %v37_v23 = vld [vmem:[%s553_s0 + $0xb8] sm:$0xff] }
   0xa   :  { %v226_v41 = vpack.c.bf16 %v121_v31, %v120_v30  ;;  %v236_v47 = vpack.c.bf16 %v125_v37, %v124_v36  ;;  %v60_v48 = vmul.f32 %v344_v2, %v24_v32  ;;  %v61_v49 = vmul.f32 %v344_v2, %v25_v33  ;;  %v38_v28 = vld [vmem:[%s553_s0 + $0xc0] sm:$0xff]  ;;  %v39_v37 = vld [vmem:[%s553_s0 + $0xc8] sm:$0xff] }
   0xb   :  { %v231_v46 = vpack.c.bf16 %v123_v35, %v122_v34  ;;  %222 = vst [vmem:[%s556_s3] sm:$0xff] %v221_v40   ;;  %v94_v50 = vadd.f32 %v349_v3, %v58_v42  ;;  %v95_v51 = vadd.f32 %v349_v3, %v59_v43  ;;  %v62_v52 = vmul.f32 %v344_v2, %v26_v38  ;;  %v40_v42 = vld [vmem:[%s553_s0 + $0xd0] sm:$0xff]  ;;  %v41_v43 = vld [vmem:[%s553_s0 + $0xd8] sm:$0xff] }
   0xc   :  { %v63_v53 = vmul.f32 %v344_v2, %v27_v39  ;;  %298 = vst [vmem:[%s556_s3 + $0x8] sm:$0xff] %v226_v41   ;;  %v96_v54 = vadd.f32 %v349_v3, %v60_v48  ;;  %v97_v55 = vadd.f32 %v349_v3, %v61_v49  ;;  %v64_v56 = vmul.f32 %v344_v2, %v28_v44  ;;  %v42_v48 = vld [vmem:[%s553_s0 + $0xe0] sm:$0xff]  ;;  %v43_v49 = vld [vmem:[%s553_s0 + $0xe8] sm:$0xff] }
   0xd   :  { %v65_v57 = vmul.f32 %v344_v2, %v29_v45  ;;  %299 = vst [vmem:[%s556_s3 + $0x10] sm:$0xff] %v231_v46   ;;  %v126_v59 = vmax.f32 %v94_v50, 0.0  ;;  %v127_v60 = vmax.f32 %v95_v51, 0.0  ;;  %v98_v61 = vadd.f32 %v349_v3, %v62_v52 }
   0xe   :  { %v99_v62 = vadd.f32 %v349_v3, %v63_v53  ;;  %300 = vst [vmem:[%s556_s3 + $0x18] sm:$0xff] %v236_v47   ;;  %v128_v0 = vmax.f32 %v96_v54, 0.0  ;;  %v129_v1 = vmax.f32 %v97_v55, 0.0  ;;  %v100_v4 = vadd.f32 %v349_v3, %v64_v56  ;;  %v44_v54 = vld [vmem:[%s553_s0 + $0xf0] sm:$0xff] }
   0xf   :  { %v101_v5 = vadd.f32 %v349_v3, %v65_v57  ;;  %v241_v8 = vpack.c.bf16 %v127_v60, %v126_v59  ;;  %v130_v9 = vmax.f32 %v98_v61, 0.0  ;;  %v66_v11 = vmul.f32 %v344_v2, %v30_v58  ;;  %v45_v59 = vld [vmem:[%s553_s0 + $0xf8] sm:$0xff] }
  0x10   :  { %v131_v10 = vmax.f32 %v99_v62, 0.0  ;;  %v246_v14 = vpack.c.bf16 %v129_v1, %v128_v0  ;;  %v132_v15 = vmax.f32 %v100_v4, 0.0  ;;  %v67_v17 = vmul.f32 %v344_v2, %v31_v63 }
  0x11   :  { %v133_v16 = vmax.f32 %v101_v5, 0.0  ;;  %301 = vst [vmem:[%s556_s3 + $0x20] sm:$0xff] %v241_v8   ;;  %v102_v20 = vadd.f32 %v349_v3, %v66_v11  ;;  %v68_v21 = vmul.f32 %v344_v2, %v32_v6  ;;  %v69_v22 = vmul.f32 %v344_v2, %v33_v7 }
  0x12   :  { %v251_v19 = vpack.c.bf16 %v131_v10, %v130_v9  ;;  %302 = vst [vmem:[%s556_s3 + $0x28] sm:$0xff] %v246_v14   ;;  %v103_v25 = vadd.f32 %v349_v3, %v67_v17  ;;  %v70_v26 = vmul.f32 %v344_v2, %v34_v12  ;;  %v71_v27 = vmul.f32 %v344_v2, %v35_v13 }
  0x13   :  { %v256_v24 = vpack.c.bf16 %v133_v16, %v132_v15  ;;  %v134_v29 = vmax.f32 %v102_v20, 0.0  ;;  %v104_v30 = vadd.f32 %v349_v3, %v68_v21  ;;  %v105_v31 = vadd.f32 %v349_v3, %v69_v22 }
  0x14   :  { %303 = vst [vmem:[%s556_s3 + $0x30] sm:$0xff] %v251_v19   ;;  %v72_v32 = vmul.f32 %v344_v2, %v36_v18  ;;  %v135_v33 = vmax.f32 %v103_v25, 0.0  ;;  %v106_v34 = vadd.f32 %v349_v3, %v70_v26  ;;  %v107_v35 = vadd.f32 %v349_v3, %v71_v27 }
  0x15   :  { %304 = vst [vmem:[%s556_s3 + $0x38] sm:$0xff] %v256_v24   ;;  %v73_v36 = vmul.f32 %v344_v2, %v37_v23  ;;  %v136_v38 = vmax.f32 %v104_v30, 0.0  ;;  %v137_v39 = vmax.f32 %v105_v31, 0.0  ;;  %v74_v41 = vmul.f32 %v344_v2, %v38_v28 }
  0x16   :  { %v108_v40 = vadd.f32 %v349_v3, %v72_v32  ;;  %v261_v44 = vpack.c.bf16 %v135_v33, %v134_v29  ;;  %v138_v45 = vmax.f32 %v106_v34, 0.0  ;;  %v139_v46 = vmax.f32 %v107_v35, 0.0 }
  0x17   :  { %v109_v47 = vadd.f32 %v349_v3, %v73_v36  ;;  %v266_v50 = vpack.c.bf16 %v137_v39, %v136_v38  ;;  %v75_v52 = vmul.f32 %v344_v2, %v39_v37  ;;  %v110_v53 = vadd.f32 %v349_v3, %v74_v41 }
  0x18   :  { %v140_v51 = vmax.f32 %v108_v40, 0.0  ;;  %305 = vst [vmem:[%s556_s3 + $0x40] sm:$0xff] %v261_v44   ;;  %v271_v55 = vpack.c.bf16 %v139_v46, %v138_v45  ;;  %v76_v57 = vmul.f32 %v344_v2, %v40_v42  ;;  %v77_v58 = vmul.f32 %v344_v2, %v41_v43 }
  0x19   :  { %v141_v56 = vmax.f32 %v109_v47, 0.0  ;;  %306 = vst [vmem:[%s556_s3 + $0x48] sm:$0xff] %v266_v50   ;;  %v111_v60 = vadd.f32 %v349_v3, %v75_v52  ;;  %v142_v61 = vmax.f32 %v110_v53, 0.0  ;;  %v78_v62 = vmul.f32 %v344_v2, %v42_v48 }
  0x1a   :  { %v79_v63 = vmul.f32 %v344_v2, %v43_v49  ;;  %307 = vst [vmem:[%s556_s3 + $0x50] sm:$0xff] %v271_v55   ;;  %v112_v1 = vadd.f32 %v349_v3, %v76_v57  ;;  %v113_v4 = vadd.f32 %v349_v3, %v77_v58  ;;  %v80_v5 = vmul.f32 %v344_v2, %v44_v54 }
  0x1b   :  { %v276_v0 = vpack.c.bf16 %v141_v56, %v140_v51  ;;  %v143_v6 = vmax.f32 %v111_v60, 0.0  ;;  %v114_v7 = vadd.f32 %v349_v3, %v78_v62  ;;  %v81_v9 = vmul.f32 %v344_v2, %v45_v59 }
  0x1c   :  { %v115_v8 = vadd.f32 %v349_v3, %v79_v63  ;;  %v144_v10 = vmax.f32 %v112_v1, 0.0  ;;  %v145_v11 = vmax.f32 %v113_v4, 0.0  ;;  %v116_v12 = vadd.f32 %v349_v3, %v80_v5 }
  0x1d   :  { %308 = vst [vmem:[%s556_s3 + $0x58] sm:$0xff] %v276_v0   ;;  %v281_v13 = vpack.c.bf16 %v143_v6, %v142_v61  ;;  %v146_v14 = vmax.f32 %v114_v7, 0.0  ;;  %v117_v16 = vadd.f32 %v349_v3, %v81_v9 }
  0x1e   :  { %v147_v15 = vmax.f32 %v115_v8, 0.0  ;;  %v286_v17 = vpack.c.bf16 %v145_v11, %v144_v10  ;;  %v148_v18 = vmax.f32 %v116_v12, 0.0 }
  0x1f   :  { %309 = vst [vmem:[%s556_s3 + $0x60] sm:$0xff] %v281_v13   ;;  %v149_v19 = vmax.f32 %v117_v16, 0.0 }
  0x20   :  { %v291_v2 = vpack.c.bf16 %v147_v15, %v146_v14  ;;  %310 = vst [vmem:[%s556_s3 + $0x68] sm:$0xff] %v286_v17  }
  0x21   :  { %v296_v20 = vpack.c.bf16 %v149_v19, %v148_v18 }
  0x22   :  { %311 = vst [vmem:[%s556_s3 + $0x70] sm:$0xff] %v291_v2  }
  0x23   :  { %312 = vst [vmem:[%s556_s3 + $0x78] sm:$0xff] %v296_v20  }

// kernel: resnet18_features.31
= control target key start
LH: loop header
LB: loop body
LE: loop exit
PB: predicated region body
PF: predicated region fallthrough
CT: control target
= control target key end

     0   :  { %s1404_s12 = smov 0   ;;  %s1406_s13 = smov 0   ;;  %s1647_s0 = inlined_call_operand.vmem [shape: bf16[2,19,19,12], index: 0, kind: input, shape index: {}]   ;;  %s1648_s1 = inlined_call_operand.vmem [shape: bf16[4,4,12,64], index: 1, kind: input, shape index: {}]   ;;  %s1649_s2 = inlined_call_operand.vmem [shape: f32[2,16,16,64], index: 2, kind: output, shape index: {0}]   ;;  %s1650_s3 = inlined_call_operand.vmem [shape: f32[2,16,2,64], index: 3, kind: output, shape index: {1}]  }
   0x1   :  { %s1408_s14 = smov 0   ;;  %s1410_s15 = smov 0  }
   0x2   :  { %s1412_s16 = smov 0  }
   0x3 LB: > { %s23_s17 = sadd.s32 1, %s1374_s14  ;;  %s26_s18 = sadd.s32 1, %s1378_s15  ;;  %s1382_s16 = sphi %s1412_s16, %s14_s16   ;;  %s1378_s15 = sphi %s1410_s15, %s1654_s15   ;;  %s1374_s14 = sphi %s1408_s14, %s1653_s14   ;;  %s1370_s13 = sphi %s1406_s13, %s1652_s13   ;;  %s1366_s12 = sphi %s1404_s12, %s1651_s12  }
   0x4   : > { %p24_p0 = scmp.ge.s32.totalorder %s23_s17, 16  ;;  %p1109_p1 = scmp.ge.s32.totalorder %s1382_s16, 1 }
   0x5   : > { %p156_p2 = scmp.lt.s32.totalorder %s1382_s16, 33 }
   0x6   : > { %s1656_s17 = smov (%p24_p0, %s23_s17), 0  ;;  %s1658_s18 = smov (!%p24_p0, %s26_s18), %s1378_s15 }
   0x7   : > { %p157_p3 = pnand %p1109_p1, %p156_p2  ;;  %p28_p4 = scmp.ge.s32.totalorder %s1658_s18, 2 }
   0x8   : > { %p192_p5 = scmp.lt.s32.totalorder (!%p157_p3), %s1370_s13, 1  ;;  %s1262_s4 = smul.u32 (!%p157_p3), 12, %s1366_s12 }
   0x9   : > { %s1660_s18 = smov (%p28_p4, %s1658_s18), 0  ;;  %160 = sbr.rel (%p157_p3) target bundleno = 244 (0xf4), region = 28 }
   0xa   : > { %p199_p6 = scmp.lt.s32.totalorder (!%p157_p3), %s1366_s12, 15 }
   0xe   : > { %v1126_v0 = vld [vmem:[%s1648_s1] sm:$0xf]  ;;  %v1263_v1 = vld [vmem:[%s1648_s1] sm:$0x30]  ;;  %vm256_vm0 = vcmask 1045504   ;;  %s1662_s13 = smov (!%p192_p5, %s1370_s13), 1 }
   0xf   : > { %v1127_v2 = vor.u32 %v1263_v1, %v1126_v0  ;;  %v1133_v3 = vld [vmem:[%s1648_s1 + $0x10] sm:$0xf]  ;;  %v1265_v4 = vld [vmem:[%s1648_s1 + $0x10] sm:$0x30]  ;;  %v1121_v6 = vld [vmem:[%s1648_s1 + $0x8] sm:$0xf] }
  0x10   : > { %v1134_v5 = vor.u32 %v1265_v4, %v1133_v3  ;;  %v1264_v7 = vld [vmem:[%s1648_s1 + $0x8] sm:$0x30]  ;;  %v1140_v10 = vld [vmem:[%s1648_s1 + $0x18] sm:$0xf]  ;;  %v1266_v11 = vld [vmem:[%s1648_s1 + $0x18] sm:$0x30] }
  0x11   : > { %v282_v8 = vsel %vm256_vm0, %v1127_v2, 0  ;;  %v1122_v9 = vor.u32 %v1264_v7, %v1121_v6  ;;  %s1297_s9 = smul.u32 228, %s1662_s13  ;;  %v1141_v13 = vor.u32 %v1266_v11, %v1140_v10  ;;  %v1171_v14 = vld [vmem:[%s1648_s1 + $0x30] sm:$0xf]  ;;  %vm252_vm1 = vcmask 97280   ;;  %s1664_s12 = smov (!%p199_p6, %s1366_s12), 15 }
  0x12   : > { %291 = vmatpush.bf16.msra.mxu1 %v282_v8  ;;  %v318_v12 = vsel %vm256_vm0, %v1134_v5, 0  ;;  %v1270_v16 = vld [vmem:[%s1648_s1 + $0x30] sm:$0x30]  ;;  %vm305_vm2 = vcmask 1046528   ;;  %vm234_vm3 = vsmask.f32 7424 }
  0x13   : > { %327 = vmatpush.bf16.msra.mxu2 %v318_v12  ;;  %v258_v15 = vsel %vm256_vm0, %v1122_v9, 0  ;;  %s196_s23 = scalar_lea.vmem %s1647_s0, %s1297_s9  ;;  %v370_v17 = vsel %vm256_vm0, %v1141_v13, 0  ;;  %v1172_v18 = vor.u32 %v1270_v16, %v1171_v14  ;;  %v1153_v19 = vld [vmem:[%s1648_s1 + $0x20] sm:$0xf]  ;;  %v1268_v20 = vld [vmem:[%s1648_s1 + $0x20] sm:$0x30] }
  0x14   : > { %267 = vmatpush.bf16.msra.mxu0 %v258_v15  ;;  %s1483_s28 = scalar_lea.vmem %s196_s23, %s1262_s4  ;;  %379 = vmatpush.bf16.msra.mxu3 %v370_v17  ;;  %v1154_v21 = vor.u32 %v1268_v20, %v1153_v19  ;;  %v1179_v22 = vld [vmem:[%s1648_s1 + $0x38] sm:$0xf]  ;;  %v1271_v23 = vld [vmem:[%s1648_s1 + $0x38] sm:$0x30]  ;;  %v1163_v24 = vld [vmem:[%s1648_s1 + $0x28] sm:$0xf] }
  0x15   : > { %v1283_v25 = vld [vmem:[%s1483_s28] sm:$0xff]   ;;  %v222_v27 = vld [vmem:[%s1483_s28 + $0x8] sm:$0x1]  ;;  %v501_v28 = vsel %vm256_vm0, %v1172_v18, 0  ;;  %v1180_v29 = vor.u32 %v1271_v23, %v1179_v22  ;;  %vm343_vm4 = vsmask.f32 6400 }
  0x16   : > { %v1290_v26 = vld [vmem:[%s1483_s28] sm:$0xf0]  ;;  %v236_v30 = vshrl.u32 %v1283_v25, 16  ;;  %v238_v31 = vshll.u32 %v1283_v25, 16  ;;  %1128 = vmatmul.msk.bf16.vlgmr.msra.gmra.mxu1 %vm252_vm1, %v1283_v25  ;;  %v231_v32 = vunpack.c.l.b16 %v222_v27  ;;  %v1291_v33 = vld [vmem:[%s1483_s28] sm:$0xe] }
  0x17   : > { %510 = vmatpush.bf16.msrb.mxu2 %v501_v28  ;;  %v336_v34 = vld [vmem:[%s1483_s28 + $0x8] sm:$0x3]  ;;  %v1292_v35 = vor.u32 %v1291_v33, %v1290_v26  ;;  %v411_v37 = vsel %vm256_vm0, %v1154_v21, 0  ;;  %v552_v38 = vsel %vm256_vm0, %v1180_v29, 0  ;;  %v1269_v39 = vld [vmem:[%s1648_s1 + $0x28] sm:$0x30] }
  0x18   : > { %v341_v36 = vunpack.c.l.b16 %v336_v34  ;;  %v1507_v40 = vld [vmem:[%s1483_s28 + $0xc] sm:$0xff]   ;;  %v240_v42 = vrot.slane %v238_v31, 1  ;;  %v233_v43 = vpack.c.b16 %v231_v32, %v231_v32  ;;  %420 = vmatpush.bf16.msrb.mxu0 %v411_v37  ;;  %561 = vmatpush.bf16.msrb.mxu3 %v552_v38  ;;  %v1164_v44 = vor.u32 %v1269_v39, %v1163_v24  ;;  %v1158_v45 = vld [vmem:[%s1483_s28 + $0x14] sm:$0x1]  ;;  %v1192_v1 = vld [vmem:[%s1648_s1 + $0x40] sm:$0xf] }
  0x19   : > { %v1338_v41 = vld [vmem:[%s1483_s28 + $0xc] sm:$0xf0]  ;;  %v1339_v46 = vld [vmem:[%s1483_s28 + $0xc] sm:$0xe]  ;;  %v306_v47 = vrot.slane %v1292_v35, 1  ;;  %v345_v49 = vshrl.u32 %v1292_v35, 16  ;;  %v440_v0 = vunpack.c.l.b16 %v1158_v45 }
  0x1a   : > { %v342_v48 = vpack.c.b16 %v341_v36, %v341_v36  ;;  %v348_v50 = vshll.u32 %v1292_v35, 16  ;;  %v1210_v51 = vld [vmem:[%s1648_s1 + $0x50] sm:$0xf]  ;;  %v241_v52 = vor.u32 %v240_v42, %v236_v30  ;;  %v307_v53 = vrot.slane %v233_v43, 1  ;;  %v1275_v56 = vld [vmem:[%s1648_s1 + $0x50] sm:$0x30] }
  0x1b   : > { %v243_v54 = vshll.u32 %v233_v43, 16  ;;  %v464_v55 = vsel %vm256_vm0, %v1164_v44, 0  ;;  %v347_v57 = vrot.slane %v345_v49, 1  ;;  %v1174_v61 = vld [vmem:[%s1483_s28 + $0x14] sm:$0x3]  ;;  %v442_v7 = vpack.c.b16 %v440_v0, %v440_v0  ;;  %v1293_v33 = vld [vmem:[%s1483_s28 + $0x18] sm:$0xff]  }
  0x1c   : > { %v350_v58 = vrot.slane %v348_v50, 2  ;;  %v353_v59 = vshrl.u32 %v342_v48, 16  ;;  %v356_v60 = vshll.u32 %v342_v48, 16  ;;  %473 = vmatpush.bf16.msrb.mxu1 %v464_v55  ;;  %v308_v62 = vsel %vm305_vm2, %v306_v47, %v307_v53  ;;  %v1273_v2 = vld [vmem:[%s1648_s1 + $0x40] sm:$0x30]  ;;  %s1112_s5 = sshll.u32 %s1662_s13, 5 }
  0x1d   : > { %v245_v63 = vrot.slane %v243_v54, 1  ;;  %1135 = vmatmul.msk.bf16.vlgmr.msra.gmra.mxu2 %vm252_vm1, %v308_v62  ;;  %v1211_v8 = vor.u32 %v1275_v56, %v1210_v51  ;;  %v1340_v10 = vor.u32 %v1339_v46, %v1338_v41  ;;  %v524_v11 = vunpack.c.l.b16 %v1174_v61  ;;  %v1218_v13 = vld [vmem:[%s1648_s1 + $0x58] sm:$0xf]  ;;  %v1276_v17 = vld [vmem:[%s1648_s1 + $0x58] sm:$0x30]  ;;  %s1114_s10 = sshll.u32 %s1662_s13, 4 }
  0x1e   : > { %v351_v3 = vor.u32 %v350_v58, %v347_v57  ;;  %v355_v4 = vrot.slane %v353_v59, 1  ;;  %v358_v5 = vrot.slane %v356_v60, 2  ;;  %v1193_v12 = vor.u32 %v1273_v2, %v1192_v1  ;;  %v1202_v21 = vld [vmem:[%s1648_s1 + $0x48] sm:$0xf]  ;;  %v1274_v22 = vld [vmem:[%s1648_s1 + $0x48] sm:$0x30]  ;;  %s211_s11 = sadd.s32 %s1114_s10, %s1664_s12 }
  0x1f   : > { %v246_v6 = vsel %vm234_vm3, %v241_v52, %v245_v63  ;;  %v444_v14 = vshrl.u32 %v1507_v40, 16  ;;  %v446_v15 = vshll.u32 %v1507_v40, 16  ;;  %v451_v16 = vshll.u32 %v442_v7, 16  ;;  %v1197_v27 = vld [vmem:[%s1483_s28 + $0x20] sm:$0x1]  ;;  %v1267_v57 = vld [vmem:[%s1483_s28 + $0xc] sm:$0xff] }
  0x20   : > { %1123 = vmatmul.msk.bf16.vlgmr.msra.gmra.mxu0 %vm252_vm1, %v246_v6  ;;  %v359_v9 = vor.u32 %v358_v5, %v355_v4  ;;  %v683_v19 = vsel %vm256_vm0, %v1211_v8, 0  ;;  %v525_v20 = vpack.c.b16 %v524_v11, %v524_v11  ;;  %v527_v25 = vshrl.u32 %v1340_v10, 16  ;;  %v1249_v34 = vld [vmem:[%s1648_s1 + $0x70] sm:$0xf]  ;;  %v1280_v39 = vld [vmem:[%s1648_s1 + $0x70] sm:$0x30] }
  0x21   : > { %v448_v23 = vrot.slane %v446_v15, 1  ;;  %v453_v24 = vrot.slane %v451_v16, 1  ;;  %692 = vmatpush.bf16.msra.mxu2 %v683_v19  ;;  %v530_v26 = vshll.u32 %v1340_v10, 16  ;;  %v593_v30 = vsel %vm256_vm0, %v1193_v12, 0  ;;  %v1231_v40 = vld [vmem:[%s1648_s1 + $0x60] sm:$0xf] }
  0x22   : > { %v360_v18 = vsel %vm343_vm4, %v351_v3, %v359_v9  ;;  %v535_v28 = vshrl.u32 %v525_v20, 16  ;;  %v538_v29 = vshll.u32 %v525_v20, 16  ;;  %602 = vmatpush.bf16.msra.mxu0 %v593_v30  ;;  %v1219_v32 = vor.u32 %v1276_v17, %v1218_v13  ;;  %v1278_v45 = vld [vmem:[%s1648_s1 + $0x60] sm:$0x30]  ;;  %v1213_v52 = vld [vmem:[%s1483_s28 + $0x20] sm:$0x3] }
  0x23   : > { %1142 = vmatmul.msk.bf16.vlgmr.msra.gmra.mxu3 %vm252_vm1, %v360_v18  ;;  %v449_v31 = vor.u32 %v448_v23, %v444_v14  ;;  %v489_v35 = vrot.slane %v1340_v10, 1  ;;  %v490_v36 = vrot.slane %v442_v7, 1  ;;  %v1203_v37 = vor.u32 %v1274_v22, %v1202_v21  ;;  %v1257_v54 = vld [vmem:[%s1648_s1 + $0x78] sm:$0xf]  ;;  %v1281_v55 = vld [vmem:[%s1648_s1 + $0x78] sm:$0x30] }
  0x24   : > { %v622_v38 = vunpack.c.l.b16 %v1197_v27  ;;  %v529_v42 = vrot.slane %v527_v25, 1  ;;  %v532_v43 = vrot.slane %v530_v26, 2  ;;  %v734_v44 = vsel %vm256_vm0, %v1219_v32, 0  ;;  %v1241_v60 = vld [vmem:[%s1648_s1 + $0x68] sm:$0xf]  ;;  %s1115_s19 = sshll.u32 %s211_s11, 1 }
  0x25   : > { %v454_v41 = vsel %vm234_vm3, %v449_v31, %v453_v24  ;;  %v537_v46 = vrot.slane %v535_v28, 1  ;;  %v540_v47 = vrot.slane %v538_v29, 2  ;;  %743 = vmatpush.bf16.msra.mxu3 %v734_v44  ;;  %v646_v48 = vsel %vm256_vm0, %v1203_v37, 0  ;;  %v1279_v61 = vld [vmem:[%s1648_s1 + $0x68] sm:$0x30]  ;;  %v1234_v8 = vld [vmem:[%s1483_s28 + $0x24] sm:$0xff]   ;;  %s213_s22 = scalar_lea.vmem %s1650_s3, %s1115_s19 }
  0x26   : > { %1165 = vmatmul.msk.bf16.vlgmr.msrb.gmra.mxu1 %vm252_vm1, %v454_v41  ;;  %v628_v49 = vshll.u32 %v1293_v33, 16  ;;  %v624_v50 = vpack.c.b16 %v622_v38, %v622_v38  ;;  %v1250_v51 = vor.u32 %v1280_v39, %v1249_v34  ;;  %v1232_v53 = vor.u32 %v1278_v45, %v1231_v40  ;;  %v1294_v0 = vld [vmem:[%s1483_s28 + $0x18] sm:$0xf0]  ;;  %v1295_v1 = vld [vmem:[%s1483_s28 + $0x18] sm:$0xe] }
  0x27   : > { %655 = vmatpush.bf16.msra.mxu1 %v646_v48  ;;  %v491_v56 = vsel %vm305_vm2, %v489_v35, %v490_v36  ;;  %v533_v58 = vor.u32 %v532_v43, %v529_v42  ;;  %v626_v59 = vshrl.u32 %v1293_v33, 16  ;;  %v541_v62 = vor.u32 %v540_v47, %v537_v46  ;;  %v1341_v9 = vld [vmem:[%s1483_s28 + $0x24] sm:$0xf0]  ;;  %v1236_v17 = vld [vmem:[%s1483_s28 + $0x2c] sm:$0x1]  ;;  %v1272_v35 = vld [vmem:[%s1483_s28 + $0x18] sm:$0xff] }
  0x28   : > { %v630_v63 = vrot.slane %v628_v49, 1  ;;  %v865_v2 = vsel %vm256_vm0, %v1250_v51, 0  ;;  %v706_v3 = vunpack.c.l.b16 %v1213_v52  ;;  %v633_v4 = vshll.u32 %v624_v50, 16  ;;  %v1342_v32 = vld [vmem:[%s1483_s28 + $0x24] sm:$0xe] }
  0x29   : > { %v775_v5 = vsel %vm256_vm0, %v1232_v53, 0  ;;  %v1258_v6 = vor.u32 %v1281_v55, %v1257_v54  ;;  %v1242_v7 = vor.u32 %v1279_v61, %v1241_v60  ;;  %v1296_v10 = vor.u32 %v1295_v1, %v1294_v0  ;;  %v1252_v33 = vld [vmem:[%s1483_s28 + $0x2c] sm:$0x3] }
  0x2a   : > { %v542_v11 = vsel %vm343_vm4, %v533_v58, %v541_v62  ;;  %v631_v12 = vor.u32 %v630_v63, %v626_v59  ;;  %v707_v13 = vpack.c.b16 %v706_v3, %v706_v3  ;;  %v635_v15 = vrot.slane %v633_v4, 1  ;;  %v1277_v59 = vld [vmem:[%s1483_s28 + $0x24] sm:$0xff]  ;;  %s1111_s28 = sshll.u32 %s1664_s12, 1 }
  0x2b   : > { %v828_v14 = vsel %vm256_vm0, %v1242_v7, 0  ;;  %v916_v16 = vsel %vm256_vm0, %v1258_v6, 0  ;;  %v709_v18 = vshrl.u32 %v1296_v10, 16  ;;  %v712_v19 = vshll.u32 %v1296_v10, 16  ;;  %s203_s6 = sadd.s32 %s1112_s5, %s1111_s28 }
  0x2c   : > { %837 = vmatpush.bf16.msrb.mxu1 %v828_v14  ;;  %v717_v20 = vshrl.u32 %v707_v13, 16  ;;  %v720_v21 = vshll.u32 %v707_v13, 16  ;;  %v636_v22 = vsel %vm234_vm3, %v631_v12, %v635_v15  ;;  %v804_v23 = vunpack.c.l.b16 %v1236_v17  ;;  %s1113_s7 = sshll.u32 %s203_s6, 3 }
  0x2d   : > { %1173 = vmatmul.msk.bf16.vlgmr.msrb.gmra.mxu2 %vm252_vm1, %v491_v56  ;;  %v671_v24 = vrot.slane %v1296_v10, 1  ;;  %v672_v25 = vrot.slane %v624_v50, 1  ;;  %v711_v26 = vrot.slane %v709_v18, 1  ;;  %v714_v27 = vrot.slane %v712_v19, 2  ;;  %s205_s9 = scalar_lea.vmem %s1649_s2, %s1113_s7 }
  0x2e   : > { %874 = vmatpush.bf16.msrb.mxu2 %v865_v2  ;;  %v719_v28 = vrot.slane %v717_v20, 1  ;;  %v722_v29 = vrot.slane %v720_v21, 2  ;;  %v806_v30 = vpack.c.b16 %v804_v23, %v804_v23  ;;  %v810_v31 = vshll.u32 %v1234_v8, 16 }
  0x2f   : > { %v673_v34 = vsel %vm305_vm2, %v671_v24, %v672_v25  ;;  %v715_v36 = vor.u32 %v714_v27, %v711_v26  ;;  %v888_v38 = vunpack.c.l.b16 %v1252_v33  ;;  %v808_v39 = vshrl.u32 %v1234_v8, 16 }
  0x30   : > { %1155 = vmatmul.msk.bf16.vlgmr.msrb.gmra.mxu0 %vm252_vm1, %v1267_v57  ;;  %v723_v37 = vor.u32 %v722_v29, %v719_v28  ;;  %v812_v40 = vrot.slane %v810_v31, 1  ;;  %v815_v41 = vshll.u32 %v806_v30, 16  ;;  %v1343_v43 = vor.u32 %v1342_v32, %v1341_v9 }
  0x31   : > { %784 = vmatpush.bf16.msrb.mxu0 %v775_v5  ;;  %v889_v44 = vpack.c.b16 %v888_v38, %v888_v38  ;;  %v854_v53 = vrot.slane %v806_v30, 1  ;;  %vm934_vm5 = vcmask 523264   ;;  %vm957_vm6 = vcmask 1040384  }
  0x32   : > { %v724_v42 = vsel %vm343_vm4, %v715_v36, %v723_v37  ;;  %v813_v45 = vor.u32 %v812_v40, %v808_v39  ;;  %v817_v46 = vrot.slane %v815_v41, 1  ;;  %v891_v47 = vshrl.u32 %v1343_v43, 16 }
  0x33   : > { %1181 = vmatmul.msk.bf16.vlgmr.msrb.gmra.mxu3 %vm252_vm1, %v542_v11  ;;  %v894_v48 = vshll.u32 %v1343_v43, 16  ;;  %v899_v49 = vshrl.u32 %v889_v44, 16  ;;  %v902_v50 = vshll.u32 %v889_v44, 16  ;;  %v853_v52 = vrot.slane %v1343_v43, 1 }
  0x34   : > { %925 = vmatpush.bf16.msrb.mxu3 %v916_v16  ;;  %v818_v51 = vsel %vm234_vm3, %v813_v45, %v817_v46  ;;  %v893_v54 = vrot.slane %v891_v47, 1  ;;  %vm959_vm7 = vcmask 517120  }
  0x35   : > { %v896_v55 = vrot.slane %v894_v48, 2  ;;  %v901_v56 = vrot.slane %v899_v49, 1  ;;  %v904_v57 = vrot.slane %v902_v50, 2  ;;  %v855_v58 = vsel %vm305_vm2, %v853_v52, %v854_v53 }
  0x36   : > { %1204 = vmatmul.msk.bf16.vlgmr.msra.gmra.mxu1 %vm252_vm1, %v636_v22 }
  0x37   : > { %v897_v60 = vor.u32 %v896_v55, %v893_v54  ;;  %v905_v61 = vor.u32 %v904_v57, %v901_v56 }
  0x39   : > { %v906_v62 = vsel %vm343_vm4, %v897_v60, %v905_v61 }
  0x3d   : > { %1212 = vmatmul.msk.bf16.vlgmr.msra.gmra.mxu2 %vm252_vm1, %v673_v34 }
  0x40   : > { %1194 = vmatmul.msk.bf16.vlgmr.msra.gmra.mxu0 %vm252_vm1, %v1272_v35 }
  0x43   : > { %1220 = vmatmul.msk.bf16.vlgmr.msra.gmra.mxu3 %vm252_vm1, %v724_v42 }
  0x46   : > { %1243 = vmatmul.msk.bf16.vlgmr.msrb.gmra.mxu1 %vm252_vm1, %v818_v51 }
  0x4d   : > { %1251 = vmatmul.msk.bf16.vlgmr.msrb.gmra.mxu2 %vm252_vm1, %v855_v58 }
  0x50   : > { %1233 = vmatmul.msk.bf16.vlgmr.msrb.gmra.mxu0 %vm252_vm1, %v1277_v59 }
  0x53   : > { %1259 = vmatmul.msk.bf16.vlgmr.msrb.gmra.mxu3 %vm252_vm1, %v906_v62 }
  0x93   : > { %v293_v63 = vpop.f32.mrf.mxu1 }
  0x9b   : > { %v295_v0 = vpop.f32.mrf.mxu1 }
  0x9d   : > { %v269_v1 = vpop.f32.mrf.mxu0 }
  0x9e   : > { %v294_v8 = vadd.f32 %v293_v63, %v269_v1 }
  0xa0   : > { %v329_v2 = vpop.f32.mrf.mxu2 }
  0xa1   : > { %v334_v12 = vadd.f32 %v329_v2, %v294_v8 }
  0xa3   : > { %v475_v5 = vpop.f32.mrf.mxu1 }
  0xa5   : > { %v271_v3 = vpop.f32.mrf.mxu0 }
  0xa6   : > { %v381_v4 = vpop.f32.mrf.mxu3  ;;  %v296_v17 = vadd.f32 %v295_v0, %v271_v3 }
  0xa7   : > { %v386_v13 = vadd.f32 %v381_v4, %v334_v12 }
  0xa8   : > { %v331_v6 = vpop.f32.mrf.mxu2 }
  0xa9   : > { %v335_v19 = vadd.f32 %v331_v6, %v296_v17 }
  0xab   : > { %v477_v10 = vpop.f32.mrf.mxu1 }
  0xad   : > { %v422_v7 = vpop.f32.mrf.mxu0 }
  0xae   : > { %v383_v9 = vpop.f32.mrf.mxu3  ;;  %v427_v15 = vadd.f32 %v422_v7, %v386_v13 }
  0xaf   : > { %v387_v22 = vadd.f32 %v383_v9, %v335_v19 }
  0xb0   : > { %v512_v11 = vpop.f32.mrf.mxu2  ;;  %v480_v20 = vadd.f32 %v475_v5, %v427_v15 }
  0xb2   : > { %v517_v24 = vadd.f32 %v512_v11, %v480_v20 }
  0xb3   : > { %v657_v21 = vpop.f32.mrf.mxu1 }
  0xb5   : > { %v424_v14 = vpop.f32.mrf.mxu0 }
  0xb6   : > { %v563_v16 = vpop.f32.mrf.mxu3  ;;  %v428_v25 = vadd.f32 %v424_v14, %v387_v22 }
  0xb7   : > { %v568_v27 = vadd.f32 %v563_v16, %v517_v24 }
  0xb8   : > { %v514_v18 = vpop.f32.mrf.mxu2  ;;  %v481_v29 = vadd.f32 %v477_v10, %v428_v25 }
  0xba   : > { %v518_v33 = vadd.f32 %v514_v18, %v481_v29 }
  0xbb   : > { %v659_v31 = vpop.f32.mrf.mxu1 }
  0xbd   : > { %v604_v23 = vpop.f32.mrf.mxu0 }
  0xbe   : > { %v565_v26 = vpop.f32.mrf.mxu3  ;;  %v609_v30 = vadd.f32 %v604_v23, %v568_v27 }
  0xbf   : > { %v569_v36 = vadd.f32 %v565_v26, %v518_v33 }
  0xc0   : > { %v694_v28 = vpop.f32.mrf.mxu2  ;;  %v662_v34 = vadd.f32 %v657_v21, %v609_v30 }
  0xc2   : > { %v699_v38 = vadd.f32 %v694_v28, %v662_v34 }
  0xc3   : > { %v839_v43 = vpop.f32.mrf.mxu1 }
  0xc5   : > { %v606_v32 = vpop.f32.mrf.mxu0 }
  0xc6   : > { %v745_v35 = vpop.f32.mrf.mxu3  ;;  %v610_v39 = vadd.f32 %v606_v32, %v569_v36 }
  0xc7   : > { %v750_v40 = vadd.f32 %v745_v35, %v699_v38 }
  0xc8   : > { %v696_v37 = vpop.f32.mrf.mxu2  ;;  %v663_v42 = vadd.f32 %v659_v31, %v610_v39 }
  0xca   : > { %v700_v48 = vadd.f32 %v696_v37, %v663_v42 }
  0xcb   : > { %v841_v55 = vpop.f32.mrf.mxu1 }
  0xcd   : > { %v786_v41 = vpop.f32.mrf.mxu0 }
  0xce   : > { %v747_v44 = vpop.f32.mrf.mxu3  ;;  %v791_v45 = vadd.f32 %v786_v41, %v750_v40 }
  0xcf   : > { %v751_v49 = vadd.f32 %v747_v44, %v700_v48 }
  0xd0   : > { %v844_v46 = vadd.f32 %v839_v43, %v791_v45  ;;  %v876_v47 = vpop.f32.mrf.mxu2 }
  0xd2   : > { %v881_v50 = vadd.f32 %v876_v47, %v844_v46 }
  0xd5   : > { %v788_v51 = vpop.f32.mrf.mxu0 }
  0xd6   : > { %v792_v52 = vadd.f32 %v788_v51, %v751_v49  ;;  %v927_v53 = vpop.f32.mrf.mxu3 }
  0xd7   : > { %v932_v54 = vadd.f32 %v927_v53, %v881_v50 }
  0xd8   : > { %v845_v56 = vadd.f32 %v841_v55, %v792_v52  ;;  %v878_v57 = vpop.f32.mrf.mxu2 }
  0xd9   : > { %935 = vst.msk [vmem:[%s205_s9] sm:$0xff] %vm934_vm5, %v932_v54  ;;  %v946_v60 = vmul.f32 %v932_v54, %v932_v54  ;;  %v937_v62 = vsel %vm934_vm5, %v932_v54, 0.0 }
  0xda   : > { %v882_v58 = vadd.f32 %v878_v57, %v845_v56 }
  0xdb   : > { %v948_v2 = vsel %vm934_vm5, %v946_v60, 0.0 }
  0xde   : > { %v929_v59 = vpop.f32.mrf.mxu3 }
  0xdf   : > { %v933_v61 = vadd.f32 %v929_v59, %v882_v58 }
  0xe1   : > { %936 = vst.msk [vmem:[%s205_s9 + $0x8] sm:$0xff] %vm934_vm5, %v933_v61  ;;  %v938_v63 = vsel %vm934_vm5, %v933_v61, 0.0  ;;  %v947_v0 = vmul.f32 %v933_v61, %v933_v61 }
  0xe2   : > { %v939_v1 = vadd.f32 %v938_v63, %v937_v62 }
  0xe3   : > { %v949_v3 = vsel %vm934_vm5, %v947_v0, 0.0 }
  0xe4   : > { %v940_v4 = vrot.slane %v939_v1, 4  ;;  %v950_v5 = vadd.f32 %v949_v3, %v948_v2 }
  0xe6   : > { %v941_v6 = vadd.f32 %v940_v4, %v939_v1  ;;  %v951_v7 = vrot.slane %v950_v5, 4 }
  0xe8   : > { %v942_v8 = vrot.slane %v941_v6, 2  ;;  %v952_v9 = vadd.f32 %v951_v7, %v950_v5 }
  0xea   : > { %v943_v10 = vadd.f32 %v942_v8, %v941_v6  ;;  %v953_v11 = vrot.slane %v952_v9, 2 }
  0xec   : > { %v944_v12 = vrot.slane %v943_v10, 1  ;;  %v954_v13 = vadd.f32 %v953_v11, %v952_v9 }
  0xee   : > { %v955_v14 = vrot.slane %v954_v13, 1  ;;  %v945_v15 = vadd.f32 %v944_v12, %v943_v10 }
  0xf0   : > { %v956_v16 = vadd.f32 %v955_v14, %v954_v13 }
  0xf2   : > { %v958_v17 = vsel %vm957_vm6, %v945_v15, %v956_v16 }
  0xf3   : > { %960 = vst.msk [vmem:[%s213_s22] sm:$0x3] %vm959_vm7, %v958_v17 }
  0xf4 PF: > { %s14_s16 = sadd.s32 1, %s1382_s16   ;;  %s1651_s12 = smov %s1374_s14 }
  0xf5   : > { %p11_p7 = scmp.ge.s32.totalorder %s14_s16, 34   ;;  %s1652_s13 = smov %s1378_s15 }
  0xf6   : > { %s1653_s14 = smov %s1656_s17  ;;  %s1654_s15 = smov %s1660_s18 }
  0xf7   :  { %13 = sbr.rel (!%p11_p7) target bundleno = 3 (0x3), region = 89 }

// kernel: resnet18_features.33
= control target key start
LH: loop header
LB: loop body
LE: loop exit
PB: predicated region body
PF: predicated region fallthrough
CT: control target
= control target key end

     0   :  { %s1024_s15 = smov 0   ;;  %s1026_s16 = smov 0   ;;  %s1241_s0 = inlined_call_operand.vmem [shape: bf16[2,9,9,64], index: 0, kind: input, shape index: {}]   ;;  %s1242_s1 = inlined_call_operand.vmem [shape: bf16[2,9,9,64], index: 1, kind: input, shape index: {}]   ;;  %s1243_s2 = inlined_call_operand.vmem [shape: bf16[2,9,9,64], index: 2, kind: input, shape index: {}]   ;;  %s1244_s3 = inlined_call_operand.vmem [shape: bf16[2,9,9,64], index: 3, kind: input, shape index: {}]   ;;  %s1245_s4 = inlined_call_operand.vmem [shape: bf16[2,8,8,64], index: 4, kind: output, shape index: {}]  }
   0x1   :  { %s1028_s17 = smov 0  }
   0x2 LB: > { %s26_s18 = sadd.s32 1, %s993_s16  ;;  %p916_p0 = scmp.ge.s32.totalorder %s997_s17, 1  ;;  %s997_s17 = sphi %s1028_s17, %s14_s17   ;;  %s993_s16 = sphi %s1026_s16, %s1247_s16   ;;  %s989_s15 = sphi %s1024_s15, %s1246_s15  }
   0x3   : > { %p28_p1 = scmp.ge.s32.totalorder %s26_s18, 2  ;;  %p206_p2 = scmp.lt.s32.totalorder %s997_s17, 3 }
   0x5   : > { %s1249_s18 = smov (%p28_p1, %s26_s18), 0  ;;  %p207_p3 = pnand %p916_p0, %p206_p2 }
   0x6   : > { %p251_p4 = scmp.lt.s32.totalorder (!%p207_p3), %s989_s15, 1 }
   0x7   : > { %210 = sbr.rel (%p207_p3) target bundleno = 84 (0x54), region = 36 }
   0xc   : > { %s1251_s15 = smov (!%p251_p4, %s989_s15), 1  ;;  %vm333_vm0 = vcmask 1046528   ;;  %vm770_vm1 = vcmask 519168  }
   0xd   : > { %s950_s19 = smul.u32 72, %s1251_s15  ;;  %s949_s6 = sshll.u32 %s1251_s15, 5 }
   0xe   : > { %s1154_s9 = scalar_lea.vmem %s1245_s4, %s949_s6 }
   0xf   : > { %s1048_s22 = scalar_lea.vmem %s1241_s0, %s950_s19  ;;  %s1053_s25 = scalar_lea.vmem %s1242_s1, %s950_s19 }
  0x10   : > { %s1058_s28 = scalar_lea.vmem %s1243_s2, %s950_s19  ;;  %s1063_s5 = scalar_lea.vmem %s1244_s3, %s950_s19  ;;  %v285_v0 = vld [vmem:[%s1048_s22] sm:$0xf]  ;;  %v293_v1 = vld [vmem:[%s1048_s22 + $0x4] sm:$0x1]  ;;  %v923_v2 = vld [vmem:[%s1048_s22 + $0x8] sm:$0xf] }
  0x11   : > { %v301_v3 = vunpack.c.l.bf16 %v285_v0  ;;  %v309_v4 = vunpack.c.l.bf16 %v293_v1  ;;  %v402_v5 = vunpack.c.l.bf16 %v923_v2  ;;  %v931_v6 = vld [vmem:[%s1048_s22 + $0xc] sm:$0x1]  ;;  %v516_v7 = vld [vmem:[%s1053_s25] sm:$0xf]  ;;  %v1071_v8 = vld [vmem:[%s1053_s25 + $0x8] sm:$0xf] }
  0x12   : > { %v442_v9 = vunpack.c.l.bf16 %v931_v6  ;;  %v532_v10 = vunpack.c.l.bf16 %v516_v7  ;;  %v1074_v11 = vld [vmem:[%s1058_s28] sm:$0xf]  ;;  %v640_v12 = vld [vmem:[%s1058_s28 + $0x4] sm:$0x1]  ;;  %v286_v18 = vld [vmem:[%s1048_s22 + $0x8] sm:$0xf]  ;;  %v574_v20 = vunpack.c.l.bf16 %v1071_v8 }
  0x13   : > { %v1078_v13 = vld [vmem:[%s1063_s5] sm:$0xf]  ;;  %v334_v14 = vrot.slane %v301_v3, 1  ;;  %v335_v15 = vrot.slane %v309_v4, 1  ;;  %v466_v16 = vrot.slane %v402_v5, 1  ;;  %v616_v17 = vunpack.c.l.bf16 %v1074_v11 }
  0x14   : > { %v467_v19 = vrot.slane %v442_v9, 1  ;;  %v656_v21 = vunpack.c.l.bf16 %v640_v12  ;;  %v294_v22 = vld [vmem:[%s1048_s22 + $0xc] sm:$0x1]  ;;  %v302_v23 = vunpack.c.l.bf16 %v286_v18  ;;  %v924_v24 = vld [vmem:[%s1048_s22 + $0x10] sm:$0xf]  ;;  %v746_v33 = vunpack.c.l.bf16 %v1078_v13 }
  0x15   : > { %v336_v25 = vsel %vm333_vm0, %v334_v14, %v335_v15  ;;  %v680_v26 = vrot.slane %v616_v17, 1  ;;  %v310_v27 = vunpack.c.l.bf16 %v294_v22  ;;  %v403_v28 = vunpack.c.l.bf16 %v924_v24  ;;  %v932_v29 = vld [vmem:[%s1048_s22 + $0x14] sm:$0x1]  ;;  %v517_v30 = vld [vmem:[%s1053_s25 + $0x8] sm:$0xf] }
  0x16   : > { %v366_v31 = vmax.f32 %v301_v3, %v336_v25  ;;  %v681_v32 = vrot.slane %v656_v21, 1  ;;  %v337_v34 = vrot.slane %v302_v23, 1  ;;  %v1092_v35 = vld [vmem:[%s1053_s25 + $0x10] sm:$0xf]  ;;  %v1095_v36 = vld [vmem:[%s1058_s28 + $0x8] sm:$0xf]  ;;  %v468_v37 = vsel %vm333_vm0, %v466_v16, %v467_v19 }
  0x17   : > { %v338_v38 = vrot.slane %v310_v27, 1  ;;  %v443_v39 = vunpack.c.l.bf16 %v932_v29  ;;  %v469_v40 = vrot.slane %v403_v28, 1  ;;  %v641_v41 = vld [vmem:[%s1058_s28 + $0xc] sm:$0x1]  ;;  %v533_v44 = vunpack.c.l.bf16 %v517_v30  ;;  %v287_v46 = vld [vmem:[%s1048_s22 + $0x10] sm:$0xf] }
  0x18   : > { %v410_v42 = vmax.f32 %v366_v31, %v402_v5  ;;  %v1100_v43 = vsel %vm333_vm0, %v680_v26, %v681_v32  ;;  %v617_v45 = vunpack.c.l.bf16 %v1095_v36  ;;  %v295_v47 = vld [vmem:[%s1048_s22 + $0x14] sm:$0x1]  ;;  %v925_v48 = vld [vmem:[%s1048_s22 + $0x18] sm:$0xf]  ;;  %v575_v51 = vunpack.c.l.bf16 %v1092_v35  ;;  %v933_v53 = vld [vmem:[%s1048_s22 + $0x1c] sm:$0x1] }
  0x19   : > { %v339_v49 = vsel %vm333_vm0, %v337_v34, %v338_v38  ;;  %v470_v50 = vrot.slane %v443_v39, 1  ;;  %v657_v52 = vunpack.c.l.bf16 %v641_v41  ;;  %v1112_v57 = vld [vmem:[%s1063_s5 + $0x8] sm:$0xf]  ;;  %v303_v58 = vunpack.c.l.bf16 %v287_v46  ;;  %v518_v63 = vld [vmem:[%s1053_s25 + $0x10] sm:$0xf] }
  0x1a   : > { %v498_v54 = vmax.f32 %v410_v42, %v468_v37  ;;  %v367_v55 = vmax.f32 %v302_v23, %v339_v49  ;;  %v683_v56 = vrot.slane %v617_v45, 1  ;;  %v311_v61 = vunpack.c.l.bf16 %v295_v47  ;;  %v1117_v0 = vld [vmem:[%s1053_s25 + $0x18] sm:$0xf]  ;;  %v1120_v5 = vld [vmem:[%s1058_s28 + $0x10] sm:$0xf] }
  0x1b   : > { %v471_v59 = vsel %vm333_vm0, %v469_v40, %v470_v50  ;;  %v684_v60 = vrot.slane %v657_v52, 1  ;;  %v404_v62 = vunpack.c.l.bf16 %v925_v48  ;;  %v340_v3 = vrot.slane %v303_v58, 1  ;;  %v642_v6 = vld [vmem:[%s1058_s28 + $0x14] sm:$0x1]  ;;  %v288_v18 = vld [vmem:[%s1048_s22 + $0x18] sm:$0xf] }
  0x1c   : > { %v540_v1 = vmax.f32 %v498_v54, %v532_v10  ;;  %v411_v2 = vmax.f32 %v367_v55, %v403_v28  ;;  %v444_v4 = vunpack.c.l.bf16 %v933_v53  ;;  %v747_v8 = vunpack.c.l.bf16 %v1112_v57  ;;  %v296_v19 = vld [vmem:[%s1048_s22 + $0x1c] sm:$0x1]  ;;  %v926_v25 = vld [vmem:[%s1048_s22 + $0x20] sm:$0xf]  ;;  %v1135_v29 = vld [vmem:[%s1063_s5 + $0x10] sm:$0xf] }
  0x1d   : > { %v685_v7 = vsel %vm333_vm0, %v683_v56, %v684_v60  ;;  %v341_v9 = vrot.slane %v311_v61, 1  ;;  %v472_v12 = vrot.slane %v404_v62, 1  ;;  %v534_v16 = vunpack.c.l.bf16 %v518_v63  ;;  %v934_v30 = vld [vmem:[%s1048_s22 + $0x24] sm:$0x1]  ;;  %v519_v39 = vld [vmem:[%s1053_s25 + $0x18] sm:$0xf] }
  0x1e   : > { %v582_v14 = vmax.f32 %v540_v1, %v574_v20  ;;  %v499_v15 = vmax.f32 %v411_v2, %v471_v59  ;;  %v473_v10 = vrot.slane %v444_v4, 1  ;;  %v576_v22 = vunpack.c.l.bf16 %v1117_v0  ;;  %v942_v46 = vld [vmem:[%s1053_s25 + $0x20] sm:$0xf]  ;;  %v1148_v50 = vld [vmem:[%s1058_s28 + $0x18] sm:$0xf] }
  0x1f   : > { %v342_v21 = vsel %vm333_vm0, %v340_v3, %v341_v9  ;;  %v618_v23 = vunpack.c.l.bf16 %v1120_v5  ;;  %v658_v24 = vunpack.c.l.bf16 %v642_v6  ;;  %v304_v34 = vunpack.c.l.bf16 %v288_v18  ;;  %v289_v53 = vld [vmem:[%s1048_s22 + $0x20] sm:$0xf]  ;;  %v297_v57 = vld [vmem:[%s1048_s22 + $0x24] sm:$0x1]  ;;  %v935_v3 = vld [vmem:[%s1048_s22 + $0x2c] sm:$0x1] }
  0x20   : > { %v624_v26 = vmax.f32 %v582_v14, %v616_v17  ;;  %v541_v20 = vmax.f32 %v499_v15, %v533_v44  ;;  %v368_v27 = vmax.f32 %v303_v58, %v342_v21  ;;  %v474_v28 = vsel %vm333_vm0, %v472_v12, %v473_v10  ;;  %v927_v58 = vld [vmem:[%s1048_s22 + $0x28] sm:$0xf]  ;;  %v733_v6 = vld [vmem:[%s1063_s5 + $0x18] sm:$0xf] }
  0x21   : > { %v686_v31 = vrot.slane %v618_v23, 1  ;;  %v687_v32 = vrot.slane %v658_v24, 1  ;;  %v312_v35 = vunpack.c.l.bf16 %v296_v19  ;;  %v405_v17 = vunpack.c.l.bf16 %v926_v25 }
  0x22   : > { %v712_v37 = vmax.f32 %v624_v26, %v1100_v43  ;;  %v583_v11 = vmax.f32 %v541_v20, %v575_v51  ;;  %v412_v38 = vmax.f32 %v368_v27, %v404_v62  ;;  %v748_v40 = vunpack.c.l.bf16 %v1135_v29  ;;  %v643_v51 = vld [vmem:[%s1058_s28 + $0x1c] sm:$0x1]  ;;  %v290_v20 = vld [vmem:[%s1048_s22 + $0x28] sm:$0xf] }
  0x23   : > { %v343_v41 = vrot.slane %v304_v34, 1  ;;  %v344_v42 = vrot.slane %v312_v35, 1  ;;  %v445_v44 = vunpack.c.l.bf16 %v934_v30  ;;  %v475_v49 = vrot.slane %v405_v17, 1 }
  0x24   : > { %v754_v47 = vmax.f32 %v712_v37, %v746_v33  ;;  %v625_v48 = vmax.f32 %v583_v11, %v617_v45  ;;  %v500_v43 = vmax.f32 %v412_v38, %v474_v28  ;;  %v688_v52 = vsel %vm333_vm0, %v686_v31, %v687_v32  ;;  %v298_v31 = vld [vmem:[%s1048_s22 + $0x2c] sm:$0x1]  ;;  %v928_v11 = vld [vmem:[%s1048_s22 + $0x30] sm:$0xf]  ;;  %v936_v38 = vld [vmem:[%s1048_s22 + $0x34] sm:$0x1] }
  0x25   : > { %v345_v13 = vsel %vm333_vm0, %v343_v41, %v344_v42  ;;  %v476_v33 = vrot.slane %v445_v44, 1  ;;  %v535_v36 = vunpack.c.l.bf16 %v519_v39  ;;  %v577_v60 = vunpack.c.l.bf16 %v942_v46  ;;  %v943_v39 = vld [vmem:[%s1053_s25 + $0x28] sm:$0xf] }
  0x26   : > { %v762_v45 = vpack.c.bf16 %v754_v47, %v754_v47  ;;  %v713_v54 = vmax.f32 %v625_v48, %v685_v7  ;;  %v542_v55 = vmax.f32 %v500_v43, %v534_v16  ;;  %v369_v56 = vmax.f32 %v304_v34, %v345_v13  ;;  %v1168_v16 = vld [vmem:[%s1058_s28 + $0x20] sm:$0xf] }
  0x27   : > { %v477_v59 = vsel %vm333_vm0, %v475_v49, %v476_v33  ;;  %v619_v61 = vunpack.c.l.bf16 %v1148_v50  ;;  %v659_v62 = vunpack.c.l.bf16 %v643_v51  ;;  %v305_v2 = vunpack.c.l.bf16 %v289_v53 }
  0x28   : > { %771 = vst.msk [vmem:[%s1154_s9] sm:$0xf] %vm770_vm1, %v762_v45  ;;  %v755_v63 = vmax.f32 %v713_v54, %v747_v8  ;;  %v584_v0 = vmax.f32 %v542_v55, %v576_v22  ;;  %v413_v1 = vmax.f32 %v369_v56, %v405_v17  ;;  %v313_v7 = vunpack.c.l.bf16 %v297_v57  ;;  %v644_v8 = vld [vmem:[%s1058_s28 + $0x24] sm:$0x1]  ;;  %v520_v22 = vld [vmem:[%s1053_s25 + $0x20] sm:$0xf] }
  0x29   : > { %v689_v4 = vrot.slane %v619_v61, 1  ;;  %v690_v5 = vrot.slane %v659_v62, 1  ;;  %v406_v9 = vunpack.c.l.bf16 %v927_v58  ;;  %v346_v10 = vrot.slane %v305_v2, 1  ;;  %v521_v45 = vld [vmem:[%s1053_s25 + $0x28] sm:$0xf] }
  0x2a   : > { %v763_v12 = vpack.c.bf16 %v755_v63, %v755_v63  ;;  %v626_v14 = vmax.f32 %v584_v0, %v618_v23  ;;  %v501_v15 = vmax.f32 %v413_v1, %v477_v59  ;;  %v347_v18 = vrot.slane %v313_v7, 1  ;;  %v291_v58 = vld [vmem:[%s1048_s22 + $0x30] sm:$0xf]  ;;  %v299_v63 = vld [vmem:[%s1048_s22 + $0x34] sm:$0x1] }
  0x2b   : > { %v446_v19 = vunpack.c.l.bf16 %v935_v3  ;;  %v478_v21 = vrot.slane %v406_v9, 1  ;;  %v691_v26 = vsel %vm333_vm0, %v689_v4, %v690_v5  ;;  %v749_v23 = vunpack.c.l.bf16 %v733_v6  ;;  %v929_v0 = vld [vmem:[%s1048_s22 + $0x38] sm:$0xf]  ;;  %v937_v1 = vld [vmem:[%s1048_s22 + $0x3c] sm:$0x1] }
  0x2c   : > { %772 = vst.msk [vmem:[%s1154_s9 + $0x4] sm:$0xf] %vm770_vm1, %v763_v12  ;;  %v714_v24 = vmax.f32 %v626_v14, %v688_v52  ;;  %v543_v25 = vmax.f32 %v501_v15, %v535_v36  ;;  %v348_v27 = vsel %vm333_vm0, %v346_v10, %v347_v18  ;;  %v620_v29 = vunpack.c.l.bf16 %v1168_v16  ;;  %v645_v52 = vld [vmem:[%s1058_s28 + $0x2c] sm:$0x1]  ;;  %v944_v6 = vld [vmem:[%s1053_s25 + $0x30] sm:$0xf] }
  0x2d   : > { %v479_v28 = vrot.slane %v446_v19, 1  ;;  %v660_v30 = vunpack.c.l.bf16 %v644_v8  ;;  %v370_v35 = vmax.f32 %v305_v2, %v348_v27  ;;  %v536_v37 = vunpack.c.l.bf16 %v520_v22  ;;  %v734_v2 = vld [vmem:[%s1063_s5 + $0x20] sm:$0xf]  ;;  %v735_v16 = vld [vmem:[%s1063_s5 + $0x28] sm:$0xf] }
  0x2e   : > { %v756_v32 = vmax.f32 %v714_v24, %v748_v40  ;;  %v585_v34 = vmax.f32 %v543_v25, %v577_v60  ;;  %v692_v41 = vrot.slane %v620_v29, 1  ;;  %v306_v44 = vunpack.c.l.bf16 %v290_v20  ;;  %v1184_v40 = vld [vmem:[%s1058_s28 + $0x28] sm:$0xf] }
  0x2f   : > { %v480_v17 = vsel %vm333_vm0, %v478_v21, %v479_v28  ;;  %v693_v42 = vrot.slane %v660_v30, 1  ;;  %v414_v48 = vmax.f32 %v370_v35, %v406_v9  ;;  %v314_v43 = vunpack.c.l.bf16 %v298_v31  ;;  %v646_v30 = vld [vmem:[%s1058_s28 + $0x34] sm:$0x1]  ;;  %v300_v35 = vld [vmem:[%s1048_s22 + $0x3c] sm:$0x1] }
  0x30   : > { %v764_v46 = vpack.c.bf16 %v756_v32, %v756_v32  ;;  %v627_v47 = vmax.f32 %v585_v34, %v619_v61  ;;  %v349_v49 = vrot.slane %v306_v44, 1  ;;  %v407_v50 = vunpack.c.l.bf16 %v928_v11  ;;  %v292_v34 = vld [vmem:[%s1048_s22 + $0x38] sm:$0xf] }
  0x31   : > { %v447_v51 = vunpack.c.l.bf16 %v936_v38  ;;  %v502_v33 = vmax.f32 %v414_v48, %v480_v17  ;;  %v578_v36 = vunpack.c.l.bf16 %v943_v39  ;;  %v350_v53 = vrot.slane %v314_v43, 1  ;;  %v522_v17 = vld [vmem:[%s1053_s25 + $0x30] sm:$0xf]  ;;  %v945_v43 = vld [vmem:[%s1053_s25 + $0x38] sm:$0xf] }
  0x32   : > { %773 = vst.msk [vmem:[%s1154_s9 + $0x8] sm:$0xf] %vm770_vm1, %v764_v46  ;;  %v715_v13 = vmax.f32 %v627_v47, %v691_v26  ;;  %v694_v54 = vsel %vm333_vm0, %v692_v41, %v693_v42  ;;  %v481_v55 = vrot.slane %v407_v50, 1  ;;  %v621_v57 = vunpack.c.l.bf16 %v1184_v40  ;;  %v606_v26 = vld [vmem:[%s1058_s28 + $0x30] sm:$0xf] }
  0x33   : > { %v482_v56 = vrot.slane %v447_v51, 1  ;;  %v544_v60 = vmax.f32 %v502_v33, %v536_v37  ;;  %v351_v61 = vsel %vm333_vm0, %v349_v49, %v350_v53  ;;  %v661_v62 = vunpack.c.l.bf16 %v645_v52  ;;  %v930_v37 = vld [vmem:[%s1048_s22 + $0x40] sm:$0xf]  ;;  %v938_v41 = vld [vmem:[%s1048_s22 + $0x44] sm:$0x1] }
  0x34   : > { %v757_v59 = vmax.f32 %v715_v13, %v749_v23  ;;  %v371_v3 = vmax.f32 %v306_v44, %v351_v61  ;;  %v537_v5 = vunpack.c.l.bf16 %v521_v45  ;;  %v695_v7 = vrot.slane %v621_v57, 1 }
  0x35   : > { %v483_v4 = vsel %vm333_vm0, %v481_v55, %v482_v56  ;;  %v586_v12 = vmax.f32 %v544_v60, %v578_v36  ;;  %v696_v14 = vrot.slane %v661_v62, 1  ;;  %v307_v15 = vunpack.c.l.bf16 %v291_v58  ;;  %v607_v55 = vld [vmem:[%s1058_s28 + $0x38] sm:$0xf]  ;;  %v647_v60 = vld [vmem:[%s1058_s28 + $0x3c] sm:$0x1] }
  0x36   : > { %v765_v9 = vpack.c.bf16 %v757_v59, %v757_v59  ;;  %v415_v10 = vmax.f32 %v371_v3, %v407_v50  ;;  %v315_v8 = vunpack.c.l.bf16 %v299_v63  ;;  %v408_v18 = vunpack.c.l.bf16 %v929_v0 }
  0x37   : > { %v448_v19 = vunpack.c.l.bf16 %v937_v1  ;;  %v628_v21 = vmax.f32 %v586_v12, %v620_v29  ;;  %v750_v22 = vunpack.c.l.bf16 %v734_v2  ;;  %v579_v24 = vunpack.c.l.bf16 %v944_v6  ;;  %v523_v1 = vld [vmem:[%s1053_s25 + $0x38] sm:$0xf]  ;;  %v946_v6 = vld [vmem:[%s1053_s25 + $0x40] sm:$0xf] }
  0x38   : > { %774 = vst.msk [vmem:[%s1154_s9 + $0xc] sm:$0xf] %vm770_vm1, %v765_v9  ;;  %v352_v25 = vrot.slane %v307_v15, 1  ;;  %v503_v23 = vmax.f32 %v415_v10, %v483_v4  ;;  %v353_v20 = vrot.slane %v315_v8, 1  ;;  %v484_v27 = vrot.slane %v408_v18, 1 }
  0x39   : > { %v485_v28 = vrot.slane %v448_v19, 1  ;;  %v716_v31 = vmax.f32 %v628_v21, %v694_v54  ;;  %v751_v32 = vunpack.c.l.bf16 %v735_v16  ;;  %v697_v29 = vsel %vm333_vm0, %v695_v7, %v696_v14  ;;  %v736_v4 = vld [vmem:[%s1063_s5 + $0x30] sm:$0xf] }
  0x3a   : > { %v545_v11 = vmax.f32 %v503_v23, %v537_v5  ;;  %v354_v38 = vsel %vm333_vm0, %v352_v25, %v353_v20  ;;  %v622_v39 = vunpack.c.l.bf16 %v606_v26  ;;  %v662_v47 = vunpack.c.l.bf16 %v646_v30  ;;  %v737_v23 = vld [vmem:[%s1063_s5 + $0x38] sm:$0xf] }
  0x3b   : > { %v758_v42 = vmax.f32 %v716_v31, %v750_v22  ;;  %v372_v44 = vmax.f32 %v307_v15, %v354_v38  ;;  %v486_v46 = vsel %vm333_vm0, %v484_v27, %v485_v28  ;;  %v308_v40 = vunpack.c.l.bf16 %v292_v34 }
  0x3c   : > { %v587_v48 = vmax.f32 %v545_v11, %v579_v24  ;;  %v316_v49 = vunpack.c.l.bf16 %v300_v35  ;;  %v409_v50 = vunpack.c.l.bf16 %v930_v37  ;;  %v538_v13 = vunpack.c.l.bf16 %v522_v17 }
  0x3d   : > { %v766_v51 = vpack.c.bf16 %v758_v42, %v758_v42  ;;  %v416_v52 = vmax.f32 %v372_v44, %v408_v18  ;;  %v449_v33 = vunpack.c.l.bf16 %v938_v41  ;;  %v355_v53 = vrot.slane %v308_v40, 1 }
  0x3e   : > { %v629_v36 = vmax.f32 %v587_v48, %v621_v57  ;;  %v356_v45 = vrot.slane %v316_v49, 1  ;;  %v487_v54 = vrot.slane %v409_v50, 1  ;;  %v580_v58 = vunpack.c.l.bf16 %v945_v43 }
  0x3f   : > { %775 = vst.msk [vmem:[%s1154_s9 + $0x10] sm:$0xf] %vm770_vm1, %v766_v51  ;;  %v504_v56 = vmax.f32 %v416_v52, %v486_v46  ;;  %v488_v59 = vrot.slane %v449_v33, 1  ;;  %v698_v62 = vrot.slane %v622_v39, 1  ;;  %v699_v63 = vrot.slane %v662_v47, 1 }
  0x40   : > { %v717_v61 = vmax.f32 %v629_v36, %v697_v29  ;;  %v357_v0 = vsel %vm333_vm0, %v355_v53, %v356_v45  ;;  %v623_v7 = vunpack.c.l.bf16 %v607_v55  ;;  %v663_v9 = vunpack.c.l.bf16 %v647_v60 }
  0x41   : > { %v546_v2 = vmax.f32 %v504_v56, %v538_v13  ;;  %v373_v57 = vmax.f32 %v308_v40, %v357_v0  ;;  %v489_v5 = vsel %vm333_vm0, %v487_v54, %v488_v59  ;;  %v539_v15 = vunpack.c.l.bf16 %v523_v1 }
  0x42   : > { %v759_v3 = vmax.f32 %v717_v61, %v751_v32  ;;  %v700_v16 = vsel %vm333_vm0, %v698_v62, %v699_v63  ;;  %v752_v18 = vunpack.c.l.bf16 %v736_v4  ;;  %v581_v21 = vunpack.c.l.bf16 %v946_v6 }
  0x43   : > { %v588_v12 = vmax.f32 %v546_v2, %v580_v58  ;;  %v417_v14 = vmax.f32 %v373_v57, %v409_v50  ;;  %v701_v22 = vrot.slane %v623_v7, 1  ;;  %v702_v24 = vrot.slane %v663_v9, 1 }
  0x44   : > { %v767_v10 = vpack.c.bf16 %v759_v3, %v759_v3  ;;  %v753_v32 = vunpack.c.l.bf16 %v737_v23 }
  0x45   : > { %v630_v8 = vmax.f32 %v588_v12, %v622_v39  ;;  %v505_v19 = vmax.f32 %v417_v14, %v489_v5  ;;  %v703_v28 = vsel %vm333_vm0, %v701_v22, %v702_v24 }
  0x46   : > { %776 = vst.msk [vmem:[%s1154_s9 + $0x14] sm:$0xf] %vm770_vm1, %v767_v10 }
  0x47   : > { %v718_v25 = vmax.f32 %v630_v8, %v700_v16  ;;  %v547_v26 = vmax.f32 %v505_v19, %v539_v15 }
  0x49   : > { %v760_v20 = vmax.f32 %v718_v25, %v752_v18  ;;  %v589_v27 = vmax.f32 %v547_v26, %v581_v21 }
  0x4b   : > { %v768_v30 = vpack.c.bf16 %v760_v20, %v760_v20  ;;  %v631_v31 = vmax.f32 %v589_v27, %v623_v7 }
  0x4d   : > { %777 = vst.msk [vmem:[%s1154_s9 + $0x18] sm:$0xf] %vm770_vm1, %v768_v30  ;;  %v719_v34 = vmax.f32 %v631_v31, %v703_v28 }
  0x4f   : > { %v761_v35 = vmax.f32 %v719_v34, %v753_v32 }
  0x51   : > { %v769_v37 = vpack.c.bf16 %v761_v35, %v761_v35 }
  0x53   : > { %778 = vst.msk [vmem:[%s1154_s9 + $0x1c] sm:$0xf] %vm770_vm1, %v769_v37 }
  0x54 PF: > { %s14_s17 = sadd.s32 1, %s997_s17   ;;  %s1246_s15 = smov %s993_s16 }
  0x55   : > { %p11_p5 = scmp.ge.s32.totalorder %s14_s17, 4   ;;  %s1247_s16 = smov %s1249_s18 }
  0x57   :  { %13 = sbr.rel (!%p11_p5) target bundleno = 2 (0x2), region = 81 }

// kernel: resnet18_features.35
= control target key start
LH: loop header
LB: loop body
LE: loop exit
PB: predicated region body
PF: predicated region fallthrough
CT: control target
= control target key end

     0   :  { %s161_s0 = inlined_call_operand.vmem [shape: f32[64,128], index: 0, kind: input, shape index: {}]   ;;  %s162_s1 = inlined_call_operand.vmem [shape: f32[1,128], index: 1, kind: input, shape index: {}]   ;;  %s163_s2 = inlined_call_operand.vmem [shape: f32[1,128], index: 2, kind: input, shape index: {}]   ;;  %s164_s3 = inlined_call_operand.vmem [shape: bf16[64,128], index: 3, kind: output, shape index: {}]  }
   0x1   :  { %v14_v0 = vld [vmem:[%s161_s0] sm:$0xff]  ;;  %v15_v1 = vld [vmem:[%s161_s0 + $0x8] sm:$0xff]  ;;  %v16_v4 = vld [vmem:[%s161_s0 + $0x10] sm:$0xff] }
   0x2   :  { %v97_v2 = vld [vmem:[%s162_s1] ss:$0 sm:$0xff]  ;;  %v17_v5 = vld [vmem:[%s161_s0 + $0x18] sm:$0xff]  ;;  %v19_v11 = vld [vmem:[%s161_s0 + $0x28] sm:$0xff] }
   0x3   :  { %v98_v3 = vld [vmem:[%s163_s2] ss:$0 sm:$0xff]  ;;  %v26_v7 = vmul.f32 %v97_v2, %v14_v0  ;;  %v27_v8 = vmul.f32 %v97_v2, %v15_v1  ;;  %v28_v9 = vmul.f32 %v97_v2, %v16_v4  ;;  %v29_v10 = vmul.f32 %v97_v2, %v17_v5  ;;  %v20_v12 = vld [vmem:[%s161_s0 + $0x30] sm:$0xff]  ;;  %v21_v13 = vld [vmem:[%s161_s0 + $0x38] sm:$0xff] }
   0x4   :  { %v18_v6 = vld [vmem:[%s161_s0 + $0x20] sm:$0xff]  ;;  %v31_v15 = vmul.f32 %v97_v2, %v19_v11  ;;  %v32_v16 = vmul.f32 %v97_v2, %v20_v12  ;;  %v33_v17 = vmul.f32 %v97_v2, %v21_v13 }
   0x5   :  { %v30_v14 = vmul.f32 %v97_v2, %v18_v6  ;;  %v38_v18 = vadd.f32 %v98_v3, %v26_v7  ;;  %v39_v19 = vadd.f32 %v98_v3, %v27_v8  ;;  %v40_v20 = vadd.f32 %v98_v3, %v28_v9 }
   0x6   :  { %v41_v21 = vadd.f32 %v98_v3, %v29_v10  ;;  %v43_v23 = vadd.f32 %v98_v3, %v31_v15  ;;  %v44_v24 = vadd.f32 %v98_v3, %v32_v16  ;;  %v45_v25 = vadd.f32 %v98_v3, %v33_v17 }
   0x7   :  { %v42_v22 = vadd.f32 %v98_v3, %v30_v14  ;;  %v46_v26 = vmax.f32 %v38_v18, 0.0  ;;  %v47_v27 = vmax.f32 %v39_v19, 0.0  ;;  %v48_v28 = vmax.f32 %v40_v20, 0.0 }
   0x8   :  { %v49_v29 = vmax.f32 %v41_v21, 0.0  ;;  %v51_v31 = vmax.f32 %v43_v23, 0.0  ;;  %v52_v32 = vmax.f32 %v44_v24, 0.0  ;;  %v53_v33 = vmax.f32 %v45_v25, 0.0 }
   0x9   :  { %v50_v30 = vmax.f32 %v42_v22, 0.0  ;;  %v77_v34 = vpack.c.bf16 %v47_v27, %v46_v26 }
   0xa   :  { %v82_v35 = vpack.c.bf16 %v49_v29, %v48_v28  ;;  %v92_v37 = vpack.c.bf16 %v53_v33, %v52_v32 }
   0xb   :  { %v87_v36 = vpack.c.bf16 %v51_v31, %v50_v30  ;;  %78 = vst [vmem:[%s164_s3] sm:$0xff] %v77_v34  }
   0xc   :  { %94 = vst [vmem:[%s164_s3 + $0x8] sm:$0xff] %v82_v35  }
   0xd   :  { %95 = vst [vmem:[%s164_s3 + $0x10] sm:$0xff] %v87_v36  }
   0xe   :  { %96 = vst [vmem:[%s164_s3 + $0x18] sm:$0xff] %v92_v37  }

// kernel: resnet18_features.34
= control target key start
LH: loop header
LB: loop body
LE: loop exit
PB: predicated region body
PF: predicated region fallthrough
CT: control target
= control target key end

     0   :  { %s1265_s12 = smov 0   ;;  %s1267_s13 = smov 0   ;;  %s1468_s0 = inlined_call_operand.vmem [shape: bf16[2,10,10,64], index: 0, kind: input, shape index: {}]   ;;  %s1469_s1 = inlined_call_operand.vmem [shape: bf16[3,3,64,64], index: 1, kind: input, shape index: {}]   ;;  %s1470_s2 = inlined_call_operand.vmem [shape: f32[2,8,8,64], index: 2, kind: output, shape index: {0}]   ;;  %s1471_s3 = inlined_call_operand.vmem [shape: f32[2,8,2,64], index: 3, kind: output, shape index: {1}]  }
   0x1   :  { %s1269_s14 = smov 0   ;;  %s1271_s15 = smov 0  }
   0x2   :  { %s1273_s16 = smov 0  }
   0x3 LB: > { %s23_s17 = sadd.s32 1, %s1235_s14  ;;  %s26_s18 = sadd.s32 1, %s1239_s15  ;;  %s1243_s16 = sphi %s1273_s16, %s14_s16   ;;  %s1239_s15 = sphi %s1271_s15, %s1475_s15   ;;  %s1235_s14 = sphi %s1269_s14, %s1474_s14   ;;  %s1231_s13 = sphi %s1267_s13, %s1473_s13   ;;  %s1227_s12 = sphi %s1265_s12, %s1472_s12  }
   0x4   : > { %p24_p0 = scmp.ge.s32.totalorder %s23_s17, 8  ;;  %p890_p1 = scmp.ge.s32.totalorder %s1243_s16, 1 }
   0x5   : > { %p156_p2 = scmp.lt.s32.totalorder %s1243_s16, 17 }
   0x6   : > { %s1477_s17 = smov (%p24_p0, %s23_s17), 0  ;;  %s1479_s18 = smov (!%p24_p0, %s26_s18), %s1239_s15 }
   0x7   : > { %p157_p3 = pnand %p890_p1, %p156_p2  ;;  %p28_p4 = scmp.ge.s32.totalorder %s1479_s18, 2 }
   0x8   : > { %p191_p5 = scmp.lt.s32.totalorder (!%p157_p3), %s1231_s13, 1  ;;  %s1127_s9 = sshll.u32 (!%p157_p3), %s1227_s12, 3 }
   0x9   : > { %s1481_s18 = smov (%p28_p4, %s1479_s18), 0  ;;  %160 = sbr.rel (%p157_p3) target bundleno = 208 (0xd0), region = 28 }
   0xa   : > { %p198_p6 = scmp.lt.s32.totalorder (!%p157_p3), %s1227_s12, 7 }
   0xe   : > { %v1139_v0 = vld [vmem:[%s1469_s1 + $0x58] sm:$0xff]  ;;  %v1138_v4 = vld [vmem:[%s1469_s1 + $0x50] sm:$0xff]  ;;  %s1483_s13 = smov (!%p191_p5, %s1231_s13), 1  ;;  %v1137_v8 = vld [vmem:[%s1469_s1 + $0x48] sm:$0xff]  ;;  %vm271_vm0 = vcmask 523264   ;;  %s1485_s12 = smov (!%p198_p6, %s1227_s12), 7 }
   0xf   : > { %v1135_v1 = vld [vmem:[%s1469_s1 + $0x38] sm:$0xff]  ;;  %373 = vmatpush.bf16.msra.mxu2 %v1139_v0  ;;  %v1134_v5 = vld [vmem:[%s1469_s1 + $0x30] sm:$0xff]  ;;  %s1164_s8 = smul.u32 80, %s1483_s13  ;;  %v1133_v9 = vld [vmem:[%s1469_s1 + $0x28] sm:$0xff]  ;;  %vm747_vm1 = vcmask 1040384   ;;  %vm749_vm2 = vcmask 517120  }
  0x10   : > { %v1131_v2 = vld [vmem:[%s1469_s1 + $0x18] sm:$0xff]  ;;  %279 = vmatpush.bf16.msra.mxu0 %v1135_v1  ;;  %v1130_v6 = vld [vmem:[%s1469_s1 + $0x10] sm:$0xff]  ;;  %v1129_v10 = vld [vmem:[%s1469_s1 + $0x8] sm:$0xff] }
  0x11   : > { %v1143_v3 = vld [vmem:[%s1469_s1 + $0x78] sm:$0xff]  ;;  %319 = vmatpush.bf16.msra.mxu1 %v1131_v2  ;;  %v1142_v7 = vld [vmem:[%s1469_s1 + $0x70] sm:$0xff]  ;;  %s195_s23 = scalar_lea.vmem %s1468_s0, %s1164_s8  ;;  %v1141_v11 = vld [vmem:[%s1469_s1 + $0x68] sm:$0xff] }
  0x12   : > { %428 = vmatpush.bf16.msra.mxu3 %v1143_v3  ;;  %s1340_s28 = scalar_lea.vmem %s195_s23, %s1127_s9  ;;  %v1136_v18 = vld [vmem:[%s1469_s1 + $0x40] sm:$0xff]  ;;  %v1147_v24 = vld [vmem:[%s1469_s1 + $0x98] sm:$0xff]  ;;  %v1146_v41 = vld [vmem:[%s1469_s1 + $0x90] sm:$0xff] }
  0x13   : > { %374 = vmatpush.bf16.msra.mxu2 %v1138_v4  ;;  %v225_v12 = vld [vmem:[%s1340_s28 + $0x4] sm:$0x1]  ;;  %v328_v13 = vld [vmem:[%s1340_s28] sm:$0xe]  ;;  %v1155_v25 = vld [vmem:[%s1469_s1 + $0xd8] sm:$0xff] }
  0x14   : > { %280 = vmatpush.bf16.msra.mxu0 %v1134_v5  ;;  %v216_v14 = vld [vmem:[%s1340_s28] sm:$0xf]  ;;  %v238_v15 = vunpack.c.l.b16 %v225_v12  ;;  %v339_v16 = vunpack.c.l.b16 %v328_v13  ;;  %v992_v26 = vld [vmem:[%s1340_s28 + $0x8] sm:$0xf]  ;;  %v993_v27 = vld [vmem:[%s1340_s28 + $0xc] sm:$0x1] }
  0x15   : > { %320 = vmatpush.bf16.msra.mxu1 %v1130_v6  ;;  %v237_v17 = vunpack.c.l.b16 %v216_v14  ;;  %v1132_v19 = vld [vmem:[%s1469_s1 + $0x20] sm:$0xff]  ;;  %v1159_v31 = vld [vmem:[%s1469_s1 + $0xf8] sm:$0xff]  ;;  %v1072_v32 = vld [vmem:[%s1340_s28 + $0x10] sm:$0xf]  ;;  %v451_v38 = vunpack.c.l.b16 %v992_v26  ;;  %v452_v39 = vunpack.c.l.b16 %v993_v27 }
  0x16   : > { %429 = vmatpush.bf16.msra.mxu3 %v1142_v7  ;;  %v1128_v20 = vld [vmem:[%s1469_s1] sm:$0xff]  ;;  %v340_v22 = vpack.c.b16 %v238_v15, %v339_v16  ;;  %v1370_v33 = vld [vmem:[%s1340_s28 + $0x14] sm:$0x1]  ;;  %v625_v34 = vunpack.c.l.b16 %v1072_v32  ;;  %v966_v36 = vld [vmem:[%s1340_s28 + $0x8] sm:$0xf] }
  0x17   : > { %375 = vmatpush.bf16.msra.mxu2 %v1137_v8  ;;  %v1140_v21 = vld [vmem:[%s1469_s1 + $0x60] sm:$0xff]  ;;  %v239_v23 = vpack.c.b16 %v238_v15, %v237_v17  ;;  %v1151_v37 = vld [vmem:[%s1469_s1 + $0xb8] sm:$0xff]  ;;  %v626_v40 = vunpack.c.l.b16 %v1370_v33  ;;  %v1154_v42 = vld [vmem:[%s1469_s1 + $0xd0] sm:$0xff]  ;;  %v453_v47 = vpack.c.b16 %v452_v39, %v451_v38 }
  0x18   : > { %281 = vmatpush.bf16.msra.mxu0 %v1133_v9  ;;  %v341_v28 = vrot.slane %v340_v22, 1  ;;  %v1158_v44 = vld [vmem:[%s1469_s1 + $0xf0] sm:$0xff]  ;;  %v1019_v48 = vld [vmem:[%s1340_s28 + $0x8] sm:$0xe]  ;;  %v1144_v56 = vld [vmem:[%s1469_s1 + $0x80] sm:$0xff] }
  0x19   : > { %321 = vmatpush.bf16.msra.mxu1 %v1129_v10  ;;  %v241_v29 = vshrl.u32 %v239_v23, 16  ;;  %v243_v30 = vshll.u32 %v239_v23, 16  ;;  %v627_v45 = vpack.c.b16 %v626_v40, %v625_v34  ;;  %v1150_v46 = vld [vmem:[%s1469_s1 + $0xb0] sm:$0xff]  ;;  %v1145_v49 = vld [vmem:[%s1469_s1 + $0x88] sm:$0xff]  ;;  %v513_v53 = vunpack.c.l.b16 %v1019_v48  ;;  %v1152_v57 = vld [vmem:[%s1469_s1 + $0xc0] sm:$0xff] }
  0x1a   : > { %430 = vmatpush.bf16.msra.mxu3 %v1141_v11  ;;  %v1153_v50 = vld [vmem:[%s1469_s1 + $0xc8] sm:$0xff]  ;;  %v457_v55 = vshll.u32 %v453_v47, 16  ;;  %v1156_v58 = vld [vmem:[%s1469_s1 + $0xe0] sm:$0xff]  ;;  %v1163_v59 = vld [vmem:[%s1469_s1 + $0x118] sm:$0xff]  ;;  %v455_v0 = vshrl.u32 %v453_v47, 16 }
  0x1b   : > { %376 = vmatpush.bf16.msra.mxu2 %v1136_v18  ;;  %v245_v35 = vrot.slane %v243_v30, 1  ;;  %v1157_v51 = vld [vmem:[%s1469_s1 + $0xe8] sm:$0xff]  ;;  %v631_v52 = vshll.u32 %v627_v45, 16  ;;  %v629_v60 = vshrl.u32 %v627_v45, 16  ;;  %v514_v62 = vpack.c.b16 %v452_v39, %v513_v53  ;;  %v1148_v63 = vld [vmem:[%s1469_s1 + $0xa0] sm:$0xff]  ;;  %v1162_v2 = vld [vmem:[%s1469_s1 + $0x110] sm:$0xff] }
  0x1c   : > { %282 = vmatpush.bf16.msra.mxu0 %v1132_v19  ;;  %v1149_v54 = vld [vmem:[%s1469_s1 + $0xa8] sm:$0xff]  ;;  %v459_v1 = vrot.slane %v457_v55, 1  ;;  %v1046_v3 = vld [vmem:[%s1340_s28 + $0x10] sm:$0xf]  ;;  %v1160_v9 = vld [vmem:[%s1469_s1 + $0x100] sm:$0xff] }
  0x1d   : > { %322 = vmatpush.bf16.msra.mxu1 %v1128_v20  ;;  %v246_v43 = vor.u32 %v245_v35, %v241_v29  ;;  %v633_v61 = vrot.slane %v631_v52, 1  ;;  %v515_v5 = vrot.slane %v514_v62, 1  ;;  %v1161_v7 = vld [vmem:[%s1469_s1 + $0x108] sm:$0xff]  ;;  %v1099_v8 = vld [vmem:[%s1340_s28 + $0x10] sm:$0xe]  ;;  %s892_s28 = sshll.u32 %s1483_s13, 3 }
  0x1e   : > { %431 = vmatpush.bf16.msra.mxu3 %v1140_v21  ;;  %964 = vmatmul.msk.bf16.vlgmr.msra.gmra.mxu2 %vm271_vm0, %v341_v28  ;;  %v460_v6 = vor.u32 %v459_v1, %v455_v0  ;;  %v687_v10 = vunpack.c.l.b16 %v1099_v8  ;;  %s201_s19 = sadd.s32 %s892_s28, %s1485_s12 }
  0x1f   : > { %602 = vmatpush.bf16.msrb.mxu2 %v1155_v25  ;;  %922 = vmatmul.msk.bf16.vlgmr.msra.gmra.mxu0 %vm271_vm0, %v246_v43  ;;  %v634_v4 = vor.u32 %v633_v61, %v629_v60  ;;  %s893_s20 = sshll.u32 %s201_s19, 3  ;;  %s895_s12 = sshll.u32 %s201_s19, 1 }
  0x20   : > { %492 = vmatpush.bf16.msrb.mxu0 %v1147_v24  ;;  %939 = vmatmul.msk.bf16.vlgmr.msra.gmra.mxu1 %vm271_vm0, %v216_v14  ;;  %v688_v11 = vpack.c.b16 %v626_v40, %v687_v10  ;;  %s203_s23 = scalar_lea.vmem %s1470_s2, %s893_s20  ;;  %s211_s25 = scalar_lea.vmem %s1471_s3, %s895_s12 }
  0x21   : > { %991 = vmatmul.msk.bf16.vlgmr.msra.gmra.mxu3 %vm271_vm0, %v966_v36  ;;  %547 = vmatpush.bf16.msrb.mxu1 %v1151_v37 }
  0x22   : > { %666 = vmatpush.bf16.msrb.mxu3 %v1159_v31  ;;  %v689_v12 = vrot.slane %v688_v11, 1 }
  0x23   : > { %603 = vmatpush.bf16.msrb.mxu2 %v1154_v42 }
  0x24   : > { %493 = vmatpush.bf16.msrb.mxu0 %v1146_v41 }
  0x25   : > { %548 = vmatpush.bf16.msrb.mxu1 %v1150_v46 }
  0x26   : > { %667 = vmatpush.bf16.msrb.mxu3 %v1158_v44 }
  0x27   : > { %604 = vmatpush.bf16.msrb.mxu2 %v1153_v50 }
  0x28   : > { %494 = vmatpush.bf16.msrb.mxu0 %v1145_v49 }
  0x29   : > { %549 = vmatpush.bf16.msrb.mxu1 %v1149_v54 }
  0x2a   : > { %668 = vmatpush.bf16.msrb.mxu3 %v1157_v51 }
  0x2b   : > { %605 = vmatpush.bf16.msrb.mxu2 %v1152_v57 }
  0x2c   : > { %495 = vmatpush.bf16.msrb.mxu0 %v1144_v56 }
  0x2d   : > { %550 = vmatpush.bf16.msrb.mxu1 %v1148_v63 }
  0x2e   : > { %669 = vmatpush.bf16.msrb.mxu3 %v1156_v58  ;;  %1071 = vmatmul.msk.bf16.vlgmr.msrb.gmra.mxu2 %vm271_vm0, %v1046_v3 }
  0x2f   : > { %1018 = vmatmul.msk.bf16.vlgmr.msrb.gmra.mxu0 %vm271_vm0, %v460_v6 }
  0x30   : > { %721 = vmatpush.bf16.msra.mxu0 %v1163_v59  ;;  %1044 = vmatmul.msk.bf16.vlgmr.msrb.gmra.mxu1 %vm271_vm0, %v515_v5 }
  0x31   : > { %1098 = vmatmul.msk.bf16.vlgmr.msrb.gmra.mxu3 %vm271_vm0, %v634_v4 }
  0x34   : > { %722 = vmatpush.bf16.msra.mxu0 %v1162_v2 }
  0x38   : > { %723 = vmatpush.bf16.msra.mxu0 %v1161_v7 }
  0x3c   : > { %724 = vmatpush.bf16.msra.mxu0 %v1160_v9 }
  0x3f   : > { %1124 = vmatmul.msk.bf16.vlgmr.msra.gmra.mxu0 %vm271_vm0, %v689_v12 }
  0x9c   : > { %v284_v14 = vpop.f32.mrf.mxu0 }
  0x9d   : > { %v324_v13 = vpop.f32.mrf.mxu1 }
  0x9e   : > { %v325_v19 = vadd.f32 %v324_v13, %v284_v14 }
  0xa1   : > { %v378_v15 = vpop.f32.mrf.mxu2 }
  0xa2   : > { %v382_v21 = vadd.f32 %v378_v15, %v325_v19 }
  0xa4   : > { %v433_v16 = vpop.f32.mrf.mxu3  ;;  %v286_v18 = vpop.f32.mrf.mxu0 }
  0xa5   : > { %v326_v17 = vpop.f32.mrf.mxu1  ;;  %v437_v25 = vadd.f32 %v433_v16, %v382_v21 }
  0xa9   : > { %v380_v20 = vpop.f32.mrf.mxu2 }
  0xac   : > { %v435_v22 = vpop.f32.mrf.mxu3  ;;  %v497_v24 = vpop.f32.mrf.mxu0 }
  0xad   : > { %v552_v23 = vpop.f32.mrf.mxu1  ;;  %v501_v26 = vadd.f32 %v497_v24, %v437_v25 }
  0xaf   : > { %v556_v29 = vadd.f32 %v552_v23, %v501_v26 }
  0xb1   : > { %v607_v27 = vpop.f32.mrf.mxu2 }
  0xb2   : > { %v611_v32 = vadd.f32 %v607_v27, %v556_v29 }
  0xb4   : > { %v671_v28 = vpop.f32.mrf.mxu3  ;;  %v499_v31 = vpop.f32.mrf.mxu0 }
  0xb5   : > { %v554_v30 = vpop.f32.mrf.mxu1  ;;  %v675_v35 = vadd.f32 %v671_v28, %v611_v32 }
  0xb9   : > { %v609_v33 = vpop.f32.mrf.mxu2 }
  0xbc   : > { %v673_v34 = vpop.f32.mrf.mxu3  ;;  %v726_v36 = vpop.f32.mrf.mxu0 }
  0xbd   : > { %v730_v37 = vadd.f32 %v726_v36, %v675_v35 }
  0xbf   : > { %731 = vst.msk [vmem:[%s203_s23] sm:$0xff] %vm271_vm0, %v730_v37  ;;  %v732_v38 = vsel %vm271_vm0, %v730_v37, 0.0  ;;  %v739_v39 = vmul.f32 %v730_v37, %v730_v37 }
  0xc0   : > { %v733_v40 = vrot.slane %v732_v38, 4 }
  0xc1   : > { %v740_v41 = vsel %vm271_vm0, %v739_v39, 0.0 }
  0xc2   : > { %v734_v42 = vadd.f32 %v733_v40, %v732_v38  ;;  %v741_v43 = vrot.slane %v740_v41, 4 }
  0xc4   : > { %v735_v44 = vrot.slane %v734_v42, 2  ;;  %v742_v45 = vadd.f32 %v741_v43, %v740_v41  ;;  %v728_v46 = vpop.f32.mrf.mxu0 }
  0xc6   : > { %v736_v47 = vadd.f32 %v735_v44, %v734_v42  ;;  %v743_v48 = vrot.slane %v742_v45, 2 }
  0xc8   : > { %v737_v49 = vrot.slane %v736_v47, 1  ;;  %v744_v50 = vadd.f32 %v743_v48, %v742_v45 }
  0xca   : > { %v745_v51 = vrot.slane %v744_v50, 1  ;;  %v738_v52 = vadd.f32 %v737_v49, %v736_v47 }
  0xcc   : > { %v746_v53 = vadd.f32 %v745_v51, %v744_v50 }
  0xce   : > { %v748_v54 = vsel %vm747_vm1, %v738_v52, %v746_v53 }
  0xcf   : > { %750 = vst.msk [vmem:[%s211_s25] sm:$0x3] %vm749_vm2, %v748_v54 }
  0xd0 PF: > { %s14_s16 = sadd.s32 1, %s1243_s16   ;;  %s1472_s12 = smov %s1235_s14 }
  0xd1   : > { %p11_p7 = scmp.ge.s32.totalorder %s14_s16, 18   ;;  %s1473_s13 = smov %s1239_s15 }
  0xd2   : > { %s1474_s14 = smov %s1477_s17  ;;  %s1475_s15 = smov %s1481_s18 }
  0xd3   :  { %13 = sbr.rel (!%p11_p7) target bundleno = 3 (0x3), region = 81 }

// kernel: resnet18_features.37
= control target key start
LH: loop header
LB: loop body
LE: loop exit
PB: predicated region body
PF: predicated region fallthrough
CT: control target
= control target key end

     0   :  { %s224_s0 = inlined_call_operand.vmem [shape: f32[64,128], index: 0, kind: input, shape index: {}]   ;;  %s225_s1 = inlined_call_operand.vmem [shape: f32[1,128], index: 1, kind: input, shape index: {}]   ;;  %s226_s2 = inlined_call_operand.vmem [shape: f32[1,128], index: 2, kind: input, shape index: {}]   ;;  %s227_s3 = inlined_call_operand.vmem [shape: bf16[64,128], index: 3, kind: input, shape index: {}]   ;;  %s228_s4 = inlined_call_operand.vmem [shape: bf16[64,128], index: 4, kind: output, shape index: {}]  }
   0x1   :  { %v17_v0 = vld [vmem:[%s224_s0] sm:$0xff]  ;;  %v18_v1 = vld [vmem:[%s224_s0 + $0x8] sm:$0xff]  ;;  %v19_v5 = vld [vmem:[%s224_s0 + $0x10] sm:$0xff] }
   0x2   :  { %v143_v2 = vld [vmem:[%s225_s1] ss:$0 sm:$0xff]  ;;  %v20_v6 = vld [vmem:[%s224_s0 + $0x18] sm:$0xff]  ;;  %v137_v11 = vld [vmem:[%s227_s3 + $0x8] sm:$0xff]  }
   0x3   :  { %v144_v3 = vld [vmem:[%s226_s2] ss:$0 sm:$0xff]  ;;  %v29_v7 = vmul.f32 %v143_v2, %v17_v0  ;;  %v30_v8 = vmul.f32 %v143_v2, %v18_v1  ;;  %v22_v13 = vld [vmem:[%s224_s0 + $0x28] sm:$0xff]  ;;  %v31_v14 = vmul.f32 %v143_v2, %v19_v5  ;;  %v32_v15 = vmul.f32 %v143_v2, %v20_v6  ;;  %v138_v18 = vld [vmem:[%s227_s3 + $0x10] sm:$0xff]  }
   0x4   :  { %v102_v4 = vld [vmem:[%s227_s3] sm:$0xff]   ;;  %v107_v16 = vunpack.c.l.bf16 %v137_v11  ;;  %v108_v17 = vunpack.c.h.bf16 %v137_v11  ;;  %v34_v22 = vmul.f32 %v143_v2, %v22_v13  ;;  %v23_v23 = vld [vmem:[%s224_s0 + $0x30] sm:$0xff]  ;;  %v24_v24 = vld [vmem:[%s224_s0 + $0x38] sm:$0xff]  ;;  %v111_v27 = vunpack.c.l.bf16 %v138_v18 }
   0x5   :  { %v103_v9 = vunpack.c.l.bf16 %v102_v4  ;;  %v104_v10 = vunpack.c.h.bf16 %v102_v4  ;;  %v21_v12 = vld [vmem:[%s224_s0 + $0x20] sm:$0xff]  ;;  %v41_v19 = vadd.f32 %v144_v3, %v29_v7  ;;  %v42_v20 = vadd.f32 %v144_v3, %v30_v8  ;;  %v139_v37 = vld [vmem:[%s227_s3 + $0x18] sm:$0xff]  }
   0x6   :  { %v33_v21 = vmul.f32 %v143_v2, %v21_v12  ;;  %v43_v25 = vadd.f32 %v144_v3, %v31_v14  ;;  %v44_v26 = vadd.f32 %v144_v3, %v32_v15  ;;  %v112_v28 = vunpack.c.h.bf16 %v138_v18 }
   0x7   :  { %v65_v29 = vadd.f32 %v103_v9, %v41_v19  ;;  %v66_v30 = vadd.f32 %v104_v10, %v42_v20  ;;  %v46_v32 = vadd.f32 %v144_v3, %v34_v22  ;;  %v35_v35 = vmul.f32 %v143_v2, %v23_v23 }
   0x8   :  { %v45_v31 = vadd.f32 %v144_v3, %v33_v21  ;;  %v67_v33 = vadd.f32 %v107_v16, %v43_v25  ;;  %v68_v34 = vadd.f32 %v108_v17, %v44_v26  ;;  %v36_v36 = vmul.f32 %v143_v2, %v24_v24 }
   0x9   :  { %v73_v38 = vmax.f32 %v65_v29, 0.0  ;;  %v74_v39 = vmax.f32 %v66_v30, 0.0  ;;  %v70_v41 = vadd.f32 %v112_v28, %v46_v32  ;;  %v47_v44 = vadd.f32 %v144_v3, %v35_v35 }
   0xa   :  { %v69_v40 = vadd.f32 %v111_v27, %v45_v31  ;;  %v75_v42 = vmax.f32 %v67_v33, 0.0  ;;  %v76_v43 = vmax.f32 %v68_v34, 0.0  ;;  %v48_v45 = vadd.f32 %v144_v3, %v36_v36 }
   0xb   :  { %v120_v46 = vpack.c.bf16 %v74_v39, %v73_v38  ;;  %v78_v48 = vmax.f32 %v70_v41, 0.0  ;;  %v115_v49 = vunpack.c.l.bf16 %v139_v37  ;;  %v116_v51 = vunpack.c.h.bf16 %v139_v37 }
   0xc   :  { %v77_v47 = vmax.f32 %v69_v40, 0.0  ;;  %v125_v50 = vpack.c.bf16 %v76_v43, %v75_v42 }
   0xd   :  { %121 = vst [vmem:[%s228_s4] sm:$0xff] %v120_v46   ;;  %v71_v53 = vadd.f32 %v115_v49, %v47_v44  ;;  %v72_v54 = vadd.f32 %v116_v51, %v48_v45 }
   0xe   :  { %v130_v52 = vpack.c.bf16 %v78_v48, %v77_v47  ;;  %140 = vst [vmem:[%s228_s4 + $0x8] sm:$0xff] %v125_v50  }
   0xf   :  { %v79_v55 = vmax.f32 %v71_v53, 0.0  ;;  %v80_v56 = vmax.f32 %v72_v54, 0.0 }
  0x10   :  { %141 = vst [vmem:[%s228_s4 + $0x10] sm:$0xff] %v130_v52  }
  0x11   :  { %v135_v57 = vpack.c.bf16 %v80_v56, %v79_v55 }
  0x13   :  { %142 = vst [vmem:[%s228_s4 + $0x18] sm:$0xff] %v135_v57  }

// kernel: resnet18_features.44
= control target key start
LH: loop header
LB: loop body
LE: loop exit
PB: predicated region body
PF: predicated region fallthrough
CT: control target
= control target key end

     0   :  { %s550_s12 = smov 0   ;;  %s552_s13 = smov 0   ;;  %s621_s0 = inlined_call_operand.vmem [shape: bf16[2,4,4,64], index: 0, kind: input, shape index: {}]   ;;  %s622_s1 = inlined_call_operand.vmem [shape: bf16[1,1,64,128], index: 1, kind: input, shape index: {}]   ;;  %s623_s2 = inlined_call_operand.vmem [shape: f32[2,4,4,128], index: 2, kind: output, shape index: {0}]   ;;  %s624_s3 = inlined_call_operand.vmem [shape: f32[2,4,2,128], index: 3, kind: output, shape index: {1}]  }
   0x1   :  { %s554_s14 = smov 0   ;;  %s556_s15 = smov 0  }
   0x2   :  { %s558_s16 = smov 0  }
   0x3 LB: > { %s23_s17 = sadd.s32 1, %s520_s14  ;;  %s26_s18 = sadd.s32 1, %s524_s15  ;;  %s528_s16 = sphi %s558_s16, %s14_s16   ;;  %s524_s15 = sphi %s556_s15, %s628_s15   ;;  %s520_s14 = sphi %s554_s14, %s627_s14   ;;  %s516_s13 = sphi %s552_s13, %s626_s13   ;;  %s512_s12 = sphi %s550_s12, %s625_s12  }
   0x4   : > { %p24_p0 = scmp.ge.s32.totalorder %s23_s17, 4  ;;  %p418_p1 = scmp.ge.s32.totalorder %s528_s16, 1 }
   0x5   : > { %p156_p2 = scmp.lt.s32.totalorder %s528_s16, 9 }
   0x6   : > { %s630_s17 = smov (%p24_p0, %s23_s17), 0  ;;  %s632_s18 = smov (!%p24_p0, %s26_s18), %s524_s15 }
   0x7   : > { %p157_p3 = pnand %p418_p1, %p156_p2  ;;  %p28_p4 = scmp.ge.s32.totalorder %s632_s18, 2 }
   0x8   : > { %p191_p5 = scmp.lt.s32.totalorder (!%p157_p3), %s516_s13, 1  ;;  %s425_s29 = sshll.u32 (!%p157_p3), %s512_s12, 1 }
   0x9   : > { %s634_s18 = smov (%p28_p4, %s632_s18), 0  ;;  %160 = sbr.rel (%p157_p3) target bundleno = 173 (0xad), region = 28 }
   0xa   : > { %p198_p6 = scmp.lt.s32.totalorder (!%p157_p3), %s512_s12, 3 }
   0xe   : > { %v449_v0 = vld [vmem:[%s622_s1 + $0x18] sm:$0xff]  ;;  %v448_v1 = vld [vmem:[%s622_s1 + $0x10] sm:$0xff]  ;;  %s636_s13 = smov (!%p191_p5, %s516_s13), 1  ;;  %v447_v2 = vld [vmem:[%s622_s1 + $0x8] sm:$0xff]  ;;  %vm248_vm0 = vcmask 523264   ;;  %s638_s12 = smov (!%p198_p6, %s512_s12), 3 }
   0xf   : > { %256 = vmatpush.bf16.msra.mxu0 %v449_v0  ;;  %s445_s23 = sshll.u32 %s636_s13, 3  ;;  %v446_v3 = vld [vmem:[%s622_s1] sm:$0xff]  ;;  %s421_s6 = sshll.u32 %s636_s13, 2  ;;  %vm266_vm1 = vcmask 1043456   ;;  %vm282_vm2 = vcmask 1040384  }
  0x10   : > { %s195_s28 = scalar_lea.vmem %s621_s0, %s445_s23  ;;  %s201_s7 = sadd.s32 %s421_s6, %s638_s12 }
  0x11   : > { %s214_s5 = scalar_lea.vmem %s195_s28, %s425_s29  ;;  %s422_s8 = sshll.u32 %s201_s7, 2 }
  0x12   : > { %v215_v4 = vld [vmem:[%s214_s5] sm:$0x3]  ;;  %s203_s11 = scalar_lea.vmem %s623_s2, %s422_s8  ;;  %s424_s12 = sshll.u32 %s201_s7, 1 }
  0x13   : > { %257 = vmatpush.bf16.msra.mxu0 %v448_v1  ;;  %s211_s20 = scalar_lea.vmem %s624_s3, %s424_s12 }
  0x17   : > { %258 = vmatpush.bf16.msra.mxu0 %v447_v2 }
  0x1b   : > { %259 = vmatpush.bf16.msra.mxu0 %v446_v3 }
  0x1e   : > { %442 = vmatmul.msk.bf16.vlgmr.msra.gmra.mxu0 %vm248_vm0, %v215_v4 }
  0x9b   : > { %v261_v5 = vpop.f32.mrf.mxu0 }
  0x9c   : > { %265 = vst [vmem:[%s203_s11] sm:$0xf] %v261_v5  ;;  %v267_v6 = vsel %vm266_vm1, %v261_v5, 0.0  ;;  %v274_v7 = vmul.f32 %v261_v5, %v261_v5 }
  0x9d   : > { %v268_v8 = vrot.slane %v267_v6, 4 }
  0x9e   : > { %v275_v9 = vsel %vm266_vm1, %v274_v7, 0.0 }
  0x9f   : > { %v269_v10 = vadd.f32 %v268_v8, %v267_v6  ;;  %v276_v11 = vrot.slane %v275_v9, 4 }
  0xa1   : > { %v270_v12 = vrot.slane %v269_v10, 2  ;;  %v277_v13 = vadd.f32 %v276_v11, %v275_v9 }
  0xa3   : > { %v271_v14 = vadd.f32 %v270_v12, %v269_v10  ;;  %v278_v15 = vrot.slane %v277_v13, 2  ;;  %v263_v16 = vpop.f32.mrf.mxu0 }
  0xa5   : > { %v272_v17 = vrot.slane %v271_v14, 1  ;;  %v279_v18 = vadd.f32 %v278_v15, %v277_v13 }
  0xa7   : > { %v280_v19 = vrot.slane %v279_v18, 1  ;;  %v273_v20 = vadd.f32 %v272_v17, %v271_v14 }
  0xa9   : > { %v281_v21 = vadd.f32 %v280_v19, %v279_v18 }
  0xab   : > { %v283_v22 = vsel %vm282_vm2, %v273_v20, %v281_v21 }
  0xac   : > { %284 = vst [vmem:[%s211_s20] sm:$0x3] %v283_v22 }
  0xad PF: > { %s14_s16 = sadd.s32 1, %s528_s16   ;;  %s625_s12 = smov %s520_s14 }
  0xae   : > { %p11_p7 = scmp.ge.s32.totalorder %s14_s16, 10   ;;  %s626_s13 = smov %s524_s15 }
  0xaf   : > { %s627_s14 = smov %s630_s17  ;;  %s628_s15 = smov %s634_s18 }
  0xb0   :  { %13 = sbr.rel (!%p11_p7) target bundleno = 3 (0x3), region = 71 }

// kernel: resnet18_features.45
= control target key start
LH: loop header
LB: loop body
LE: loop exit
PB: predicated region body
PF: predicated region fallthrough
CT: control target
= control target key end

     0   :  { %s103_s0 = inlined_call_operand.vmem [shape: f32[32,128], index: 0, kind: input, shape index: {}]   ;;  %s104_s1 = inlined_call_operand.vmem [shape: f32[1,128], index: 1, kind: input, shape index: {}]   ;;  %s105_s2 = inlined_call_operand.vmem [shape: f32[1,128], index: 2, kind: input, shape index: {}]   ;;  %s106_s3 = inlined_call_operand.vmem [shape: bf16[32,128], index: 3, kind: output, shape index: {}]  }
   0x1   :  { %v14_v0 = vld [vmem:[%s103_s0] sm:$0xff]  ;;  %v15_v1 = vld [vmem:[%s103_s0 + $0x8] sm:$0xff]  ;;  %v16_v4 = vld [vmem:[%s103_s0 + $0x10] sm:$0xff] }
   0x2   :  { %v57_v2 = vld [vmem:[%s104_s1] ss:$0 sm:$0xff]  ;;  %v17_v5 = vld [vmem:[%s103_s0 + $0x18] sm:$0xff] }
   0x3   :  { %v58_v3 = vld [vmem:[%s105_s2] ss:$0 sm:$0xff]  ;;  %v22_v6 = vmul.f32 %v57_v2, %v14_v0  ;;  %v23_v7 = vmul.f32 %v57_v2, %v15_v1  ;;  %v24_v8 = vmul.f32 %v57_v2, %v16_v4  ;;  %v25_v9 = vmul.f32 %v57_v2, %v17_v5 }
   0x5   :  { %v30_v10 = vadd.f32 %v58_v3, %v22_v6  ;;  %v31_v11 = vadd.f32 %v58_v3, %v23_v7  ;;  %v32_v12 = vadd.f32 %v58_v3, %v24_v8  ;;  %v33_v13 = vadd.f32 %v58_v3, %v25_v9 }
   0x7   :  { %v49_v14 = vpack.c.bf16 %v31_v11, %v30_v10  ;;  %v54_v15 = vpack.c.bf16 %v33_v13, %v32_v12 }
   0x9   :  { %50 = vst [vmem:[%s106_s3] sm:$0xff] %v49_v14  }
   0xa   :  { %56 = vst [vmem:[%s106_s3 + $0x8] sm:$0xff] %v54_v15  }

// kernel: resnet18_features.43
= control target key start
LH: loop header
LB: loop body
LE: loop exit
PB: predicated region body
PF: predicated region fallthrough
CT: control target
= control target key end

     0   :  { %s107_s0 = inlined_call_operand.vmem [shape: f32[32,128], index: 0, kind: input, shape index: {}]   ;;  %s108_s1 = inlined_call_operand.vmem [shape: f32[1,128], index: 1, kind: input, shape index: {}]   ;;  %s109_s2 = inlined_call_operand.vmem [shape: f32[1,128], index: 2, kind: input, shape index: {}]   ;;  %s110_s3 = inlined_call_operand.vmem [shape: bf16[32,128], index: 3, kind: output, shape index: {}]  }
   0x1   :  { %v14_v0 = vld [vmem:[%s107_s0] sm:$0xff]  ;;  %v15_v1 = vld [vmem:[%s107_s0 + $0x8] sm:$0xff]  ;;  %v16_v4 = vld [vmem:[%s107_s0 + $0x10] sm:$0xff] }
   0x2   :  { %v61_v2 = vld [vmem:[%s108_s1] ss:$0 sm:$0xff]  ;;  %v17_v5 = vld [vmem:[%s107_s0 + $0x18] sm:$0xff] }
   0x3   :  { %v62_v3 = vld [vmem:[%s109_s2] ss:$0 sm:$0xff]  ;;  %v22_v6 = vmul.f32 %v61_v2, %v14_v0  ;;  %v23_v7 = vmul.f32 %v61_v2, %v15_v1  ;;  %v24_v8 = vmul.f32 %v61_v2, %v16_v4  ;;  %v25_v9 = vmul.f32 %v61_v2, %v17_v5 }
   0x5   :  { %v30_v10 = vadd.f32 %v62_v3, %v22_v6  ;;  %v31_v11 = vadd.f32 %v62_v3, %v23_v7  ;;  %v32_v12 = vadd.f32 %v62_v3, %v24_v8  ;;  %v33_v13 = vadd.f32 %v62_v3, %v25_v9 }
   0x7   :  { %v34_v14 = vmax.f32 %v30_v10, 0.0  ;;  %v35_v15 = vmax.f32 %v31_v11, 0.0  ;;  %v36_v16 = vmax.f32 %v32_v12, 0.0  ;;  %v37_v17 = vmax.f32 %v33_v13, 0.0 }
   0x9   :  { %v53_v18 = vpack.c.bf16 %v35_v15, %v34_v14  ;;  %v58_v19 = vpack.c.bf16 %v37_v17, %v36_v16 }
   0xb   :  { %54 = vst [vmem:[%s110_s3] sm:$0xff] %v53_v18  }
   0xc   :  { %60 = vst [vmem:[%s110_s3 + $0x8] sm:$0xff] %v58_v19  }

// kernel: resnet18_features.42
= control target key start
LH: loop header
LB: loop body
LE: loop exit
PB: predicated region body
PF: predicated region fallthrough
CT: control target
= control target key end

     0   :  { %s1587_s12 = smov 0   ;;  %s1589_s13 = smov 0   ;;  %s1852_s0 = inlined_call_operand.vmem [shape: bf16[2,5,5,256], index: 0, kind: input, shape index: {}]   ;;  %s1853_s1 = inlined_call_operand.vmem [shape: bf16[2,2,256,128], index: 1, kind: input, shape index: {}]   ;;  %s1854_s2 = inlined_call_operand.vmem [shape: f32[2,4,4,128], index: 2, kind: output, shape index: {0}]   ;;  %s1855_s3 = inlined_call_operand.vmem [shape: f32[2,4,2,128], index: 3, kind: output, shape index: {1}]  }
   0x1   :  { %s1591_s14 = smov 0   ;;  %s1593_s15 = smov 0  }
   0x2   :  { %s1595_s16 = smov 0  }
   0x3 LB: > { %s23_s17 = sadd.s32 1, %s1557_s14  ;;  %s26_s18 = sadd.s32 1, %s1561_s15  ;;  %s1565_s16 = sphi %s1595_s16, %s14_s16   ;;  %s1561_s15 = sphi %s1593_s15, %s1859_s15   ;;  %s1557_s14 = sphi %s1591_s14, %s1858_s14   ;;  %s1553_s13 = sphi %s1589_s13, %s1857_s13   ;;  %s1549_s12 = sphi %s1587_s12, %s1856_s12  }
   0x4   : > { %p24_p0 = scmp.ge.s32.totalorder %s23_s17, 4  ;;  %p1056_p1 = scmp.ge.s32.totalorder %s1565_s16, 1 }
   0x5   : > { %p156_p2 = scmp.lt.s32.totalorder %s1565_s16, 9 }
   0x6   : > { %s1861_s17 = smov (%p24_p0, %s23_s17), 0  ;;  %s1863_s18 = smov (!%p24_p0, %s26_s18), %s1561_s15 }
   0x7   : > { %p157_p3 = pnand %p1056_p1, %p156_p2  ;;  %p28_p4 = scmp.ge.s32.totalorder %s1863_s18, 2 }
   0x8   : > { %p191_p5 = scmp.lt.s32.totalorder (!%p157_p3), %s1553_s13, 1  ;;  %s1421_s27 = sshll.u32 (!%p157_p3), %s1549_s12, 3 }
   0x9   : > { %s1865_s18 = smov (%p28_p4, %s1863_s18), 0  ;;  %160 = sbr.rel (%p157_p3) target bundleno = 234 (0xea), region = 28 }
   0xa   : > { %p198_p6 = scmp.lt.s32.totalorder (!%p157_p3), %s1549_s12, 3 }
   0xe   : > { %v1445_v0 = vld [vmem:[%s1853_s1 + $0xb8] sm:$0xff]  ;;  %v1444_v4 = vld [vmem:[%s1853_s1 + $0xb0] sm:$0xff]  ;;  %s1867_s13 = smov (!%p191_p5, %s1553_s13), 1  ;;  %v1443_v8 = vld [vmem:[%s1853_s1 + $0xa8] sm:$0xff]  ;;  %s1869_s12 = smov (!%p198_p6, %s1549_s12), 3  ;;  %vm901_vm0 = vcmask 1043456  }
   0xf   : > { %v1453_v1 = vld [vmem:[%s1853_s1 + $0xf8] sm:$0xff]  ;;  %399 = vmatpush.bf16.msra.mxu0 %v1445_v0  ;;  %v1452_v5 = vld [vmem:[%s1853_s1 + $0xf0] sm:$0xff]  ;;  %s1486_s8 = smul.u32 40, %s1867_s13  ;;  %v1451_v9 = vld [vmem:[%s1853_s1 + $0xe8] sm:$0xff]  ;;  %s1058_s10 = sshll.u32 %s1867_s13, 2  ;;  %vm917_vm1 = vcmask 1040384  }
  0x10   : > { %v1429_v2 = vld [vmem:[%s1853_s1 + $0x38] sm:$0xff]  ;;  %412 = vmatpush.bf16.msra.mxu1 %v1453_v1  ;;  %v1428_v6 = vld [vmem:[%s1853_s1 + $0x30] sm:$0xff]  ;;  %v1427_v10 = vld [vmem:[%s1853_s1 + $0x28] sm:$0xff]  ;;  %s1827_s11 = sadd.s32 %s1058_s10, %s1869_s12 }
  0x11   : > { %v1437_v3 = vld [vmem:[%s1853_s1 + $0x78] sm:$0xff]  ;;  %528 = vmatpush.bf16.msra.mxu2 %v1429_v2  ;;  %v1436_v7 = vld [vmem:[%s1853_s1 + $0x70] sm:$0xff]  ;;  %v1435_v11 = vld [vmem:[%s1853_s1 + $0x68] sm:$0xff]  ;;  %s195_s26 = scalar_lea.vmem %s1852_s0, %s1486_s8  ;;  %s1059_s19 = sshll.u32 %s1827_s11, 2 }
  0x12   : > { %541 = vmatpush.bf16.msra.mxu3 %v1437_v3  ;;  %v1442_v12 = vld [vmem:[%s1853_s1 + $0xa0] sm:$0xff]  ;;  %s1674_s8 = scalar_lea.vmem %s195_s26, %s1421_s27  ;;  %v1441_v16 = vld [vmem:[%s1853_s1 + $0x98] sm:$0xff]  ;;  %v1440_v23 = vld [vmem:[%s1853_s1 + $0x90] sm:$0xff]  ;;  %s203_s22 = scalar_lea.vmem %s1854_s2, %s1059_s19 }
  0x13   : > { %400 = vmatpush.bf16.msra.mxu0 %v1444_v4  ;;  %v1450_v13 = vld [vmem:[%s1853_s1 + $0xe0] sm:$0xff]  ;;  %v1449_v17 = vld [vmem:[%s1853_s1 + $0xd8] sm:$0xff]  ;;  %v1448_v24 = vld [vmem:[%s1853_s1 + $0xd0] sm:$0xff]  ;;  %s1061_s12 = sshll.u32 %s1827_s11, 1 }
  0x14   : > { %413 = vmatpush.bf16.msra.mxu1 %v1452_v5  ;;  %v1426_v14 = vld [vmem:[%s1853_s1 + $0x20] sm:$0xff]  ;;  %v1425_v18 = vld [vmem:[%s1853_s1 + $0x18] sm:$0xff]  ;;  %v1424_v25 = vld [vmem:[%s1853_s1 + $0x10] sm:$0xff]  ;;  %s211_s24 = scalar_lea.vmem %s1855_s3, %s1061_s12 }
  0x15   : > { %529 = vmatpush.bf16.msra.mxu2 %v1428_v6  ;;  %v1434_v15 = vld [vmem:[%s1853_s1 + $0x60] sm:$0xff]  ;;  %v1433_v19 = vld [vmem:[%s1853_s1 + $0x58] sm:$0xff]  ;;  %v1432_v26 = vld [vmem:[%s1853_s1 + $0x50] sm:$0xff] }
  0x16   : > { %542 = vmatpush.bf16.msra.mxu3 %v1436_v7  ;;  %v248_v20 = vld [vmem:[%s1674_s8] sm:$0x77]  ;;  %v1439_v29 = vld [vmem:[%s1853_s1 + $0x88] sm:$0xff]  ;;  %v1461_v46 = vld [vmem:[%s1853_s1 + $0x138] sm:$0xff] }
  0x17   : > { %401 = vmatpush.bf16.msra.mxu0 %v1443_v8  ;;  %v283_v21 = vunpack.c.l.b16 %v248_v20  ;;  %v284_v22 = vunpack.c.h.b16 %v248_v20  ;;  %v1447_v30 = vld [vmem:[%s1853_s1 + $0xc8] sm:$0xff]  ;;  %v215_v33 = vld [vmem:[%s1674_s8] sm:$0x33]  ;;  %v1469_v47 = vld [vmem:[%s1853_s1 + $0x178] sm:$0xff] }
  0x18   : > { %414 = vmatpush.bf16.msra.mxu1 %v1451_v9  ;;  %v1423_v31 = vld [vmem:[%s1853_s1 + $0x8] sm:$0xff]  ;;  %v1438_v36 = vld [vmem:[%s1853_s1 + $0x80] sm:$0xff]  ;;  %v426_v38 = vunpack.c.l.b16 %v215_v33  ;;  %v427_v39 = vunpack.c.h.b16 %v215_v33  ;;  %v1477_v48 = vld [vmem:[%s1853_s1 + $0x1b8] sm:$0xff] }
  0x19   : > { %530 = vmatpush.bf16.msra.mxu2 %v1427_v10  ;;  %v285_v27 = vpack.c.b16 %v283_v21, %v283_v21  ;;  %v286_v28 = vpack.c.b16 %v284_v22, %v284_v22  ;;  %v1431_v32 = vld [vmem:[%s1853_s1 + $0x48] sm:$0xff]  ;;  %v1446_v37 = vld [vmem:[%s1853_s1 + $0xc0] sm:$0xff]  ;;  %v1485_v49 = vld [vmem:[%s1853_s1 + $0x1f8] sm:$0xff] }
  0x1a   : > { %543 = vmatpush.bf16.msra.mxu3 %v1435_v11  ;;  %v1422_v40 = vld [vmem:[%s1853_s1] sm:$0xff]  ;;  %v428_v50 = vpack.c.b16 %v426_v38, %v426_v38  ;;  %v429_v51 = vpack.c.b16 %v427_v39, %v427_v39  ;;  %v1460_v54 = vld [vmem:[%s1853_s1 + $0x130] sm:$0xff]  ;;  %v1459_v58 = vld [vmem:[%s1853_s1 + $0x128] sm:$0xff] }
  0x1b   : > { %402 = vmatpush.bf16.msra.mxu0 %v1442_v12  ;;  %v290_v34 = vshll.u32 %v285_v27, 16  ;;  %v297_v35 = vshll.u32 %v286_v28, 16  ;;  %v1430_v41 = vld [vmem:[%s1853_s1 + $0x40] sm:$0xff]  ;;  %v288_v42 = vshrl.u32 %v285_v27, 16  ;;  %v295_v44 = vshrl.u32 %v286_v28, 16  ;;  %v1468_v55 = vld [vmem:[%s1853_s1 + $0x170] sm:$0xff] }
  0x1c   : > { %415 = vmatpush.bf16.msra.mxu1 %v1450_v13  ;;  %v1476_v56 = vld [vmem:[%s1853_s1 + $0x1b0] sm:$0xff]  ;;  %v1467_v59 = vld [vmem:[%s1853_s1 + $0x168] sm:$0xff]  ;;  %v1458_v62 = vld [vmem:[%s1853_s1 + $0x120] sm:$0xff] }
  0x1d   : > { %531 = vmatpush.bf16.msra.mxu2 %v1426_v14  ;;  %v292_v43 = vrot.slane %v290_v34, 1  ;;  %v299_v45 = vrot.slane %v297_v35, 1  ;;  %v1484_v57 = vld [vmem:[%s1853_s1 + $0x1f0] sm:$0xff]  ;;  %v1475_v60 = vld [vmem:[%s1853_s1 + $0x1a8] sm:$0xff]  ;;  %v1466_v63 = vld [vmem:[%s1853_s1 + $0x160] sm:$0xff] }
  0x1e   : > { %544 = vmatpush.bf16.msra.mxu3 %v1434_v15  ;;  %v1483_v61 = vld [vmem:[%s1853_s1 + $0x1e8] sm:$0xff]  ;;  %v1474_v0 = vld [vmem:[%s1853_s1 + $0x1a0] sm:$0xff]  ;;  %v1457_v3 = vld [vmem:[%s1853_s1 + $0x118] sm:$0xff] }
  0x1f   : > { %403 = vmatpush.bf16.msra.mxu0 %v1441_v16  ;;  %v293_v52 = vor.u32 %v292_v43, %v288_v42  ;;  %v300_v53 = vor.u32 %v299_v45, %v295_v44  ;;  %v1482_v1 = vld [vmem:[%s1853_s1 + $0x1e0] sm:$0xff]  ;;  %v1322_v2 = vld [vmem:[%s1674_s8 + $0x8] sm:$0x77]  ;;  %v1465_v4 = vld [vmem:[%s1853_s1 + $0x158] sm:$0xff] }
  0x20   : > { %416 = vmatpush.bf16.msra.mxu1 %v1449_v17  ;;  %v757_v5 = vunpack.c.l.b16 %v1322_v2  ;;  %v758_v6 = vunpack.c.h.b16 %v1322_v2  ;;  %v1473_v7 = vld [vmem:[%s1853_s1 + $0x198] sm:$0xff]  ;;  %v1456_v9 = vld [vmem:[%s1853_s1 + $0x110] sm:$0xff]  ;;  %v1455_v15 = vld [vmem:[%s1853_s1 + $0x108] sm:$0xff] }
  0x21   : > { %532 = vmatpush.bf16.msra.mxu2 %v1425_v18  ;;  %v1481_v8 = vld [vmem:[%s1853_s1 + $0x1d8] sm:$0xff]  ;;  %v1464_v10 = vld [vmem:[%s1853_s1 + $0x150] sm:$0xff]  ;;  %v1463_v16 = vld [vmem:[%s1853_s1 + $0x148] sm:$0xff] }
  0x22   : > { %545 = vmatpush.bf16.msra.mxu3 %v1433_v19  ;;  %v759_v11 = vpack.c.b16 %v757_v5, %v757_v5  ;;  %v760_v12 = vpack.c.b16 %v758_v6, %v758_v6  ;;  %v1472_v13 = vld [vmem:[%s1853_s1 + $0x190] sm:$0xff]  ;;  %v1225_v17 = vld [vmem:[%s1674_s8 + $0x8] sm:$0x33] }
  0x23   : > { %404 = vmatpush.bf16.msra.mxu0 %v1440_v23  ;;  %v1480_v14 = vld [vmem:[%s1853_s1 + $0x1d0] sm:$0xff]  ;;  %v1471_v20 = vld [vmem:[%s1853_s1 + $0x188] sm:$0xff]  ;;  %v593_v22 = vunpack.c.l.b16 %v1225_v17  ;;  %v594_v23 = vunpack.c.h.b16 %v1225_v17 }
  0x24   : > { %417 = vmatpush.bf16.msra.mxu1 %v1448_v24  ;;  %v764_v18 = vshll.u32 %v759_v11, 16  ;;  %v771_v19 = vshll.u32 %v760_v12, 16  ;;  %v1479_v21 = vld [vmem:[%s1853_s1 + $0x1c8] sm:$0xff]  ;;  %v1454_v24 = vld [vmem:[%s1853_s1 + $0x100] sm:$0xff]  ;;  %v769_v28 = vshrl.u32 %v760_v12, 16 }
  0x25   : > { %533 = vmatpush.bf16.msra.mxu2 %v1424_v25  ;;  %v1462_v25 = vld [vmem:[%s1853_s1 + $0x140] sm:$0xff]  ;;  %v596_v33 = vpack.c.b16 %v594_v23, %v594_v23 }
  0x26   : > { %546 = vmatpush.bf16.msra.mxu3 %v1432_v26  ;;  %v762_v26 = vshrl.u32 %v759_v11, 16  ;;  %v766_v27 = vrot.slane %v764_v18, 1 }
  0x27   : > { %405 = vmatpush.bf16.msra.mxu0 %v1439_v29  ;;  %v773_v29 = vrot.slane %v771_v19, 1 }
  0x28   : > { %418 = vmatpush.bf16.msra.mxu1 %v1447_v30  ;;  %v1470_v30 = vld [vmem:[%s1853_s1 + $0x180] sm:$0xff]  ;;  %v767_v34 = vor.u32 %v766_v27, %v762_v26 }
  0x29   : > { %534 = vmatpush.bf16.msra.mxu2 %v1423_v31  ;;  %v1478_v31 = vld [vmem:[%s1853_s1 + $0x1c0] sm:$0xff]  ;;  %v774_v35 = vor.u32 %v773_v29, %v769_v28 }
  0x2a   : > { %547 = vmatpush.bf16.msra.mxu3 %v1431_v32  ;;  %v595_v32 = vpack.c.b16 %v593_v22, %v593_v22 }
  0x2b   : > { %406 = vmatpush.bf16.msra.mxu0 %v1438_v36 }
  0x2c   : > { %419 = vmatpush.bf16.msra.mxu1 %v1446_v37 }
  0x2d   : > { %535 = vmatpush.bf16.msra.mxu2 %v1422_v40 }
  0x2e   : > { %548 = vmatpush.bf16.msra.mxu3 %v1430_v41  ;;  %407 = vmatmul.bf16.vlgmr.msra.gmra.mxu0 %v293_v52 }
  0x2f   : > { %695 = vmatpush.bf16.msrb.mxu0 %v1461_v46  ;;  %420 = vmatmul.bf16.vlgmr.msra.gmra.mxu1 %v300_v53 }
  0x30   : > { %708 = vmatpush.bf16.msrb.mxu1 %v1469_v47  ;;  %536 = vmatmul.bf16.vlgmr.msra.gmra.mxu2 %v428_v50 }
  0x31   : > { %873 = vmatpush.bf16.msrb.mxu2 %v1477_v48  ;;  %549 = vmatmul.bf16.vlgmr.msra.gmra.mxu3 %v429_v51 }
  0x32   : > { %886 = vmatpush.bf16.msrb.mxu3 %v1485_v49 }
  0x33   : > { %696 = vmatpush.bf16.msrb.mxu0 %v1460_v54 }
  0x34   : > { %709 = vmatpush.bf16.msrb.mxu1 %v1468_v55 }
  0x35   : > { %874 = vmatpush.bf16.msrb.mxu2 %v1476_v56 }
  0x36   : > { %887 = vmatpush.bf16.msrb.mxu3 %v1484_v57 }
  0x37   : > { %697 = vmatpush.bf16.msrb.mxu0 %v1459_v58 }
  0x38   : > { %710 = vmatpush.bf16.msrb.mxu1 %v1467_v59 }
  0x39   : > { %875 = vmatpush.bf16.msrb.mxu2 %v1475_v60 }
  0x3a   : > { %888 = vmatpush.bf16.msrb.mxu3 %v1483_v61 }
  0x3b   : > { %698 = vmatpush.bf16.msrb.mxu0 %v1458_v62 }
  0x3c   : > { %711 = vmatpush.bf16.msrb.mxu1 %v1466_v63 }
  0x3d   : > { %876 = vmatpush.bf16.msrb.mxu2 %v1474_v0 }
  0x3e   : > { %889 = vmatpush.bf16.msrb.mxu3 %v1482_v1 }
  0x3f   : > { %699 = vmatpush.bf16.msrb.mxu0 %v1457_v3 }
  0x40   : > { %712 = vmatpush.bf16.msrb.mxu1 %v1465_v4 }
  0x41   : > { %877 = vmatpush.bf16.msrb.mxu2 %v1473_v7 }
  0x42   : > { %890 = vmatpush.bf16.msrb.mxu3 %v1481_v8 }
  0x43   : > { %700 = vmatpush.bf16.msrb.mxu0 %v1456_v9 }
  0x44   : > { %713 = vmatpush.bf16.msrb.mxu1 %v1464_v10 }
  0x45   : > { %878 = vmatpush.bf16.msrb.mxu2 %v1472_v13 }
  0x46   : > { %891 = vmatpush.bf16.msrb.mxu3 %v1480_v14 }
  0x47   : > { %701 = vmatpush.bf16.msrb.mxu0 %v1455_v15 }
  0x48   : > { %714 = vmatpush.bf16.msrb.mxu1 %v1463_v16 }
  0x49   : > { %879 = vmatpush.bf16.msrb.mxu2 %v1471_v20 }
  0x4a   : > { %892 = vmatpush.bf16.msrb.mxu3 %v1479_v21 }
  0x4b   : > { %702 = vmatpush.bf16.msrb.mxu0 %v1454_v24 }
  0x4c   : > { %715 = vmatpush.bf16.msrb.mxu1 %v1462_v25 }
  0x4d   : > { %880 = vmatpush.bf16.msrb.mxu2 %v1470_v30 }
  0x4e   : > { %893 = vmatpush.bf16.msrb.mxu3 %v1478_v31  ;;  %703 = vmatmul.bf16.vlgmr.msrb.gmra.mxu0 %v595_v32 }
  0x4f   : > { %716 = vmatmul.bf16.vlgmr.msrb.gmra.mxu1 %v596_v33 }
  0x50   : > { %881 = vmatmul.bf16.vlgmr.msrb.gmra.mxu2 %v767_v34 }
  0x51   : > { %894 = vmatmul.bf16.vlgmr.msrb.gmra.mxu3 %v774_v35 }
  0xab   : > { %v408_v36 = vpop.f32.mrf.mxu0 }
  0xac   : > { %v421_v37 = vpop.f32.mrf.mxu1 }
  0xad   : > { %v422_v44 = vadd.f32 %v421_v37, %v408_v36 }
  0xb3   : > { %v537_v38 = vpop.f32.mrf.mxu2  ;;  %v410_v40 = vpop.f32.mrf.mxu0 }
  0xb4   : > { %v550_v39 = vpop.f32.mrf.mxu3  ;;  %v423_v41 = vpop.f32.mrf.mxu1  ;;  %v538_v47 = vadd.f32 %v537_v38, %v422_v44 }
  0xb6   : > { %v551_v49 = vadd.f32 %v550_v39, %v538_v47 }
  0xbb   : > { %v539_v42 = vpop.f32.mrf.mxu2 }
  0xbc   : > { %v552_v43 = vpop.f32.mrf.mxu3 }
  0xcb   : > { %v704_v45 = vpop.f32.mrf.mxu0 }
  0xcc   : > { %v717_v46 = vpop.f32.mrf.mxu1 }
  0xcd   : > { %v718_v48 = vadd.f32 %v717_v46, %v704_v45 }
  0xcf   : > { %v721_v52 = vadd.f32 %v718_v48, %v551_v49 }
  0xd3   : > { %v882_v50 = vpop.f32.mrf.mxu2  ;;  %v706_v54 = vpop.f32.mrf.mxu0 }
  0xd4   : > { %v895_v51 = vpop.f32.mrf.mxu3  ;;  %v719_v55 = vpop.f32.mrf.mxu1 }
  0xd5   : > { %v896_v53 = vadd.f32 %v895_v51, %v882_v50 }
  0xd7   : > { %v899_v56 = vadd.f32 %v896_v53, %v721_v52 }
  0xd9   : > { %900 = vst [vmem:[%s203_s22] sm:$0xf] %v899_v56  ;;  %v902_v57 = vsel %vm901_vm0, %v899_v56, 0.0  ;;  %v909_v58 = vmul.f32 %v899_v56, %v899_v56 }
  0xda   : > { %v903_v59 = vrot.slane %v902_v57, 4 }
  0xdb   : > { %v910_v60 = vsel %vm901_vm0, %v909_v58, 0.0  ;;  %v884_v63 = vpop.f32.mrf.mxu2 }
  0xdc   : > { %v904_v61 = vadd.f32 %v903_v59, %v902_v57  ;;  %v911_v62 = vrot.slane %v910_v60, 4  ;;  %v897_v0 = vpop.f32.mrf.mxu3 }
  0xde   : > { %v905_v1 = vrot.slane %v904_v61, 2  ;;  %v912_v2 = vadd.f32 %v911_v62, %v910_v60 }
  0xe0   : > { %v906_v3 = vadd.f32 %v905_v1, %v904_v61  ;;  %v913_v4 = vrot.slane %v912_v2, 2 }
  0xe2   : > { %v907_v5 = vrot.slane %v906_v3, 1  ;;  %v914_v6 = vadd.f32 %v913_v4, %v912_v2 }
  0xe4   : > { %v915_v7 = vrot.slane %v914_v6, 1  ;;  %v908_v8 = vadd.f32 %v907_v5, %v906_v3 }
  0xe6   : > { %v916_v9 = vadd.f32 %v915_v7, %v914_v6 }
  0xe8   : > { %v918_v10 = vsel %vm917_vm1, %v908_v8, %v916_v9 }
  0xe9   : > { %919 = vst [vmem:[%s211_s24] sm:$0x3] %v918_v10 }
  0xea PF: > { %s14_s16 = sadd.s32 1, %s1565_s16   ;;  %s1856_s12 = smov %s1557_s14 }
  0xeb   : > { %p11_p7 = scmp.ge.s32.totalorder %s14_s16, 10   ;;  %s1857_s13 = smov %s1561_s15 }
  0xec   : > { %s1858_s14 = smov %s1861_s17  ;;  %s1859_s15 = smov %s1865_s18 }
  0xed   :  { %13 = sbr.rel (!%p11_p7) target bundleno = 3 (0x3), region = 75 }

// kernel: resnet18_features.47
= control target key start
LH: loop header
LB: loop body
LE: loop exit
PB: predicated region body
PF: predicated region fallthrough
CT: control target
= control target key end

     0   :  { %s142_s0 = inlined_call_operand.vmem [shape: f32[32,128], index: 0, kind: input, shape index: {}]   ;;  %s143_s1 = inlined_call_operand.vmem [shape: f32[1,128], index: 1, kind: input, shape index: {}]   ;;  %s144_s2 = inlined_call_operand.vmem [shape: f32[1,128], index: 2, kind: input, shape index: {}]   ;;  %s145_s3 = inlined_call_operand.vmem [shape: bf16[32,128], index: 3, kind: input, shape index: {}]   ;;  %s146_s4 = inlined_call_operand.vmem [shape: bf16[32,128], index: 4, kind: output, shape index: {}]  }
   0x1   :  { %v17_v0 = vld [vmem:[%s142_s0] sm:$0xff]  ;;  %v18_v1 = vld [vmem:[%s142_s0 + $0x8] sm:$0xff]  ;;  %v19_v5 = vld [vmem:[%s142_s0 + $0x10] sm:$0xff] }
   0x2   :  { %v85_v2 = vld [vmem:[%s143_s1] ss:$0 sm:$0xff]  ;;  %v20_v6 = vld [vmem:[%s142_s0 + $0x18] sm:$0xff]  ;;  %v83_v11 = vld [vmem:[%s145_s3 + $0x8] sm:$0xff]  }
   0x3   :  { %v86_v3 = vld [vmem:[%s144_s2] ss:$0 sm:$0xff]  ;;  %v25_v7 = vmul.f32 %v85_v2, %v17_v0  ;;  %v26_v8 = vmul.f32 %v85_v2, %v18_v1  ;;  %v27_v12 = vmul.f32 %v85_v2, %v19_v5  ;;  %v28_v13 = vmul.f32 %v85_v2, %v20_v6 }
   0x4   :  { %v66_v4 = vld [vmem:[%s145_s3] sm:$0xff]   ;;  %v71_v14 = vunpack.c.l.bf16 %v83_v11  ;;  %v72_v15 = vunpack.c.h.bf16 %v83_v11 }
   0x5   :  { %v67_v9 = vunpack.c.l.bf16 %v66_v4  ;;  %v68_v10 = vunpack.c.h.bf16 %v66_v4  ;;  %v33_v16 = vadd.f32 %v86_v3, %v25_v7  ;;  %v34_v17 = vadd.f32 %v86_v3, %v26_v8 }
   0x6   :  { %v35_v18 = vadd.f32 %v86_v3, %v27_v12  ;;  %v36_v19 = vadd.f32 %v86_v3, %v28_v13 }
   0x7   :  { %v45_v20 = vadd.f32 %v67_v9, %v33_v16  ;;  %v46_v21 = vadd.f32 %v68_v10, %v34_v17 }
   0x8   :  { %v47_v22 = vadd.f32 %v71_v14, %v35_v18  ;;  %v48_v23 = vadd.f32 %v72_v15, %v36_v19 }
   0x9   :  { %v49_v24 = vmax.f32 %v45_v20, 0.0  ;;  %v50_v25 = vmax.f32 %v46_v21, 0.0 }
   0xa   :  { %v51_v26 = vmax.f32 %v47_v22, 0.0  ;;  %v52_v27 = vmax.f32 %v48_v23, 0.0 }
   0xb   :  { %v76_v28 = vpack.c.bf16 %v50_v25, %v49_v24 }
   0xc   :  { %v81_v29 = vpack.c.bf16 %v52_v27, %v51_v26 }
   0xd   :  { %77 = vst [vmem:[%s146_s4] sm:$0xff] %v76_v28  }
   0xe   :  { %84 = vst [vmem:[%s146_s4 + $0x8] sm:$0xff] %v81_v29  }

// kernel: resnet18_features.46
= control target key start
LH: loop header
LB: loop body
LE: loop exit
PB: predicated region body
PF: predicated region fallthrough
CT: control target
= control target key end

     0   :  { %s1750_s12 = smov 0   ;;  %s1752_s13 = smov 0   ;;  %s2040_s0 = inlined_call_operand.vmem [shape: bf16[2,6,6,128], index: 0, kind: input, shape index: {}]   ;;  %s2041_s1 = inlined_call_operand.vmem [shape: bf16[3,3,128,128], index: 1, kind: input, shape index: {}]   ;;  %s2042_s2 = inlined_call_operand.vmem [shape: f32[2,4,4,128], index: 2, kind: output, shape index: {0}]   ;;  %s2043_s3 = inlined_call_operand.vmem [shape: f32[2,4,2,128], index: 3, kind: output, shape index: {1}]  }
   0x1   :  { %s1754_s14 = smov 0   ;;  %s1756_s15 = smov 0  }
   0x2   :  { %s1758_s16 = smov 0  }
   0x3 LB: > { %s23_s17 = sadd.s32 1, %s1720_s14  ;;  %s26_s18 = sadd.s32 1, %s1724_s15  ;;  %s1728_s16 = sphi %s1758_s16, %s14_s16   ;;  %s1724_s15 = sphi %s1756_s15, %s2047_s15   ;;  %s1720_s14 = sphi %s1754_s14, %s2046_s14   ;;  %s1716_s13 = sphi %s1752_s13, %s2045_s13   ;;  %s1712_s12 = sphi %s1750_s12, %s2044_s12  }
   0x4   : > { %p24_p0 = scmp.ge.s32.totalorder %s23_s17, 4  ;;  %p1144_p1 = scmp.ge.s32.totalorder %s1728_s16, 1 }
   0x5   : > { %p156_p2 = scmp.lt.s32.totalorder %s1728_s16, 9 }
   0x6   : > { %s2049_s17 = smov (%p24_p0, %s23_s17), 0  ;;  %s2051_s18 = smov (!%p24_p0, %s26_s18), %s1724_s15 }
   0x7   : > { %p157_p3 = pnand %p1144_p1, %p156_p2  ;;  %p28_p4 = scmp.ge.s32.totalorder %s2051_s18, 2 }
   0x8   : > { %p191_p5 = scmp.lt.s32.totalorder (!%p157_p3), %s1716_s13, 1  ;;  %s1150_s8 = sshll.u32 (!%p157_p3), %s1712_s12, 2 }
   0x9   : > { %s2053_s18 = smov (%p28_p4, %s2051_s18), 0  ;;  %160 = sbr.rel (%p157_p3) target bundleno = 255 (0xff), region = 28 }
   0xa   : > { %p198_p6 = scmp.lt.s32.totalorder (!%p157_p3), %s1712_s12, 3 }
   0xe   : > { %v1592_v0 = vld [vmem:[%s2041_s1 + $0x78] sm:$0xff]  ;;  %v1591_v4 = vld [vmem:[%s2041_s1 + $0x70] sm:$0xff]  ;;  %s2055_s13 = smov (!%p191_p5, %s1716_s13), 1  ;;  %v1590_v8 = vld [vmem:[%s2041_s1 + $0x68] sm:$0xff]  ;;  %s2057_s12 = smov (!%p198_p6, %s1712_s12), 3  ;;  %vm986_vm0 = vcmask 1043456  }
   0xf   : > { %v1600_v1 = vld [vmem:[%s2041_s1 + $0xb8] sm:$0xff]  ;;  %308 = vmatpush.bf16.msra.mxu0 %v1592_v0  ;;  %v1599_v5 = vld [vmem:[%s2041_s1 + $0xb0] sm:$0xff]  ;;  %v1598_v9 = vld [vmem:[%s2041_s1 + $0xa8] sm:$0xff]  ;;  %s1649_s23 = smul.u32 24, %s2055_s13  ;;  %vm1002_vm1 = vcmask 1040384  }
  0x10   : > { %v1608_v2 = vld [vmem:[%s2041_s1 + $0xf8] sm:$0xff]  ;;  %453 = vmatpush.bf16.msra.mxu2 %v1600_v1  ;;  %v1607_v6 = vld [vmem:[%s2041_s1 + $0xf0] sm:$0xff]  ;;  %v1606_v10 = vld [vmem:[%s2041_s1 + $0xe8] sm:$0xff] }
  0x11   : > { %v1584_v3 = vld [vmem:[%s2041_s1 + $0x38] sm:$0xff]  ;;  %536 = vmatpush.bf16.msra.mxu3 %v1608_v2  ;;  %v1583_v7 = vld [vmem:[%s2041_s1 + $0x30] sm:$0xff]  ;;  %v1582_v11 = vld [vmem:[%s2041_s1 + $0x28] sm:$0xff]  ;;  %s195_s7 = scalar_lea.vmem %s2040_s0, %s1649_s23 }
  0x12   : > { %369 = vmatpush.bf16.msra.mxu1 %v1584_v3  ;;  %v1589_v12 = vld [vmem:[%s2041_s1 + $0x60] sm:$0xff]  ;;  %v1588_v16 = vld [vmem:[%s2041_s1 + $0x58] sm:$0xff]  ;;  %s1843_s20 = scalar_lea.vmem %s195_s7, %s1150_s8  ;;  %v1587_v21 = vld [vmem:[%s2041_s1 + $0x50] sm:$0xff] }
  0x13   : > { %309 = vmatpush.bf16.msra.mxu0 %v1591_v4  ;;  %v1597_v13 = vld [vmem:[%s2041_s1 + $0xa0] sm:$0xff]  ;;  %v1596_v17 = vld [vmem:[%s2041_s1 + $0x98] sm:$0xff]  ;;  %v1595_v22 = vld [vmem:[%s2041_s1 + $0x90] sm:$0xff] }
  0x14   : > { %454 = vmatpush.bf16.msra.mxu2 %v1599_v5  ;;  %v1605_v14 = vld [vmem:[%s2041_s1 + $0xe0] sm:$0xff]  ;;  %v1604_v18 = vld [vmem:[%s2041_s1 + $0xd8] sm:$0xff]  ;;  %v1603_v24 = vld [vmem:[%s2041_s1 + $0xd0] sm:$0xff] }
  0x15   : > { %537 = vmatpush.bf16.msra.mxu3 %v1607_v6  ;;  %v1581_v15 = vld [vmem:[%s2041_s1 + $0x20] sm:$0xff]  ;;  %v1580_v19 = vld [vmem:[%s2041_s1 + $0x18] sm:$0xff]  ;;  %v1579_v25 = vld [vmem:[%s2041_s1 + $0x10] sm:$0xff] }
  0x16   : > { %370 = vmatpush.bf16.msra.mxu1 %v1583_v7  ;;  %v231_v20 = vld [vmem:[%s1843_s20] sm:$0x7]  ;;  %v1586_v28 = vld [vmem:[%s2041_s1 + $0x48] sm:$0xff]  ;;  %v1616_v39 = vld [vmem:[%s2041_s1 + $0x138] sm:$0xff] }
  0x17   : > { %310 = vmatpush.bf16.msra.mxu0 %v1590_v8  ;;  %v250_v23 = vunpack.c.l.b16 %v231_v20  ;;  %v382_v26 = vld [vmem:[%s1843_s20] sm:$0x6]  ;;  %v1594_v29 = vld [vmem:[%s2041_s1 + $0x88] sm:$0xff]  ;;  %v1632_v40 = vld [vmem:[%s2041_s1 + $0x1b8] sm:$0xff] }
  0x18   : > { %455 = vmatpush.bf16.msra.mxu2 %v1598_v9  ;;  %v401_v30 = vunpack.c.l.b16 %v382_v26  ;;  %v1602_v32 = vld [vmem:[%s2041_s1 + $0xc8] sm:$0xff]  ;;  %v1585_v34 = vld [vmem:[%s2041_s1 + $0x40] sm:$0xff]  ;;  %v1640_v43 = vld [vmem:[%s2041_s1 + $0x1f8] sm:$0xff] }
  0x19   : > { %538 = vmatpush.bf16.msra.mxu3 %v1606_v10  ;;  %v251_v27 = vpack.c.b16 %v250_v23, %v250_v23  ;;  %v1578_v33 = vld [vmem:[%s2041_s1 + $0x8] sm:$0xff]  ;;  %v1593_v35 = vld [vmem:[%s2041_s1 + $0x80] sm:$0xff]  ;;  %v1624_v44 = vld [vmem:[%s2041_s1 + $0x178] sm:$0xff] }
  0x1a   : > { %371 = vmatpush.bf16.msra.mxu1 %v1582_v11  ;;  %v402_v36 = vpack.c.b16 %v401_v30, %v401_v30  ;;  %v1601_v41 = vld [vmem:[%s2041_s1 + $0xc0] sm:$0xff]  ;;  %v1615_v47 = vld [vmem:[%s2041_s1 + $0x130] sm:$0xff]  ;;  %v1614_v53 = vld [vmem:[%s2041_s1 + $0x128] sm:$0xff] }
  0x1b   : > { %311 = vmatpush.bf16.msra.mxu0 %v1589_v12  ;;  %v255_v31 = vshll.u32 %v251_v27, 16  ;;  %v253_v37 = vshrl.u32 %v251_v27, 16  ;;  %v1577_v42 = vld [vmem:[%s2041_s1] sm:$0xff]  ;;  %v1631_v48 = vld [vmem:[%s2041_s1 + $0x1b0] sm:$0xff]  ;;  %v1630_v54 = vld [vmem:[%s2041_s1 + $0x1a8] sm:$0xff] }
  0x1c   : > { %456 = vmatpush.bf16.msra.mxu2 %v1597_v13  ;;  %v403_v45 = vrot.slane %v402_v36, 1  ;;  %v1639_v49 = vld [vmem:[%s2041_s1 + $0x1f0] sm:$0xff]  ;;  %v1280_v51 = vld [vmem:[%s1843_s20 + $0x4] sm:$0x3]  ;;  %v214_v52 = vld [vmem:[%s1843_s20] sm:$0x3] }
  0x1d   : > { %539 = vmatpush.bf16.msra.mxu3 %v1605_v14  ;;  %v257_v38 = vrot.slane %v255_v31, 1  ;;  %v1623_v50 = vld [vmem:[%s2041_s1 + $0x170] sm:$0xff]  ;;  %v1638_v55 = vld [vmem:[%s2041_s1 + $0x1e8] sm:$0xff]  ;;  %v1613_v57 = vld [vmem:[%s2041_s1 + $0x120] sm:$0xff] }
  0x1e   : > { %372 = vmatpush.bf16.msra.mxu1 %v1581_v15  ;;  %v1622_v56 = vld [vmem:[%s2041_s1 + $0x168] sm:$0xff]  ;;  %v1629_v58 = vld [vmem:[%s2041_s1 + $0x1a0] sm:$0xff]  ;;  %v1612_v0 = vld [vmem:[%s2041_s1 + $0x118] sm:$0xff] }
  0x1f   : > { %312 = vmatpush.bf16.msra.mxu0 %v1588_v16  ;;  %v258_v46 = vor.u32 %v257_v38, %v253_v37  ;;  %v1329_v59 = vld [vmem:[%s1843_s20 + $0x4] sm:$0x7]  ;;  %v1477_v62 = vld [vmem:[%s1843_s20 + $0x8] sm:$0x7]  ;;  %v1628_v1 = vld [vmem:[%s2041_s1 + $0x198] sm:$0xff] }
  0x20   : > { %457 = vmatpush.bf16.msra.mxu2 %v1596_v17  ;;  %v1637_v60 = vld [vmem:[%s2041_s1 + $0x1e0] sm:$0xff]  ;;  %v569_v63 = vunpack.c.l.b16 %v1329_v59  ;;  %v828_v2 = vunpack.c.l.b16 %v1477_v62  ;;  %v1636_v3 = vld [vmem:[%s2041_s1 + $0x1d8] sm:$0xff]  ;;  %v1611_v6 = vld [vmem:[%s2041_s1 + $0x110] sm:$0xff] }
  0x21   : > { %540 = vmatpush.bf16.msra.mxu3 %v1604_v18  ;;  %v1621_v61 = vld [vmem:[%s2041_s1 + $0x160] sm:$0xff]  ;;  %v1620_v4 = vld [vmem:[%s2041_s1 + $0x158] sm:$0xff]  ;;  %v1627_v7 = vld [vmem:[%s2041_s1 + $0x190] sm:$0xff] }
  0x22   : > { %373 = vmatpush.bf16.msra.mxu1 %v1580_v19  ;;  %v570_v5 = vpack.c.b16 %v569_v63, %v569_v63  ;;  %v829_v8 = vpack.c.b16 %v828_v2, %v828_v2  ;;  %v1635_v9 = vld [vmem:[%s2041_s1 + $0x1d0] sm:$0xff]  ;;  %v1378_v12 = vld [vmem:[%s1843_s20 + $0x4] sm:$0x6]  ;;  %v1610_v13 = vld [vmem:[%s2041_s1 + $0x108] sm:$0xff] }
  0x23   : > { %313 = vmatpush.bf16.msra.mxu0 %v1587_v21  ;;  %v1619_v10 = vld [vmem:[%s2041_s1 + $0x150] sm:$0xff]  ;;  %v1626_v14 = vld [vmem:[%s2041_s1 + $0x188] sm:$0xff]  ;;  %v660_v18 = vunpack.c.l.b16 %v1378_v12  ;;  %v1609_v21 = vld [vmem:[%s2041_s1 + $0x100] sm:$0xff] }
  0x24   : > { %458 = vmatpush.bf16.msra.mxu2 %v1595_v22  ;;  %v574_v11 = vshll.u32 %v570_v5, 16  ;;  %v833_v15 = vshll.u32 %v829_v8, 16  ;;  %v1634_v16 = vld [vmem:[%s2041_s1 + $0x1c8] sm:$0xff]  ;;  %v572_v19 = vshrl.u32 %v570_v5, 16  ;;  %v1625_v22 = vld [vmem:[%s2041_s1 + $0x180] sm:$0xff]  ;;  %v1648_v23 = vld [vmem:[%s2041_s1 + $0x238] sm:$0xff] }
  0x25   : > { %541 = vmatpush.bf16.msra.mxu3 %v1603_v24  ;;  %v1618_v17 = vld [vmem:[%s2041_s1 + $0x148] sm:$0xff]  ;;  %v831_v24 = vshrl.u32 %v829_v8, 16  ;;  %v1633_v26 = vld [vmem:[%s2041_s1 + $0x1c0] sm:$0xff]  ;;  %v1647_v31 = vld [vmem:[%s2041_s1 + $0x230] sm:$0xff] }
  0x26   : > { %374 = vmatpush.bf16.msra.mxu1 %v1579_v25  ;;  %v576_v20 = vrot.slane %v574_v11, 1  ;;  %v835_v25 = vrot.slane %v833_v15, 1  ;;  %v1617_v27 = vld [vmem:[%s2041_s1 + $0x140] sm:$0xff]  ;;  %v1428_v30 = vld [vmem:[%s1843_s20 + $0x8] sm:$0x3]  ;;  %v1644_v36 = vld [vmem:[%s2041_s1 + $0x218] sm:$0xff] }
  0x27   : > { %314 = vmatpush.bf16.msra.mxu0 %v1586_v28  ;;  %v661_v28 = vpack.c.b16 %v660_v18, %v660_v18  ;;  %v1643_v37 = vld [vmem:[%s2041_s1 + $0x210] sm:$0xff]  ;;  %v1526_v38 = vld [vmem:[%s1843_s20 + $0x8] sm:$0x6]  ;;  %s1146_s20 = sshll.u32 %s2055_s13, 2 }
  0x28   : > { %459 = vmatpush.bf16.msra.mxu2 %v1594_v29  ;;  %v577_v29 = vor.u32 %v576_v20, %v572_v19  ;;  %s201_s7 = sadd.s32 %s1146_s20, %s2057_s12 }
  0x29   : > { %542 = vmatpush.bf16.msra.mxu3 %v1602_v32  ;;  %v836_v32 = vor.u32 %v835_v25, %v831_v24  ;;  %s1147_s8 = sshll.u32 %s201_s7, 2  ;;  %s1149_s12 = sshll.u32 %s201_s7, 1 }
  0x2a   : > { %375 = vmatpush.bf16.msra.mxu1 %v1578_v33  ;;  %v662_v33 = vrot.slane %v661_v28, 1  ;;  %s203_s11 = scalar_lea.vmem %s2042_s2, %s1147_s8  ;;  %s211_s21 = scalar_lea.vmem %s2043_s3, %s1149_s12 }
  0x2b   : > { %315 = vmatpush.bf16.msra.mxu0 %v1585_v34  ;;  %v1646_v34 = vld [vmem:[%s2041_s1 + $0x228] sm:$0xff] }
  0x2c   : > { %460 = vmatpush.bf16.msra.mxu2 %v1593_v35  ;;  %v1645_v35 = vld [vmem:[%s2041_s1 + $0x220] sm:$0xff] }
  0x2d   : > { %543 = vmatpush.bf16.msra.mxu3 %v1601_v41 }
  0x2e   : > { %376 = vmatpush.bf16.msra.mxu1 %v1577_v42  ;;  %316 = vmatmul.bf16.vlgmr.msra.gmra.mxu0 %v258_v46  ;;  %v1641_v42 = vld [vmem:[%s2041_s1 + $0x200] sm:$0xff] }
  0x2f   : > { %627 = vmatpush.bf16.msrb.mxu0 %v1616_v39  ;;  %461 = vmatmul.bf16.vlgmr.msra.gmra.mxu2 %v403_v45  ;;  %v919_v39 = vunpack.c.l.b16 %v1526_v38 }
  0x30   : > { %795 = vmatpush.bf16.msrb.mxu2 %v1632_v40  ;;  %544 = vmatmul.bf16.vlgmr.msra.gmra.mxu3 %v1280_v51  ;;  %v1642_v40 = vld [vmem:[%s2041_s1 + $0x208] sm:$0xff] }
  0x31   : > { %886 = vmatpush.bf16.msrb.mxu3 %v1640_v43  ;;  %377 = vmatmul.bf16.vlgmr.msra.gmra.mxu1 %v214_v52  ;;  %v920_v41 = vpack.c.b16 %v919_v39, %v919_v39 }
  0x32   : > { %712 = vmatpush.bf16.msrb.mxu1 %v1624_v44 }
  0x33   : > { %628 = vmatpush.bf16.msrb.mxu0 %v1615_v47  ;;  %v921_v43 = vrot.slane %v920_v41, 1 }
  0x34   : > { %796 = vmatpush.bf16.msrb.mxu2 %v1631_v48 }
  0x35   : > { %887 = vmatpush.bf16.msrb.mxu3 %v1639_v49 }
  0x36   : > { %713 = vmatpush.bf16.msrb.mxu1 %v1623_v50 }
  0x37   : > { %629 = vmatpush.bf16.msrb.mxu0 %v1614_v53 }
  0x38   : > { %797 = vmatpush.bf16.msrb.mxu2 %v1630_v54 }
  0x39   : > { %888 = vmatpush.bf16.msrb.mxu3 %v1638_v55 }
  0x3a   : > { %714 = vmatpush.bf16.msrb.mxu1 %v1622_v56 }
  0x3b   : > { %630 = vmatpush.bf16.msrb.mxu0 %v1613_v57 }
  0x3c   : > { %798 = vmatpush.bf16.msrb.mxu2 %v1629_v58 }
  0x3d   : > { %889 = vmatpush.bf16.msrb.mxu3 %v1637_v60 }
  0x3e   : > { %715 = vmatpush.bf16.msrb.mxu1 %v1621_v61 }
  0x3f   : > { %631 = vmatpush.bf16.msrb.mxu0 %v1612_v0 }
  0x40   : > { %799 = vmatpush.bf16.msrb.mxu2 %v1628_v1 }
  0x41   : > { %890 = vmatpush.bf16.msrb.mxu3 %v1636_v3 }
  0x42   : > { %716 = vmatpush.bf16.msrb.mxu1 %v1620_v4 }
  0x43   : > { %632 = vmatpush.bf16.msrb.mxu0 %v1611_v6 }
  0x44   : > { %800 = vmatpush.bf16.msrb.mxu2 %v1627_v7 }
  0x45   : > { %891 = vmatpush.bf16.msrb.mxu3 %v1635_v9 }
  0x46   : > { %717 = vmatpush.bf16.msrb.mxu1 %v1619_v10 }
  0x47   : > { %633 = vmatpush.bf16.msrb.mxu0 %v1610_v13 }
  0x48   : > { %801 = vmatpush.bf16.msrb.mxu2 %v1626_v14 }
  0x49   : > { %892 = vmatpush.bf16.msrb.mxu3 %v1634_v16 }
  0x4a   : > { %718 = vmatpush.bf16.msrb.mxu1 %v1618_v17 }
  0x4b   : > { %634 = vmatpush.bf16.msrb.mxu0 %v1609_v21 }
  0x4c   : > { %802 = vmatpush.bf16.msrb.mxu2 %v1625_v22 }
  0x4d   : > { %893 = vmatpush.bf16.msrb.mxu3 %v1633_v26 }
  0x4e   : > { %719 = vmatpush.bf16.msrb.mxu1 %v1617_v27  ;;  %635 = vmatmul.bf16.vlgmr.msrb.gmra.mxu0 %v577_v29 }
  0x4f   : > { %971 = vmatpush.bf16.msra.mxu0 %v1648_v23  ;;  %803 = vmatmul.bf16.vlgmr.msrb.gmra.mxu2 %v1428_v30 }
  0x50   : > { %894 = vmatmul.bf16.vlgmr.msrb.gmra.mxu3 %v836_v32 }
  0x51   : > { %720 = vmatmul.bf16.vlgmr.msrb.gmra.mxu1 %v662_v33 }
  0x53   : > { %972 = vmatpush.bf16.msra.mxu0 %v1647_v31 }
  0x57   : > { %973 = vmatpush.bf16.msra.mxu0 %v1646_v34 }
  0x5b   : > { %974 = vmatpush.bf16.msra.mxu0 %v1645_v35 }
  0x5f   : > { %975 = vmatpush.bf16.msra.mxu0 %v1644_v36 }
  0x63   : > { %976 = vmatpush.bf16.msra.mxu0 %v1643_v37 }
  0x67   : > { %977 = vmatpush.bf16.msra.mxu0 %v1642_v40 }
  0x6b   : > { %978 = vmatpush.bf16.msra.mxu0 %v1641_v42 }
  0x6e   : > { %979 = vmatmul.bf16.vlgmr.msra.gmra.mxu0 %v921_v43 }
  0xab   : > { %v317_v44 = vpop.f32.mrf.mxu0 }
  0xae   : > { %v378_v45 = vpop.f32.mrf.mxu1 }
  0xaf   : > { %v379_v54 = vadd.f32 %v378_v45, %v317_v44 }
  0xb2   : > { %v462_v46 = vpop.f32.mrf.mxu2 }
  0xb3   : > { %v545_v47 = vpop.f32.mrf.mxu3  ;;  %v319_v48 = vpop.f32.mrf.mxu0  ;;  %v466_v56 = vadd.f32 %v462_v46, %v379_v54 }
  0xb5   : > { %v549_v60 = vadd.f32 %v545_v47, %v466_v56 }
  0xb6   : > { %v380_v49 = vpop.f32.mrf.mxu1 }
  0xba   : > { %v464_v50 = vpop.f32.mrf.mxu2 }
  0xbb   : > { %v547_v51 = vpop.f32.mrf.mxu3 }
  0xcb   : > { %v636_v52 = vpop.f32.mrf.mxu0 }
  0xcc   : > { %v640_v62 = vadd.f32 %v636_v52, %v549_v60 }
  0xce   : > { %v721_v53 = vpop.f32.mrf.mxu1 }
  0xcf   : > { %v725_v0 = vadd.f32 %v721_v53, %v640_v62 }
  0xd2   : > { %v804_v55 = vpop.f32.mrf.mxu2 }
  0xd3   : > { %v895_v57 = vpop.f32.mrf.mxu3  ;;  %v638_v58 = vpop.f32.mrf.mxu0  ;;  %v808_v1 = vadd.f32 %v804_v55, %v725_v0 }
  0xd5   : > { %v899_v2 = vadd.f32 %v895_v57, %v808_v1 }
  0xd6   : > { %v723_v59 = vpop.f32.mrf.mxu1 }
  0xda   : > { %v806_v61 = vpop.f32.mrf.mxu2 }
  0xdb   : > { %v897_v63 = vpop.f32.mrf.mxu3 }
  0xeb   : > { %v980_v3 = vpop.f32.mrf.mxu0 }
  0xec   : > { %v984_v4 = vadd.f32 %v980_v3, %v899_v2 }
  0xee   : > { %985 = vst [vmem:[%s203_s11] sm:$0xf] %v984_v4  ;;  %v987_v5 = vsel %vm986_vm0, %v984_v4, 0.0  ;;  %v994_v6 = vmul.f32 %v984_v4, %v984_v4 }
  0xef   : > { %v988_v7 = vrot.slane %v987_v5, 4 }
  0xf0   : > { %v995_v8 = vsel %vm986_vm0, %v994_v6, 0.0 }
  0xf1   : > { %v989_v9 = vadd.f32 %v988_v7, %v987_v5  ;;  %v996_v10 = vrot.slane %v995_v8, 4 }
  0xf3   : > { %v990_v11 = vrot.slane %v989_v9, 2  ;;  %v997_v12 = vadd.f32 %v996_v10, %v995_v8  ;;  %v982_v13 = vpop.f32.mrf.mxu0 }
  0xf5   : > { %v991_v14 = vadd.f32 %v990_v11, %v989_v9  ;;  %v998_v15 = vrot.slane %v997_v12, 2 }
  0xf7   : > { %v992_v16 = vrot.slane %v991_v14, 1  ;;  %v999_v17 = vadd.f32 %v998_v15, %v997_v12 }
  0xf9   : > { %v1000_v18 = vrot.slane %v999_v17, 1  ;;  %v993_v19 = vadd.f32 %v992_v16, %v991_v14 }
  0xfb   : > { %v1001_v20 = vadd.f32 %v1000_v18, %v999_v17 }
  0xfd   : > { %v1003_v21 = vsel %vm1002_vm1, %v993_v19, %v1001_v20 }
  0xfe   : > { %1004 = vst [vmem:[%s211_s21] sm:$0x3] %v1003_v21 }
  0xff PF: > { %s14_s16 = sadd.s32 1, %s1728_s16   ;;  %s2044_s12 = smov %s1720_s14 }
 0x100   : > { %p11_p7 = scmp.ge.s32.totalorder %s14_s16, 10   ;;  %s2045_s13 = smov %s1724_s15 }
 0x101   : > { %s2046_s14 = smov %s2049_s17  ;;  %s2047_s15 = smov %s2053_s18 }
 0x102   :  { %13 = sbr.rel (!%p11_p7) target bundleno = 3 (0x3), region = 81 }

// kernel: resnet18_features.54
= control target key start
LH: loop header
LB: loop body
LE: loop exit
PB: predicated region body
PF: predicated region fallthrough
CT: control target
= control target key end

     0   :  { %s717_s12 = smov 0   ;;  %s719_s13 = smov 0   ;;  %s893_s0 = inlined_call_operand.vmem [shape: bf16[2,2,2,128], index: 0, kind: input, shape index: {}]   ;;  %s894_s1 = inlined_call_operand.vmem [shape: bf16[1,1,128,256], index: 1, kind: input, shape index: {}]   ;;  %s895_s2 = inlined_call_operand.vmem [shape: f32[2,2,2,256], index: 2, kind: output, shape index: {0}]   ;;  %s896_s3 = inlined_call_operand.vmem [shape: f32[2,2,2,256], index: 3, kind: output, shape index: {1}]  }
   0x1   :  { %s721_s14 = smov 0   ;;  %s723_s15 = smov 0  }
   0x2   :  { %s725_s16 = smov 0  }
   0x3 LB: > { %s23_s17 = sadd.s32 1, %s687_s14  ;;  %s26_s18 = sadd.s32 1, %s691_s15  ;;  %s695_s16 = sphi %s725_s16, %s14_s16   ;;  %s691_s15 = sphi %s723_s15, %s900_s15   ;;  %s687_s14 = sphi %s721_s14, %s899_s14   ;;  %s683_s13 = sphi %s719_s13, %s898_s13   ;;  %s679_s12 = sphi %s717_s12, %s897_s12  }
   0x4   : > { %p24_p0 = scmp.ge.s32.totalorder %s23_s17, 2  ;;  %p527_p1 = scmp.ge.s32.totalorder %s695_s16, 1 }
   0x5   : > { %p155_p2 = scmp.lt.s32.totalorder %s695_s16, 5 }
   0x6   : > { %s902_s17 = smov (%p24_p0, %s23_s17), 0  ;;  %s904_s18 = smov (!%p24_p0, %s26_s18), %s691_s15 }
   0x7   : > { %p156_p3 = pnand %p527_p1, %p155_p2  ;;  %p28_p4 = scmp.ge.s32.totalorder %s904_s18, 2 }
   0x8   : > { %p191_p5 = scmp.lt.s32.totalorder (!%p156_p3), %s683_s13, 1  ;;  %p197_p6 = scmp.lt.s32.totalorder (!%p156_p3), %s679_s12, 1 }
   0x9   : > { %s906_s18 = smov (%p28_p4, %s904_s18), 0  ;;  %159 = sbr.rel (%p156_p3) target bundleno = 195 (0xc3), region = 28 }
   0xe   : > { %v593_v0 = vld [vmem:[%s894_s1 + $0x70] sm:$0xf]  ;;  %v616_v1 = vld [vmem:[%s894_s1 + $0x74] sm:$0xf0]  ;;  %v615_v2 = vld [vmem:[%s894_s1 + $0x74] sm:$0xf] }
   0xf   : > { %v594_v3 = vor.u32 %v616_v1, %v593_v0  ;;  %v595_v4 = vld [vmem:[%s894_s1 + $0x78] sm:$0xf0]  ;;  %v585_v5 = vld [vmem:[%s894_s1 + $0x60] sm:$0xf]  ;;  %v614_v6 = vld [vmem:[%s894_s1 + $0x64] sm:$0xf0] }
  0x10   : > { %v598_v7 = vor.u32 %v615_v2, %v595_v4  ;;  %v613_v8 = vld [vmem:[%s894_s1 + $0x64] sm:$0xf]  ;;  %v587_v9 = vld [vmem:[%s894_s1 + $0x68] sm:$0xf0]  ;;  %v586_v10 = vor.u32 %v614_v6, %v585_v5  ;;  %v577_v12 = vld [vmem:[%s894_s1 + $0x50] sm:$0xf] }
  0x11   : > { %311 = vmatpush.bf16.msra.mxu0 %v594_v3  ;;  %v590_v11 = vor.u32 %v613_v8, %v587_v9  ;;  %v612_v13 = vld [vmem:[%s894_s1 + $0x54] sm:$0xf0]  ;;  %v611_v14 = vld [vmem:[%s894_s1 + $0x54] sm:$0xf]  ;;  %v579_v15 = vld [vmem:[%s894_s1 + $0x58] sm:$0xf0] }
  0x12   : > { %324 = vmatpush.bf16.msra.mxu1 %v598_v7  ;;  %v578_v16 = vor.u32 %v612_v13, %v577_v12  ;;  %v582_v17 = vor.u32 %v611_v14, %v579_v15  ;;  %v569_v18 = vld [vmem:[%s894_s1 + $0x40] sm:$0xf]  ;;  %v610_v19 = vld [vmem:[%s894_s1 + $0x44] sm:$0xf0]  ;;  %v609_v20 = vld [vmem:[%s894_s1 + $0x44] sm:$0xf] }
  0x13   : > { %v571_v21 = vld [vmem:[%s894_s1 + $0x48] sm:$0xf0]  ;;  %v570_v22 = vor.u32 %v610_v19, %v569_v18  ;;  %v561_v24 = vld [vmem:[%s894_s1 + $0x30] sm:$0xf]  ;;  %v608_v25 = vld [vmem:[%s894_s1 + $0x34] sm:$0xf0] }
  0x14   : > { %v574_v23 = vor.u32 %v609_v20, %v571_v21  ;;  %v607_v26 = vld [vmem:[%s894_s1 + $0x34] sm:$0xf]  ;;  %v563_v27 = vld [vmem:[%s894_s1 + $0x38] sm:$0xf0]  ;;  %v562_v28 = vor.u32 %v608_v25, %v561_v24  ;;  %v553_v30 = vld [vmem:[%s894_s1 + $0x20] sm:$0xf] }
  0x15   : > { %312 = vmatpush.bf16.msra.mxu0 %v586_v10  ;;  %v566_v29 = vor.u32 %v607_v26, %v563_v27  ;;  %v606_v31 = vld [vmem:[%s894_s1 + $0x24] sm:$0xf0]  ;;  %v605_v32 = vld [vmem:[%s894_s1 + $0x24] sm:$0xf]  ;;  %v555_v33 = vld [vmem:[%s894_s1 + $0x28] sm:$0xf0] }
  0x16   : > { %325 = vmatpush.bf16.msra.mxu1 %v590_v11  ;;  %s908_s13 = smov (!%p191_p5, %s683_s13), 1  ;;  %v554_v34 = vor.u32 %v606_v31, %v553_v30  ;;  %v558_v35 = vor.u32 %v605_v32, %v555_v33  ;;  %v545_v36 = vld [vmem:[%s894_s1 + $0x10] sm:$0xf]  ;;  %v604_v37 = vld [vmem:[%s894_s1 + $0x14] sm:$0xf0]  ;;  %vm340_vm0 = vcmask 1041408  }
  0x17   : > { %v603_v38 = vld [vmem:[%s894_s1 + $0x14] sm:$0xf]  ;;  %v547_v39 = vld [vmem:[%s894_s1 + $0x18] sm:$0xf0]  ;;  %s528_s8 = sshll.u32 %s908_s13, 1  ;;  %v546_v40 = vor.u32 %v604_v37, %v545_v36  ;;  %s530_s29 = sshll.u32 %s908_s13, 2 }
  0x18   : > { %v550_v41 = vor.u32 %v603_v38, %v547_v39  ;;  %v537_v42 = vld [vmem:[%s894_s1] sm:$0xf]  ;;  %v602_v43 = vld [vmem:[%s894_s1 + $0x4] sm:$0xf0]  ;;  %v601_v44 = vld [vmem:[%s894_s1 + $0x4] sm:$0xf]  ;;  %s194_s26 = scalar_lea.vmem %s893_s0, %s528_s8 }
  0x19   : > { %313 = vmatpush.bf16.msra.mxu0 %v578_v16  ;;  %v539_v45 = vld [vmem:[%s894_s1 + $0x8] sm:$0xf0]  ;;  %v538_v46 = vor.u32 %v602_v43, %v537_v42  ;;  %s213_s27 = scalar_lea.vmem %s194_s26, %s679_s12  ;;  %s910_s12 = smov (!%p197_p6, %s679_s12), 1  ;;  %vm374_vm1 = vcmask 1040384  }
  0x1a   : > { %326 = vmatpush.bf16.msra.mxu1 %v582_v17  ;;  %v542_v47 = vor.u32 %v601_v44, %v539_v45  ;;  %v214_v48 = vld [vmem:[%s213_s27] sm:$0x1]  ;;  %s529_s28 = sshll.u32 %s910_s12, 1 }
  0x1b   : > { %s859_s30 = sadd.s32 %s530_s29, %s529_s28 }
  0x1c   : > { %s531_s4 = sshll.u32 %s859_s30, 1 }
  0x1d   : > { %314 = vmatpush.bf16.msra.mxu0 %v570_v22  ;;  %s203_s7 = scalar_lea.vmem %s895_s2, %s531_s4  ;;  %s212_s8 = scalar_lea.vmem %s896_s3, %s531_s4 }
  0x1e   : > { %327 = vmatpush.bf16.msra.mxu1 %v574_v23 }
  0x21   : > { %315 = vmatpush.bf16.msra.mxu0 %v562_v28 }
  0x22   : > { %328 = vmatpush.bf16.msra.mxu1 %v566_v29 }
  0x25   : > { %316 = vmatpush.bf16.msra.mxu0 %v554_v34 }
  0x26   : > { %329 = vmatpush.bf16.msra.mxu1 %v558_v35 }
  0x29   : > { %317 = vmatpush.bf16.msra.mxu0 %v546_v40 }
  0x2a   : > { %330 = vmatpush.bf16.msra.mxu1 %v550_v41 }
  0x2d   : > { %318 = vmatpush.bf16.msra.mxu0 %v538_v46 }
  0x2e   : > { %331 = vmatpush.bf16.msra.mxu1 %v542_v47 }
  0x30   : > { %319 = vmatmul.bf16.vlgmr.msra.gmra.mxu0 %v214_v48 }
  0x31   : > { %332 = vmatmul.bf16.vlgmr.msra.gmra.mxu1 %v214_v48 }
  0xad   : > { %v320_v49 = vpop.f32.mrf.mxu0 }
  0xae   : > { %v344_v50 = vsel %vm340_vm0, %v320_v49, 0.0  ;;  %v358_v51 = vmul.f32 %v320_v49, %v320_v49  ;;  %v333_v52 = vpop.f32.mrf.mxu1 }
  0xaf   : > { %v345_v53 = vrot.slane %v344_v50, 4  ;;  %v339_v54 = vrot.slane %v333_v52, 6  ;;  %v351_v55 = vsel %vm340_vm0, %v333_v52, 0.0  ;;  %v359_v56 = vmul.f32 %v333_v52, %v333_v52 }
  0xb0   : > { %v360_v57 = vsel %vm340_vm0, %v358_v51, 0.0  ;;  %v352_v58 = vrot.slane %v351_v55, 4 }
  0xb1   : > { %v346_v59 = vadd.f32 %v345_v53, %v344_v50  ;;  %v361_v60 = vrot.slane %v360_v57, 4  ;;  %v341_v61 = vsel %vm340_vm0, %v320_v49, %v339_v54  ;;  %v367_v62 = vsel %vm340_vm0, %v359_v56, 0.0 }
  0xb2   : > { %343 = vst [vmem:[%s203_s7] sm:$0xf] %v341_v61  ;;  %v353_v63 = vadd.f32 %v352_v58, %v351_v55  ;;  %v368_v0 = vrot.slane %v367_v62, 4 }
  0xb3   : > { %v347_v1 = vrot.slane %v346_v59, 2  ;;  %v362_v2 = vadd.f32 %v361_v60, %v360_v57 }
  0xb4   : > { %v354_v3 = vrot.slane %v353_v63, 2  ;;  %v369_v4 = vadd.f32 %v368_v0, %v367_v62 }
  0xb5   : > { %v363_v5 = vrot.slane %v362_v2, 2  ;;  %v322_v6 = vpop.f32.mrf.mxu0  ;;  %v348_v7 = vadd.f32 %v347_v1, %v346_v59 }
  0xb6   : > { %v355_v8 = vadd.f32 %v354_v3, %v353_v63  ;;  %v370_v9 = vrot.slane %v369_v4, 2  ;;  %v335_v10 = vpop.f32.mrf.mxu1 }
  0xb7   : > { %v364_v11 = vadd.f32 %v363_v5, %v362_v2  ;;  %v349_v15 = vrot.slane %v348_v7, 1 }
  0xb8   : > { %v356_v12 = vrot.slane %v355_v8, 1  ;;  %v371_v13 = vadd.f32 %v370_v9, %v369_v4 }
  0xb9   : > { %v365_v14 = vrot.slane %v364_v11, 1  ;;  %v350_v20 = vadd.f32 %v349_v15, %v348_v7 }
  0xba   : > { %v372_v16 = vrot.slane %v371_v13, 1  ;;  %v357_v18 = vadd.f32 %v356_v12, %v355_v8 }
  0xbb   : > { %v366_v17 = vadd.f32 %v365_v14, %v364_v11 }
  0xbc   : > { %v373_v19 = vadd.f32 %v372_v16, %v371_v13 }
  0xbd   : > { %v375_v23 = vsel %vm374_vm1, %v350_v20, %v366_v17 }
  0xbe   : > { %v376_v21 = vsel %vm374_vm1, %v357_v18, %v373_v19 }
  0xbf   : > { %v379_v22 = vrot.slane %v376_v21, 6 }
  0xc1   : > { %v380_v24 = vsel %vm340_vm0, %v375_v23, %v379_v22 }
  0xc2   : > { %382 = vst [vmem:[%s212_s8] sm:$0xf] %v380_v24 }
  0xc3 PF: > { %s14_s16 = sadd.s32 1, %s695_s16   ;;  %s897_s12 = smov %s687_s14 }
  0xc4   : > { %p11_p7 = scmp.ge.s32.totalorder %s14_s16, 6   ;;  %s898_s13 = smov %s691_s15 }
  0xc5   : > { %s899_s14 = smov %s902_s17  ;;  %s900_s15 = smov %s906_s18 }
  0xc6   :  { %13 = sbr.rel (!%p11_p7) target bundleno = 3 (0x3), region = 71 }

// kernel: resnet18_features.55
= control target key start
LH: loop header
LB: loop body
LE: loop exit
PB: predicated region body
PF: predicated region fallthrough
CT: control target
= control target key end

     0   :  { %s73_s0 = inlined_call_operand.vmem [shape: f32[8,256], index: 0, kind: input, shape index: {}]   ;;  %s74_s1 = inlined_call_operand.vmem [shape: f32[1,256], index: 1, kind: input, shape index: {}]   ;;  %s75_s2 = inlined_call_operand.vmem [shape: f32[1,256], index: 2, kind: input, shape index: {}]   ;;  %s76_s3 = inlined_call_operand.vmem [shape: bf16[8,256], index: 3, kind: output, shape index: {}]  }
   0x1   :  { %v14_v0 = vld [vmem:[%s73_s0] sm:$0xff]  ;;  %v15_v1 = vld [vmem:[%s73_s0 + $0x8] sm:$0xff] }
   0x2   :  { %v16_v2 = vld [vmem:[%s74_s1] sm:$0x3] }
   0x3   :  { %v18_v3 = vperm.slane %v16_v2, 0  ;;  %v19_v4 = vperm.slane %v16_v2, 1  ;;  %v24_v5 = vld [vmem:[%s75_s2] sm:$0x3] }
   0x4   :  { %v26_v6 = vperm.slane %v24_v5, 0  ;;  %v27_v7 = vperm.slane %v24_v5, 1 }
   0x5   :  { %v22_v8 = vmul.f32 %v18_v3, %v14_v0  ;;  %v23_v9 = vmul.f32 %v19_v4, %v15_v1 }
   0x7   :  { %v30_v10 = vadd.f32 %v26_v6, %v22_v8  ;;  %v31_v11 = vadd.f32 %v27_v7, %v23_v9 }
   0x9   :  { %v32_v12 = vpack.c.bf16 %v31_v11, %v30_v10 }
   0xb   :  { %33 = vst [vmem:[%s76_s3] sm:$0xff] %v32_v12 }

// kernel: resnet18_features.53
= control target key start
LH: loop header
LB: loop body
LE: loop exit
PB: predicated region body
PF: predicated region fallthrough
CT: control target
= control target key end

     0   :  { %s75_s0 = inlined_call_operand.vmem [shape: f32[8,256], index: 0, kind: input, shape index: {}]   ;;  %s76_s1 = inlined_call_operand.vmem [shape: f32[1,256], index: 1, kind: input, shape index: {}]   ;;  %s77_s2 = inlined_call_operand.vmem [shape: f32[1,256], index: 2, kind: input, shape index: {}]   ;;  %s78_s3 = inlined_call_operand.vmem [shape: bf16[8,256], index: 3, kind: output, shape index: {}]  }
   0x1   :  { %v14_v0 = vld [vmem:[%s75_s0] sm:$0xff]  ;;  %v15_v1 = vld [vmem:[%s75_s0 + $0x8] sm:$0xff] }
   0x2   :  { %v16_v2 = vld [vmem:[%s76_s1] sm:$0x3] }
   0x3   :  { %v18_v3 = vperm.slane %v16_v2, 0  ;;  %v19_v4 = vperm.slane %v16_v2, 1  ;;  %v24_v5 = vld [vmem:[%s77_s2] sm:$0x3] }
   0x4   :  { %v26_v6 = vperm.slane %v24_v5, 0  ;;  %v27_v7 = vperm.slane %v24_v5, 1 }
   0x5   :  { %v22_v8 = vmul.f32 %v18_v3, %v14_v0  ;;  %v23_v9 = vmul.f32 %v19_v4, %v15_v1 }
   0x7   :  { %v30_v10 = vadd.f32 %v26_v6, %v22_v8  ;;  %v31_v11 = vadd.f32 %v27_v7, %v23_v9 }
   0x9   :  { %v32_v12 = vmax.f32 %v30_v10, 0.0  ;;  %v33_v13 = vmax.f32 %v31_v11, 0.0 }
   0xb   :  { %v34_v14 = vpack.c.bf16 %v33_v13, %v32_v12 }
   0xd   :  { %35 = vst [vmem:[%s78_s3] sm:$0xff] %v34_v14 }

// kernel: resnet18_features.52
= control target key start
LH: loop header
LB: loop body
LE: loop exit
PB: predicated region body
PF: predicated region fallthrough
CT: control target
= control target key end

     0   :  { %s4057_s12 = smov 0   ;;  %s4059_s13 = smov 0   ;;  %s5771_s0 = inlined_call_operand.vmem [shape: bf16[2,3,3,512], index: 0, kind: input, shape index: {}]   ;;  %s5772_s1 = inlined_call_operand.vmem [shape: bf16[2,2,512,256], index: 1, kind: input, shape index: {}]   ;;  %s5773_s2 = inlined_call_operand.vmem [shape: f32[2,2,2,256], index: 2, kind: output, shape index: {0}]   ;;  %s5774_s3 = inlined_call_operand.vmem [shape: f32[2,2,2,256], index: 3, kind: output, shape index: {1}]  }
   0x1   :  { %s4061_s14 = smov 0   ;;  %s4063_s15 = smov 0  }
   0x2   :  { %s4065_s16 = smov 0  }
   0x3 LB: > { %s23_s17 = sadd.s32 1, %s4027_s14  ;;  %s26_s18 = sadd.s32 1, %s4031_s15  ;;  %s4035_s16 = sphi %s4065_s16, %s14_s16   ;;  %s4031_s15 = sphi %s4063_s15, %s5778_s15   ;;  %s4027_s14 = sphi %s4061_s14, %s5777_s14   ;;  %s4023_s13 = sphi %s4059_s13, %s5776_s13   ;;  %s4019_s12 = sphi %s4057_s12, %s5775_s12  }
   0x4   : > { %p24_p0 = scmp.ge.s32.totalorder %s23_s17, 2  ;;  %p2468_p1 = scmp.ge.s32.totalorder %s4035_s16, 1 }
   0x5   : > { %p156_p2 = scmp.lt.s32.totalorder %s4035_s16, 5 }
   0x6   : > { %s5780_s17 = smov (%p24_p0, %s23_s17), 0  ;;  %s5782_s18 = smov (!%p24_p0, %s26_s18), %s4031_s15 }
   0x7   : > { %p157_p3 = pnand %p2468_p1, %p156_p2  ;;  %p28_p4 = scmp.ge.s32.totalorder %s5782_s18, 2 }
   0x8   : > { %p193_p5 = scmp.lt.s32.totalorder (!%p157_p3), %s4023_s13, 1  ;;  %s3699_s5 = sshll.u32 (!%p157_p3), %s4019_s12, 3 }
   0x9   : > { %s5784_s18 = smov (%p28_p4, %s5782_s18), 0  ;;  %160 = sbr.rel (%p157_p3) target bundleno = 432 (0x1b0), region = 28 }
   0xa   : > { %p200_p6 = scmp.lt.s32.totalorder (!%p157_p3), %s4019_s12, 1 }
   0xe   : > { %v2600_v0 = vld [vmem:[%s5772_s1 + $0x270] sm:$0xf]  ;;  %v3779_v1 = vld [vmem:[%s5772_s1 + $0x274] sm:$0xf0]  ;;  %v2592_v11 = vld [vmem:[%s5772_s1 + $0x260] sm:$0xf] }
   0xf   : > { %v2664_v2 = vld [vmem:[%s5772_s1 + $0x2f0] sm:$0xf]  ;;  %v2601_v3 = vor.u32 %v3779_v1, %v2600_v0  ;;  %v3795_v4 = vld [vmem:[%s5772_s1 + $0x2f4] sm:$0xf0]  ;;  %v3777_v13 = vld [vmem:[%s5772_s1 + $0x264] sm:$0xf0] }
  0x10   : > { %v2728_v5 = vld [vmem:[%s5772_s1 + $0x370] sm:$0xf]  ;;  %v3811_v6 = vld [vmem:[%s5772_s1 + $0x374] sm:$0xf0]  ;;  %v2665_v7 = vor.u32 %v3795_v4, %v2664_v2  ;;  %v2656_v14 = vld [vmem:[%s5772_s1 + $0x2e0] sm:$0xf]  ;;  %v2593_v16 = vor.u32 %v3777_v13, %v2592_v11 }
  0x11   : > { %v2729_v8 = vor.u32 %v3811_v6, %v2728_v5  ;;  %v2792_v9 = vld [vmem:[%s5772_s1 + $0x3f0] sm:$0xf]  ;;  %v3827_v10 = vld [vmem:[%s5772_s1 + $0x3f4] sm:$0xf0]  ;;  %704 = vmatpush.bf16.msra.mxu0 %v2601_v3  ;;  %v3793_v15 = vld [vmem:[%s5772_s1 + $0x2e4] sm:$0xf0] }
  0x12   : > { %v2793_v12 = vor.u32 %v3827_v10, %v2792_v9  ;;  %717 = vmatpush.bf16.msra.mxu1 %v2665_v7  ;;  %v2657_v17 = vor.u32 %v3793_v15, %v2656_v14  ;;  %v2720_v18 = vld [vmem:[%s5772_s1 + $0x360] sm:$0xf]  ;;  %v3809_v19 = vld [vmem:[%s5772_s1 + $0x364] sm:$0xf0]  ;;  %v2584_v23 = vld [vmem:[%s5772_s1 + $0x250] sm:$0xf] }
  0x13   : > { %730 = vmatpush.bf16.msra.mxu2 %v2729_v8  ;;  %v2784_v20 = vld [vmem:[%s5772_s1 + $0x3e0] sm:$0xf]  ;;  %v2721_v21 = vor.u32 %v3809_v19, %v2720_v18  ;;  %v3825_v22 = vld [vmem:[%s5772_s1 + $0x3e4] sm:$0xf0]  ;;  %v3775_v24 = vld [vmem:[%s5772_s1 + $0x254] sm:$0xf0] }
  0x14   : > { %743 = vmatpush.bf16.msra.mxu3 %v2793_v12  ;;  %v2785_v25 = vor.u32 %v3825_v22, %v2784_v20  ;;  %v2648_v26 = vld [vmem:[%s5772_s1 + $0x2d0] sm:$0xf]  ;;  %v3791_v27 = vld [vmem:[%s5772_s1 + $0x2d4] sm:$0xf0]  ;;  %v2585_v29 = vor.u32 %v3775_v24, %v2584_v23  ;;  %v2576_v35 = vld [vmem:[%s5772_s1 + $0x240] sm:$0xf] }
  0x15   : > { %v2712_v28 = vld [vmem:[%s5772_s1 + $0x350] sm:$0xf]  ;;  %705 = vmatpush.bf16.msra.mxu0 %v2593_v16  ;;  %v3807_v30 = vld [vmem:[%s5772_s1 + $0x354] sm:$0xf0]  ;;  %v2649_v33 = vor.u32 %v3791_v27, %v2648_v26  ;;  %v3773_v36 = vld [vmem:[%s5772_s1 + $0x244] sm:$0xf0] }
  0x16   : > { %v2776_v31 = vld [vmem:[%s5772_s1 + $0x3d0] sm:$0xf]  ;;  %v3823_v32 = vld [vmem:[%s5772_s1 + $0x3d4] sm:$0xf0]  ;;  %718 = vmatpush.bf16.msra.mxu1 %v2657_v17  ;;  %v2713_v34 = vor.u32 %v3807_v30, %v2712_v28  ;;  %v2640_v37 = vld [vmem:[%s5772_s1 + $0x2c0] sm:$0xf]  ;;  %v2577_v44 = vor.u32 %v3773_v36, %v2576_v35 }
  0x17   : > { %731 = vmatpush.bf16.msra.mxu2 %v2721_v21  ;;  %v2777_v38 = vor.u32 %v3823_v32, %v2776_v31  ;;  %v3789_v39 = vld [vmem:[%s5772_s1 + $0x2c4] sm:$0xf0]  ;;  %v2704_v40 = vld [vmem:[%s5772_s1 + $0x340] sm:$0xf]  ;;  %v2568_v47 = vld [vmem:[%s5772_s1 + $0x230] sm:$0xf] }
  0x18   : > { %744 = vmatpush.bf16.msra.mxu3 %v2785_v25  ;;  %v3805_v41 = vld [vmem:[%s5772_s1 + $0x344] sm:$0xf0]  ;;  %v2768_v42 = vld [vmem:[%s5772_s1 + $0x3c0] sm:$0xf]  ;;  %v2641_v45 = vor.u32 %v3789_v39, %v2640_v37  ;;  %v3771_v48 = vld [vmem:[%s5772_s1 + $0x234] sm:$0xf0] }
  0x19   : > { %v3821_v43 = vld [vmem:[%s5772_s1 + $0x3c4] sm:$0xf0]  ;;  %706 = vmatpush.bf16.msra.mxu0 %v2585_v29  ;;  %v2705_v46 = vor.u32 %v3805_v41, %v2704_v40  ;;  %v2632_v49 = vld [vmem:[%s5772_s1 + $0x2b0] sm:$0xf]  ;;  %v3787_v51 = vld [vmem:[%s5772_s1 + $0x2b4] sm:$0xf0]  ;;  %v2569_v56 = vor.u32 %v3771_v48, %v2568_v47 }
  0x1a   : > { %719 = vmatpush.bf16.msra.mxu1 %v2649_v33  ;;  %v2769_v50 = vor.u32 %v3821_v43, %v2768_v42  ;;  %v2696_v52 = vld [vmem:[%s5772_s1 + $0x330] sm:$0xf]  ;;  %v3803_v53 = vld [vmem:[%s5772_s1 + $0x334] sm:$0xf0]  ;;  %v2633_v57 = vor.u32 %v3787_v51, %v2632_v49  ;;  %v2560_v59 = vld [vmem:[%s5772_s1 + $0x220] sm:$0xf] }
  0x1b   : > { %732 = vmatpush.bf16.msra.mxu2 %v2713_v34  ;;  %v2760_v54 = vld [vmem:[%s5772_s1 + $0x3b0] sm:$0xf]  ;;  %v3819_v55 = vld [vmem:[%s5772_s1 + $0x3b4] sm:$0xf0]  ;;  %v2697_v58 = vor.u32 %v3803_v53, %v2696_v52  ;;  %v3769_v60 = vld [vmem:[%s5772_s1 + $0x224] sm:$0xf0] }
  0x1c   : > { %745 = vmatpush.bf16.msra.mxu3 %v2777_v38  ;;  %v2624_v61 = vld [vmem:[%s5772_s1 + $0x2a0] sm:$0xf]  ;;  %v2761_v62 = vor.u32 %v3819_v55, %v2760_v54  ;;  %v3785_v63 = vld [vmem:[%s5772_s1 + $0x2a4] sm:$0xf0]  ;;  %v2561_v4 = vor.u32 %v3769_v60, %v2560_v59  ;;  %v2552_v7 = vld [vmem:[%s5772_s1 + $0x210] sm:$0xf] }
  0x1d   : > { %707 = vmatpush.bf16.msra.mxu0 %v2577_v44  ;;  %v2688_v0 = vld [vmem:[%s5772_s1 + $0x320] sm:$0xf]  ;;  %v3801_v1 = vld [vmem:[%s5772_s1 + $0x324] sm:$0xf0]  ;;  %v2625_v5 = vor.u32 %v3785_v63, %v2624_v61  ;;  %v3767_v8 = vld [vmem:[%s5772_s1 + $0x214] sm:$0xf0] }
  0x1e   : > { %720 = vmatpush.bf16.msra.mxu1 %v2641_v45  ;;  %v2752_v2 = vld [vmem:[%s5772_s1 + $0x3a0] sm:$0xf]  ;;  %v3817_v3 = vld [vmem:[%s5772_s1 + $0x3a4] sm:$0xf0]  ;;  %v2689_v6 = vor.u32 %v3801_v1, %v2688_v0  ;;  %v2616_v9 = vld [vmem:[%s5772_s1 + $0x290] sm:$0xf]  ;;  %v2553_v16 = vor.u32 %v3767_v8, %v2552_v7 }
  0x1f   : > { %733 = vmatpush.bf16.msra.mxu2 %v2705_v46  ;;  %v2753_v10 = vor.u32 %v3817_v3, %v2752_v2  ;;  %v3783_v11 = vld [vmem:[%s5772_s1 + $0x294] sm:$0xf0]  ;;  %v2680_v12 = vld [vmem:[%s5772_s1 + $0x310] sm:$0xf]  ;;  %v2544_v17 = vld [vmem:[%s5772_s1 + $0x200] sm:$0xf] }
  0x20   : > { %746 = vmatpush.bf16.msra.mxu3 %v2769_v50  ;;  %v3799_v13 = vld [vmem:[%s5772_s1 + $0x314] sm:$0xf0]  ;;  %v2744_v14 = vld [vmem:[%s5772_s1 + $0x390] sm:$0xf]  ;;  %v3765_v18 = vld [vmem:[%s5772_s1 + $0x204] sm:$0xf0]  ;;  %v2617_v19 = vor.u32 %v3783_v11, %v2616_v9 }
  0x21   : > { %708 = vmatpush.bf16.msra.mxu0 %v2569_v56  ;;  %v3815_v15 = vld [vmem:[%s5772_s1 + $0x394] sm:$0xf0]  ;;  %v2681_v20 = vor.u32 %v3799_v13, %v2680_v12  ;;  %v2608_v21 = vld [vmem:[%s5772_s1 + $0x280] sm:$0xf]  ;;  %v3781_v22 = vld [vmem:[%s5772_s1 + $0x284] sm:$0xf0]  ;;  %v2545_v31 = vor.u32 %v3765_v18, %v2544_v17 }
  0x22   : > { %721 = vmatpush.bf16.msra.mxu1 %v2633_v57  ;;  %v2672_v23 = vld [vmem:[%s5772_s1 + $0x300] sm:$0xf]  ;;  %v2745_v24 = vor.u32 %v3815_v15, %v2744_v14  ;;  %v3797_v25 = vld [vmem:[%s5772_s1 + $0x304] sm:$0xf0]  ;;  %v3778_v28 = vld [vmem:[%s5772_s1 + $0x274] sm:$0xf]  ;;  %v2609_v35 = vor.u32 %v3781_v22, %v2608_v21 }
  0x23   : > { %734 = vmatpush.bf16.msra.mxu2 %v2697_v58  ;;  %v2736_v26 = vld [vmem:[%s5772_s1 + $0x380] sm:$0xf]  ;;  %v3813_v27 = vld [vmem:[%s5772_s1 + $0x384] sm:$0xf0]  ;;  %v2602_v29 = vld [vmem:[%s5772_s1 + $0x278] sm:$0xf0]  ;;  %v2673_v36 = vor.u32 %v3797_v25, %v2672_v23 }
  0x24   : > { %747 = vmatpush.bf16.msra.mxu3 %v2761_v62  ;;  %v3794_v30 = vld [vmem:[%s5772_s1 + $0x2f4] sm:$0xf]  ;;  %v2666_v32 = vld [vmem:[%s5772_s1 + $0x2f8] sm:$0xf0]  ;;  %v2737_v39 = vor.u32 %v3813_v27, %v2736_v26  ;;  %v2605_v40 = vor.u32 %v3778_v28, %v2602_v29  ;;  %v3776_v43 = vld [vmem:[%s5772_s1 + $0x264] sm:$0xf] }
  0x25   : > { %709 = vmatpush.bf16.msra.mxu0 %v2561_v4  ;;  %v3810_v33 = vld [vmem:[%s5772_s1 + $0x374] sm:$0xf]  ;;  %v2730_v34 = vld [vmem:[%s5772_s1 + $0x378] sm:$0xf0]  ;;  %v2669_v41 = vor.u32 %v3794_v30, %v2666_v32  ;;  %v2594_v44 = vld [vmem:[%s5772_s1 + $0x268] sm:$0xf0] }
  0x26   : > { %722 = vmatpush.bf16.msra.mxu1 %v2625_v5  ;;  %v3826_v37 = vld [vmem:[%s5772_s1 + $0x3f4] sm:$0xf]  ;;  %v2794_v38 = vld [vmem:[%s5772_s1 + $0x3f8] sm:$0xf0]  ;;  %v2733_v42 = vor.u32 %v3810_v33, %v2730_v34  ;;  %v3792_v45 = vld [vmem:[%s5772_s1 + $0x2e4] sm:$0xf]  ;;  %v2597_v52 = vor.u32 %v3776_v43, %v2594_v44 }
  0x27   : > { %735 = vmatpush.bf16.msra.mxu2 %v2689_v6  ;;  %v2797_v46 = vor.u32 %v3826_v37, %v2794_v38  ;;  %v2658_v47 = vld [vmem:[%s5772_s1 + $0x2e8] sm:$0xf0]  ;;  %v3808_v48 = vld [vmem:[%s5772_s1 + $0x364] sm:$0xf]  ;;  %v3774_v55 = vld [vmem:[%s5772_s1 + $0x254] sm:$0xf] }
  0x28   : > { %748 = vmatpush.bf16.msra.mxu3 %v2753_v10  ;;  %v2722_v49 = vld [vmem:[%s5772_s1 + $0x368] sm:$0xf0]  ;;  %v3824_v50 = vld [vmem:[%s5772_s1 + $0x3e4] sm:$0xf]  ;;  %v2661_v53 = vor.u32 %v3792_v45, %v2658_v47  ;;  %v2586_v56 = vld [vmem:[%s5772_s1 + $0x258] sm:$0xf0] }
  0x29   : > { %710 = vmatpush.bf16.msra.mxu0 %v2553_v16  ;;  %v2786_v51 = vld [vmem:[%s5772_s1 + $0x3e8] sm:$0xf0]  ;;  %v2725_v54 = vor.u32 %v3808_v48, %v2722_v49  ;;  %v3790_v57 = vld [vmem:[%s5772_s1 + $0x2d4] sm:$0xf]  ;;  %v2650_v59 = vld [vmem:[%s5772_s1 + $0x2d8] sm:$0xf0]  ;;  %v2589_v0 = vor.u32 %v3774_v55, %v2586_v56 }
  0x2a   : > { %723 = vmatpush.bf16.msra.mxu1 %v2617_v19  ;;  %v2789_v58 = vor.u32 %v3824_v50, %v2786_v51  ;;  %v3806_v60 = vld [vmem:[%s5772_s1 + $0x354] sm:$0xf]  ;;  %v2714_v61 = vld [vmem:[%s5772_s1 + $0x358] sm:$0xf0]  ;;  %v3772_v1 = vld [vmem:[%s5772_s1 + $0x244] sm:$0xf]  ;;  %v2653_v2 = vor.u32 %v3790_v57, %v2650_v59 }
  0x2b   : > { %736 = vmatpush.bf16.msra.mxu2 %v2681_v20  ;;  %v3822_v62 = vld [vmem:[%s5772_s1 + $0x3d4] sm:$0xf]  ;;  %v2778_v63 = vld [vmem:[%s5772_s1 + $0x3d8] sm:$0xf0]  ;;  %v2717_v3 = vor.u32 %v3806_v60, %v2714_v61  ;;  %v2578_v4 = vld [vmem:[%s5772_s1 + $0x248] sm:$0xf0] }
  0x2c   : > { %749 = vmatpush.bf16.msra.mxu3 %v2745_v24  ;;  %v3788_v5 = vld [vmem:[%s5772_s1 + $0x2c4] sm:$0xf]  ;;  %v2642_v6 = vld [vmem:[%s5772_s1 + $0x2c8] sm:$0xf0]  ;;  %v2781_v7 = vor.u32 %v3822_v62, %v2778_v63  ;;  %s5786_s13 = smov (!%p193_p5, %s4023_s13), 1  ;;  %v2581_v12 = vor.u32 %v3772_v1, %v2578_v4  ;;  %s5788_s12 = smov (!%p200_p6, %s4019_s12), 1 }
  0x2d   : > { %711 = vmatpush.bf16.msra.mxu0 %v2545_v31  ;;  %v3804_v8 = vld [vmem:[%s5772_s1 + $0x344] sm:$0xf]  ;;  %v2706_v9 = vld [vmem:[%s5772_s1 + $0x348] sm:$0xf0]  ;;  %s3956_s4 = smul.u32 24, %s5786_s13  ;;  %v2645_v13 = vor.u32 %v3788_v5, %v2642_v6  ;;  %vm2277_vm0 = vcmask 1041408  }
  0x2e   : > { %724 = vmatpush.bf16.msra.mxu1 %v2609_v35  ;;  %v3820_v10 = vld [vmem:[%s5772_s1 + $0x3c4] sm:$0xf]  ;;  %v2770_v11 = vld [vmem:[%s5772_s1 + $0x3c8] sm:$0xf0]  ;;  %v2709_v14 = vor.u32 %v3804_v8, %v2706_v9  ;;  %v3770_v15 = vld [vmem:[%s5772_s1 + $0x234] sm:$0xf] }
  0x2f   : > { %737 = vmatpush.bf16.msra.mxu2 %v2673_v36  ;;  %v2570_v16 = vld [vmem:[%s5772_s1 + $0x238] sm:$0xf0]  ;;  %v3786_v17 = vld [vmem:[%s5772_s1 + $0x2b4] sm:$0xf]  ;;  %v2773_v18 = vor.u32 %v3820_v10, %v2770_v11  ;;  %s197_s27 = scalar_lea.vmem %s5771_s0, %s3956_s4  ;;  %v3768_v25 = vld [vmem:[%s5772_s1 + $0x224] sm:$0xf] }
  0x30   : > { %750 = vmatpush.bf16.msra.mxu3 %v2737_v39  ;;  %v2634_v19 = vld [vmem:[%s5772_s1 + $0x2b8] sm:$0xf0]  ;;  %v3802_v20 = vld [vmem:[%s5772_s1 + $0x334] sm:$0xf]  ;;  %s4412_s7 = scalar_lea.vmem %s197_s27, %s3699_s5  ;;  %v2573_v24 = vor.u32 %v3770_v15, %v2570_v16  ;;  %v2562_v29 = vld [vmem:[%s5772_s1 + $0x228] sm:$0xf0] }
  0x31   : > { %756 = vmatpush.bf16.msrb.mxu0 %v2605_v40  ;;  %v2698_v21 = vld [vmem:[%s5772_s1 + $0x338] sm:$0xf0]  ;;  %v3818_v22 = vld [vmem:[%s5772_s1 + $0x3b4] sm:$0xf]  ;;  %v284_v26 = vld [vmem:[%s4412_s7] sm:$0xff]  ;;  %v2637_v27 = vor.u32 %v3786_v17, %v2634_v19  ;;  %v2565_v37 = vor.u32 %v3768_v25, %v2562_v29  ;;  %s2470_s26 = sshll.u32 %s5788_s12, 1 }
  0x32   : > { %769 = vmatpush.bf16.msrb.mxu1 %v2669_v41  ;;  %v2762_v23 = vld [vmem:[%s5772_s1 + $0x3b8] sm:$0xf0]  ;;  %v2701_v28 = vor.u32 %v3802_v20, %v2698_v21  ;;  %v3784_v30 = vld [vmem:[%s5772_s1 + $0x2a4] sm:$0xf]  ;;  %351 = vst [vmem:[#allocation1] ss:$4 sm:$0xff] %v284_v26 }
  0x33   : > { %782 = vmatpush.bf16.msrb.mxu2 %v2733_v42  ;;  %v2765_v31 = vor.u32 %v3818_v22, %v2762_v23  ;;  %v2626_v32 = vld [vmem:[%s5772_s1 + $0x2a8] sm:$0xf0]  ;;  %v3800_v33 = vld [vmem:[%s5772_s1 + $0x324] sm:$0xf]  ;;  %v3766_v38 = vld [vmem:[%s5772_s1 + $0x214] sm:$0xf] }
  0x34   : > { %795 = vmatpush.bf16.msrb.mxu3 %v2797_v46  ;;  %v2690_v34 = vld [vmem:[%s5772_s1 + $0x328] sm:$0xf0]  ;;  %v3816_v35 = vld [vmem:[%s5772_s1 + $0x3a4] sm:$0xf]  ;;  %v2554_v39 = vld [vmem:[%s5772_s1 + $0x218] sm:$0xf0]  ;;  %v2629_v41 = vor.u32 %v3784_v30, %v2626_v32 }
  0x35   : > { %757 = vmatpush.bf16.msrb.mxu0 %v2597_v52  ;;  %v2754_v36 = vld [vmem:[%s5772_s1 + $0x3a8] sm:$0xf0]  ;;  %v3782_v40 = vld [vmem:[%s5772_s1 + $0x294] sm:$0xf]  ;;  %v2693_v42 = vor.u32 %v3800_v33, %v2690_v34  ;;  %v2618_v43 = vld [vmem:[%s5772_s1 + $0x298] sm:$0xf0] }
  0x36   : > { %770 = vmatpush.bf16.msrb.mxu1 %v2661_v53  ;;  %v3798_v44 = vld [vmem:[%s5772_s1 + $0x314] sm:$0xf]  ;;  %v2682_v45 = vld [vmem:[%s5772_s1 + $0x318] sm:$0xf0]  ;;  %v2757_v46 = vor.u32 %v3816_v35, %v2754_v36  ;;  %v219_v49 = vld [vmem:[%s4412_s7] sm:$0x55]  ;;  %v2621_v55 = vor.u32 %v3782_v40, %v2618_v43 }
  0x37   : > { %783 = vmatpush.bf16.msrb.mxu2 %v2725_v54  ;;  %v3814_v47 = vld [vmem:[%s5772_s1 + $0x394] sm:$0xf]  ;;  %v2746_v48 = vld [vmem:[%s5772_s1 + $0x398] sm:$0xf0]  ;;  %v3764_v50 = vld [vmem:[%s5772_s1 + $0x204] sm:$0xf]  ;;  %v2557_v54 = vor.u32 %v3766_v38, %v2554_v39  ;;  %v2685_v56 = vor.u32 %v3798_v44, %v2682_v45 }
  0x38   : > { %796 = vmatpush.bf16.msrb.mxu3 %v2789_v58  ;;  %v2546_v51 = vld [vmem:[%s5772_s1 + $0x208] sm:$0xf0]  ;;  %v3780_v57 = vld [vmem:[%s5772_s1 + $0x284] sm:$0xf]  ;;  %v2749_v1 = vor.u32 %v3814_v47, %v2746_v48  ;;  %v2856_v6 = vld [vmem:[%s5772_s1 + $0x70] sm:$0xf] }
  0x39   : > { %758 = vmatpush.bf16.msrb.mxu0 %v2589_v0  ;;  %v354_v52 = vld.sshfl [vmem:[#allocation1 + $0x10] sm:$0xff pattern:$0x73625140]  ;;  %v355_v53 = vld.sshfl [vmem:[#allocation1 + $0x18] sm:$0xff pattern:$0x73625140] }
  0x3a   : > { %771 = vmatpush.bf16.msrb.mxu1 %v2653_v2  ;;  %v2610_v58 = vld [vmem:[%s5772_s1 + $0x288] sm:$0xf0]  ;;  %v368_v59 = vshrl.u32 %v354_v52, 16  ;;  %v370_v60 = vshll.u32 %v354_v52, 16  ;;  %v374_v61 = vshrl.u32 %v355_v53, 16  ;;  %v376_v62 = vshll.u32 %v355_v53, 16 }
  0x3b   : > { %784 = vmatpush.bf16.msrb.mxu2 %v2717_v3  ;;  %v3796_v63 = vld [vmem:[%s5772_s1 + $0x304] sm:$0xf]  ;;  %v2674_v0 = vld [vmem:[%s5772_s1 + $0x308] sm:$0xf0]  ;;  %v2920_v15 = vld [vmem:[%s5772_s1 + $0xf0] sm:$0xf]  ;;  %v2613_v20 = vor.u32 %v3780_v57, %v2610_v58 }
  0x3c   : > { %797 = vmatpush.bf16.msrb.mxu3 %v2781_v7  ;;  %v352_v2 = vld.sshfl [vmem:[#allocation1] sm:$0xff pattern:$0x73625140]  ;;  %v353_v3 = vld.sshfl [vmem:[#allocation1 + $0x8] sm:$0xff pattern:$0x73625140] }
  0x3d   : > { %759 = vmatpush.bf16.msrb.mxu0 %v2581_v12  ;;  %v3812_v4 = vld [vmem:[%s5772_s1 + $0x384] sm:$0xf]  ;;  %v2738_v5 = vld [vmem:[%s5772_s1 + $0x388] sm:$0xf0]  ;;  %v3715_v7 = vld [vmem:[%s5772_s1 + $0x74] sm:$0xf0] }
  0x3e   : > { %772 = vmatpush.bf16.msrb.mxu1 %v2645_v13  ;;  %v372_v8 = vrot.slane %v370_v60, 1  ;;  %v378_v9 = vrot.slane %v376_v62, 1  ;;  %v356_v10 = vshrl.u32 %v352_v2, 16  ;;  %v358_v11 = vshll.u32 %v352_v2, 16  ;;  %809 = vst [vmem:[#allocation1] ss:$4 sm:$0xff] %v219_v49 }
  0x3f   : > { %785 = vmatpush.bf16.msrb.mxu2 %v2709_v14  ;;  %v362_v12 = vshrl.u32 %v353_v3, 16  ;;  %v364_v13 = vshll.u32 %v353_v3, 16  ;;  %v2549_v14 = vor.u32 %v3764_v50, %v2546_v51  ;;  %v3731_v16 = vld [vmem:[%s5772_s1 + $0xf4] sm:$0xf0]  ;;  %v2984_v21 = vld [vmem:[%s5772_s1 + $0x170] sm:$0xf]  ;;  %v2857_v29 = vor.u32 %v3715_v7, %v2856_v6 }
  0x40   : > { %798 = vmatpush.bf16.msrb.mxu3 %v2773_v18  ;;  %v4500_v17 = vor.u32 %v372_v8, %v368_v59  ;;  %v4502_v18 = vor.u32 %v378_v9, %v374_v61  ;;  %v360_v19 = vrot.slane %v358_v11, 1  ;;  %v3747_v22 = vld [vmem:[%s5772_s1 + $0x174] sm:$0xf0]  ;;  %v3048_v25 = vld [vmem:[%s5772_s1 + $0x1f0] sm:$0xf]  ;;  %s2471_s27 = sshll.u32 %s5786_s13, 2 }
  0x41   : > { %760 = vmatpush.bf16.msrb.mxu0 %v2573_v24  ;;  %v366_v23 = vrot.slane %v364_v13, 1  ;;  %v2677_v24 = vor.u32 %v3796_v63, %v2674_v0  ;;  %v3763_v26 = vld [vmem:[%s5772_s1 + $0x1f4] sm:$0xf0]  ;;  %v2985_v32 = vor.u32 %v3747_v22, %v2984_v21  ;;  %v2848_v33 = vld [vmem:[%s5772_s1 + $0x60] sm:$0xf]  ;;  %s5739_s28 = sadd.s32 %s2471_s27, %s2470_s26  ;;  %vm2311_vm1 = vcmask 1040384  }
  0x42   : > { %773 = vmatpush.bf16.msrb.mxu1 %v2637_v27  ;;  %738 = vmatmul.bf16.vlgmr.msra.gmra.mxu2 %v4500_v17  ;;  %v4518_v27 = vor.u32 %v360_v19, %v356_v10  ;;  %v3713_v34 = vld [vmem:[%s5772_s1 + $0x64] sm:$0xf0]  ;;  %v2912_v35 = vld [vmem:[%s5772_s1 + $0xe0] sm:$0xf]  ;;  %v3049_v36 = vor.u32 %v3763_v26, %v3048_v25  ;;  %v2840_v45 = vld [vmem:[%s5772_s1 + $0x50] sm:$0xf] }
  0x43   : > { %786 = vmatpush.bf16.msrb.mxu2 %v2701_v28  ;;  %751 = vmatmul.bf16.vlgmr.msra.gmra.mxu3 %v4502_v18  ;;  %v2741_v28 = vor.u32 %v3812_v4, %v2738_v5  ;;  %v4520_v30 = vor.u32 %v366_v23, %v362_v12  ;;  %v2976_v38 = vld [vmem:[%s5772_s1 + $0x160] sm:$0xf]  ;;  %v3745_v39 = vld [vmem:[%s5772_s1 + $0x164] sm:$0xf0]  ;;  %v2904_v47 = vld [vmem:[%s5772_s1 + $0xd0] sm:$0xf] }
  0x44   : > { %799 = vmatpush.bf16.msrb.mxu3 %v2765_v31  ;;  %v2921_v31 = vor.u32 %v3731_v16, %v2920_v15  ;;  %712 = vmatmul.bf16.vlgmr.msra.gmra.mxu0 %v4518_v27  ;;  %v3040_v40 = vld [vmem:[%s5772_s1 + $0x1e0] sm:$0xf]  ;;  %v2977_v44 = vor.u32 %v3745_v39, %v2976_v38  ;;  %v3727_v49 = vld [vmem:[%s5772_s1 + $0xd4] sm:$0xf0]  ;;  %v2968_v50 = vld [vmem:[%s5772_s1 + $0x150] sm:$0xf] }
  0x45   : > { %761 = vmatpush.bf16.msrb.mxu0 %v2565_v37  ;;  %v3729_v37 = vld [vmem:[%s5772_s1 + $0xe4] sm:$0xf0]  ;;  %725 = vmatmul.bf16.vlgmr.msra.gmra.mxu1 %v4520_v30  ;;  %v3743_v51 = vld [vmem:[%s5772_s1 + $0x154] sm:$0xf0]  ;;  %v3032_v52 = vld [vmem:[%s5772_s1 + $0x1d0] sm:$0xf] }
  0x46   : > { %774 = vmatpush.bf16.msrb.mxu1 %v2629_v41  ;;  %v3761_v41 = vld [vmem:[%s5772_s1 + $0x1e4] sm:$0xf0]  ;;  %v2913_v43 = vor.u32 %v3729_v37, %v2912_v35  ;;  %v3759_v53 = vld [vmem:[%s5772_s1 + $0x1d4] sm:$0xf0]  ;;  %v2969_v57 = vor.u32 %v3743_v51, %v2968_v50  ;;  %v2896_v59 = vld [vmem:[%s5772_s1 + $0xc0] sm:$0xf] }
  0x47   : > { %787 = vmatpush.bf16.msrb.mxu2 %v2693_v42  ;;  %v2849_v42 = vor.u32 %v3713_v34, %v2848_v33  ;;  %v3041_v48 = vor.u32 %v3761_v41, %v3040_v40  ;;  %v3709_v58 = vld [vmem:[%s5772_s1 + $0x44] sm:$0xf0]  ;;  %v3033_v61 = vor.u32 %v3759_v53, %v3032_v52  ;;  %v2960_v62 = vld [vmem:[%s5772_s1 + $0x140] sm:$0xf]  ;;  %v2824_v3 = vld [vmem:[%s5772_s1 + $0x30] sm:$0xf] }
  0x48   : > { %800 = vmatpush.bf16.msrb.mxu3 %v2757_v46  ;;  %v3711_v46 = vld [vmem:[%s5772_s1 + $0x54] sm:$0xf0]  ;;  %v3725_v60 = vld [vmem:[%s5772_s1 + $0xc4] sm:$0xf0]  ;;  %v3024_v0 = vld [vmem:[%s5772_s1 + $0x1c0] sm:$0xf] }
  0x49   : > { %762 = vmatpush.bf16.msrb.mxu0 %v2557_v54  ;;  %v2841_v54 = vor.u32 %v3711_v46, %v2840_v45  ;;  %v3741_v63 = vld [vmem:[%s5772_s1 + $0x144] sm:$0xf0]  ;;  %v3707_v4 = vld [vmem:[%s5772_s1 + $0x34] sm:$0xf0]  ;;  %v2888_v6 = vld [vmem:[%s5772_s1 + $0xb0] sm:$0xf]  ;;  %v2897_v9 = vor.u32 %v3725_v60, %v2896_v59 }
  0x4a   : > { %775 = vmatpush.bf16.msrb.mxu1 %v2621_v55  ;;  %v2832_v55 = vld [vmem:[%s5772_s1 + $0x40] sm:$0xf]  ;;  %v3757_v2 = vld [vmem:[%s5772_s1 + $0x1c4] sm:$0xf0]  ;;  %v3723_v7 = vld [vmem:[%s5772_s1 + $0xb4] sm:$0xf0]  ;;  %v2961_v10 = vor.u32 %v3741_v63, %v2960_v62  ;;  %v2825_v21 = vor.u32 %v3707_v4, %v2824_v3 }
  0x4b   : > { %788 = vmatpush.bf16.msrb.mxu2 %v2685_v56  ;;  %v2905_v56 = vor.u32 %v3727_v49, %v2904_v47  ;;  %v2833_v5 = vor.u32 %v3709_v58, %v2832_v55  ;;  %v2952_v8 = vld [vmem:[%s5772_s1 + $0x130] sm:$0xf]  ;;  %v3739_v11 = vld [vmem:[%s5772_s1 + $0x134] sm:$0xf0]  ;;  %v2889_v22 = vor.u32 %v3723_v7, %v2888_v6  ;;  %v3705_v25 = vld [vmem:[%s5772_s1 + $0x24] sm:$0xf0] }
  0x4c   : > { %801 = vmatpush.bf16.msrb.mxu3 %v2749_v1  ;;  %v3055_v1 = vld [vmem:[%s4412_s7 + $0x8] sm:$0x55]  ;;  %v3016_v12 = vld [vmem:[%s5772_s1 + $0x1b0] sm:$0xf]  ;;  %v3755_v13 = vld [vmem:[%s5772_s1 + $0x1b4] sm:$0xf0]  ;;  %v2953_v23 = vor.u32 %v3739_v11, %v2952_v8 }
  0x4d   : > { %763 = vmatpush.bf16.msrb.mxu0 %v2549_v14  ;;  %v3025_v14 = vor.u32 %v3757_v2, %v3024_v0  ;;  %v4621_v15 = vld.sshfl [vmem:[#allocation1] sm:$0xff pattern:$0x73625140]  ;;  %v4623_v16 = vld.sshfl [vmem:[#allocation1 + $0x10] sm:$0xff pattern:$0x73625140] }
  0x4e   : > { %776 = vmatpush.bf16.msrb.mxu1 %v2613_v20  ;;  %v4625_v19 = vld.sshfl [vmem:[#allocation1 + $0x8] sm:$0xff pattern:$0x73625140]  ;;  %v4627_v20 = vld.sshfl [vmem:[#allocation1 + $0x18] sm:$0xff pattern:$0x73625140] }
  0x4f   : > { %789 = vmatpush.bf16.msrb.mxu2 %v2677_v24  ;;  %1313 = vst [vmem:[#allocation1] ss:$4 sm:$0xff] %v3055_v1  ;;  %v2816_v24 = vld [vmem:[%s5772_s1 + $0x20] sm:$0xf]  ;;  %v3719_v38 = vld [vmem:[%s5772_s1 + $0x94] sm:$0xf0] }
  0x50   : > { %802 = vmatpush.bf16.msrb.mxu3 %v2741_v28  ;;  %v2880_v26 = vld [vmem:[%s5772_s1 + $0xa0] sm:$0xf]  ;;  %v3721_v28 = vld [vmem:[%s5772_s1 + $0xa4] sm:$0xf0]  ;;  %v2817_v33 = vor.u32 %v3705_v25, %v2816_v24  ;;  %v2936_v39 = vld [vmem:[%s5772_s1 + $0x110] sm:$0xf] }
  0x51   : > { %1138 = vmatpush.bf16.msra.mxu0 %v2857_v29  ;;  %v2944_v29 = vld [vmem:[%s5772_s1 + $0x120] sm:$0xf]  ;;  %v2881_v34 = vor.u32 %v3721_v28, %v2880_v26  ;;  %v3735_v40 = vld [vmem:[%s5772_s1 + $0x114] sm:$0xf0]  ;;  %v3000_v41 = vld [vmem:[%s5772_s1 + $0x190] sm:$0xf] }
  0x52   : > { %1151 = vmatpush.bf16.msra.mxu1 %v2921_v31  ;;  %790 = vmatmul.bf16.vlgmr.msrb.gmra.mxu2 %v4500_v17  ;;  %v3017_v17 = vor.u32 %v3755_v13, %v3016_v12  ;;  %v3737_v31 = vld [vmem:[%s5772_s1 + $0x124] sm:$0xf0]  ;;  %v2937_v47 = vor.u32 %v3735_v40, %v2936_v39  ;;  %v2928_v50 = vld [vmem:[%s5772_s1 + $0x100] sm:$0xf]  ;;  %v3714_v55 = vld [vmem:[%s5772_s1 + $0x74] sm:$0xf] }
  0x53   : > { %1164 = vmatpush.bf16.msra.mxu2 %v2985_v32  ;;  %803 = vmatmul.bf16.vlgmr.msrb.gmra.mxu3 %v4502_v18  ;;  %v3753_v32 = vld [vmem:[%s5772_s1 + $0x1a4] sm:$0xf0]  ;;  %v2945_v35 = vor.u32 %v3737_v31, %v2944_v29  ;;  %v3703_v18 = vld [vmem:[%s5772_s1 + $0x14] sm:$0xf0]  ;;  %v2992_v53 = vld [vmem:[%s5772_s1 + $0x180] sm:$0xf] }
  0x54   : > { %1177 = vmatpush.bf16.msra.mxu3 %v3049_v36  ;;  %764 = vmatmul.bf16.vlgmr.msrb.gmra.mxu0 %v4518_v27  ;;  %v3008_v27 = vld [vmem:[%s5772_s1 + $0x1a0] sm:$0xf]  ;;  %v2872_v36 = vld [vmem:[%s5772_s1 + $0x90] sm:$0xf]  ;;  %v3701_v45 = vld [vmem:[%s5772_s1 + $0x4] sm:$0xf0] }
  0x55   : > { %1139 = vmatpush.bf16.msra.mxu0 %v2849_v42  ;;  %777 = vmatmul.bf16.vlgmr.msrb.gmra.mxu1 %v4520_v30  ;;  %v2808_v30 = vld [vmem:[%s5772_s1 + $0x10] sm:$0xf]  ;;  %v3009_v37 = vor.u32 %v3753_v32, %v3008_v27  ;;  %v3751_v42 = vld [vmem:[%s5772_s1 + $0x194] sm:$0xf0]  ;;  %v2873_v46 = vor.u32 %v3719_v38, %v2872_v36  ;;  %v3717_v49 = vld [vmem:[%s5772_s1 + $0x84] sm:$0xf0] }
  0x56   : > { %1152 = vmatpush.bf16.msra.mxu1 %v2913_v43  ;;  %v2809_v43 = vor.u32 %v3703_v18, %v2808_v30  ;;  %v3001_v51 = vor.u32 %v3751_v42, %v3000_v41  ;;  %v3733_v52 = vld [vmem:[%s5772_s1 + $0x104] sm:$0xf0]  ;;  %v2922_v59 = vld [vmem:[%s5772_s1 + $0xf8] sm:$0xf0]  ;;  %v3746_v60 = vld [vmem:[%s5772_s1 + $0x174] sm:$0xf] }
  0x57   : > { %1165 = vmatpush.bf16.msra.mxu2 %v2977_v44  ;;  %v2800_v44 = vld [vmem:[%s5772_s1] sm:$0xf]  ;;  %v2929_v63 = vor.u32 %v3733_v52, %v2928_v50  ;;  %v3762_v0 = vld [vmem:[%s5772_s1 + $0x1f4] sm:$0xf]  ;;  %v3050_v1 = vld [vmem:[%s5772_s1 + $0x1f8] sm:$0xf0] }
  0x58   : > { %1178 = vmatpush.bf16.msra.mxu3 %v3041_v48  ;;  %v2864_v48 = vld [vmem:[%s5772_s1 + $0x80] sm:$0xf]  ;;  %v2801_v58 = vor.u32 %v3701_v45, %v2800_v44  ;;  %v3712_v6 = vld [vmem:[%s5772_s1 + $0x64] sm:$0xf]  ;;  %v2850_v7 = vld [vmem:[%s5772_s1 + $0x68] sm:$0xf0] }
  0x59   : > { %1140 = vmatpush.bf16.msra.mxu0 %v2841_v54  ;;  %v3749_v54 = vld [vmem:[%s5772_s1 + $0x184] sm:$0xf0]  ;;  %v2865_v62 = vor.u32 %v3717_v49, %v2864_v48  ;;  %v3728_v8 = vld [vmem:[%s5772_s1 + $0xe4] sm:$0xf]  ;;  %v2978_v12 = vld [vmem:[%s5772_s1 + $0x168] sm:$0xf0] }
  0x5a   : > { %1153 = vmatpush.bf16.msra.mxu1 %v2905_v56  ;;  %v2858_v56 = vld [vmem:[%s5772_s1 + $0x78] sm:$0xf0]  ;;  %v2993_v2 = vor.u32 %v3749_v54, %v2992_v53  ;;  %v3744_v11 = vld [vmem:[%s5772_s1 + $0x164] sm:$0xf]  ;;  %v3710_v24 = vld [vmem:[%s5772_s1 + $0x54] sm:$0xf] }
  0x5b   : > { %1166 = vmatpush.bf16.msra.mxu2 %v2969_v57  ;;  %v3730_v57 = vld [vmem:[%s5772_s1 + $0xf4] sm:$0xf]  ;;  %v2861_v3 = vor.u32 %v3714_v55, %v2858_v56  ;;  %v3760_v13 = vld [vmem:[%s5772_s1 + $0x1e4] sm:$0xf]  ;;  %v2842_v25 = vld [vmem:[%s5772_s1 + $0x58] sm:$0xf0] }
  0x5c   : > { %1179 = vmatpush.bf16.msra.mxu3 %v3033_v61  ;;  %v2986_v61 = vld [vmem:[%s5772_s1 + $0x178] sm:$0xf0]  ;;  %v2925_v4 = vor.u32 %v3730_v57, %v2922_v59  ;;  %v3726_v26 = vld [vmem:[%s5772_s1 + $0xd4] sm:$0xf]  ;;  %v3708_v30 = vld [vmem:[%s5772_s1 + $0x44] sm:$0xf] }
  0x5d   : > { %1141 = vmatpush.bf16.msra.mxu0 %v2833_v5  ;;  %v2989_v5 = vor.u32 %v3746_v60, %v2986_v61  ;;  %v2906_v28 = vld [vmem:[%s5772_s1 + $0xd8] sm:$0xf0]  ;;  %v3742_v29 = vld [vmem:[%s5772_s1 + $0x154] sm:$0xf]  ;;  %v2834_v18 = vld [vmem:[%s5772_s1 + $0x48] sm:$0xf0] }
  0x5e   : > { %1154 = vmatpush.bf16.msra.mxu1 %v2897_v9  ;;  %v3053_v9 = vor.u32 %v3762_v0, %v3050_v1  ;;  %v2970_v31 = vld [vmem:[%s5772_s1 + $0x158] sm:$0xf0]  ;;  %v3758_v27 = vld [vmem:[%s5772_s1 + $0x1d4] sm:$0xf]  ;;  %v3724_v36 = vld [vmem:[%s5772_s1 + $0xc4] sm:$0xf] }
  0x5f   : > { %1167 = vmatpush.bf16.msra.mxu2 %v2961_v10  ;;  %v2914_v10 = vld [vmem:[%s5772_s1 + $0xe8] sm:$0xf0]  ;;  %v3034_v32 = vld [vmem:[%s5772_s1 + $0x1d8] sm:$0xf0]  ;;  %v3740_v39 = vld [vmem:[%s5772_s1 + $0x144] sm:$0xf] }
  0x60   : > { %1180 = vmatpush.bf16.msra.mxu3 %v3025_v14  ;;  %v3042_v14 = vld [vmem:[%s5772_s1 + $0x1e8] sm:$0xf0]  ;;  %v3756_v41 = vld [vmem:[%s5772_s1 + $0x1c4] sm:$0xf]  ;;  %v3722_v48 = vld [vmem:[%s5772_s1 + $0xb4] sm:$0xf] }
  0x61   : > { %1142 = vmatpush.bf16.msra.mxu0 %v2825_v21  ;;  %v2853_v21 = vor.u32 %v3712_v6, %v2850_v7  ;;  %v2898_v38 = vld [vmem:[%s5772_s1 + $0xc8] sm:$0xf0]  ;;  %v2890_v50 = vld [vmem:[%s5772_s1 + $0xb8] sm:$0xf0]  ;;  %v3754_v53 = vld [vmem:[%s5772_s1 + $0x1b4] sm:$0xf] }
  0x62   : > { %1155 = vmatpush.bf16.msra.mxu1 %v2889_v22  ;;  %v2917_v22 = vor.u32 %v3728_v8, %v2914_v10  ;;  %v2962_v40 = vld [vmem:[%s5772_s1 + $0x148] sm:$0xf0]  ;;  %v2901_v44 = vor.u32 %v3724_v36, %v2898_v38  ;;  %v2954_v52 = vld [vmem:[%s5772_s1 + $0x138] sm:$0xf0]  ;;  %v2893_v56 = vor.u32 %v3722_v48, %v2890_v50  ;;  %v3720_v60 = vld [vmem:[%s5772_s1 + $0xa4] sm:$0xf] }
  0x63   : > { %1168 = vmatpush.bf16.msra.mxu2 %v2953_v23  ;;  %v2981_v23 = vor.u32 %v3744_v11, %v2978_v12  ;;  %v3026_v42 = vld [vmem:[%s5772_s1 + $0x1c8] sm:$0xf0]  ;;  %v2965_v45 = vor.u32 %v3740_v39, %v2962_v40  ;;  %v3018_v54 = vld [vmem:[%s5772_s1 + $0x1b8] sm:$0xf0]  ;;  %v3752_v1 = vld [vmem:[%s5772_s1 + $0x1a4] sm:$0xf] }
  0x64   : > { %1181 = vmatpush.bf16.msra.mxu3 %v3017_v17  ;;  %v3045_v17 = vor.u32 %v3760_v13, %v3042_v14  ;;  %v3029_v49 = vor.u32 %v3756_v41, %v3026_v42  ;;  %v2818_v59 = vld [vmem:[%s5772_s1 + $0x28] sm:$0xf0]  ;;  %v3021_v61 = vor.u32 %v3754_v53, %v3018_v54  ;;  %v3702_v6 = vld [vmem:[%s5772_s1 + $0x14] sm:$0xf]  ;;  %v2810_v7 = vld [vmem:[%s5772_s1 + $0x18] sm:$0xf0] }
  0x65   : > { %1143 = vmatpush.bf16.msra.mxu0 %v2817_v33  ;;  %v2845_v33 = vor.u32 %v3710_v24, %v2842_v25  ;;  %v2946_v0 = vld [vmem:[%s5772_s1 + $0x128] sm:$0xf0]  ;;  %v3718_v8 = vld [vmem:[%s5772_s1 + $0x94] sm:$0xf]  ;;  %v2874_v10 = vld [vmem:[%s5772_s1 + $0x98] sm:$0xf0] }
  0x66   : > { %1156 = vmatpush.bf16.msra.mxu1 %v2881_v34  ;;  %v2909_v34 = vor.u32 %v3726_v26, %v2906_v28  ;;  %v3734_v11 = vld [vmem:[%s5772_s1 + $0x114] sm:$0xf]  ;;  %v2938_v12 = vld [vmem:[%s5772_s1 + $0x118] sm:$0xf0]  ;;  %v2877_v24 = vor.u32 %v3718_v8, %v2874_v10  ;;  %v3716_v26 = vld [vmem:[%s5772_s1 + $0x84] sm:$0xf] }
  0x67   : > { %1169 = vmatpush.bf16.msra.mxu2 %v2945_v35  ;;  %v2973_v35 = vor.u32 %v3742_v29, %v2970_v31  ;;  %v3750_v13 = vld [vmem:[%s5772_s1 + $0x194] sm:$0xf]  ;;  %v3002_v14 = vld [vmem:[%s5772_s1 + $0x198] sm:$0xf0]  ;;  %v2941_v25 = vor.u32 %v3734_v11, %v2938_v12  ;;  %v3732_v28 = vld [vmem:[%s5772_s1 + $0x104] sm:$0xf] }
  0x68   : > { %1182 = vmatpush.bf16.msra.mxu3 %v3009_v37  ;;  %v3037_v37 = vor.u32 %v3758_v27, %v3034_v32  ;;  %v3005_v29 = vor.u32 %v3750_v13, %v3002_v14  ;;  %v2930_v31 = vld [vmem:[%s5772_s1 + $0x108] sm:$0xf0]  ;;  %v3748_v27 = vld [vmem:[%s5772_s1 + $0x184] sm:$0xf]  ;;  %v3306_v36 = vld [vmem:[%s5772_s1 + $0x570] sm:$0xf] }
  0x69   : > { %1144 = vmatpush.bf16.msra.mxu0 %v2809_v43  ;;  %v2837_v43 = vor.u32 %v3708_v30, %v2834_v18  ;;  %v2994_v32 = vld [vmem:[%s5772_s1 + $0x188] sm:$0xf0]  ;;  %v3859_v18 = vld [vmem:[%s5772_s1 + $0x4f4] sm:$0xf0]  ;;  %v2933_v39 = vor.u32 %v3732_v28, %v2930_v31  ;;  %v3370_v40 = vld [vmem:[%s5772_s1 + $0x5f0] sm:$0xf] }
  0x6a   : > { %1157 = vmatpush.bf16.msra.mxu1 %v2873_v46  ;;  %v3706_v46 = vld [vmem:[%s5772_s1 + $0x34] sm:$0xf]  ;;  %v3891_v41 = vld [vmem:[%s5772_s1 + $0x5f4] sm:$0xf0]  ;;  %v2997_v42 = vor.u32 %v3748_v27, %v2994_v32  ;;  %v3234_v48 = vld [vmem:[%s5772_s1 + $0x4e0] sm:$0xf] }
  0x6b   : > { %1170 = vmatpush.bf16.msra.mxu2 %v2937_v47  ;;  %v2826_v47 = vld [vmem:[%s5772_s1 + $0x38] sm:$0xf0]  ;;  %v3857_v50 = vld [vmem:[%s5772_s1 + $0x4e4] sm:$0xf0]  ;;  %v3362_v53 = vld [vmem:[%s5772_s1 + $0x5e0] sm:$0xf] }
  0x6c   : > { %1183 = vmatpush.bf16.msra.mxu3 %v3001_v51  ;;  %v3738_v51 = vld [vmem:[%s5772_s1 + $0x134] sm:$0xf]  ;;  %v2829_v55 = vor.u32 %v3706_v46, %v2826_v47  ;;  %v3170_v46 = vld [vmem:[%s5772_s1 + $0x460] sm:$0xf]  ;;  %v3841_v47 = vld [vmem:[%s5772_s1 + $0x464] sm:$0xf0] }
  0x6d   : > { %1145 = vmatpush.bf16.msra.mxu0 %v2801_v58  ;;  %v2957_v57 = vor.u32 %v3738_v51, %v2954_v52  ;;  %v3704_v58 = vld [vmem:[%s5772_s1 + $0x24] sm:$0xf]  ;;  %v3298_v51 = vld [vmem:[%s5772_s1 + $0x560] sm:$0xf]  ;;  %v3873_v52 = vld [vmem:[%s5772_s1 + $0x564] sm:$0xf0] }
  0x6e   : > { %1158 = vmatpush.bf16.msra.mxu1 %v2865_v62  ;;  %v2882_v62 = vld [vmem:[%s5772_s1 + $0xa8] sm:$0xf0]  ;;  %v3889_v54 = vld [vmem:[%s5772_s1 + $0x5e4] sm:$0xf0]  ;;  %v3218_v10 = vld [vmem:[%s5772_s1 + $0x4c0] sm:$0xf] }
  0x6f   : > { %1171 = vmatpush.bf16.msra.mxu2 %v2929_v63  ;;  %v3736_v63 = vld [vmem:[%s5772_s1 + $0x124] sm:$0xf]  ;;  %v4987_v8 = vld.sshfl [vmem:[#allocation1 + $0x8] sm:$0xff pattern:$0x73625140]  ;;  %s2472_s29 = sshll.u32 %s5739_s28, 1 }
  0x70   : > { %1184 = vmatpush.bf16.msra.mxu3 %v2993_v2  ;;  %1146 = vmatmul.bf16.vlgmr.msra.gmra.mxu0 %v4621_v15  ;;  %v3010_v2 = vld [vmem:[%s5772_s1 + $0x1a8] sm:$0xf0]  ;;  %v3853_v11 = vld [vmem:[%s5772_s1 + $0x4c4] sm:$0xf0]  ;;  %v3282_v12 = vld [vmem:[%s5772_s1 + $0x540] sm:$0xf]  ;;  %s206_s30 = scalar_lea.vmem %s5773_s2, %s2472_s29  ;;  %s215_s8 = scalar_lea.vmem %s5774_s3, %s2472_s29 }
  0x71   : > { %1190 = vmatpush.bf16.msrb.mxu0 %v2861_v3  ;;  %1159 = vmatmul.bf16.vlgmr.msra.gmra.mxu1 %v4625_v19  ;;  %v2821_v3 = vor.u32 %v3704_v58, %v2818_v59  ;;  %v3839_v58 = vld [vmem:[%s5772_s1 + $0x454] sm:$0xf0]  ;;  %v3235_v59 = vor.u32 %v3857_v50, %v3234_v48  ;;  %v3869_v13 = vld [vmem:[%s5772_s1 + $0x544] sm:$0xf0]  ;;  %v3346_v14 = vld [vmem:[%s5772_s1 + $0x5c0] sm:$0xf] }
  0x72   : > { %1203 = vmatpush.bf16.msrb.mxu1 %v2925_v4  ;;  %1172 = vmatmul.bf16.vlgmr.msra.gmra.mxu2 %v4623_v16  ;;  %v2885_v4 = vor.u32 %v3720_v60, %v2882_v62  ;;  %v3299_v60 = vor.u32 %v3873_v52, %v3298_v51  ;;  %v3855_v62 = vld [vmem:[%s5772_s1 + $0x4d4] sm:$0xf0]  ;;  %v3274_v31 = vld [vmem:[%s5772_s1 + $0x530] sm:$0xf] }
  0x73   : > { %1216 = vmatpush.bf16.msrb.mxu2 %v2989_v5  ;;  %1185 = vmatmul.bf16.vlgmr.msra.gmra.mxu3 %v4627_v20  ;;  %v2949_v5 = vor.u32 %v3736_v63, %v2946_v0  ;;  %v3290_v63 = vld [vmem:[%s5772_s1 + $0x550] sm:$0xf]  ;;  %v3363_v0 = vor.u32 %v3889_v54, %v3362_v53  ;;  %v3867_v27 = vld [vmem:[%s5772_s1 + $0x534] sm:$0xf0] }
  0x74   : > { %1229 = vmatpush.bf16.msrb.mxu3 %v3053_v9  ;;  %v3013_v9 = vor.u32 %v3752_v1, %v3010_v2  ;;  %v3871_v1 = vld [vmem:[%s5772_s1 + $0x554] sm:$0xf0]  ;;  %v3354_v2 = vld [vmem:[%s5772_s1 + $0x5d0] sm:$0xf] }
  0x75   : > { %1191 = vmatpush.bf16.msrb.mxu0 %v2853_v21  ;;  %v2813_v21 = vor.u32 %v3702_v6, %v2810_v7  ;;  %v4985_v7 = vld.sshfl [vmem:[#allocation1] sm:$0xff pattern:$0x73625140]  ;;  %v3338_v32 = vld [vmem:[%s5772_s1 + $0x5b0] sm:$0xf] }
  0x76   : > { %1204 = vmatpush.bf16.msrb.mxu1 %v2917_v22  ;;  %v3700_v22 = vld [vmem:[%s5772_s1 + $0x4] sm:$0xf]  ;;  %v3831_v48 = vld [vmem:[%s5772_s1 + $0x414] sm:$0xf0]  ;;  %v3258_v52 = vld [vmem:[%s5772_s1 + $0x510] sm:$0xf] }
  0x77   : > { %1217 = vmatpush.bf16.msrb.mxu2 %v2981_v23  ;;  %v2802_v23 = vld [vmem:[%s5772_s1 + $0x8] sm:$0xf0]  ;;  %v3847_v51 = vld [vmem:[%s5772_s1 + $0x494] sm:$0xf0]  ;;  %v3322_v54 = vld [vmem:[%s5772_s1 + $0x590] sm:$0xf] }
  0x78   : > { %1230 = vmatpush.bf16.msrb.mxu3 %v3045_v17  ;;  %v2866_v17 = vld [vmem:[%s5772_s1 + $0x88] sm:$0xf0]  ;;  %v2805_v30 = vor.u32 %v3700_v22, %v2802_v23  ;;  %v3219_v23 = vor.u32 %v3853_v11, %v3218_v10  ;;  %v3863_v53 = vld [vmem:[%s5772_s1 + $0x514] sm:$0xf0]  ;;  %v3874_v10 = vld [vmem:[%s5772_s1 + $0x574] sm:$0xf] }
  0x79   : > { %1192 = vmatpush.bf16.msrb.mxu0 %v2845_v33  ;;  %v3178_v33 = vld [vmem:[%s5772_s1 + $0x470] sm:$0xf]  ;;  %v2869_v38 = vor.u32 %v3716_v26, %v2866_v17  ;;  %v3835_v26 = vld [vmem:[%s5772_s1 + $0x434] sm:$0xf0] }
  0x7a   : > { %1205 = vmatpush.bf16.msrb.mxu1 %v2909_v34  ;;  %v3843_v34 = vld [vmem:[%s5772_s1 + $0x474] sm:$0xf0]  ;;  %v3210_v17 = vld [vmem:[%s5772_s1 + $0x4b0] sm:$0xf] }
  0x7b   : > { %1218 = vmatpush.bf16.msrb.mxu2 %v2973_v35  ;;  %v3242_v35 = vld [vmem:[%s5772_s1 + $0x4f0] sm:$0xf] }
  0x7c   : > { %1231 = vmatpush.bf16.msrb.mxu3 %v3037_v37  ;;  %v3875_v37 = vld [vmem:[%s5772_s1 + $0x574] sm:$0xf0] }
  0x7d   : > { %1193 = vmatpush.bf16.msrb.mxu0 %v2837_v43  ;;  %v3179_v43 = vor.u32 %v3843_v34, %v3178_v33  ;;  %v3883_v33 = vld [vmem:[%s5772_s1 + $0x5b4] sm:$0xf0] }
  0x7e   : > { %1206 = vmatpush.bf16.msrb.mxu1 %v2901_v44  ;;  %v3243_v44 = vor.u32 %v3859_v18, %v3242_v35  ;;  %v3138_v18 = vld [vmem:[%s5772_s1 + $0x420] sm:$0xf] }
  0x7f   : > { %1219 = vmatpush.bf16.msrb.mxu2 %v2965_v45  ;;  %v3307_v45 = vor.u32 %v3875_v37, %v3306_v36  ;;  %v3833_v36 = vld [vmem:[%s5772_s1 + $0x424] sm:$0xf0]  ;;  %v3202_v37 = vld [vmem:[%s5772_s1 + $0x4a0] sm:$0xf] }
  0x80   : > { %1232 = vmatpush.bf16.msrb.mxu3 %v3029_v49  ;;  %v3371_v49 = vor.u32 %v3891_v41, %v3370_v40  ;;  %v3266_v40 = vld [vmem:[%s5772_s1 + $0x520] sm:$0xf]  ;;  %v3865_v41 = vld [vmem:[%s5772_s1 + $0x524] sm:$0xf0] }
  0x81   : > { %1194 = vmatpush.bf16.msrb.mxu0 %v2829_v55  ;;  %v3376_v55 = vld [vmem:[%s4412_s7 + $0x8] sm:$0xff] }
  0x82   : > { %1207 = vmatpush.bf16.msrb.mxu1 %v2893_v56  ;;  %v3171_v56 = vor.u32 %v3841_v47, %v3170_v46  ;;  %v3267_v46 = vor.u32 %v3865_v41, %v3266_v40  ;;  %v3130_v47 = vld [vmem:[%s5772_s1 + $0x410] sm:$0xf]  ;;  %v3870_v40 = vld [vmem:[%s5772_s1 + $0x554] sm:$0xf]  ;;  %v3292_v41 = vld [vmem:[%s5772_s1 + $0x558] sm:$0xf0] }
  0x83   : > { %1220 = vmatpush.bf16.msrb.mxu2 %v2957_v57  ;;  %v3162_v57 = vld [vmem:[%s5772_s1 + $0x450] sm:$0xf] }
  0x84   : > { %1233 = vmatpush.bf16.msrb.mxu3 %v3021_v61  ;;  %v3226_v61 = vld [vmem:[%s5772_s1 + $0x4d0] sm:$0xf]  ;;  %v3163_v6 = vor.u32 %v3839_v58, %v3162_v57  ;;  %v3122_v57 = vld [vmem:[%s5772_s1 + $0x400] sm:$0xf]  ;;  %v3829_v58 = vld [vmem:[%s5772_s1 + $0x404] sm:$0xf0] }
  0x85   : > { %1195 = vmatpush.bf16.msrb.mxu0 %v2821_v3  ;;  %v3887_v3 = vld [vmem:[%s5772_s1 + $0x5d4] sm:$0xf0] }
  0x86   : > { %1208 = vmatpush.bf16.msrb.mxu1 %v2885_v4  ;;  %v4980_v4 = vld.sshfl [vmem:[#allocation1 + $0x10] sm:$0xff pattern:$0x73625140] }
  0x87   : > { %1221 = vmatpush.bf16.msrb.mxu2 %v2949_v5  ;;  %v4982_v5 = vld.sshfl [vmem:[#allocation1 + $0x18] sm:$0xff pattern:$0x73625140] }
  0x88   : > { %1234 = vmatpush.bf16.msrb.mxu3 %v3013_v9  ;;  %v3837_v9 = vld [vmem:[%s5772_s1 + $0x444] sm:$0xf0]  ;;  %1815 = vst [vmem:[#allocation1] ss:$4 sm:$0xff] %v3376_v55  ;;  %v3879_v55 = vld [vmem:[%s5772_s1 + $0x594] sm:$0xf0] }
  0x89   : > { %1196 = vmatpush.bf16.msrb.mxu0 %v2813_v21  ;;  %v3885_v21 = vld [vmem:[%s5772_s1 + $0x5c4] sm:$0xf0] }
  0x8a   : > { %1209 = vmatpush.bf16.msrb.mxu1 %v2877_v24  ;;  %v3283_v24 = vor.u32 %v3869_v13, %v3282_v12  ;;  %v3347_v28 = vor.u32 %v3885_v21, %v3346_v14  ;;  %v3890_v13 = vld [vmem:[%s5772_s1 + $0x5f4] sm:$0xf]  ;;  %v3372_v14 = vld [vmem:[%s5772_s1 + $0x5f8] sm:$0xf0] }
  0x8b   : > { %1222 = vmatpush.bf16.msrb.mxu2 %v2941_v25  ;;  %v3146_v25 = vld [vmem:[%s5772_s1 + $0x430] sm:$0xf] }
  0x8c   : > { %1235 = vmatpush.bf16.msrb.mxu3 %v3005_v29  ;;  %v3851_v29 = vld [vmem:[%s5772_s1 + $0x4b4] sm:$0xf0]  ;;  %v3147_v34 = vor.u32 %v3835_v26, %v3146_v25  ;;  %v3840_v25 = vld [vmem:[%s5772_s1 + $0x464] sm:$0xf]  ;;  %v3172_v26 = vld [vmem:[%s5772_s1 + $0x468] sm:$0xf0] }
  0x8d   : > { %1197 = vmatpush.bf16.msrb.mxu0 %v2805_v30  ;;  %v3211_v35 = vor.u32 %v3851_v29, %v3210_v17  ;;  %v3275_v30 = vor.u32 %v3867_v27, %v3274_v31  ;;  %v3856_v17 = vld [vmem:[%s5772_s1 + $0x4e4] sm:$0xf]  ;;  %v3236_v29 = vld [vmem:[%s5772_s1 + $0x4e8] sm:$0xf0] }
  0x8e   : > { %1210 = vmatpush.bf16.msrb.mxu1 %v2869_v38  ;;  %v3339_v38 = vor.u32 %v3883_v33, %v3338_v32  ;;  %v3872_v31 = vld [vmem:[%s5772_s1 + $0x564] sm:$0xf]  ;;  %v3300_v27 = vld [vmem:[%s5772_s1 + $0x568] sm:$0xf0] }
  0x8f   : > { %1223 = vmatpush.bf16.msrb.mxu2 %v2933_v39  ;;  %v3849_v39 = vld [vmem:[%s5772_s1 + $0x4a4] sm:$0xf0]  ;;  %v3888_v32 = vld [vmem:[%s5772_s1 + $0x5e4] sm:$0xf]  ;;  %v3364_v33 = vld [vmem:[%s5772_s1 + $0x5e8] sm:$0xf0] }
  0x90   : > { %1236 = vmatpush.bf16.msrb.mxu3 %v2997_v42  ;;  %1198 = vmatmul.bf16.vlgmr.msrb.gmra.mxu0 %v4621_v15  ;;  %v3154_v15 = vld [vmem:[%s5772_s1 + $0x440] sm:$0xf] }
  0x91   : > { %1642 = vmatpush.bf16.msra.mxu0 %v3179_v43  ;;  %1211 = vmatmul.bf16.vlgmr.msrb.gmra.mxu1 %v4625_v19  ;;  %v3291_v19 = vor.u32 %v3871_v1, %v3290_v63  ;;  %v3155_v22 = vor.u32 %v3837_v9, %v3154_v15  ;;  %v3330_v42 = vld [vmem:[%s5772_s1 + $0x5a0] sm:$0xf]  ;;  %v3881_v43 = vld [vmem:[%s5772_s1 + $0x5a4] sm:$0xf0]  ;;  %v3842_v15 = vld [vmem:[%s5772_s1 + $0x474] sm:$0xf] }
  0x92   : > { %1655 = vmatpush.bf16.msra.mxu1 %v3243_v44  ;;  %1224 = vmatmul.bf16.vlgmr.msrb.gmra.mxu2 %v4623_v16  ;;  %v3227_v16 = vor.u32 %v3855_v62, %v3226_v61  ;;  %v3139_v44 = vor.u32 %v3833_v36, %v3138_v18  ;;  %v3331_v50 = vor.u32 %v3881_v43, %v3330_v42  ;;  %v3186_v61 = vld [vmem:[%s5772_s1 + $0x480] sm:$0xf]  ;;  %v3845_v62 = vld [vmem:[%s5772_s1 + $0x484] sm:$0xf0]  ;;  %v3244_v9 = vld [vmem:[%s5772_s1 + $0x4f8] sm:$0xf0] }
  0x93   : > { %1668 = vmatpush.bf16.msra.mxu2 %v3307_v45  ;;  %1237 = vmatmul.bf16.vlgmr.msrb.gmra.mxu3 %v4627_v20  ;;  %v3355_v20 = vor.u32 %v3887_v3, %v3354_v2  ;;  %v3203_v45 = vor.u32 %v3849_v39, %v3202_v37  ;;  %v3250_v63 = vld [vmem:[%s5772_s1 + $0x500] sm:$0xf]  ;;  %v3861_v1 = vld [vmem:[%s5772_s1 + $0x504] sm:$0xf0]  ;;  %v3187_v11 = vor.u32 %v3845_v62, %v3186_v61  ;;  %v3838_v18 = vld [vmem:[%s5772_s1 + $0x454] sm:$0xf] }
  0x94   : > { %1681 = vmatpush.bf16.msra.mxu3 %v3371_v49  ;;  %v3194_v49 = vld [vmem:[%s5772_s1 + $0x490] sm:$0xf]  ;;  %v3314_v2 = vld [vmem:[%s5772_s1 + $0x580] sm:$0xf]  ;;  %v3877_v3 = vld [vmem:[%s5772_s1 + $0x584] sm:$0xf0]  ;;  %v3251_v12 = vor.u32 %v3861_v1, %v3250_v63 }
  0x95   : > { %1643 = vmatpush.bf16.msra.mxu0 %v3171_v56  ;;  %v3131_v56 = vor.u32 %v3831_v48, %v3130_v47  ;;  %v3315_v21 = vor.u32 %v3877_v3, %v3314_v2  ;;  %v3164_v36 = vld [vmem:[%s5772_s1 + $0x458] sm:$0xf0]  ;;  %v3854_v37 = vld [vmem:[%s5772_s1 + $0x4d4] sm:$0xf]  ;;  %v3836_v47 = vld [vmem:[%s5772_s1 + $0x444] sm:$0xf] }
  0x96   : > { %1656 = vmatpush.bf16.msra.mxu1 %v3235_v59  ;;  %v3195_v59 = vor.u32 %v3847_v51, %v3194_v49  ;;  %v3228_v39 = vld [vmem:[%s5772_s1 + $0x4d8] sm:$0xf0]  ;;  %v3886_v42 = vld [vmem:[%s5772_s1 + $0x5d4] sm:$0xf]  ;;  %v3156_v48 = vld [vmem:[%s5772_s1 + $0x448] sm:$0xf0] }
  0x97   : > { %1669 = vmatpush.bf16.msra.mxu2 %v3299_v60  ;;  %v3259_v60 = vor.u32 %v3863_v53, %v3258_v52  ;;  %v3356_v43 = vld [vmem:[%s5772_s1 + $0x5d8] sm:$0xf0]  ;;  %v3852_v49 = vld [vmem:[%s5772_s1 + $0x4c4] sm:$0xf]  ;;  %v3220_v51 = vld [vmem:[%s5772_s1 + $0x4c8] sm:$0xf0] }
  0x98   : > { %1682 = vmatpush.bf16.msra.mxu3 %v3363_v0  ;;  %v3323_v0 = vor.u32 %v3879_v55, %v3322_v54  ;;  %v3868_v52 = vld [vmem:[%s5772_s1 + $0x544] sm:$0xf]  ;;  %v3284_v53 = vld [vmem:[%s5772_s1 + $0x548] sm:$0xf0]  ;;  %v3850_v61 = vld [vmem:[%s5772_s1 + $0x4b4] sm:$0xf] }
  0x99   : > { %1644 = vmatpush.bf16.msra.mxu0 %v3163_v6  ;;  %v3180_v6 = vld [vmem:[%s5772_s1 + $0x478] sm:$0xf0]  ;;  %v3884_v54 = vld [vmem:[%s5772_s1 + $0x5c4] sm:$0xf]  ;;  %v3348_v55 = vld [vmem:[%s5772_s1 + $0x5c8] sm:$0xf0] }
  0x9a   : > { %1657 = vmatpush.bf16.msra.mxu1 %v3227_v16  ;;  %v3858_v16 = vld [vmem:[%s5772_s1 + $0x4f4] sm:$0xf]  ;;  %v3351_v62 = vor.u32 %v3884_v54, %v3348_v55  ;;  %v3212_v63 = vld [vmem:[%s5772_s1 + $0x4b8] sm:$0xf0]  ;;  %v3955_v54 = vld [vmem:[%s5772_s1 + $0x7f4] sm:$0xf0] }
  0x9b   : > { %1670 = vmatpush.bf16.msra.mxu2 %v3291_v19  ;;  %v3123_v19 = vor.u32 %v3829_v58, %v3122_v57  ;;  %v3223_v57 = vor.u32 %v3852_v49, %v3220_v51  ;;  %v3287_v58 = vor.u32 %v3868_v52, %v3284_v53  ;;  %v3276_v1 = vld [vmem:[%s5772_s1 + $0x538] sm:$0xf0]  ;;  %v3882_v2 = vld [vmem:[%s5772_s1 + $0x5b4] sm:$0xf]  ;;  %v3627_v49 = vld [vmem:[%s5772_s1 + $0x770] sm:$0xf] }
  0x9c   : > { %1683 = vmatpush.bf16.msra.mxu3 %v3355_v20  ;;  %v3308_v20 = vld [vmem:[%s5772_s1 + $0x578] sm:$0xf0]  ;;  %v3691_v53 = vld [vmem:[%s5772_s1 + $0x7f0] sm:$0xf] }
  0x9d   : > { %1645 = vmatpush.bf16.msra.mxu0 %v3155_v22  ;;  %v3183_v22 = vor.u32 %v3842_v15, %v3180_v6  ;;  %v3340_v3 = vld [vmem:[%s5772_s1 + $0x5b8] sm:$0xf0]  ;;  %v3215_v6 = vor.u32 %v3850_v61, %v3212_v63  ;;  %v3555_v61 = vld [vmem:[%s5772_s1 + $0x6e0] sm:$0xf]  ;;  %v3921_v63 = vld [vmem:[%s5772_s1 + $0x6e4] sm:$0xf0] }
  0x9e   : > { %1658 = vmatpush.bf16.msra.mxu1 %v3219_v23  ;;  %v3247_v23 = vor.u32 %v3858_v16, %v3244_v9  ;;  %v3140_v9 = vld [vmem:[%s5772_s1 + $0x428] sm:$0xf0] }
  0x9f   : > { %1671 = vmatpush.bf16.msra.mxu2 %v3283_v24  ;;  %v3311_v24 = vor.u32 %v3874_v10, %v3308_v20  ;;  %v3848_v10 = vld [vmem:[%s5772_s1 + $0x4a4] sm:$0xf]  ;;  %v3343_v20 = vor.u32 %v3882_v2, %v3340_v3  ;;  %v3683_v2 = vld [vmem:[%s5772_s1 + $0x7e0] sm:$0xf]  ;;  %v3953_v3 = vld [vmem:[%s5772_s1 + $0x7e4] sm:$0xf0] }
  0xa0   : > { %1684 = vmatpush.bf16.msra.mxu3 %v3347_v28  ;;  %v3375_v28 = vor.u32 %v3890_v13, %v3372_v14  ;;  %v3268_v13 = vld [vmem:[%s5772_s1 + $0x528] sm:$0xf0]  ;;  %v3880_v14 = vld [vmem:[%s5772_s1 + $0x5a4] sm:$0xf] }
  0xa1   : > { %1646 = vmatpush.bf16.msra.mxu0 %v3147_v34  ;;  %v3175_v34 = vor.u32 %v3840_v25, %v3172_v26  ;;  %v3830_v25 = vld [vmem:[%s5772_s1 + $0x414] sm:$0xf]  ;;  %v3132_v26 = vld [vmem:[%s5772_s1 + $0x418] sm:$0xf0] }
  0xa2   : > { %1659 = vmatpush.bf16.msra.mxu1 %v3211_v35  ;;  %v3239_v35 = vor.u32 %v3856_v17, %v3236_v29  ;;  %v3846_v17 = vld [vmem:[%s5772_s1 + $0x494] sm:$0xf]  ;;  %v3196_v29 = vld [vmem:[%s5772_s1 + $0x498] sm:$0xf0] }
  0xa3   : > { %1672 = vmatpush.bf16.msra.mxu2 %v3275_v30  ;;  %v3303_v30 = vor.u32 %v3872_v31, %v3300_v27  ;;  %v3862_v31 = vld [vmem:[%s5772_s1 + $0x514] sm:$0xf]  ;;  %v3260_v27 = vld [vmem:[%s5772_s1 + $0x518] sm:$0xf0] }
  0xa4   : > { %1685 = vmatpush.bf16.msra.mxu3 %v3339_v38  ;;  %v3367_v38 = vor.u32 %v3888_v32, %v3364_v33  ;;  %v3878_v32 = vld [vmem:[%s5772_s1 + $0x594] sm:$0xf]  ;;  %v3324_v33 = vld [vmem:[%s5772_s1 + $0x598] sm:$0xf0] }
  0xa5   : > { %1647 = vmatpush.bf16.msra.mxu0 %v3139_v44  ;;  %v3167_v44 = vor.u32 %v3838_v18, %v3164_v36  ;;  %v3199_v18 = vor.u32 %v3846_v17, %v3196_v29  ;;  %v3263_v36 = vor.u32 %v3862_v31, %v3260_v27  ;;  %v3539_v17 = vld [vmem:[%s5772_s1 + $0x6c0] sm:$0xf]  ;;  %v3933_v31 = vld [vmem:[%s5772_s1 + $0x744] sm:$0xf0] }
  0xa6   : > { %1660 = vmatpush.bf16.msra.mxu1 %v3203_v45  ;;  %v3231_v45 = vor.u32 %v3854_v37, %v3228_v39  ;;  %v3844_v37 = vld [vmem:[%s5772_s1 + $0x484] sm:$0xf]  ;;  %v3603_v29 = vld [vmem:[%s5772_s1 + $0x740] sm:$0xf] }
  0xa7   : > { %1673 = vmatpush.bf16.msra.mxu2 %v3267_v46  ;;  %v3295_v46 = vor.u32 %v3870_v40, %v3292_v41  ;;  %v3860_v39 = vld [vmem:[%s5772_s1 + $0x504] sm:$0xf]  ;;  %v3327_v40 = vor.u32 %v3878_v32, %v3324_v33  ;;  %v3252_v41 = vld [vmem:[%s5772_s1 + $0x508] sm:$0xf0]  ;;  %v3667_v33 = vld [vmem:[%s5772_s1 + $0x7c0] sm:$0xf] }
  0xa8   : > { %1686 = vmatpush.bf16.msra.mxu3 %v3331_v50  ;;  %v3359_v50 = vor.u32 %v3886_v42, %v3356_v43  ;;  %v3876_v42 = vld [vmem:[%s5772_s1 + $0x584] sm:$0xf]  ;;  %v3316_v43 = vld [vmem:[%s5772_s1 + $0x588] sm:$0xf0]  ;;  %v3255_v52 = vor.u32 %v3860_v39, %v3252_v41  ;;  %v3531_v39 = vld [vmem:[%s5772_s1 + $0x6b0] sm:$0xf] }
  0xa9   : > { %1648 = vmatpush.bf16.msra.mxu0 %v3131_v56  ;;  %v3159_v56 = vor.u32 %v3836_v47, %v3156_v48  ;;  %v3923_v48 = vld [vmem:[%s5772_s1 + $0x6f4] sm:$0xf0]  ;;  %v3319_v55 = vor.u32 %v3876_v42, %v3316_v43  ;;  %v3595_v43 = vld [vmem:[%s5772_s1 + $0x730] sm:$0xf] }
  0xaa   : > { %1661 = vmatpush.bf16.msra.mxu1 %v3195_v59  ;;  %v3834_v59 = vld [vmem:[%s5772_s1 + $0x434] sm:$0xf]  ;;  %v3915_v42 = vld [vmem:[%s5772_s1 + $0x6b4] sm:$0xf0] }
  0xab   : > { %1674 = vmatpush.bf16.msra.mxu2 %v3259_v60  ;;  %v3148_v60 = vld [vmem:[%s5772_s1 + $0x438] sm:$0xf0] }
  0xac   : > { %1687 = vmatpush.bf16.msra.mxu3 %v3323_v0  ;;  %v3866_v0 = vld [vmem:[%s5772_s1 + $0x534] sm:$0xf]  ;;  %v3151_v15 = vor.u32 %v3834_v59, %v3148_v60  ;;  %v3491_v59 = vld [vmem:[%s5772_s1 + $0x660] sm:$0xf]  ;;  %v3905_v60 = vld [vmem:[%s5772_s1 + $0x664] sm:$0xf0] }
  0xad   : > { %1649 = vmatpush.bf16.msra.mxu0 %v3123_v19  ;;  %v3279_v16 = vor.u32 %v3866_v0, %v3276_v1  ;;  %v3832_v19 = vld [vmem:[%s5772_s1 + $0x424] sm:$0xf]  ;;  %v3619_v0 = vld [vmem:[%s5772_s1 + $0x760] sm:$0xf]  ;;  %v3937_v1 = vld [vmem:[%s5772_s1 + $0x764] sm:$0xf0] }
  0xae   : > { %1662 = vmatpush.bf16.msra.mxu1 %v3187_v11  ;;  %v3204_v11 = vld [vmem:[%s5772_s1 + $0x4a8] sm:$0xf0] }
  0xaf   : > { %1675 = vmatpush.bf16.msra.mxu2 %v3251_v12  ;;  %v3864_v12 = vld [vmem:[%s5772_s1 + $0x524] sm:$0xf] }
  0xb0   : > { %1688 = vmatpush.bf16.msra.mxu3 %v3315_v21  ;;  %1650 = vmatmul.bf16.vlgmr.msra.gmra.mxu0 %v4985_v7  ;;  %v3332_v21 = vld [vmem:[%s5772_s1 + $0x5a8] sm:$0xf0] }
  0xb1   : > { %1694 = vmatpush.bf16.msrb.mxu0 %v3183_v22  ;;  %1663 = vmatmul.bf16.vlgmr.msra.gmra.mxu1 %v4987_v8  ;;  %v3143_v22 = vor.u32 %v3832_v19, %v3140_v9  ;;  %v3483_v19 = vld [vmem:[%s5772_s1 + $0x650] sm:$0xf]  ;;  %v3903_v9 = vld [vmem:[%s5772_s1 + $0x654] sm:$0xf0] }
  0xb2   : > { %1707 = vmatpush.bf16.msrb.mxu1 %v3247_v23  ;;  %1676 = vmatmul.bf16.vlgmr.msra.gmra.mxu2 %v4980_v4  ;;  %v3207_v23 = vor.u32 %v3848_v10, %v3204_v11  ;;  %v3547_v10 = vld [vmem:[%s5772_s1 + $0x6d0] sm:$0xf]  ;;  %v3919_v11 = vld [vmem:[%s5772_s1 + $0x6d4] sm:$0xf0] }
  0xb3   : > { %1720 = vmatpush.bf16.msrb.mxu2 %v3311_v24  ;;  %1689 = vmatmul.bf16.vlgmr.msra.gmra.mxu3 %v4982_v5  ;;  %v3271_v24 = vor.u32 %v3864_v12, %v3268_v13  ;;  %v3611_v12 = vld [vmem:[%s5772_s1 + $0x750] sm:$0xf]  ;;  %v3935_v13 = vld [vmem:[%s5772_s1 + $0x754] sm:$0xf0] }
  0xb4   : > { %1733 = vmatpush.bf16.msrb.mxu3 %v3375_v28  ;;  %v3335_v28 = vor.u32 %v3880_v14, %v3332_v21  ;;  %v3951_v21 = vld [vmem:[%s5772_s1 + $0x7d4] sm:$0xf0] }
  0xb5   : > { %1695 = vmatpush.bf16.msrb.mxu0 %v3175_v34  ;;  %v3135_v34 = vor.u32 %v3830_v25, %v3132_v26  ;;  %v3612_v25 = vor.u32 %v3935_v13, %v3611_v12  ;;  %v3901_v26 = vld [vmem:[%s5772_s1 + $0x644] sm:$0xf0]  ;;  %v3443_v12 = vld [vmem:[%s5772_s1 + $0x600] sm:$0xf] }
  0xb6   : > { %1708 = vmatpush.bf16.msrb.mxu1 %v3239_v35  ;;  %v3828_v35 = vld [vmem:[%s5772_s1 + $0x404] sm:$0xf]  ;;  %v3893_v13 = vld [vmem:[%s5772_s1 + $0x604] sm:$0xf0] }
  0xb7   : > { %1721 = vmatpush.bf16.msrb.mxu2 %v3303_v30  ;;  %v3124_v30 = vld [vmem:[%s5772_s1 + $0x408] sm:$0xf0] }
  0xb8   : > { %1734 = vmatpush.bf16.msrb.mxu3 %v3367_v38  ;;  %v3188_v38 = vld [vmem:[%s5772_s1 + $0x488] sm:$0xf0]  ;;  %v3127_v47 = vor.u32 %v3828_v35, %v3124_v30 }
  0xb9   : > { %1696 = vmatpush.bf16.msrb.mxu0 %v3167_v44  ;;  %v3499_v44 = vld [vmem:[%s5772_s1 + $0x670] sm:$0xf]  ;;  %v3191_v51 = vor.u32 %v3844_v37, %v3188_v38  ;;  %v3899_v38 = vld [vmem:[%s5772_s1 + $0x634] sm:$0xf0] }
  0xba   : > { %1709 = vmatpush.bf16.msrb.mxu1 %v3231_v45  ;;  %v3907_v45 = vld [vmem:[%s5772_s1 + $0x674] sm:$0xf0]  ;;  %v3467_v37 = vld [vmem:[%s5772_s1 + $0x630] sm:$0xf] }
  0xbb   : > { %1722 = vmatpush.bf16.msrb.mxu2 %v3295_v46  ;;  %v3563_v46 = vld [vmem:[%s5772_s1 + $0x6f0] sm:$0xf] }
  0xbc   : > { %1735 = vmatpush.bf16.msrb.mxu3 %v3359_v50  ;;  %v3939_v50 = vld [vmem:[%s5772_s1 + $0x774] sm:$0xf0] }
  0xbd   : > { %1697 = vmatpush.bf16.msrb.mxu0 %v3159_v56  ;;  %v3500_v56 = vor.u32 %v3907_v45, %v3499_v44  ;;  %v3931_v44 = vld [vmem:[%s5772_s1 + $0x734] sm:$0xf0] }
  0xbe   : > { %1710 = vmatpush.bf16.msrb.mxu1 %v3223_v57  ;;  %v3564_v57 = vor.u32 %v3923_v48, %v3563_v46  ;;  %v3659_v46 = vld [vmem:[%s5772_s1 + $0x7b0] sm:$0xf] }
  0xbf   : > { %1723 = vmatpush.bf16.msrb.mxu2 %v3287_v58  ;;  %v3628_v58 = vor.u32 %v3939_v50, %v3627_v49  ;;  %v3468_v49 = vor.u32 %v3899_v38, %v3467_v37  ;;  %v3459_v50 = vld [vmem:[%s5772_s1 + $0x620] sm:$0xf]  ;;  %v3922_v38 = vld [vmem:[%s5772_s1 + $0x6f4] sm:$0xf] }
  0xc0   : > { %1736 = vmatpush.bf16.msrb.mxu3 %v3351_v62  ;;  %v3692_v62 = vor.u32 %v3955_v54, %v3691_v53  ;;  %v3596_v53 = vor.u32 %v3931_v44, %v3595_v43  ;;  %v3523_v54 = vld [vmem:[%s5772_s1 + $0x6a0] sm:$0xf]  ;;  %v3629_v44 = vld [vmem:[%s5772_s1 + $0x778] sm:$0xf0] }
  0xc1   : > { %1698 = vmatpush.bf16.msrb.mxu0 %v3151_v15  ;;  %v3492_v15 = vor.u32 %v3905_v60, %v3491_v59  ;;  %v713_v14 = vpop.f32.mrf.mxu0  ;;  %v3651_v59 = vld [vmem:[%s5772_s1 + $0x7a0] sm:$0xf]  ;;  %v3945_v60 = vld [vmem:[%s5772_s1 + $0x7a4] sm:$0xf0] }
  0xc2   : > { %1711 = vmatpush.bf16.msrb.mxu1 %v3215_v6  ;;  %v3556_v6 = vor.u32 %v3921_v63, %v3555_v61  ;;  %v3451_v63 = vld [vmem:[%s5772_s1 + $0x610] sm:$0xf] }
  0xc3   : > { %1724 = vmatpush.bf16.msrb.mxu2 %v3279_v16  ;;  %v3620_v16 = vor.u32 %v3937_v1, %v3619_v0  ;;  %v3895_v0 = vld [vmem:[%s5772_s1 + $0x614] sm:$0xf0]  ;;  %v3515_v1 = vld [vmem:[%s5772_s1 + $0x690] sm:$0xf] }
  0xc4   : > { %1737 = vmatpush.bf16.msrb.mxu3 %v3343_v20  ;;  %v3684_v20 = vor.u32 %v3953_v3, %v3683_v2  ;;  %v3911_v3 = vld [vmem:[%s5772_s1 + $0x694] sm:$0xf0] }
  0xc5   : > { %1699 = vmatpush.bf16.msrb.mxu0 %v3143_v22  ;;  %v726_v22 = vpop.f32.mrf.mxu1  ;;  %v739_v27 = vpop.f32.mrf.mxu2 }
  0xc6   : > { %1712 = vmatpush.bf16.msrb.mxu1 %v3207_v23  ;;  %v3484_v23 = vor.u32 %v3903_v9, %v3483_v19  ;;  %v752_v32 = vpop.f32.mrf.mxu3  ;;  %v3643_v9 = vld [vmem:[%s5772_s1 + $0x790] sm:$0xf] }
  0xc7   : > { %1725 = vmatpush.bf16.msrb.mxu2 %v3271_v24  ;;  %v727_v24 = vadd.f32 %v726_v22, %v713_v14  ;;  %v5487_v14 = vld [vmem:[%s5772_s1 + $0x680] sm:$0xf] }
  0xc8   : > { %1738 = vmatpush.bf16.msrb.mxu3 %v3335_v28  ;;  %v3917_v28 = vld [vmem:[%s5772_s1 + $0x6c4] sm:$0xf0] }
  0xc9   : > { %1700 = vmatpush.bf16.msrb.mxu0 %v3135_v34  ;;  %v3949_v34 = vld [vmem:[%s5772_s1 + $0x7c4] sm:$0xf0]  ;;  %v740_v35 = vadd.f32 %v739_v27, %v727_v24  ;;  %v715_v45 = vpop.f32.mrf.mxu0 }
  0xca   : > { %1713 = vmatpush.bf16.msrb.mxu1 %v3199_v18  ;;  %v3540_v18 = vor.u32 %v3917_v28, %v3539_v17  ;;  %v3668_v41 = vor.u32 %v3949_v34, %v3667_v33  ;;  %v5496_v24 = vld.sshfl [vmem:[#allocation1 + $0x8] sm:$0xff pattern:$0x73625140]  ;;  %v3954_v45 = vld [vmem:[%s5772_s1 + $0x7f4] sm:$0xf] }
  0xcb   : > { %1726 = vmatpush.bf16.msrb.mxu2 %v3263_v36  ;;  %v3604_v36 = vor.u32 %v3933_v31, %v3603_v29  ;;  %v3925_v17 = vld [vmem:[%s5772_s1 + $0x704] sm:$0xf0]  ;;  %v3635_v31 = vld [vmem:[%s5772_s1 + $0x780] sm:$0xf] }
  0xcc   : > { %1739 = vmatpush.bf16.msrb.mxu3 %v3327_v40  ;;  %v5411_v40 = vadd.f32 %v752_v32, %v740_v35  ;;  %v3941_v27 = vld [vmem:[%s5772_s1 + $0x784] sm:$0xf0]  ;;  %v3906_v35 = vld [vmem:[%s5772_s1 + $0x674] sm:$0xf] }
  0xcd   : > { %1701 = vmatpush.bf16.msrb.mxu0 %v3127_v47  ;;  %v3947_v47 = vld [vmem:[%s5772_s1 + $0x7b4] sm:$0xf0]  ;;  %v728_v48 = vpop.f32.mrf.mxu1  ;;  %v741_v61 = vpop.f32.mrf.mxu2 }
  0xce   : > { %1714 = vmatpush.bf16.msrb.mxu1 %v3191_v51  ;;  %v3897_v51 = vld [vmem:[%s5772_s1 + $0x624] sm:$0xf0] }
  0xcf   : > { %1727 = vmatpush.bf16.msrb.mxu2 %v3255_v52  ;;  %v3532_v52 = vor.u32 %v3915_v42, %v3531_v39  ;;  %v3460_v2 = vor.u32 %v3897_v51, %v3459_v50  ;;  %v3565_v39 = vld [vmem:[%s5772_s1 + $0x6f8] sm:$0xf0] }
  0xd0   : > { %1740 = vmatpush.bf16.msrb.mxu3 %v3319_v55  ;;  %1702 = vmatmul.bf16.vlgmr.msrb.gmra.mxu0 %v4985_v7  ;;  %v3475_v7 = vld [vmem:[%s5772_s1 + $0x640] sm:$0xf]  ;;  %v3913_v55 = vld [vmem:[%s5772_s1 + $0x6a4] sm:$0xf0] }
  0xd1   : > { %2168 = vmatpush.bf16.msra.mxu0 %v3500_v56  ;;  %1715 = vmatmul.bf16.vlgmr.msrb.gmra.mxu1 %v4987_v8  ;;  %v3476_v30 = vor.u32 %v3901_v26, %v3475_v7  ;;  %v3587_v56 = vld [vmem:[%s5772_s1 + $0x720] sm:$0xf]  ;;  %v765_v22 = vpop.f32.mrf.mxu0 }
  0xd2   : > { %2181 = vmatpush.bf16.msra.mxu1 %v3564_v57  ;;  %1728 = vmatmul.bf16.vlgmr.msrb.gmra.mxu2 %v4980_v4  ;;  %v3675_v4 = vld [vmem:[%s5772_s1 + $0x7d0] sm:$0xf]  ;;  %v3660_v57 = vor.u32 %v3947_v47, %v3659_v46  ;;  %v3571_v26 = vld [vmem:[%s5772_s1 + $0x700] sm:$0xf] }
  0xd3   : > { %2194 = vmatpush.bf16.msra.mxu2 %v3628_v58  ;;  %1741 = vmatmul.bf16.vlgmr.msrb.gmra.mxu3 %v4982_v5  ;;  %v3548_v5 = vor.u32 %v3919_v11, %v3547_v10  ;;  %v3676_v8 = vor.u32 %v3951_v21, %v3675_v4  ;;  %v3929_v58 = vld [vmem:[%s5772_s1 + $0x724] sm:$0xf0]  ;;  %v3943_v10 = vld [vmem:[%s5772_s1 + $0x794] sm:$0xf0]  ;;  %v3652_v11 = vor.u32 %v3945_v60, %v3651_v59 }
  0xd4   : > { %2207 = vmatpush.bf16.msra.mxu3 %v3692_v62  ;;  %v754_v62 = vpop.f32.mrf.mxu3  ;;  %v3588_v19 = vor.u32 %v3929_v58, %v3587_v56  ;;  %v5489_v4 = vld.sshfl [vmem:[#allocation1 + $0x18] sm:$0xff pattern:$0x73625140]  ;;  %v5491_v21 = vld.sshfl [vmem:[#allocation1] sm:$0xff pattern:$0x73625140]  ;;  %v3644_v34 = vor.u32 %v3943_v10, %v3643_v9  ;;  %v3572_v43 = vor.u32 %v3925_v17, %v3571_v26  ;;  %v3568_v59 = vor.u32 %v3922_v38, %v3565_v39 }
  0xd5   : > { %2169 = vmatpush.bf16.msra.mxu0 %v3492_v15  ;;  %v3579_v15 = vld [vmem:[%s5772_s1 + $0x710] sm:$0xf]  ;;  %v778_v7 = vpop.f32.mrf.mxu1  ;;  %v1840_v32 = vshll.u32 %v5489_v4, 16  ;;  %v1822_v33 = vshll.u32 %v5491_v21, 16  ;;  %v791_v42 = vpop.f32.mrf.mxu2  ;;  %v1838_v50 = vshrl.u32 %v5489_v4, 16 }
  0xd6   : > { %2182 = vmatpush.bf16.msra.mxu1 %v3556_v6  ;;  %v3927_v6 = vld [vmem:[%s5772_s1 + $0x714] sm:$0xf0]  ;;  %v779_v29 = vadd.f32 %v778_v7, %v765_v22  ;;  %v3952_v10 = vld [vmem:[%s5772_s1 + $0x7e4] sm:$0xf]  ;;  %v3485_v22 = vld [vmem:[%s5772_s1 + $0x658] sm:$0xf0] }
  0xd7   : > { %2195 = vmatpush.bf16.msra.mxu2 %v3620_v16  ;;  %v3524_v16 = vor.u32 %v3913_v55, %v3523_v54  ;;  %v3580_v28 = vor.u32 %v3927_v6, %v3579_v15  ;;  %v1842_v51 = vrot.slane %v1840_v32, 1  ;;  %v3636_v54 = vor.u32 %v3941_v27, %v3635_v31  ;;  %v3557_v15 = vld [vmem:[%s5772_s1 + $0x6e8] sm:$0xf0]  ;;  %v3936_v6 = vld [vmem:[%s5772_s1 + $0x764] sm:$0xf] }
  0xd8   : > { %2208 = vmatpush.bf16.msra.mxu3 %v3684_v20  ;;  %v5476_v20 = vld.sshfl [vmem:[#allocation1 + $0x10] sm:$0xff pattern:$0x73625140]  ;;  %v792_v46 = vadd.f32 %v791_v42, %v779_v29  ;;  %v3613_v26 = vld [vmem:[%s5772_s1 + $0x758] sm:$0xf0] }
  0xd9   : > { %2170 = vmatpush.bf16.msra.mxu0 %v3484_v23  ;;  %v3909_v23 = vld [vmem:[%s5772_s1 + $0x684] sm:$0xf0]  ;;  %v1832_v47 = vshrl.u32 %v5476_v20, 16  ;;  %v767_v61 = vpop.f32.mrf.mxu0  ;;  %v5565_v9 = vor.u32 %v1842_v51, %v1838_v50  ;;  %v3934_v7 = vld [vmem:[%s5772_s1 + $0x754] sm:$0xf] }
  0xda   : > { %2183 = vmatpush.bf16.msra.mxu1 %v3548_v5  ;;  %v3452_v5 = vor.u32 %v3895_v0, %v3451_v63  ;;  %v3508_v37 = vor.u32 %v3909_v23, %v5487_v14  ;;  %v3904_v63 = vld [vmem:[%s5772_s1 + $0x664] sm:$0xf]  ;;  %v3493_v0 = vld [vmem:[%s5772_s1 + $0x668] sm:$0xf0]  ;;  %v3918_v23 = vld [vmem:[%s5772_s1 + $0x6d4] sm:$0xf]  ;;  %v3616_v27 = vor.u32 %v3934_v7, %v3613_v26 }
  0xdb   : > { %2196 = vmatpush.bf16.msra.mxu2 %v3612_v25  ;;  %v3516_v25 = vor.u32 %v3911_v3, %v3515_v1  ;;  %v3920_v1 = vld [vmem:[%s5772_s1 + $0x6e4] sm:$0xf]  ;;  %v3950_v17 = vld [vmem:[%s5772_s1 + $0x7d4] sm:$0xf]  ;;  %v3669_v39 = vld [vmem:[%s5772_s1 + $0x7c8] sm:$0xf0] }
  0xdc   : > { %2209 = vmatpush.bf16.msra.mxu3 %v3676_v8  ;;  %v1834_v8 = vshll.u32 %v5476_v20, 16  ;;  %v804_v56 = vpop.f32.mrf.mxu3  ;;  %v3685_v20 = vld [vmem:[%s5772_s1 + $0x7e8] sm:$0xf0]  ;;  %v3560_v14 = vor.u32 %v3920_v1, %v3557_v15  ;;  %v3900_v32 = vld [vmem:[%s5772_s1 + $0x644] sm:$0xf] }
  0xdd   : > { %2171 = vmatpush.bf16.msra.mxu0 %v3476_v30  ;;  %v3501_v30 = vld [vmem:[%s5772_s1 + $0x678] sm:$0xf0]  ;;  %v5543_v62 = vadd.f32 %v804_v56, %v792_v46  ;;  %v3948_v38 = vld [vmem:[%s5772_s1 + $0x7c4] sm:$0xf]  ;;  %v3898_v46 = vld [vmem:[%s5772_s1 + $0x634] sm:$0xf] }
  0xde   : > { %2184 = vmatpush.bf16.msra.mxu1 %v3540_v18  ;;  %v1828_v18 = vshll.u32 %v5496_v24, 16  ;;  %v1836_v48 = vrot.slane %v1834_v8, 1  ;;  %v3504_v55 = vor.u32 %v3906_v35, %v3501_v30  ;;  %v3677_v8 = vld [vmem:[%s5772_s1 + $0x7d8] sm:$0xf0]  ;;  %v3541_v30 = vld [vmem:[%s5772_s1 + $0x6c8] sm:$0xf0] }
  0xdf   : > { %2197 = vmatpush.bf16.msra.mxu2 %v3604_v36  ;;  %v3444_v36 = vor.u32 %v3893_v13, %v3443_v12  ;;  %v3496_v12 = vor.u32 %v3904_v63, %v3493_v0  ;;  %v3680_v35 = vor.u32 %v3950_v17, %v3677_v8  ;;  %v3533_v50 = vld [vmem:[%s5772_s1 + $0x6b8] sm:$0xf0]  ;;  %v3930_v51 = vld [vmem:[%s5772_s1 + $0x734] sm:$0xf]  ;;  %v3525_v0 = vld [vmem:[%s5772_s1 + $0x6a8] sm:$0xf0] }
  0xe0   : > { %2210 = vmatpush.bf16.msra.mxu3 %v3668_v41  ;;  %v3938_v41 = vld [vmem:[%s5772_s1 + $0x774] sm:$0xf]  ;;  %v1830_v58 = vrot.slane %v1828_v18, 1  ;;  %v5554_v3 = vor.u32 %v1836_v48, %v1832_v47  ;;  %v3932_v18 = vld [vmem:[%s5772_s1 + $0x744] sm:$0xf] }
  0xe1   : > { %2172 = vmatpush.bf16.msra.mxu0 %v3468_v49  ;;  %v3693_v49 = vld [vmem:[%s5772_s1 + $0x7f8] sm:$0xf0]  ;;  %v3632_v60 = vor.u32 %v3938_v41, %v3629_v44  ;;  %v3914_v48 = vld [vmem:[%s5772_s1 + $0x6b4] sm:$0xf]  ;;  %v3928_v1 = vld [vmem:[%s5772_s1 + $0x724] sm:$0xf] }
  0xe2   : > { %2185 = vmatpush.bf16.msra.mxu1 %v3532_v52  ;;  %v1820_v52 = vshrl.u32 %v5491_v21, 16  ;;  %v3902_v21 = vld [vmem:[%s5772_s1 + $0x654] sm:$0xf]  ;;  %v3469_v47 = vld [vmem:[%s5772_s1 + $0x638] sm:$0xf0]  ;;  %v3536_v56 = vor.u32 %v3914_v48, %v3533_v50 }
  0xe3   : > { %2198 = vmatpush.bf16.msra.mxu2 %v3596_v53  ;;  %v1824_v53 = vrot.slane %v1822_v33, 1  ;;  %v3477_v33 = vld [vmem:[%s5772_s1 + $0x648] sm:$0xf0]  ;;  %v3926_v7 = vld [vmem:[%s5772_s1 + $0x714] sm:$0xf] }
  0xe4   : > { %2211 = vmatpush.bf16.msra.mxu3 %v3660_v57  ;;  %v1826_v57 = vshrl.u32 %v5496_v24, 16  ;;  %v793_v24 = vpop.f32.mrf.mxu2  ;;  %v806_v29 = vpop.f32.mrf.mxu3  ;;  %v3480_v42 = vor.u32 %v3900_v32, %v3477_v33  ;;  %v3581_v26 = vld [vmem:[%s5772_s1 + $0x718] sm:$0xf0]  ;;  %v3942_v17 = vld [vmem:[%s5772_s1 + $0x794] sm:$0xf] }
  0xe5   : > { %2173 = vmatpush.bf16.msra.mxu0 %v3460_v2  ;;  %v3696_v2 = vor.u32 %v3954_v45, %v3693_v49  ;;  %v3910_v24 = vld [vmem:[%s5772_s1 + $0x694] sm:$0xf]  ;;  %v3645_v8 = vld [vmem:[%s5772_s1 + $0x798] sm:$0xf0]  ;;  %v3445_v32 = vld [vmem:[%s5772_s1 + $0x608] sm:$0xf0] }
  0xe6   : > { %2186 = vmatpush.bf16.msra.mxu1 %v3524_v16  ;;  %v3621_v16 = vld [vmem:[%s5772_s1 + $0x768] sm:$0xf0]  ;;  %v5575_v13 = vor.u32 %v1830_v58, %v1826_v57  ;;  %v3896_v58 = vld [vmem:[%s5772_s1 + $0x624] sm:$0xf] }
  0xe7   : > { %2199 = vmatpush.bf16.msra.mxu2 %v3588_v19  ;;  %v780_v19 = vpop.f32.mrf.mxu1  ;;  %v3624_v4 = vor.u32 %v3936_v6, %v3621_v16  ;;  %v3944_v16 = vld [vmem:[%s5772_s1 + $0x7a4] sm:$0xf] }
  0xe8   : > { %2212 = vmatpush.bf16.msra.mxu3 %v3652_v11  ;;  %v5573_v11 = vor.u32 %v1824_v53, %v1820_v52  ;;  %v3597_v52 = vld [vmem:[%s5772_s1 + $0x738] sm:$0xf0]  ;;  %v3946_v53 = vld [vmem:[%s5772_s1 + $0x7b4] sm:$0xf]  ;;  %v3653_v19 = vld [vmem:[%s5772_s1 + $0x7a8] sm:$0xf0] }
  0xe9   : > { %2174 = vmatpush.bf16.msra.mxu0 %v3452_v5  ;;  %v3688_v5 = vor.u32 %v3952_v10, %v3685_v20  ;;  %v3600_v57 = vor.u32 %v3930_v51, %v3597_v52  ;;  %v3908_v33 = vld [vmem:[%s5772_s1 + $0x684] sm:$0xf] }
  0xea   : > { %2187 = vmatpush.bf16.msra.mxu1 %v3516_v25  ;;  %v3549_v25 = vld [vmem:[%s5772_s1 + $0x6d8] sm:$0xf0] }
  0xeb   : > { %2200 = vmatpush.bf16.msra.mxu2 %v3580_v28  ;;  %v3488_v28 = vor.u32 %v3902_v21, %v3485_v22  ;;  %v3552_v31 = vor.u32 %v3918_v23, %v3549_v25  ;;  %v3894_v22 = vld [vmem:[%s5772_s1 + $0x614] sm:$0xf]  ;;  %v3453_v23 = vld [vmem:[%s5772_s1 + $0x618] sm:$0xf0] }
  0xec   : > { %2213 = vmatpush.bf16.msra.mxu3 %v3644_v34  ;;  %v3916_v34 = vld [vmem:[%s5772_s1 + $0x6c4] sm:$0xf]  ;;  %v3517_v25 = vld [vmem:[%s5772_s1 + $0x698] sm:$0xf0] }
  0xed   : > { %2175 = vmatpush.bf16.msra.mxu0 %v3444_v36  ;;  %v3605_v36 = vld [vmem:[%s5772_s1 + $0x748] sm:$0xf0]  ;;  %v3544_v44 = vor.u32 %v3916_v34, %v3541_v30  ;;  %v3520_v29 = vor.u32 %v3910_v24, %v3517_v25  ;;  %v3648_v34 = vor.u32 %v3942_v17, %v3645_v8  ;;  %v3924_v30 = vld [vmem:[%s5772_s1 + $0x704] sm:$0xf] }
  0xee   : > { %2188 = vmatpush.bf16.msra.mxu1 %v3508_v37  ;;  %v1147_v37 = vpop.f32.mrf.mxu0  ;;  %v3608_v45 = vor.u32 %v3932_v18, %v3605_v36  ;;  %v3573_v18 = vld [vmem:[%s5772_s1 + $0x708] sm:$0xf0] }
  0xef   : > { %2201 = vmatpush.bf16.msra.mxu2 %v3572_v43  ;;  %v1148_v41 = vadd.f32 %v1147_v37, %v5411_v40  ;;  %v1160_v43 = vpop.f32.mrf.mxu1  ;;  %v3672_v40 = vor.u32 %v3948_v38, %v3669_v39  ;;  %v3940_v37 = vld [vmem:[%s5772_s1 + $0x784] sm:$0xf]  ;;  %v3637_v38 = vld [vmem:[%s5772_s1 + $0x788] sm:$0xf0] }
  0xf0   : > { %2214 = vmatpush.bf16.msra.mxu3 %v3636_v54  ;;  %2176 = vmatmul.bf16.vlgmr.msra.gmra.mxu0 %v5573_v11  ;;  %v3661_v54 = vld [vmem:[%s5772_s1 + $0x7b8] sm:$0xf0] }
  0xf1   : > { %2220 = vmatpush.bf16.msrb.mxu0 %v3504_v55  ;;  %2189 = vmatmul.bf16.vlgmr.msra.gmra.mxu1 %v5575_v13  ;;  %v1161_v49 = vadd.f32 %v1160_v43, %v1148_v41  ;;  %v3472_v55 = vor.u32 %v3898_v46, %v3469_v47  ;;  %v3664_v61 = vor.u32 %v3946_v53, %v3661_v54 }
  0xf2   : > { %2233 = vmatpush.bf16.msrb.mxu1 %v3568_v59  ;;  %2202 = vmatmul.bf16.vlgmr.msra.gmra.mxu2 %v5554_v3  ;;  %v3461_v59 = vld [vmem:[%s5772_s1 + $0x628] sm:$0xf0]  ;;  %v3576_v43 = vor.u32 %v3924_v30, %v3573_v18 }
  0xf3   : > { %2246 = vmatpush.bf16.msrb.mxu2 %v3632_v60  ;;  %2215 = vmatmul.bf16.vlgmr.msra.gmra.mxu3 %v5565_v9  ;;  %v3912_v60 = vld [vmem:[%s5772_s1 + $0x6a4] sm:$0xf]  ;;  %v3464_v20 = vor.u32 %v3896_v58, %v3461_v59 }
  0xf4   : > { %2259 = vmatpush.bf16.msrb.mxu3 %v3696_v2  ;;  %v3589_v2 = vld [vmem:[%s5772_s1 + $0x728] sm:$0xf0] }
  0xf5   : > { %2221 = vmatpush.bf16.msrb.mxu0 %v3496_v12  ;;  %v1173_v63 = vpop.f32.mrf.mxu2  ;;  %v3592_v21 = vor.u32 %v3928_v1, %v3589_v2 }
  0xf6   : > { %2234 = vmatpush.bf16.msrb.mxu1 %v3560_v14  ;;  %v1174_v15 = vadd.f32 %v1173_v63, %v1161_v49  ;;  %v1186_v6 = vpop.f32.mrf.mxu3  ;;  %v1149_v10 = vpop.f32.mrf.mxu0 }
  0xf7   : > { %2247 = vmatpush.bf16.msrb.mxu2 %v3624_v4  ;;  %v1162_v12 = vpop.f32.mrf.mxu1  ;;  %v3528_v4 = vor.u32 %v3912_v60, %v3525_v0 }
  0xf8   : > { %2260 = vmatpush.bf16.msrb.mxu3 %v3688_v5  ;;  %v5678_v14 = vadd.f32 %v1186_v6, %v1174_v15  ;;  %v3656_v5 = vor.u32 %v3944_v16, %v3653_v19 }
  0xf9   : > { %2222 = vmatpush.bf16.msrb.mxu0 %v3488_v28  ;;  %v3456_v28 = vor.u32 %v3894_v22, %v3453_v23 }
  0xfa   : > { %2235 = vmatpush.bf16.msrb.mxu1 %v3552_v31  ;;  %v3584_v31 = vor.u32 %v3926_v7, %v3581_v26 }
  0xfb   : > { %2248 = vmatpush.bf16.msrb.mxu2 %v3616_v27  ;;  %v3892_v27 = vld [vmem:[%s5772_s1 + $0x604] sm:$0xf] }
  0xfc   : > { %2261 = vmatpush.bf16.msrb.mxu3 %v3680_v35  ;;  %v3509_v35 = vld [vmem:[%s5772_s1 + $0x688] sm:$0xf0]  ;;  %v3448_v41 = vor.u32 %v3892_v27, %v3445_v32 }
  0xfd   : > { %2223 = vmatpush.bf16.msrb.mxu0 %v3480_v42  ;;  %v1175_v36 = vpop.f32.mrf.mxu2  ;;  %v3512_v42 = vor.u32 %v3908_v33, %v3509_v35 }
  0xfe   : > { %2236 = vmatpush.bf16.msrb.mxu1 %v3544_v44  ;;  %v1188_v39 = vpop.f32.mrf.mxu3  ;;  %v3640_v44 = vor.u32 %v3940_v37, %v3637_v38 }
  0xff   : > { %2249 = vmatpush.bf16.msrb.mxu2 %v3608_v45 }
 0x100   : > { %2262 = vmatpush.bf16.msrb.mxu3 %v3672_v40 }
 0x101   : > { %2224 = vmatpush.bf16.msrb.mxu0 %v3472_v55 }
 0x102   : > { %2237 = vmatpush.bf16.msrb.mxu1 %v3536_v56 }
 0x103   : > { %2250 = vmatpush.bf16.msrb.mxu2 %v3600_v57 }
 0x104   : > { %2263 = vmatpush.bf16.msrb.mxu3 %v3664_v61 }
 0x105   : > { %2225 = vmatpush.bf16.msrb.mxu0 %v3464_v20 }
 0x106   : > { %2238 = vmatpush.bf16.msrb.mxu1 %v3528_v4 }
 0x107   : > { %2251 = vmatpush.bf16.msrb.mxu2 %v3592_v21 }
 0x108   : > { %2264 = vmatpush.bf16.msrb.mxu3 %v3656_v5 }
 0x109   : > { %2226 = vmatpush.bf16.msrb.mxu0 %v3456_v28 }
 0x10a   : > { %2239 = vmatpush.bf16.msrb.mxu1 %v3520_v29 }
 0x10b   : > { %2252 = vmatpush.bf16.msrb.mxu2 %v3584_v31 }
 0x10c   : > { %2265 = vmatpush.bf16.msrb.mxu3 %v3648_v34 }
 0x10d   : > { %2227 = vmatpush.bf16.msrb.mxu0 %v3448_v41  ;;  %v1199_v45 = vpop.f32.mrf.mxu0 }
 0x10e   : > { %2240 = vmatpush.bf16.msrb.mxu1 %v3512_v42  ;;  %v1200_v46 = vadd.f32 %v1199_v45, %v5543_v62  ;;  %v1212_v47 = vpop.f32.mrf.mxu1 }
 0x10f   : > { %2253 = vmatpush.bf16.msrb.mxu2 %v3576_v43 }
 0x110   : > { %2266 = vmatpush.bf16.msrb.mxu3 %v3640_v44  ;;  %2228 = vmatmul.bf16.vlgmr.msrb.gmra.mxu0 %v5573_v11  ;;  %v1213_v48 = vadd.f32 %v1212_v47, %v1200_v46 }
 0x111   : > { %2241 = vmatmul.bf16.vlgmr.msrb.gmra.mxu1 %v5575_v13 }
 0x112   : > { %2254 = vmatmul.bf16.vlgmr.msrb.gmra.mxu2 %v5554_v3 }
 0x113   : > { %2267 = vmatmul.bf16.vlgmr.msrb.gmra.mxu3 %v5565_v9 }
 0x115   : > { %v1225_v40 = vpop.f32.mrf.mxu2  ;;  %v1201_v51 = vpop.f32.mrf.mxu0 }
 0x116   : > { %v1226_v49 = vadd.f32 %v1225_v40, %v1213_v48  ;;  %v1238_v50 = vpop.f32.mrf.mxu3  ;;  %v1214_v52 = vpop.f32.mrf.mxu1 }
 0x118   : > { %v1239_v53 = vadd.f32 %v1238_v50, %v1226_v49 }
 0x11d   : > { %v1227_v54 = vpop.f32.mrf.mxu2 }
 0x11e   : > { %v1240_v55 = vpop.f32.mrf.mxu3 }
 0x12d   : > { %v1651_v11 = vpop.f32.mrf.mxu0 }
 0x12e   : > { %v1664_v56 = vpop.f32.mrf.mxu1 }
 0x12f   : > { %v1665_v13 = vadd.f32 %v1664_v56, %v1651_v11 }
 0x135   : > { %v1677_v57 = vpop.f32.mrf.mxu2  ;;  %v1653_v59 = vpop.f32.mrf.mxu0 }
 0x136   : > { %v1678_v3 = vadd.f32 %v1677_v57, %v1665_v13  ;;  %v1690_v58 = vpop.f32.mrf.mxu3  ;;  %v1666_v60 = vpop.f32.mrf.mxu1 }
 0x138   : > { %v1691_v9 = vadd.f32 %v1690_v58, %v1678_v3 }
 0x13a   : > { %v1746_v62 = vadd.f32 %v1691_v9, %v5678_v14 }
 0x13d   : > { %v1679_v61 = vpop.f32.mrf.mxu2 }
 0x13e   : > { %v1692_v63 = vpop.f32.mrf.mxu3 }
 0x14d   : > { %v1703_v0 = vpop.f32.mrf.mxu0 }
 0x14e   : > { %v1716_v1 = vpop.f32.mrf.mxu1 }
 0x14f   : > { %v1717_v17 = vadd.f32 %v1716_v1, %v1703_v0 }
 0x155   : > { %v1729_v2 = vpop.f32.mrf.mxu2  ;;  %v1705_v6 = vpop.f32.mrf.mxu0 }
 0x156   : > { %v1742_v15 = vpop.f32.mrf.mxu3  ;;  %v1718_v16 = vpop.f32.mrf.mxu1  ;;  %v1730_v31 = vadd.f32 %v1729_v2, %v1717_v17 }
 0x158   : > { %v1743_v33 = vadd.f32 %v1742_v15, %v1730_v31 }
 0x15a   : > { %v1747_v41 = vadd.f32 %v1743_v33, %v1239_v53 }
 0x15d   : > { %v1731_v19 = vpop.f32.mrf.mxu2 }
 0x15e   : > { %v1744_v10 = vpop.f32.mrf.mxu3 }
 0x16d   : > { %v2177_v20 = vpop.f32.mrf.mxu0 }
 0x16e   : > { %v2190_v12 = vpop.f32.mrf.mxu1 }
 0x16f   : > { %v2191_v24 = vadd.f32 %v2190_v12, %v2177_v20 }
 0x175   : > { %v2203_v4 = vpop.f32.mrf.mxu2  ;;  %v2179_v22 = vpop.f32.mrf.mxu0 }
 0x176   : > { %v2216_v21 = vpop.f32.mrf.mxu3  ;;  %v2192_v23 = vpop.f32.mrf.mxu1  ;;  %v2204_v25 = vadd.f32 %v2203_v4, %v2191_v24 }
 0x178   : > { %v2217_v7 = vadd.f32 %v2216_v21, %v2204_v25 }
 0x17a   : > { %v2272_v26 = vadd.f32 %v2217_v7, %v1746_v62 }
 0x17c   : > { %v2295_v8 = vmul.f32 %v2272_v26, %v2272_v26  ;;  %v2281_v34 = vsel %vm2277_vm0, %v2272_v26, 0.0 }
 0x17d   : > { %v2205_v14 = vpop.f32.mrf.mxu2  ;;  %v2282_v38 = vrot.slane %v2281_v34, 4 }
 0x17e   : > { %v2218_v5 = vpop.f32.mrf.mxu3  ;;  %v2297_v27 = vsel %vm2277_vm0, %v2295_v8, 0.0 }
 0x17f   : > { %v2298_v35 = vrot.slane %v2297_v27, 4  ;;  %v2283_v45 = vadd.f32 %v2282_v38, %v2281_v34 }
 0x181   : > { %v2299_v43 = vadd.f32 %v2298_v35, %v2297_v27  ;;  %v2284_v54 = vrot.slane %v2283_v45, 2 }
 0x183   : > { %v2300_v40 = vrot.slane %v2299_v43, 2  ;;  %v2285_v3 = vadd.f32 %v2284_v54, %v2283_v45 }
 0x185   : > { %v2301_v56 = vadd.f32 %v2300_v40, %v2299_v43  ;;  %v2286_v61 = vrot.slane %v2285_v3, 1 }
 0x187   : > { %v2302_v59 = vrot.slane %v2301_v56, 1  ;;  %v2287_v15 = vadd.f32 %v2286_v61, %v2285_v3 }
 0x189   : > { %v2303_v0 = vadd.f32 %v2302_v59, %v2301_v56 }
 0x18b   : > { %v2312_v19 = vsel %vm2311_vm1, %v2287_v15, %v2303_v0 }
 0x18d   : > { %v2229_v28 = vpop.f32.mrf.mxu0 }
 0x18e   : > { %v2242_v29 = vpop.f32.mrf.mxu1 }
 0x18f   : > { %v2243_v32 = vadd.f32 %v2242_v29, %v2229_v28 }
 0x195   : > { %v2255_v30 = vpop.f32.mrf.mxu2  ;;  %v2231_v37 = vpop.f32.mrf.mxu0 }
 0x196   : > { %v2256_v18 = vadd.f32 %v2255_v30, %v2243_v32  ;;  %v2268_v36 = vpop.f32.mrf.mxu3  ;;  %v2244_v39 = vpop.f32.mrf.mxu1 }
 0x198   : > { %v2269_v42 = vadd.f32 %v2268_v36, %v2256_v18 }
 0x19a   : > { %v2273_v44 = vadd.f32 %v2269_v42, %v1747_v41 }
 0x19c   : > { %v2276_v46 = vrot.slane %v2273_v44, 6  ;;  %v2288_v47 = vsel %vm2277_vm0, %v2273_v44, 0.0  ;;  %v2296_v48 = vmul.f32 %v2273_v44, %v2273_v44 }
 0x19d   : > { %v2289_v49 = vrot.slane %v2288_v47, 4  ;;  %v2257_v50 = vpop.f32.mrf.mxu2 }
 0x19e   : > { %v2278_v51 = vsel %vm2277_vm0, %v2272_v26, %v2276_v46  ;;  %v2304_v52 = vsel %vm2277_vm0, %v2296_v48, 0.0  ;;  %v2270_v53 = vpop.f32.mrf.mxu3 }
 0x19f   : > { %2280 = vst [vmem:[%s206_s30] sm:$0xf] %v2278_v51  ;;  %v2290_v55 = vadd.f32 %v2289_v49, %v2288_v47  ;;  %v2305_v11 = vrot.slane %v2304_v52, 4 }
 0x1a1   : > { %v2291_v13 = vrot.slane %v2290_v55, 2  ;;  %v2306_v57 = vadd.f32 %v2305_v11, %v2304_v52 }
 0x1a3   : > { %v2292_v58 = vadd.f32 %v2291_v13, %v2290_v55  ;;  %v2307_v9 = vrot.slane %v2306_v57, 2 }
 0x1a5   : > { %v2293_v60 = vrot.slane %v2292_v58, 1  ;;  %v2308_v62 = vadd.f32 %v2307_v9, %v2306_v57 }
 0x1a7   : > { %v2309_v63 = vrot.slane %v2308_v62, 1  ;;  %v2294_v1 = vadd.f32 %v2293_v60, %v2292_v58 }
 0x1a9   : > { %v2310_v2 = vadd.f32 %v2309_v63, %v2308_v62 }
 0x1ab   : > { %v2313_v6 = vsel %vm2311_vm1, %v2294_v1, %v2310_v2 }
 0x1ac   : > { %v2316_v16 = vrot.slane %v2313_v6, 6 }
 0x1ae   : > { %v2317_v10 = vsel %vm2277_vm0, %v2312_v19, %v2316_v16 }
 0x1af   : > { %2319 = vst [vmem:[%s215_s8] sm:$0xf] %v2317_v10 }
 0x1b0 PF: > { %s14_s16 = sadd.s32 1, %s4035_s16   ;;  %s5775_s12 = smov %s4027_s14 }
 0x1b1   : > { %p11_p7 = scmp.ge.s32.totalorder %s14_s16, 6   ;;  %s5776_s13 = smov %s4031_s15 }
 0x1b2   : > { %s5777_s14 = smov %s5780_s17  ;;  %s5778_s15 = smov %s5784_s18 }
 0x1b3   :  { %13 = sbr.rel (!%p11_p7) target bundleno = 3 (0x3), region = 75 }

// kernel: resnet18_features.57
= control target key start
LH: loop header
LB: loop body
LE: loop exit
PB: predicated region body
PF: predicated region fallthrough
CT: control target
= control target key end

     0   :  { %s91_s0 = inlined_call_operand.vmem [shape: f32[8,256], index: 0, kind: input, shape index: {}]   ;;  %s92_s1 = inlined_call_operand.vmem [shape: f32[1,256], index: 1, kind: input, shape index: {}]   ;;  %s93_s2 = inlined_call_operand.vmem [shape: f32[1,256], index: 2, kind: input, shape index: {}]   ;;  %s94_s3 = inlined_call_operand.vmem [shape: bf16[8,256], index: 3, kind: input, shape index: {}]   ;;  %s95_s4 = inlined_call_operand.vmem [shape: bf16[8,256], index: 4, kind: output, shape index: {}]  }
   0x1   :  { %v17_v0 = vld [vmem:[%s91_s0] sm:$0xff]  ;;  %v18_v1 = vld [vmem:[%s91_s0 + $0x8] sm:$0xff] }
   0x2   :  { %v19_v2 = vld [vmem:[%s92_s1] sm:$0x3] }
   0x3   :  { %v21_v3 = vperm.slane %v19_v2, 0  ;;  %v22_v4 = vperm.slane %v19_v2, 1  ;;  %v27_v5 = vld [vmem:[%s93_s2] sm:$0x3] }
   0x4   :  { %v35_v6 = vld [vmem:[%s94_s3] sm:$0xff]  ;;  %v29_v7 = vperm.slane %v27_v5, 0  ;;  %v30_v8 = vperm.slane %v27_v5, 1 }
   0x5   :  { %v25_v9 = vmul.f32 %v21_v3, %v17_v0  ;;  %v26_v10 = vmul.f32 %v22_v4, %v18_v1  ;;  %v36_v11 = vunpack.c.l.bf16 %v35_v6  ;;  %v37_v12 = vunpack.c.h.bf16 %v35_v6 }
   0x7   :  { %v33_v13 = vadd.f32 %v29_v7, %v25_v9  ;;  %v34_v14 = vadd.f32 %v30_v8, %v26_v10 }
   0x9   :  { %v38_v15 = vadd.f32 %v36_v11, %v33_v13  ;;  %v39_v16 = vadd.f32 %v37_v12, %v34_v14 }
   0xb   :  { %v40_v17 = vmax.f32 %v38_v15, 0.0  ;;  %v41_v18 = vmax.f32 %v39_v16, 0.0 }
   0xd   :  { %v42_v19 = vpack.c.bf16 %v41_v18, %v40_v17 }
   0xf   :  { %43 = vst [vmem:[%s95_s4] sm:$0xff] %v42_v19 }

// kernel: resnet18_features.56
= control target key start
LH: loop header
LB: loop body
LE: loop exit
PB: predicated region body
PF: predicated region fallthrough
CT: control target
= control target key end

     0   :  { %s4572_s12 = smov 0   ;;  %s4574_s13 = smov 0   ;;  %s6450_s0 = inlined_call_operand.vmem [shape: bf16[2,4,4,256], index: 0, kind: input, shape index: {}]   ;;  %s6451_s1 = inlined_call_operand.vmem [shape: bf16[3,3,256,256], index: 1, kind: input, shape index: {}]   ;;  %s6452_s2 = inlined_call_operand.vmem [shape: f32[2,2,2,256], index: 2, kind: output, shape index: {0}]   ;;  %s6453_s3 = inlined_call_operand.vmem [shape: f32[2,2,2,256], index: 3, kind: output, shape index: {1}]  }
   0x1   :  { %s4576_s14 = smov 0   ;;  %s4578_s15 = smov 0  }
   0x2   :  { %s4580_s16 = smov 0  }
   0x3 LB: > { %s23_s17 = sadd.s32 1, %s4542_s14  ;;  %s26_s18 = sadd.s32 1, %s4546_s15  ;;  %s4550_s16 = sphi %s4580_s16, %s14_s16   ;;  %s4546_s15 = sphi %s4578_s15, %s6457_s15   ;;  %s4542_s14 = sphi %s4576_s14, %s6456_s14   ;;  %s4538_s13 = sphi %s4574_s13, %s6455_s13   ;;  %s4534_s12 = sphi %s4572_s12, %s6454_s12  }
   0x4   : > { %p24_p0 = scmp.ge.s32.totalorder %s23_s17, 2  ;;  %p2753_p1 = scmp.ge.s32.totalorder %s4550_s16, 1 }
   0x5   : > { %p156_p2 = scmp.lt.s32.totalorder %s4550_s16, 5 }
   0x6   : > { %s6459_s17 = smov (%p24_p0, %s23_s17), 0  ;;  %s6461_s18 = smov (!%p24_p0, %s26_s18), %s4546_s15 }
   0x7   : > { %p157_p3 = pnand %p2753_p1, %p156_p2  ;;  %p28_p4 = scmp.ge.s32.totalorder %s6461_s18, 2 }
   0x8   : > { %p193_p5 = scmp.lt.s32.totalorder (!%p157_p3), %s4538_s13, 1  ;;  %s4183_s4 = sshll.u32 (!%p157_p3), %s4534_s12, 2 }
   0x9   : > { %s6463_s18 = smov (%p28_p4, %s6461_s18), 0  ;;  %160 = sbr.rel (%p157_p3) target bundleno = 462 (0x1ce), region = 28 }
   0xa   : > { %p200_p6 = scmp.lt.s32.totalorder (!%p157_p3), %s4534_s12, 1 }
   0xe   : > { %v2854_v0 = vld [vmem:[%s6451_s1 + $0x170] sm:$0xf]  ;;  %v4231_v1 = vld [vmem:[%s6451_s1 + $0x174] sm:$0xf0]  ;;  %v4230_v5 = vld [vmem:[%s6451_s1 + $0x174] sm:$0xf] }
   0xf   : > { %v2918_v2 = vld [vmem:[%s6451_s1 + $0x1f0] sm:$0xf]  ;;  %v2855_v3 = vor.u32 %v4231_v1, %v2854_v0  ;;  %v4247_v4 = vld [vmem:[%s6451_s1 + $0x1f4] sm:$0xf0]  ;;  %v2856_v6 = vld [vmem:[%s6451_s1 + $0x178] sm:$0xf0] }
  0x10   : > { %v2919_v7 = vor.u32 %v4247_v4, %v2918_v2  ;;  %v2859_v8 = vor.u32 %v4230_v5, %v2856_v6  ;;  %v4246_v9 = vld [vmem:[%s6451_s1 + $0x1f4] sm:$0xf]  ;;  %v2920_v10 = vld [vmem:[%s6451_s1 + $0x1f8] sm:$0xf0]  ;;  %v2846_v11 = vld [vmem:[%s6451_s1 + $0x160] sm:$0xf] }
  0x11   : > { %464 = vmatpush.bf16.msra.mxu0 %v2855_v3  ;;  %v2923_v12 = vor.u32 %v4246_v9, %v2920_v10  ;;  %v4229_v13 = vld [vmem:[%s6451_s1 + $0x164] sm:$0xf0]  ;;  %v2910_v14 = vld [vmem:[%s6451_s1 + $0x1e0] sm:$0xf]  ;;  %v4228_v18 = vld [vmem:[%s6451_s1 + $0x164] sm:$0xf] }
  0x12   : > { %v4245_v15 = vld [vmem:[%s6451_s1 + $0x1e4] sm:$0xf0]  ;;  %477 = vmatpush.bf16.msra.mxu1 %v2919_v7  ;;  %490 = vmatpush.bf16.msra.mxu2 %v2859_v8  ;;  %v2847_v16 = vor.u32 %v4229_v13, %v2846_v11  ;;  %v2848_v19 = vld [vmem:[%s6451_s1 + $0x168] sm:$0xf0]  ;;  %v4244_v20 = vld [vmem:[%s6451_s1 + $0x1e4] sm:$0xf] }
  0x13   : > { %v2911_v17 = vor.u32 %v4245_v15, %v2910_v14  ;;  %503 = vmatpush.bf16.msra.mxu3 %v2923_v12  ;;  %v2851_v21 = vor.u32 %v4228_v18, %v2848_v19  ;;  %v2912_v22 = vld [vmem:[%s6451_s1 + $0x1e8] sm:$0xf0]  ;;  %v2838_v23 = vld [vmem:[%s6451_s1 + $0x150] sm:$0xf]  ;;  %v4227_v24 = vld [vmem:[%s6451_s1 + $0x154] sm:$0xf0] }
  0x14   : > { %v2915_v25 = vor.u32 %v4244_v20, %v2912_v22  ;;  %v2902_v26 = vld [vmem:[%s6451_s1 + $0x1d0] sm:$0xf]  ;;  %v4243_v27 = vld [vmem:[%s6451_s1 + $0x1d4] sm:$0xf0]  ;;  %v4226_v28 = vld [vmem:[%s6451_s1 + $0x154] sm:$0xf]  ;;  %v2839_v29 = vor.u32 %v4227_v24, %v2838_v23 }
  0x15   : > { %465 = vmatpush.bf16.msra.mxu0 %v2847_v16  ;;  %v2840_v30 = vld [vmem:[%s6451_s1 + $0x158] sm:$0xf0]  ;;  %v4242_v31 = vld [vmem:[%s6451_s1 + $0x1d4] sm:$0xf]  ;;  %v2903_v33 = vor.u32 %v4243_v27, %v2902_v26  ;;  %v2830_v35 = vld [vmem:[%s6451_s1 + $0x140] sm:$0xf] }
  0x16   : > { %v2904_v32 = vld [vmem:[%s6451_s1 + $0x1d8] sm:$0xf0]  ;;  %478 = vmatpush.bf16.msra.mxu1 %v2911_v17  ;;  %491 = vmatpush.bf16.msra.mxu2 %v2851_v21  ;;  %v2843_v34 = vor.u32 %v4226_v28, %v2840_v30  ;;  %v4225_v36 = vld [vmem:[%s6451_s1 + $0x144] sm:$0xf0]  ;;  %v2894_v37 = vld [vmem:[%s6451_s1 + $0x1c0] sm:$0xf] }
  0x17   : > { %504 = vmatpush.bf16.msra.mxu3 %v2915_v25  ;;  %v2907_v38 = vor.u32 %v4242_v31, %v2904_v32  ;;  %v4241_v39 = vld [vmem:[%s6451_s1 + $0x1c4] sm:$0xf0]  ;;  %v4224_v40 = vld [vmem:[%s6451_s1 + $0x144] sm:$0xf]  ;;  %v2832_v41 = vld [vmem:[%s6451_s1 + $0x148] sm:$0xf0]  ;;  %v2831_v44 = vor.u32 %v4225_v36, %v2830_v35 }
  0x18   : > { %v4240_v42 = vld [vmem:[%s6451_s1 + $0x1c4] sm:$0xf]  ;;  %v2896_v43 = vld [vmem:[%s6451_s1 + $0x1c8] sm:$0xf0]  ;;  %v2895_v45 = vor.u32 %v4241_v39, %v2894_v37  ;;  %v2835_v46 = vor.u32 %v4224_v40, %v2832_v41  ;;  %v2822_v47 = vld [vmem:[%s6451_s1 + $0x130] sm:$0xf] }
  0x19   : > { %466 = vmatpush.bf16.msra.mxu0 %v2839_v29  ;;  %v4223_v48 = vld [vmem:[%s6451_s1 + $0x134] sm:$0xf0]  ;;  %v2886_v49 = vld [vmem:[%s6451_s1 + $0x1b0] sm:$0xf]  ;;  %v2899_v50 = vor.u32 %v4240_v42, %v2896_v43  ;;  %v4222_v52 = vld [vmem:[%s6451_s1 + $0x134] sm:$0xf] }
  0x1a   : > { %479 = vmatpush.bf16.msra.mxu1 %v2903_v33  ;;  %492 = vmatpush.bf16.msra.mxu2 %v2843_v34  ;;  %v4239_v51 = vld [vmem:[%s6451_s1 + $0x1b4] sm:$0xf0]  ;;  %v2824_v53 = vld [vmem:[%s6451_s1 + $0x138] sm:$0xf0]  ;;  %v4238_v54 = vld [vmem:[%s6451_s1 + $0x1b4] sm:$0xf]  ;;  %v2823_v56 = vor.u32 %v4223_v48, %v2822_v47 }
  0x1b   : > { %505 = vmatpush.bf16.msra.mxu3 %v2907_v38  ;;  %v2888_v55 = vld [vmem:[%s6451_s1 + $0x1b8] sm:$0xf0]  ;;  %v2887_v57 = vor.u32 %v4239_v51, %v2886_v49  ;;  %v2827_v58 = vor.u32 %v4222_v52, %v2824_v53  ;;  %v2814_v59 = vld [vmem:[%s6451_s1 + $0x120] sm:$0xf]  ;;  %v4221_v60 = vld [vmem:[%s6451_s1 + $0x124] sm:$0xf0] }
  0x1c   : > { %v2878_v61 = vld [vmem:[%s6451_s1 + $0x1a0] sm:$0xf]  ;;  %v2891_v62 = vor.u32 %v4238_v54, %v2888_v55  ;;  %v4237_v63 = vld [vmem:[%s6451_s1 + $0x1a4] sm:$0xf0]  ;;  %v4220_v0 = vld [vmem:[%s6451_s1 + $0x124] sm:$0xf]  ;;  %v2815_v4 = vor.u32 %v4221_v60, %v2814_v59 }
  0x1d   : > { %467 = vmatpush.bf16.msra.mxu0 %v2831_v44  ;;  %v2816_v1 = vld [vmem:[%s6451_s1 + $0x128] sm:$0xf0]  ;;  %v4236_v2 = vld [vmem:[%s6451_s1 + $0x1a4] sm:$0xf]  ;;  %v2879_v5 = vor.u32 %v4237_v63, %v2878_v61  ;;  %v2806_v7 = vld [vmem:[%s6451_s1 + $0x110] sm:$0xf] }
  0x1e   : > { %480 = vmatpush.bf16.msra.mxu1 %v2895_v45  ;;  %493 = vmatpush.bf16.msra.mxu2 %v2835_v46  ;;  %v2880_v3 = vld [vmem:[%s6451_s1 + $0x1a8] sm:$0xf0]  ;;  %v2819_v6 = vor.u32 %v4220_v0, %v2816_v1  ;;  %v4219_v8 = vld [vmem:[%s6451_s1 + $0x114] sm:$0xf0]  ;;  %v2870_v9 = vld [vmem:[%s6451_s1 + $0x190] sm:$0xf] }
  0x1f   : > { %506 = vmatpush.bf16.msra.mxu3 %v2899_v50  ;;  %v2883_v10 = vor.u32 %v4236_v2, %v2880_v3  ;;  %v4235_v11 = vld [vmem:[%s6451_s1 + $0x194] sm:$0xf0]  ;;  %v4218_v12 = vld [vmem:[%s6451_s1 + $0x114] sm:$0xf]  ;;  %v2808_v13 = vld [vmem:[%s6451_s1 + $0x118] sm:$0xf0]  ;;  %v2807_v16 = vor.u32 %v4219_v8, %v2806_v7 }
  0x20   : > { %v4234_v14 = vld [vmem:[%s6451_s1 + $0x194] sm:$0xf]  ;;  %v2872_v15 = vld [vmem:[%s6451_s1 + $0x198] sm:$0xf0]  ;;  %v2798_v17 = vld [vmem:[%s6451_s1 + $0x100] sm:$0xf]  ;;  %v2871_v19 = vor.u32 %v4235_v11, %v2870_v9  ;;  %v2811_v20 = vor.u32 %v4218_v12, %v2808_v13 }
  0x21   : > { %468 = vmatpush.bf16.msra.mxu0 %v2823_v56  ;;  %v4217_v18 = vld [vmem:[%s6451_s1 + $0x104] sm:$0xf0]  ;;  %v2862_v21 = vld [vmem:[%s6451_s1 + $0x180] sm:$0xf]  ;;  %v4216_v23 = vld [vmem:[%s6451_s1 + $0x104] sm:$0xf]  ;;  %v2875_v24 = vor.u32 %v4234_v14, %v2872_v15 }
  0x22   : > { %481 = vmatpush.bf16.msra.mxu1 %v2887_v57  ;;  %494 = vmatpush.bf16.msra.mxu2 %v2827_v58  ;;  %v4233_v22 = vld [vmem:[%s6451_s1 + $0x184] sm:$0xf0]  ;;  %v2800_v25 = vld [vmem:[%s6451_s1 + $0x108] sm:$0xf0]  ;;  %v4232_v26 = vld [vmem:[%s6451_s1 + $0x184] sm:$0xf]  ;;  %v2799_v31 = vor.u32 %v4217_v18, %v2798_v17 }
  0x23   : > { %507 = vmatpush.bf16.msra.mxu3 %v2891_v62  ;;  %v2864_v27 = vld [vmem:[%s6451_s1 + $0x188] sm:$0xf0]  ;;  %v2982_v28 = vld [vmem:[%s6451_s1 + $0x70] sm:$0xf]  ;;  %v4199_v29 = vld [vmem:[%s6451_s1 + $0x74] sm:$0xf0]  ;;  %v2863_v35 = vor.u32 %v4233_v22, %v2862_v21  ;;  %v2803_v36 = vor.u32 %v4216_v23, %v2800_v25 }
  0x24   : > { %v3046_v30 = vld [vmem:[%s6451_s1 + $0xf0] sm:$0xf]  ;;  %v4215_v32 = vld [vmem:[%s6451_s1 + $0xf4] sm:$0xf0]  ;;  %v4198_v33 = vld [vmem:[%s6451_s1 + $0x74] sm:$0xf]  ;;  %v2867_v39 = vor.u32 %v4232_v26, %v2864_v27  ;;  %v2983_v40 = vor.u32 %v4199_v29, %v2982_v28 }
  0x25   : > { %469 = vmatpush.bf16.msra.mxu0 %v2815_v4  ;;  %v2984_v34 = vld [vmem:[%s6451_s1 + $0x78] sm:$0xf0]  ;;  %v4214_v37 = vld [vmem:[%s6451_s1 + $0xf4] sm:$0xf]  ;;  %v3047_v41 = vor.u32 %v4215_v32, %v3046_v30  ;;  %v2974_v43 = vld [vmem:[%s6451_s1 + $0x60] sm:$0xf] }
  0x26   : > { %482 = vmatpush.bf16.msra.mxu1 %v2879_v5  ;;  %495 = vmatpush.bf16.msra.mxu2 %v2819_v6  ;;  %v3048_v38 = vld [vmem:[%s6451_s1 + $0xf8] sm:$0xf0]  ;;  %v2987_v42 = vor.u32 %v4198_v33, %v2984_v34  ;;  %v4197_v44 = vld [vmem:[%s6451_s1 + $0x64] sm:$0xf0]  ;;  %v3038_v45 = vld [vmem:[%s6451_s1 + $0xe0] sm:$0xf] }
  0x27   : > { %508 = vmatpush.bf16.msra.mxu3 %v2883_v10  ;;  %v3051_v46 = vor.u32 %v4214_v37, %v3048_v38  ;;  %v4213_v47 = vld [vmem:[%s6451_s1 + $0xe4] sm:$0xf0]  ;;  %v4196_v48 = vld [vmem:[%s6451_s1 + $0x64] sm:$0xf]  ;;  %v2976_v49 = vld [vmem:[%s6451_s1 + $0x68] sm:$0xf0]  ;;  %v2975_v52 = vor.u32 %v4197_v44, %v2974_v43 }
  0x28   : > { %v4212_v50 = vld [vmem:[%s6451_s1 + $0xe4] sm:$0xf]  ;;  %v3040_v51 = vld [vmem:[%s6451_s1 + $0xe8] sm:$0xf0]  ;;  %v2966_v53 = vld [vmem:[%s6451_s1 + $0x50] sm:$0xf]  ;;  %v3039_v55 = vor.u32 %v4213_v47, %v3038_v45  ;;  %v2979_v56 = vor.u32 %v4196_v48, %v2976_v49 }
  0x29   : > { %470 = vmatpush.bf16.msra.mxu0 %v2807_v16  ;;  %v4195_v54 = vld [vmem:[%s6451_s1 + $0x54] sm:$0xf0]  ;;  %v3030_v57 = vld [vmem:[%s6451_s1 + $0xd0] sm:$0xf]  ;;  %s6465_s13 = smov (!%p193_p5, %s4538_s13), 1  ;;  %v3043_v59 = vor.u32 %v4212_v50, %v3040_v51  ;;  %s6467_s12 = smov (!%p200_p6, %s4534_s12), 1 }
  0x2a   : > { %483 = vmatpush.bf16.msra.mxu1 %v2871_v19  ;;  %496 = vmatpush.bf16.msra.mxu2 %v2811_v20  ;;  %v4211_v58 = vld [vmem:[%s6451_s1 + $0xd4] sm:$0xf0]  ;;  %v4194_v60 = vld [vmem:[%s6451_s1 + $0x54] sm:$0xf]  ;;  %v2968_v61 = vld [vmem:[%s6451_s1 + $0x58] sm:$0xf0]  ;;  %v2967_v0 = vor.u32 %v4195_v54, %v2966_v53 }
  0x2b   : > { %509 = vmatpush.bf16.msra.mxu3 %v2875_v24  ;;  %v4210_v62 = vld [vmem:[%s6451_s1 + $0xd4] sm:$0xf]  ;;  %v3032_v63 = vld [vmem:[%s6451_s1 + $0xd8] sm:$0xf0]  ;;  %s4182_s9 = sshll.u32 %s6465_s13, 4  ;;  %v3031_v2 = vor.u32 %v4211_v58, %v3030_v57  ;;  %v2971_v3 = vor.u32 %v4194_v60, %v2968_v61  ;;  %vm2559_vm0 = vcmask 1041408  }
  0x2c   : > { %v2958_v1 = vld [vmem:[%s6451_s1 + $0x40] sm:$0xf]  ;;  %s197_s21 = scalar_lea.vmem %s6450_s0, %s4182_s9  ;;  %v4193_v4 = vld [vmem:[%s6451_s1 + $0x44] sm:$0xf0]  ;;  %v3035_v7 = vor.u32 %v4210_v62, %v3032_v63  ;;  %v4192_v8 = vld [vmem:[%s6451_s1 + $0x44] sm:$0xf] }
  0x2d   : > { %471 = vmatpush.bf16.msra.mxu0 %v2799_v31  ;;  %v3022_v5 = vld [vmem:[%s6451_s1 + $0xc0] sm:$0xf]  ;;  %v4209_v6 = vld [vmem:[%s6451_s1 + $0xc4] sm:$0xf0]  ;;  %s4891_s28 = scalar_lea.vmem %s197_s21, %s4183_s4  ;;  %v2960_v9 = vld [vmem:[%s6451_s1 + $0x48] sm:$0xf0]  ;;  %v2959_v13 = vor.u32 %v4193_v4, %v2958_v1 }
  0x2e   : > { %484 = vmatpush.bf16.msra.mxu1 %v2863_v35  ;;  %497 = vmatpush.bf16.msra.mxu2 %v2803_v36  ;;  %v252_v10 = vld [vmem:[%s4891_s28] sm:$0xf]  ;;  %v4208_v11 = vld [vmem:[%s6451_s1 + $0xc4] sm:$0xf]  ;;  %v3024_v12 = vld [vmem:[%s6451_s1 + $0xc8] sm:$0xf0]  ;;  %v3023_v14 = vor.u32 %v4209_v6, %v3022_v5  ;;  %v2963_v15 = vor.u32 %v4192_v8, %v2960_v9 }
  0x2f   : > { %510 = vmatpush.bf16.msra.mxu3 %v2867_v39  ;;  %287 = vst [vmem:[#allocation1] ss:$4 sm:$0xff] %v252_v10  ;;  %v2950_v16 = vld [vmem:[%s6451_s1 + $0x30] sm:$0xf]  ;;  %v4191_v17 = vld [vmem:[%s6451_s1 + $0x34] sm:$0xf0]  ;;  %v3027_v19 = vor.u32 %v4208_v11, %v3024_v12 }
  0x30   : > { %v3014_v18 = vld [vmem:[%s6451_s1 + $0xb0] sm:$0xf]  ;;  %v4207_v20 = vld [vmem:[%s6451_s1 + $0xb4] sm:$0xf0]  ;;  %v4190_v21 = vld [vmem:[%s6451_s1 + $0x34] sm:$0xf]  ;;  %v2951_v25 = vor.u32 %v4191_v17, %v2950_v16 }
  0x31   : > { %682 = vmatpush.bf16.msrb.mxu0 %v2983_v40  ;;  %v2952_v22 = vld [vmem:[%s6451_s1 + $0x38] sm:$0xf0]  ;;  %v4206_v23 = vld [vmem:[%s6451_s1 + $0xb4] sm:$0xf]  ;;  %v2942_v26 = vld [vmem:[%s6451_s1 + $0x20] sm:$0xf]  ;;  %v3015_v28 = vor.u32 %v4207_v20, %v3014_v18 }
  0x32   : > { %695 = vmatpush.bf16.msrb.mxu1 %v3047_v41  ;;  %708 = vmatpush.bf16.msrb.mxu2 %v2987_v42  ;;  %v3016_v24 = vld [vmem:[%s6451_s1 + $0xb8] sm:$0xf0]  ;;  %v4189_v27 = vld [vmem:[%s6451_s1 + $0x24] sm:$0xf0]  ;;  %v2955_v29 = vor.u32 %v4190_v21, %v2952_v22  ;;  %v3006_v30 = vld [vmem:[%s6451_s1 + $0xa0] sm:$0xf] }
  0x33   : > { %721 = vmatpush.bf16.msrb.mxu3 %v3051_v46  ;;  %v4205_v31 = vld [vmem:[%s6451_s1 + $0xa4] sm:$0xf0]  ;;  %v4188_v32 = vld [vmem:[%s6451_s1 + $0x24] sm:$0xf]  ;;  %v2944_v33 = vld [vmem:[%s6451_s1 + $0x28] sm:$0xf0]  ;;  %v3019_v35 = vor.u32 %v4206_v23, %v3016_v24  ;;  %v2943_v42 = vor.u32 %v4189_v27, %v2942_v26 }
  0x34   : > { %v4204_v41 = vld [vmem:[%s6451_s1 + $0xa4] sm:$0xf]  ;;  %v3008_v43 = vld [vmem:[%s6451_s1 + $0xa8] sm:$0xf0]  ;;  %v2934_v44 = vld [vmem:[%s6451_s1 + $0x10] sm:$0xf]  ;;  %v3007_v49 = vor.u32 %v4205_v31, %v3006_v30  ;;  %v2947_v50 = vor.u32 %v4188_v32, %v2944_v33 }
  0x35   : > { %683 = vmatpush.bf16.msrb.mxu0 %v2975_v52  ;;  %v219_v45 = vld [vmem:[%s4891_s28] sm:$0x5]  ;;  %v4187_v48 = vld [vmem:[%s6451_s1 + $0x14] sm:$0xf0]  ;;  %v2998_v51 = vld [vmem:[%s6451_s1 + $0x90] sm:$0xf] }
  0x36   : > { %696 = vmatpush.bf16.msrb.mxu1 %v3039_v55  ;;  %709 = vmatpush.bf16.msrb.mxu2 %v2979_v56  ;;  %v288_v34 = vld.sshfl [vmem:[#allocation1] sm:$0xff pattern:$0x73625140]  ;;  %v289_v36 = vld.sshfl [vmem:[#allocation1 + $0x8] sm:$0xff pattern:$0x73625140]  ;;  %v3011_v55 = vor.u32 %v4204_v41, %v3008_v43 }
  0x37   : > { %722 = vmatpush.bf16.msrb.mxu3 %v3043_v59  ;;  %v290_v37 = vshrl.u32 %v288_v34, 16  ;;  %v292_v38 = vshll.u32 %v288_v34, 16  ;;  %v296_v39 = vshrl.u32 %v289_v36, 16  ;;  %v298_v40 = vshll.u32 %v289_v36, 16  ;;  %517 = vst [vmem:[#allocation1] ss:$4 sm:$0xff] %v219_v45 }
  0x38   : > { %v4203_v52 = vld [vmem:[%s6451_s1 + $0x94] sm:$0xf0]  ;;  %v4186_v56 = vld [vmem:[%s6451_s1 + $0x14] sm:$0xf]  ;;  %v2936_v57 = vld [vmem:[%s6451_s1 + $0x18] sm:$0xf0]  ;;  %v2935_v59 = vor.u32 %v4187_v48, %v2934_v44 }
  0x39   : > { %684 = vmatpush.bf16.msrb.mxu0 %v2967_v0  ;;  %v294_v46 = vrot.slane %v292_v38, 1  ;;  %v300_v47 = vrot.slane %v298_v40, 1  ;;  %v4202_v58 = vld [vmem:[%s6451_s1 + $0x94] sm:$0xf]  ;;  %v3000_v60 = vld [vmem:[%s6451_s1 + $0x98] sm:$0xf0]  ;;  %v2999_v4 = vor.u32 %v4203_v52, %v2998_v51  ;;  %v2939_v5 = vor.u32 %v4186_v56, %v2936_v57 }
  0x3a   : > { %697 = vmatpush.bf16.msrb.mxu1 %v3031_v2  ;;  %710 = vmatpush.bf16.msrb.mxu2 %v2971_v3  ;;  %v2926_v61 = vld [vmem:[%s6451_s1] sm:$0xf]  ;;  %v4185_v62 = vld [vmem:[%s6451_s1 + $0x4] sm:$0xf0]  ;;  %v4184_v1 = vld [vmem:[%s6451_s1 + $0x4] sm:$0xf]  ;;  %v3003_v11 = vor.u32 %v4202_v58, %v3000_v60 }
  0x3b   : > { %723 = vmatpush.bf16.msrb.mxu3 %v3035_v7  ;;  %v295_v53 = vor.u32 %v294_v46, %v290_v37  ;;  %v301_v54 = vor.u32 %v300_v47, %v296_v39  ;;  %v2990_v63 = vld [vmem:[%s6451_s1 + $0x80] sm:$0xf]  ;;  %v4201_v0 = vld [vmem:[%s6451_s1 + $0x84] sm:$0xf0]  ;;  %v2928_v2 = vld [vmem:[%s6451_s1 + $0x8] sm:$0xf0] }
  0x3c   : > { %v3142_v3 = vld [vmem:[%s6451_s1 + $0x270] sm:$0xf]  ;;  %v4200_v6 = vld [vmem:[%s6451_s1 + $0x84] sm:$0xf]  ;;  %v2992_v7 = vld [vmem:[%s6451_s1 + $0x88] sm:$0xf0]  ;;  %v2991_v21 = vor.u32 %v4201_v0, %v2990_v63  ;;  %v2931_v22 = vor.u32 %v4184_v1, %v2928_v2 }
  0x3d   : > { %685 = vmatpush.bf16.msrb.mxu0 %v2959_v13  ;;  %498 = vmatmul.bf16.vlgmr.msra.gmra.mxu2 %v295_v53  ;;  %v4263_v8 = vld [vmem:[%s6451_s1 + $0x274] sm:$0xf0]  ;;  %v3206_v9 = vld [vmem:[%s6451_s1 + $0x2f0] sm:$0xf]  ;;  %v734_v10 = vld [vmem:[%s4891_s28] sm:$0xa] }
  0x3e   : > { %698 = vmatpush.bf16.msrb.mxu1 %v3023_v14  ;;  %711 = vmatpush.bf16.msrb.mxu2 %v2963_v15  ;;  %v4279_v12 = vld [vmem:[%s6451_s1 + $0x2f4] sm:$0xf0]  ;;  %v4262_v13 = vld [vmem:[%s6451_s1 + $0x274] sm:$0xf]  ;;  %v3144_v14 = vld [vmem:[%s6451_s1 + $0x278] sm:$0xf0]  ;;  %v2927_v15 = vor.u32 %v4185_v62, %v2926_v61  ;;  %v3143_v18 = vor.u32 %v4263_v8, %v3142_v3 }
  0x3f   : > { %724 = vmatpush.bf16.msrb.mxu3 %v3027_v19  ;;  %472 = vmatmul.bf16.vlgmr.msra.gmra.mxu0 %v295_v53  ;;  %v5022_v16 = vld.sshfl [vmem:[#allocation1] sm:$0xff pattern:$0x73625140]  ;;  %v5024_v17 = vld.sshfl [vmem:[#allocation1 + $0x8] sm:$0xff pattern:$0x73625140]  ;;  %v3207_v26 = vor.u32 %v4279_v12, %v3206_v9  ;;  %v3147_v27 = vor.u32 %v4262_v13, %v3144_v14 }
  0x40   : > { %511 = vmatmul.bf16.vlgmr.msra.gmra.mxu3 %v301_v54  ;;  %485 = vmatmul.bf16.vlgmr.msra.gmra.mxu1 %v301_v54  ;;  %v4278_v19 = vld [vmem:[%s6451_s1 + $0x2f4] sm:$0xf]  ;;  %v3208_v20 = vld [vmem:[%s6451_s1 + $0x2f8] sm:$0xf0]  ;;  %769 = vst [vmem:[#allocation1] ss:$4 sm:$0xff] %v734_v10 }
  0x41   : > { %686 = vmatpush.bf16.msrb.mxu0 %v2951_v25  ;;  %v3134_v23 = vld [vmem:[%s6451_s1 + $0x260] sm:$0xf]  ;;  %v4261_v24 = vld [vmem:[%s6451_s1 + $0x264] sm:$0xf0]  ;;  %v2995_v25 = vor.u32 %v4200_v6, %v2992_v7  ;;  %v4260_v31 = vld [vmem:[%s6451_s1 + $0x264] sm:$0xf] }
  0x42   : > { %699 = vmatpush.bf16.msrb.mxu1 %v3015_v28  ;;  %712 = vmatpush.bf16.msrb.mxu2 %v2955_v29  ;;  %v3211_v28 = vor.u32 %v4278_v19, %v3208_v20  ;;  %v3198_v29 = vld [vmem:[%s6451_s1 + $0x2e0] sm:$0xf]  ;;  %v4277_v30 = vld [vmem:[%s6451_s1 + $0x2e4] sm:$0xf0]  ;;  %v3135_v32 = vor.u32 %v4261_v24, %v3134_v23  ;;  %v3136_v33 = vld [vmem:[%s6451_s1 + $0x268] sm:$0xf0] }
  0x43   : > { %725 = vmatpush.bf16.msrb.mxu3 %v3019_v35  ;;  %v4276_v34 = vld [vmem:[%s6451_s1 + $0x2e4] sm:$0xf]  ;;  %v3200_v35 = vld [vmem:[%s6451_s1 + $0x2e8] sm:$0xf0]  ;;  %v3199_v36 = vor.u32 %v4277_v30, %v3198_v29  ;;  %v3126_v37 = vld [vmem:[%s6451_s1 + $0x250] sm:$0xf]  ;;  %v3139_v39 = vor.u32 %v4260_v31, %v3136_v33 }
  0x44   : > { %v4259_v38 = vld [vmem:[%s6451_s1 + $0x254] sm:$0xf0]  ;;  %v3203_v40 = vor.u32 %v4276_v34, %v3200_v35  ;;  %v3190_v41 = vld [vmem:[%s6451_s1 + $0x2d0] sm:$0xf]  ;;  %v4258_v43 = vld [vmem:[%s6451_s1 + $0x254] sm:$0xf] }
  0x45   : > { %687 = vmatpush.bf16.msrb.mxu0 %v2943_v42  ;;  %v4275_v42 = vld [vmem:[%s6451_s1 + $0x2d4] sm:$0xf0]  ;;  %v3128_v44 = vld [vmem:[%s6451_s1 + $0x258] sm:$0xf0]  ;;  %v4274_v45 = vld [vmem:[%s6451_s1 + $0x2d4] sm:$0xf]  ;;  %v3127_v47 = vor.u32 %v4259_v38, %v3126_v37 }
  0x46   : > { %700 = vmatpush.bf16.msrb.mxu1 %v3007_v49  ;;  %713 = vmatpush.bf16.msrb.mxu2 %v2947_v50  ;;  %v3192_v46 = vld [vmem:[%s6451_s1 + $0x2d8] sm:$0xf0]  ;;  %v3191_v48 = vor.u32 %v4275_v42, %v3190_v41  ;;  %v3118_v49 = vld [vmem:[%s6451_s1 + $0x240] sm:$0xf]  ;;  %v4257_v50 = vld [vmem:[%s6451_s1 + $0x244] sm:$0xf0]  ;;  %v3131_v52 = vor.u32 %v4258_v43, %v3128_v44 }
  0x47   : > { %726 = vmatpush.bf16.msrb.mxu3 %v3011_v55  ;;  %v3182_v51 = vld [vmem:[%s6451_s1 + $0x2c0] sm:$0xf]  ;;  %v3195_v53 = vor.u32 %v4274_v45, %v3192_v46  ;;  %v4273_v54 = vld [vmem:[%s6451_s1 + $0x2c4] sm:$0xf0]  ;;  %v4256_v55 = vld [vmem:[%s6451_s1 + $0x244] sm:$0xf]  ;;  %v3119_v60 = vor.u32 %v4257_v50, %v3118_v49 }
  0x48   : > { %v3120_v56 = vld [vmem:[%s6451_s1 + $0x248] sm:$0xf0]  ;;  %v4272_v57 = vld [vmem:[%s6451_s1 + $0x2c4] sm:$0xf]  ;;  %v4255_v61 = vld [vmem:[%s6451_s1 + $0x234] sm:$0xf0]  ;;  %v3183_v0 = vor.u32 %v4273_v54, %v3182_v51 }
  0x49   : > { %688 = vmatpush.bf16.msrb.mxu0 %v2935_v59  ;;  %v3184_v58 = vld [vmem:[%s6451_s1 + $0x2c8] sm:$0xf0]  ;;  %v3110_v59 = vld [vmem:[%s6451_s1 + $0x230] sm:$0xf]  ;;  %v4271_v63 = vld [vmem:[%s6451_s1 + $0x2b4] sm:$0xf0] }
  0x4a   : > { %701 = vmatpush.bf16.msrb.mxu1 %v2999_v4  ;;  %714 = vmatpush.bf16.msrb.mxu2 %v2939_v5  ;;  %v3174_v62 = vld [vmem:[%s6451_s1 + $0x2b0] sm:$0xf]  ;;  %v4254_v1 = vld [vmem:[%s6451_s1 + $0x234] sm:$0xf]  ;;  %v3112_v2 = vld [vmem:[%s6451_s1 + $0x238] sm:$0xf0]  ;;  %v3123_v4 = vor.u32 %v4256_v55, %v3120_v56  ;;  %v3187_v5 = vor.u32 %v4272_v57, %v3184_v58  ;;  %v3111_v10 = vor.u32 %v4255_v61, %v3110_v59 }
  0x4b   : > { %727 = vmatpush.bf16.msrb.mxu3 %v3003_v11  ;;  %v4270_v3 = vld [vmem:[%s6451_s1 + $0x2b4] sm:$0xf]  ;;  %v3176_v6 = vld [vmem:[%s6451_s1 + $0x2b8] sm:$0xf0]  ;;  %v3213_v9 = vld [vmem:[%s4891_s28 + $0x4] sm:$0x5]  ;;  %v3175_v11 = vor.u32 %v4271_v63, %v3174_v62  ;;  %v3115_v14 = vor.u32 %v4254_v1, %v3112_v2 }
  0x4c   : > { %v5131_v7 = vld.sshfl [vmem:[#allocation1] sm:$0xff pattern:$0x73625140]  ;;  %v5134_v8 = vld.sshfl [vmem:[#allocation1 + $0x8] sm:$0xff pattern:$0x73625140] }
  0x4d   : > { %689 = vmatpush.bf16.msrb.mxu0 %v2927_v15  ;;  %1031 = vst [vmem:[#allocation1] ss:$4 sm:$0xff] %v3213_v9  ;;  %v3102_v12 = vld [vmem:[%s6451_s1 + $0x220] sm:$0xf]  ;;  %v4253_v13 = vld [vmem:[%s6451_s1 + $0x224] sm:$0xf0]  ;;  %v3179_v15 = vor.u32 %v4270_v3, %v3176_v6 }
  0x4e   : > { %702 = vmatpush.bf16.msrb.mxu1 %v2991_v21  ;;  %715 = vmatpush.bf16.msrb.mxu2 %v2931_v22  ;;  %v3104_v19 = vld [vmem:[%s6451_s1 + $0x228] sm:$0xf0]  ;;  %v4268_v20 = vld [vmem:[%s6451_s1 + $0x2a4] sm:$0xf]  ;;  %v3103_v22 = vor.u32 %v4253_v13, %v3102_v12  ;;  %v3094_v24 = vld [vmem:[%s6451_s1 + $0x210] sm:$0xf] }
  0x4f   : > { %728 = vmatpush.bf16.msrb.mxu3 %v2995_v25  ;;  %v3168_v21 = vld [vmem:[%s6451_s1 + $0x2a8] sm:$0xf0]  ;;  %v4251_v25 = vld [vmem:[%s6451_s1 + $0x214] sm:$0xf0]  ;;  %v4250_v30 = vld [vmem:[%s6451_s1 + $0x214] sm:$0xf] }
  0x50   : > { %690 = vmatmul.bf16.vlgmr.msrb.gmra.mxu0 %v5022_v16  ;;  %v4267_v29 = vld [vmem:[%s6451_s1 + $0x294] sm:$0xf0]  ;;  %v3096_v31 = vld [vmem:[%s6451_s1 + $0x218] sm:$0xf0]  ;;  %v3095_v34 = vor.u32 %v4251_v25, %v3094_v24  ;;  %v3086_v35 = vld [vmem:[%s6451_s1 + $0x200] sm:$0xf] }
  0x51   : > { %938 = vmatpush.bf16.msra.mxu0 %v3143_v18  ;;  %716 = vmatmul.bf16.vlgmr.msrb.gmra.mxu2 %v5022_v16  ;;  %v3166_v16 = vld [vmem:[%s6451_s1 + $0x2a0] sm:$0xf]  ;;  %v4252_v18 = vld [vmem:[%s6451_s1 + $0x224] sm:$0xf]  ;;  %v3160_v33 = vld [vmem:[%s6451_s1 + $0x298] sm:$0xf0]  ;;  %v3099_v41 = vor.u32 %v4250_v30, %v3096_v31 }
  0x52   : > { %951 = vmatpush.bf16.msra.mxu1 %v3207_v26  ;;  %964 = vmatpush.bf16.msra.mxu2 %v3147_v27  ;;  %v3107_v26 = vor.u32 %v4252_v18, %v3104_v19  ;;  %v3171_v27 = vor.u32 %v4268_v20, %v3168_v21  ;;  %v3150_v38 = vld [vmem:[%s6451_s1 + $0x280] sm:$0xf]  ;;  %v3088_v43 = vld [vmem:[%s6451_s1 + $0x208] sm:$0xf0]  ;;  %v3304_v44 = vld [vmem:[%s6451_s1 + $0x370] sm:$0xf] }
  0x53   : > { %977 = vmatpush.bf16.msra.mxu3 %v3211_v28  ;;  %703 = vmatmul.bf16.vlgmr.msrb.gmra.mxu1 %v5024_v17  ;;  %v3158_v28 = vld [vmem:[%s6451_s1 + $0x290] sm:$0xf]  ;;  %v4295_v45 = vld [vmem:[%s6451_s1 + $0x374] sm:$0xf0]  ;;  %v4264_v46 = vld [vmem:[%s6451_s1 + $0x284] sm:$0xf] }
  0x54   : > { %729 = vmatmul.bf16.vlgmr.msrb.gmra.mxu3 %v5024_v17  ;;  %v4269_v17 = vld [vmem:[%s6451_s1 + $0x2a4] sm:$0xf0]  ;;  %v3159_v37 = vor.u32 %v4267_v29, %v3158_v28  ;;  %v4311_v50 = vld [vmem:[%s6451_s1 + $0x3f4] sm:$0xf0]  ;;  %v4294_v51 = vld [vmem:[%s6451_s1 + $0x374] sm:$0xf]  ;;  %v3305_v54 = vor.u32 %v4295_v45, %v3304_v44 }
  0x55   : > { %939 = vmatpush.bf16.msra.mxu0 %v3135_v32  ;;  %v3167_v23 = vor.u32 %v4269_v17, %v3166_v16  ;;  %v4266_v32 = vld [vmem:[%s6451_s1 + $0x294] sm:$0xf]  ;;  %v3370_v56 = vld [vmem:[%s6451_s1 + $0x3f8] sm:$0xf0]  ;;  %v774_v59 = vrot.slane %v5131_v7, 1  ;;  %s2756_s9 = sshll.u32 %s6467_s12, 1 }
  0x56   : > { %952 = vmatpush.bf16.msra.mxu1 %v3199_v36  ;;  %965 = vmatpush.bf16.msra.mxu2 %v3139_v39  ;;  %v4249_v36 = vld [vmem:[%s6451_s1 + $0x204] sm:$0xf0]  ;;  %v3163_v42 = vor.u32 %v4266_v32, %v3160_v33  ;;  %v4310_v55 = vld [vmem:[%s6451_s1 + $0x3f4] sm:$0xf]  ;;  %v3296_v62 = vld [vmem:[%s6451_s1 + $0x360] sm:$0xf] }
  0x57   : > { %978 = vmatpush.bf16.msra.mxu3 %v3203_v40  ;;  %v4265_v39 = vld [vmem:[%s6451_s1 + $0x284] sm:$0xf0]  ;;  %v4248_v40 = vld [vmem:[%s6451_s1 + $0x204] sm:$0xf]  ;;  %v3087_v49 = vor.u32 %v4249_v36, %v3086_v35  ;;  %v3373_v1 = vor.u32 %v4310_v55, %v3370_v56  ;;  %v3362_v7 = vld [vmem:[%s6451_s1 + $0x3e8] sm:$0xf0] }
  0x58   : > { %v3091_v57 = vor.u32 %v4248_v40, %v3088_v43  ;;  %v4293_v63 = vld [vmem:[%s6451_s1 + $0x364] sm:$0xf0]  ;;  %v4292_v3 = vld [vmem:[%s6451_s1 + $0x364] sm:$0xf]  ;;  %v3352_v13 = vld [vmem:[%s6451_s1 + $0x3d0] sm:$0xf] }
  0x59   : > { %940 = vmatpush.bf16.msra.mxu0 %v3127_v47  ;;  %v3152_v47 = vld [vmem:[%s6451_s1 + $0x288] sm:$0xf0]  ;;  %v4309_v2 = vld [vmem:[%s6451_s1 + $0x3e4] sm:$0xf0]  ;;  %v4308_v6 = vld [vmem:[%s6451_s1 + $0x3e4] sm:$0xf]  ;;  %v3297_v9 = vor.u32 %v4293_v63, %v3296_v62 }
  0x5a   : > { %953 = vmatpush.bf16.msra.mxu1 %v3191_v48  ;;  %966 = vmatpush.bf16.msra.mxu2 %v3131_v52  ;;  %v3368_v48 = vld [vmem:[%s6451_s1 + $0x3f0] sm:$0xf]  ;;  %v3306_v52 = vld [vmem:[%s6451_s1 + $0x378] sm:$0xf0]  ;;  %v3155_v58 = vor.u32 %v4264_v46, %v3152_v47  ;;  %v4290_v16 = vld [vmem:[%s6451_s1 + $0x354] sm:$0xf] }
  0x5b   : > { %979 = vmatpush.bf16.msra.mxu3 %v3195_v53  ;;  %v3151_v53 = vor.u32 %v4265_v39, %v3150_v38  ;;  %v3309_v61 = vor.u32 %v4294_v51, %v3306_v52  ;;  %v3290_v17 = vld [vmem:[%s6451_s1 + $0x358] sm:$0xf0]  ;;  %v4306_v18 = vld [vmem:[%s6451_s1 + $0x3d4] sm:$0xf]  ;;  %v3280_v20 = vld [vmem:[%s6451_s1 + $0x340] sm:$0xf] }
  0x5c   : > { %v3354_v19 = vld [vmem:[%s6451_s1 + $0x3d8] sm:$0xf0]  ;;  %v4289_v21 = vld [vmem:[%s6451_s1 + $0x344] sm:$0xf0]  ;;  %v3374_v29 = vld [vmem:[%s4891_s28 + $0x4] sm:$0xf] }
  0x5d   : > { %941 = vmatpush.bf16.msra.mxu0 %v3119_v60  ;;  %v3369_v60 = vor.u32 %v4311_v50, %v3368_v48  ;;  %v4305_v24 = vld [vmem:[%s6451_s1 + $0x3c4] sm:$0xf0]  ;;  %v5295_v25 = vld.sshfl [vmem:[#allocation1] sm:$0xff pattern:$0x73625140]  ;;  %v3357_v30 = vor.u32 %v4306_v18, %v3354_v19  ;;  %v3281_v35 = vor.u32 %v4289_v21, %v3280_v20  ;;  %s2757_s10 = sshll.u32 %s6465_s13, 2 }
  0x5e   : > { %954 = vmatpush.bf16.msra.mxu1 %v3183_v0  ;;  %967 = vmatpush.bf16.msra.mxu2 %v3123_v4  ;;  %v3360_v0 = vld [vmem:[%s6451_s1 + $0x3e0] sm:$0xf]  ;;  %v3298_v4 = vld [vmem:[%s6451_s1 + $0x368] sm:$0xf0]  ;;  %v4288_v31 = vld [vmem:[%s6451_s1 + $0x344] sm:$0xf]  ;;  %s6417_s4 = sadd.s32 %s2757_s10, %s2756_s9 }
  0x5f   : > { %980 = vmatpush.bf16.msra.mxu3 %v3187_v5  ;;  %v775_v5 = vrot.slane %v5134_v8, 1  ;;  %v3301_v12 = vor.u32 %v4292_v3, %v3298_v4  ;;  %v4291_v8 = vld [vmem:[%s6451_s1 + $0x354] sm:$0xf0]  ;;  %v5297_v28 = vld.sshfl [vmem:[#allocation1 + $0x8] sm:$0xff pattern:$0x73625140] }
  0x60   : > { %v3282_v32 = vld [vmem:[%s6451_s1 + $0x348] sm:$0xf0]  ;;  %1285 = vst [vmem:[#allocation1] ss:$4 sm:$0xff] %v3374_v29  ;;  %v4304_v33 = vld [vmem:[%s6451_s1 + $0x3c4] sm:$0xf] }
  0x61   : > { %942 = vmatpush.bf16.msra.mxu0 %v3111_v10  ;;  %v3288_v10 = vld [vmem:[%s6451_s1 + $0x350] sm:$0xf]  ;;  %v4287_v39 = vld [vmem:[%s6451_s1 + $0x334] sm:$0xf0]  ;;  %v4286_v43 = vld [vmem:[%s6451_s1 + $0x334] sm:$0xf] }
  0x62   : > { %955 = vmatpush.bf16.msra.mxu1 %v3175_v11  ;;  %968 = vmatpush.bf16.msra.mxu2 %v3115_v14  ;;  %v3361_v11 = vor.u32 %v4309_v2, %v3360_v0  ;;  %v4307_v14 = vld [vmem:[%s6451_s1 + $0x3d4] sm:$0xf0]  ;;  %v3272_v38 = vld [vmem:[%s6451_s1 + $0x330] sm:$0xf]  ;;  %v3274_v44 = vld [vmem:[%s6451_s1 + $0x338] sm:$0xf0] }
  0x63   : > { %981 = vmatpush.bf16.msra.mxu3 %v3179_v15  ;;  %v3365_v15 = vor.u32 %v4308_v6, %v3362_v7  ;;  %v3336_v40 = vld [vmem:[%s6451_s1 + $0x3b0] sm:$0xf]  ;;  %v4302_v45 = vld [vmem:[%s6451_s1 + $0x3b4] sm:$0xf]  ;;  %v3338_v46 = vld [vmem:[%s6451_s1 + $0x3b8] sm:$0xf0]  ;;  %v3273_v47 = vor.u32 %v4287_v39, %v3272_v38 }
  0x64   : > { %v3264_v50 = vld [vmem:[%s6451_s1 + $0x320] sm:$0xf]  ;;  %v4285_v51 = vld [vmem:[%s6451_s1 + $0x324] sm:$0xf0]  ;;  %v4284_v55 = vld [vmem:[%s6451_s1 + $0x324] sm:$0xf] }
  0x65   : > { %943 = vmatpush.bf16.msra.mxu0 %v3103_v22  ;;  %v3289_v22 = vor.u32 %v4291_v8, %v3288_v10  ;;  %v3328_v52 = vld [vmem:[%s6451_s1 + $0x3a0] sm:$0xf]  ;;  %v3266_v56 = vld [vmem:[%s6451_s1 + $0x328] sm:$0xf0]  ;;  %v3256_v62 = vld [vmem:[%s6451_s1 + $0x310] sm:$0xf] }
  0x66   : > { %956 = vmatpush.bf16.msra.mxu1 %v3167_v23  ;;  %969 = vmatpush.bf16.msra.mxu2 %v3107_v26  ;;  %v3344_v23 = vld [vmem:[%s6451_s1 + $0x3c0] sm:$0xf]  ;;  %v3353_v26 = vor.u32 %v4307_v14, %v3352_v13  ;;  %v4283_v63 = vld [vmem:[%s6451_s1 + $0x314] sm:$0xf0]  ;;  %v3320_v0 = vld [vmem:[%s6451_s1 + $0x390] sm:$0xf] }
  0x67   : > { %982 = vmatpush.bf16.msra.mxu3 %v3171_v27  ;;  %v3293_v27 = vor.u32 %v4290_v16, %v3290_v17  ;;  %v3345_v36 = vor.u32 %v4305_v24, %v3344_v23  ;;  %v4299_v2 = vld [vmem:[%s6451_s1 + $0x394] sm:$0xf0]  ;;  %v4282_v3 = vld [vmem:[%s6451_s1 + $0x314] sm:$0xf]  ;;  %v3258_v4 = vld [vmem:[%s6451_s1 + $0x318] sm:$0xf0]  ;;  %v3257_v7 = vor.u32 %v4283_v63, %v3256_v62 }
  0x68   : > { %v3322_v6 = vld [vmem:[%s6451_s1 + $0x398] sm:$0xf0]  ;;  %v4281_v10 = vld [vmem:[%s6451_s1 + $0x304] sm:$0xf0]  ;;  %v3312_v8 = vld [vmem:[%s6451_s1 + $0x380] sm:$0xf] }
  0x69   : > { %944 = vmatpush.bf16.msra.mxu0 %v3095_v34  ;;  %v3346_v34 = vld [vmem:[%s6451_s1 + $0x3c8] sm:$0xf0]  ;;  %v4297_v13 = vld [vmem:[%s6451_s1 + $0x384] sm:$0xf0]  ;;  %v4280_v14 = vld [vmem:[%s6451_s1 + $0x304] sm:$0xf] }
  0x6a   : > { %957 = vmatpush.bf16.msra.mxu1 %v3159_v37  ;;  %970 = vmatpush.bf16.msra.mxu2 %v3099_v41  ;;  %v3285_v37 = vor.u32 %v4288_v31, %v3282_v32  ;;  %v3349_v41 = vor.u32 %v4304_v33, %v3346_v34  ;;  %v3250_v16 = vld [vmem:[%s6451_s1 + $0x308] sm:$0xf0]  ;;  %v4296_v17 = vld [vmem:[%s6451_s1 + $0x384] sm:$0xf]  ;;  %v3465_v19 = vld [vmem:[%s6451_s1 + $0x470] sm:$0xf] }
  0x6b   : > { %983 = vmatpush.bf16.msra.mxu3 %v3163_v42  ;;  %v4303_v42 = vld [vmem:[%s6451_s1 + $0x3b4] sm:$0xf0]  ;;  %v3314_v18 = vld [vmem:[%s6451_s1 + $0x388] sm:$0xf0]  ;;  %v3529_v21 = vld [vmem:[%s6451_s1 + $0x4f0] sm:$0xf]  ;;  %v3253_v29 = vor.u32 %v4280_v14, %v3250_v16 }
  0x6c   : > { %v3337_v48 = vor.u32 %v4303_v42, %v3336_v40  ;;  %v4327_v20 = vld [vmem:[%s6451_s1 + $0x474] sm:$0xf0]  ;;  %v4326_v24 = vld [vmem:[%s6451_s1 + $0x474] sm:$0xf]  ;;  %v3531_v31 = vld [vmem:[%s6451_s1 + $0x4f8] sm:$0xf0]  ;;  %v3317_v32 = vor.u32 %v4296_v17, %v3314_v18 }
  0x6d   : > { %945 = vmatpush.bf16.msra.mxu0 %v3087_v49  ;;  %v3277_v49 = vor.u32 %v4286_v43, %v3274_v44  ;;  %v4343_v23 = vld [vmem:[%s6451_s1 + $0x4f4] sm:$0xf0]  ;;  %v3466_v33 = vor.u32 %v4327_v20, %v3465_v19  ;;  %v3521_v38 = vld [vmem:[%s6451_s1 + $0x4e0] sm:$0xf]  ;;  %v4341_v40 = vld [vmem:[%s6451_s1 + $0x4e4] sm:$0xf0] }
  0x6e   : > { %958 = vmatpush.bf16.msra.mxu1 %v3151_v53  ;;  %971 = vmatpush.bf16.msra.mxu2 %v3091_v57  ;;  %v3341_v53 = vor.u32 %v4302_v45, %v3338_v46  ;;  %v4300_v57 = vld [vmem:[%s6451_s1 + $0x3a4] sm:$0xf]  ;;  %v3530_v34 = vor.u32 %v4343_v23, %v3529_v21  ;;  %v3459_v42 = vld [vmem:[%s6451_s1 + $0x468] sm:$0xf0]  ;;  %v3522_v46 = vor.u32 %v4341_v40, %v3521_v38  ;;  %v4337_v62 = vld [vmem:[%s6451_s1 + $0x4c4] sm:$0xf0] }
  0x6f   : > { %984 = vmatpush.bf16.msra.mxu3 %v3155_v58  ;;  %v3330_v58 = vld [vmem:[%s6451_s1 + $0x3a8] sm:$0xf0]  ;;  %v4340_v43 = vld [vmem:[%s6451_s1 + $0x4e4] sm:$0xf]  ;;  %v3499_v14 = vld [vmem:[%s6451_s1 + $0x4b8] sm:$0xf0] }
  0x70   : > { %946 = vmatmul.bf16.vlgmr.msra.gmra.mxu0 %v774_v59  ;;  %v3523_v44 = vld [vmem:[%s6451_s1 + $0x4e8] sm:$0xf0]  ;;  %v4320_v63 = vld [vmem:[%s6451_s1 + $0x444] sm:$0xf]  ;;  %v3425_v16 = vld [vmem:[%s6451_s1 + $0x420] sm:$0xf] }
  0x71   : > { %1196 = vmatpush.bf16.msrb.mxu0 %v3305_v54  ;;  %959 = vmatmul.bf16.vlgmr.msra.gmra.mxu1 %v775_v5  ;;  %v4301_v54 = vld [vmem:[%s6451_s1 + $0x3a4] sm:$0xf0]  ;;  %v3489_v20 = vld [vmem:[%s6451_s1 + $0x4a0] sm:$0xf]  ;;  %v4316_v23 = vld [vmem:[%s6451_s1 + $0x424] sm:$0xf] }
  0x72   : > { %1209 = vmatpush.bf16.msrb.mxu1 %v3369_v60  ;;  %1222 = vmatpush.bf16.msrb.mxu2 %v3309_v61  ;;  %v3329_v60 = vor.u32 %v4301_v54, %v3328_v52  ;;  %v3269_v61 = vor.u32 %v4284_v55, %v3266_v56  ;;  %v4339_v52 = vld [vmem:[%s6451_s1 + $0x4d4] sm:$0xf0]  ;;  %v3451_v54 = vld [vmem:[%s6451_s1 + $0x458] sm:$0xf0]  ;;  %v4338_v55 = vld [vmem:[%s6451_s1 + $0x4d4] sm:$0xf] }
  0x73   : > { %1235 = vmatpush.bf16.msrb.mxu3 %v3373_v1  ;;  %972 = vmatmul.bf16.vlgmr.msra.gmra.mxu2 %v774_v59  ;;  %v3265_v59 = vor.u32 %v4285_v51, %v3264_v50  ;;  %v3333_v1 = vor.u32 %v4300_v57, %v3330_v58  ;;  %v3513_v50 = vld [vmem:[%s6451_s1 + $0x4d0] sm:$0xf]  ;;  %v3526_v51 = vor.u32 %v4340_v43, %v3523_v44  ;;  %v3515_v56 = vld [vmem:[%s6451_s1 + $0x4d8] sm:$0xf0]  ;;  %v4317_v19 = vld [vmem:[%s6451_s1 + $0x424] sm:$0xf0] }
  0x74   : > { %985 = vmatmul.bf16.vlgmr.msra.gmra.mxu3 %v775_v5  ;;  %v4298_v5 = vld [vmem:[%s6451_s1 + $0x394] sm:$0xf]  ;;  %v3514_v58 = vor.u32 %v4339_v52, %v3513_v50  ;;  %v4333_v21 = vld [vmem:[%s6451_s1 + $0x4a4] sm:$0xf0]  ;;  %v3409_v43 = vld [vmem:[%s6451_s1 + $0x400] sm:$0xf] }
  0x75   : > { %1197 = vmatpush.bf16.msrb.mxu0 %v3297_v9  ;;  %v3248_v9 = vld [vmem:[%s6451_s1 + $0x300] sm:$0xf]  ;;  %v4330_v40 = vld [vmem:[%s6451_s1 + $0x494] sm:$0xf]  ;;  %v4313_v44 = vld [vmem:[%s6451_s1 + $0x404] sm:$0xf0] }
  0x76   : > { %1210 = vmatpush.bf16.msrb.mxu1 %v3361_v11  ;;  %1223 = vmatpush.bf16.msrb.mxu2 %v3301_v12  ;;  %v3321_v11 = vor.u32 %v4299_v2, %v3320_v0  ;;  %v3261_v12 = vor.u32 %v4282_v3, %v3258_v4  ;;  %v3443_v0 = vld [vmem:[%s6451_s1 + $0x448] sm:$0xf0]  ;;  %v1286_v38 = vld.sshfl [vmem:[#allocation1] sm:$0xff pattern:$0x73625140]  ;;  %s2758_s12 = sshll.u32 %s6417_s4, 1 }
  0x77   : > { %1236 = vmatpush.bf16.msrb.mxu3 %v3365_v15  ;;  %v3325_v15 = vor.u32 %v4298_v5, %v3322_v6  ;;  %v3507_v2 = vld [vmem:[%s6451_s1 + $0x4c8] sm:$0xf0]  ;;  %v3446_v5 = vor.u32 %v4320_v63, %v3443_v0  ;;  %v3433_v6 = vld [vmem:[%s6451_s1 + $0x430] sm:$0xf]  ;;  %v1290_v50 = vshll.u32 %v1286_v38, 16  ;;  %v1288_v63 = vshrl.u32 %v1286_v38, 16  ;;  %s206_s19 = scalar_lea.vmem %s6452_s2, %s2758_s12  ;;  %s215_s21 = scalar_lea.vmem %s6453_s3, %s2758_s12 }
  0x78   : > { %vm2593_vm1 = vcmask 1040384  }
  0x79   : > { %1198 = vmatpush.bf16.msrb.mxu0 %v3289_v22  ;;  %v3249_v22 = vor.u32 %v4281_v10, %v3248_v9  ;;  %v3497_v9 = vld [vmem:[%s6451_s1 + $0x4b0] sm:$0xf]  ;;  %v1292_v0 = vrot.slane %v1290_v50, 1 }
  0x7a   : > { %1211 = vmatpush.bf16.msrb.mxu1 %v3353_v26  ;;  %1224 = vmatpush.bf16.msrb.mxu2 %v3293_v27  ;;  %v3467_v26 = vld [vmem:[%s6451_s1 + $0x478] sm:$0xf0]  ;;  %v3313_v27 = vor.u32 %v4297_v13, %v3312_v8  ;;  %v4334_v13 = vld [vmem:[%s6451_s1 + $0x4b4] sm:$0xf] }
  0x7b   : > { %1237 = vmatpush.bf16.msrb.mxu3 %v3357_v30  ;;  %v4342_v30 = vld [vmem:[%s6451_s1 + $0x4f4] sm:$0xf]  ;;  %v3435_v8 = vld [vmem:[%s6451_s1 + $0x438] sm:$0xf0] }
  0x7c   : > { %v3534_v39 = vor.u32 %v4342_v30, %v3531_v31  ;;  %v4315_v30 = vld [vmem:[%s6451_s1 + $0x414] sm:$0xf0]  ;;  %v3426_v31 = vor.u32 %v4317_v19, %v3425_v16  ;;  %v4373_v16 = vld [vmem:[%s6451_s1 + $0x5e4] sm:$0xf0] }
  0x7d   : > { %1199 = vmatpush.bf16.msrb.mxu0 %v3281_v35  ;;  %v3470_v35 = vor.u32 %v4326_v24, %v3467_v26  ;;  %v3427_v24 = vld [vmem:[%s6451_s1 + $0x428] sm:$0xf0]  ;;  %v4332_v26 = vld [vmem:[%s6451_s1 + $0x4a4] sm:$0xf] }
  0x7e   : > { %1212 = vmatpush.bf16.msrb.mxu1 %v3345_v36  ;;  %1225 = vmatpush.bf16.msrb.mxu2 %v3285_v37  ;;  %v3457_v36 = vld [vmem:[%s6451_s1 + $0x460] sm:$0xf]  ;;  %v4325_v37 = vld [vmem:[%s6451_s1 + $0x464] sm:$0xf0] }
  0x7f   : > { %1238 = vmatpush.bf16.msrb.mxu3 %v3349_v41  ;;  %v4324_v41 = vld [vmem:[%s6451_s1 + $0x464] sm:$0xf]  ;;  %v3458_v45 = vor.u32 %v4325_v37, %v3457_v36  ;;  %v3430_v36 = vor.u32 %v4316_v23, %v3427_v24  ;;  %v3419_v37 = vld [vmem:[%s6451_s1 + $0x418] sm:$0xf0] }
  0x81   : > { %1200 = vmatpush.bf16.msrb.mxu0 %v3273_v47  ;;  %v3462_v47 = vor.u32 %v4324_v41, %v3459_v42  ;;  %v1287_v41 = vld.sshfl [vmem:[#allocation1 + $0x8] sm:$0xff pattern:$0x73625140]  ;;  %v3483_v42 = vld [vmem:[%s6451_s1 + $0x498] sm:$0xf0] }
  0x82   : > { %1213 = vmatpush.bf16.msrb.mxu1 %v3337_v48  ;;  %1226 = vmatpush.bf16.msrb.mxu2 %v3277_v49  ;;  %v3449_v48 = vld [vmem:[%s6451_s1 + $0x450] sm:$0xf]  ;;  %v4323_v49 = vld [vmem:[%s6451_s1 + $0x454] sm:$0xf0] }
  0x83   : > { %1239 = vmatpush.bf16.msrb.mxu3 %v3341_v53  ;;  %v4322_v53 = vld [vmem:[%s6451_s1 + $0x454] sm:$0xf]  ;;  %v3450_v57 = vor.u32 %v4323_v49, %v3449_v48  ;;  %v4312_v48 = vld [vmem:[%s6451_s1 + $0x404] sm:$0xf]  ;;  %v3411_v49 = vld [vmem:[%s6451_s1 + $0x408] sm:$0xf0] }
  0x85   : > { %1201 = vmatpush.bf16.msrb.mxu0 %v3265_v59  ;;  %v3454_v59 = vor.u32 %v4322_v53, %v3451_v54  ;;  %v4328_v53 = vld [vmem:[%s6451_s1 + $0x484] sm:$0xf]  ;;  %v3475_v54 = vld [vmem:[%s6451_s1 + $0x488] sm:$0xf0] }
  0x86   : > { %1214 = vmatpush.bf16.msrb.mxu1 %v3329_v60  ;;  %1227 = vmatpush.bf16.msrb.mxu2 %v3269_v61  ;;  %v4321_v60 = vld [vmem:[%s6451_s1 + $0x444] sm:$0xf0]  ;;  %v3505_v61 = vld [vmem:[%s6451_s1 + $0x4c0] sm:$0xf] }
  0x87   : > { %1240 = vmatpush.bf16.msrb.mxu3 %v3333_v1  ;;  %v4336_v1 = vld [vmem:[%s6451_s1 + $0x4c4] sm:$0xf]  ;;  %v3506_v4 = vor.u32 %v4337_v62, %v3505_v61  ;;  %v3628_v62 = vld [vmem:[%s6451_s1 + $0x578] sm:$0xf0] }
  0x88   : > { %v3510_v10 = vor.u32 %v4336_v1, %v3507_v2  ;;  %v3535_v61 = vld [vmem:[%s4891_s28 + $0x4] sm:$0xa]  ;;  %v3414_v2 = vor.u32 %v4312_v48, %v3411_v49 }
  0x89   : > { %1202 = vmatpush.bf16.msrb.mxu0 %v3257_v7  ;;  %v4319_v7 = vld [vmem:[%s6451_s1 + $0x434] sm:$0xf0]  ;;  %1551 = vst [vmem:[#allocation1] ss:$4 sm:$0xff] %v3535_v61 }
  0x8a   : > { %1215 = vmatpush.bf16.msrb.mxu1 %v3321_v11  ;;  %1228 = vmatpush.bf16.msrb.mxu2 %v3261_v12  ;;  %v4335_v11 = vld [vmem:[%s6451_s1 + $0x4b4] sm:$0xf0]  ;;  %v4318_v12 = vld [vmem:[%s6451_s1 + $0x434] sm:$0xf] }
  0x8b   : > { %1241 = vmatpush.bf16.msrb.mxu3 %v3325_v15  ;;  %v3434_v15 = vor.u32 %v4319_v7, %v3433_v6  ;;  %v3498_v17 = vor.u32 %v4335_v11, %v3497_v9  ;;  %v3438_v18 = vor.u32 %v4318_v12, %v3435_v8  ;;  %v3478_v7 = vor.u32 %v4328_v53, %v3475_v54  ;;  %v3618_v12 = vld [vmem:[%s6451_s1 + $0x560] sm:$0xf]  ;;  %v4357_v8 = vld [vmem:[%s6451_s1 + $0x564] sm:$0xf0]  ;;  %v3658_v53 = vld [vmem:[%s6451_s1 + $0x5b0] sm:$0xf] }
  0x8d   : > { %1203 = vmatpush.bf16.msrb.mxu0 %v3249_v22  ;;  %v3502_v22 = vor.u32 %v4334_v13, %v3499_v14  ;;  %v3682_v13 = vld [vmem:[%s6451_s1 + $0x5e0] sm:$0xf] }
  0x8e   : > { %1216 = vmatpush.bf16.msrb.mxu1 %v3313_v27  ;;  %1229 = vmatpush.bf16.msrb.mxu2 %v3253_v29  ;;  %v3491_v27 = vld [vmem:[%s6451_s1 + $0x4a8] sm:$0xf0]  ;;  %v3417_v29 = vld [vmem:[%s6451_s1 + $0x410] sm:$0xf]  ;;  %v3683_v23 = vor.u32 %v4373_v16, %v3682_v13  ;;  %v4362_v16 = vld [vmem:[%s6451_s1 + $0x594] sm:$0xf] }
  0x8f   : > { %1242 = vmatpush.bf16.msrb.mxu3 %v3317_v32  ;;  %v3481_v32 = vld [vmem:[%s6451_s1 + $0x490] sm:$0xf] }
  0x90   : > { %1204 = vmatmul.bf16.vlgmr.msrb.gmra.mxu0 %v5295_v25 }
  0x91   : > { %1462 = vmatpush.bf16.msra.mxu0 %v3466_v33  ;;  %1217 = vmatmul.bf16.vlgmr.msrb.gmra.mxu1 %v5297_v28  ;;  %v4331_v33 = vld [vmem:[%s6451_s1 + $0x494] sm:$0xf0] }
  0x92   : > { %1475 = vmatpush.bf16.msra.mxu1 %v3530_v34  ;;  %1488 = vmatpush.bf16.msra.mxu2 %v3470_v35  ;;  %v4314_v34 = vld [vmem:[%s6451_s1 + $0x414] sm:$0xf]  ;;  %v3490_v35 = vor.u32 %v4333_v21, %v3489_v20  ;;  %v4372_v20 = vld [vmem:[%s6451_s1 + $0x5e4] sm:$0xf]  ;;  %v3684_v21 = vld [vmem:[%s6451_s1 + $0x5e8] sm:$0xf0] }
  0x93   : > { %1501 = vmatpush.bf16.msra.mxu3 %v3534_v39  ;;  %1230 = vmatmul.bf16.vlgmr.msrb.gmra.mxu2 %v5295_v25  ;;  %v3441_v25 = vld [vmem:[%s6451_s1 + $0x440] sm:$0xf]  ;;  %v3494_v39 = vor.u32 %v4332_v26, %v3491_v27  ;;  %v3422_v52 = vor.u32 %v4314_v34, %v3419_v37  ;;  %v3610_v26 = vld [vmem:[%s6451_s1 + $0x550] sm:$0xf]  ;;  %v4355_v27 = vld [vmem:[%s6451_s1 + $0x554] sm:$0xf0] }
  0x94   : > { %1243 = vmatmul.bf16.vlgmr.msrb.gmra.mxu3 %v5297_v28  ;;  %v3518_v28 = vor.u32 %v4338_v55, %v3515_v56  ;;  %v3442_v3 = vor.u32 %v4321_v60, %v3441_v25  ;;  %v1296_v55 = vshll.u32 %v1287_v41, 16  ;;  %v3486_v56 = vor.u32 %v4330_v40, %v3483_v42  ;;  %v4375_v25 = vld [vmem:[%s6451_s1 + $0x5f4] sm:$0xf0]  ;;  %v4358_v60 = vld [vmem:[%s6451_s1 + $0x574] sm:$0xf] }
  0x95   : > { %1463 = vmatpush.bf16.msra.mxu0 %v3458_v45  ;;  %v3418_v45 = vor.u32 %v4315_v30, %v3417_v29  ;;  %v3631_v11 = vor.u32 %v4358_v60, %v3628_v62  ;;  %v3674_v29 = vld [vmem:[%s6451_s1 + $0x5d0] sm:$0xf]  ;;  %v3687_v30 = vor.u32 %v4372_v20, %v3684_v21  ;;  %v4370_v34 = vld [vmem:[%s6451_s1 + $0x5d4] sm:$0xf]  ;;  %v4353_v40 = vld [vmem:[%s6451_s1 + $0x544] sm:$0xf0] }
  0x96   : > { %1476 = vmatpush.bf16.msra.mxu1 %v3522_v46  ;;  %1489 = vmatpush.bf16.msra.mxu2 %v3462_v47  ;;  %v3473_v46 = vld [vmem:[%s6451_s1 + $0x480] sm:$0xf]  ;;  %v4329_v47 = vld [vmem:[%s6451_s1 + $0x484] sm:$0xf0]  ;;  %v1298_v6 = vrot.slane %v1296_v55, 1 }
  0x97   : > { %1502 = vmatpush.bf16.msra.mxu3 %v3526_v51  ;;  %v3482_v51 = vor.u32 %v4331_v33, %v3481_v32  ;;  %v3474_v1 = vor.u32 %v4329_v47, %v3473_v46  ;;  %v4354_v32 = vld [vmem:[%s6451_s1 + $0x554] sm:$0xf]  ;;  %v3612_v33 = vld [vmem:[%s6451_s1 + $0x558] sm:$0xf0]  ;;  %v4368_v46 = vld [vmem:[%s6451_s1 + $0x5c4] sm:$0xf] }
  0x98   : > { %v3615_v38 = vor.u32 %v4354_v32, %v3612_v33  ;;  %v3668_v47 = vld [vmem:[%s6451_s1 + $0x5c8] sm:$0xf0]  ;;  %v4367_v55 = vld [vmem:[%s6451_s1 + $0x5b4] sm:$0xf0]  ;;  %v4349_v62 = vld [vmem:[%s6451_s1 + $0x524] sm:$0xf0] }
  0x99   : > { %1464 = vmatpush.bf16.msra.mxu0 %v3450_v57  ;;  %v3626_v57 = vld [vmem:[%s6451_s1 + $0x570] sm:$0xf]  ;;  %v3671_v54 = vor.u32 %v4368_v46, %v3668_v47  ;;  %v3659_v60 = vor.u32 %v4367_v55, %v3658_v53  ;;  %v3634_v21 = vld [vmem:[%s6451_s1 + $0x580] sm:$0xf]  ;;  %v4391_v32 = vld [vmem:[%s6451_s1 + $0x674] sm:$0xf0] }
  0x9a   : > { %1477 = vmatpush.bf16.msra.mxu1 %v3514_v58  ;;  %1490 = vmatpush.bf16.msra.mxu2 %v3454_v59  ;;  %v4359_v58 = vld [vmem:[%s6451_s1 + $0x574] sm:$0xf0]  ;;  %v3690_v59 = vld [vmem:[%s6451_s1 + $0x5f0] sm:$0xf]  ;;  %v3780_v53 = vld [vmem:[%s6451_s1 + $0x660] sm:$0xf] }
  0x9b   : > { %1503 = vmatpush.bf16.msra.mxu3 %v3518_v28  ;;  %v3410_v28 = vor.u32 %v4313_v44, %v3409_v43  ;;  %v3627_v9 = vor.u32 %v4359_v58, %v3626_v57  ;;  %v4369_v43 = vld [vmem:[%s6451_s1 + $0x5c4] sm:$0xf0]  ;;  %v4352_v44 = vld [vmem:[%s6451_s1 + $0x544] sm:$0xf]  ;;  %v3596_v57 = vld [vmem:[%s6451_s1 + $0x538] sm:$0xf0] }
  0x9c   : > { %v4366_v58 = vld [vmem:[%s6451_s1 + $0x5b4] sm:$0xf]  ;;  %v3844_v55 = vld [vmem:[%s6451_s1 + $0x6e0] sm:$0xf] }
  0x9d   : > { %1465 = vmatpush.bf16.msra.mxu0 %v3442_v3  ;;  %v4374_v3 = vld [vmem:[%s6451_s1 + $0x5f4] sm:$0xf] }
  0x9e   : > { %1478 = vmatpush.bf16.msra.mxu1 %v3506_v4  ;;  %1491 = vmatpush.bf16.msra.mxu2 %v3446_v5  ;;  %v3692_v4 = vld [vmem:[%s6451_s1 + $0x5f8] sm:$0xf0]  ;;  %v1294_v5 = vshrl.u32 %v1287_v41, 16  ;;  %v3666_v41 = vld [vmem:[%s6451_s1 + $0x5c0] sm:$0xf] }
  0x9f   : > { %1504 = vmatpush.bf16.msra.mxu3 %v3510_v10  ;;  %v3691_v10 = vor.u32 %v4375_v25, %v3690_v59  ;;  %v3695_v14 = vor.u32 %v4374_v3, %v3692_v4  ;;  %v3667_v49 = vor.u32 %v4369_v43, %v3666_v41  ;;  %v3660_v59 = vld [vmem:[%s6451_s1 + $0x5b8] sm:$0xf0]  ;;  %v3588_v3 = vld [vmem:[%s6451_s1 + $0x528] sm:$0xf0]  ;;  %v4364_v4 = vld [vmem:[%s6451_s1 + $0x5a4] sm:$0xf] }
  0xa0   : > { %v1299_v19 = vor.u32 %v1298_v6, %v1294_v5  ;;  %v3652_v5 = vld [vmem:[%s6451_s1 + $0x5a8] sm:$0xf0]  ;;  %v3790_v41 = vld [vmem:[%s6451_s1 + $0x678] sm:$0xf0] }
  0xa1   : > { %1466 = vmatpush.bf16.msra.mxu0 %v3434_v15  ;;  %v1293_v15 = vor.u32 %v1292_v0, %v1288_v63  ;;  %v3650_v63 = vld [vmem:[%s6451_s1 + $0x5a0] sm:$0xf]  ;;  %v3663_v0 = vor.u32 %v4366_v58, %v3660_v59  ;;  %v3655_v13 = vor.u32 %v4364_v4, %v3652_v5  ;;  %v4405_v58 = vld [vmem:[%s6451_s1 + $0x6e4] sm:$0xf0]  ;;  %v4388_v59 = vld [vmem:[%s6451_s1 + $0x664] sm:$0xf] }
  0xa2   : > { %1479 = vmatpush.bf16.msra.mxu1 %v3498_v17  ;;  %1492 = vmatpush.bf16.msra.mxu2 %v3438_v18  ;;  %v4356_v17 = vld [vmem:[%s6451_s1 + $0x564] sm:$0xf]  ;;  %v3620_v18 = vld [vmem:[%s6451_s1 + $0x568] sm:$0xf0]  ;;  %v3845_v4 = vor.u32 %v4405_v58, %v3844_v55 }
  0xa3   : > { %1505 = vmatpush.bf16.msra.mxu3 %v3502_v22  ;;  %v3619_v22 = vor.u32 %v4357_v8, %v3618_v12  ;;  %v3623_v24 = vor.u32 %v4356_v17, %v3620_v18  ;;  %v3642_v12 = vld [vmem:[%s6451_s1 + $0x590] sm:$0xf]  ;;  %v4363_v8 = vld [vmem:[%s6451_s1 + $0x594] sm:$0xf0]  ;;  %v3644_v17 = vld [vmem:[%s6451_s1 + $0x598] sm:$0xf0] }
  0xa4   : > { %v3570_v18 = vld [vmem:[%s6451_s1 + $0x500] sm:$0xf]  ;;  %v3647_v33 = vor.u32 %v4362_v16, %v3644_v17  ;;  %v4380_v55 = vld [vmem:[%s6451_s1 + $0x624] sm:$0xf] }
  0xa5   : > { %1467 = vmatpush.bf16.msra.mxu0 %v3426_v31  ;;  %v4371_v31 = vld [vmem:[%s6451_s1 + $0x5d4] sm:$0xf0]  ;;  %v4396_v58 = vld [vmem:[%s6451_s1 + $0x6a4] sm:$0xf] }
  0xa6   : > { %1480 = vmatpush.bf16.msra.mxu1 %v3490_v35  ;;  %1493 = vmatpush.bf16.msra.mxu2 %v3430_v36  ;;  %v3676_v35 = vld [vmem:[%s6451_s1 + $0x5d8] sm:$0xf0]  ;;  %v3611_v36 = vor.u32 %v4355_v27, %v3610_v26  ;;  %v3675_v37 = vor.u32 %v4371_v31, %v3674_v29  ;;  %v3643_v26 = vor.u32 %v4363_v8, %v3642_v12  ;;  %v4360_v29 = vld [vmem:[%s6451_s1 + $0x584] sm:$0xf]  ;;  %v3788_v31 = vld [vmem:[%s6451_s1 + $0x670] sm:$0xf] }
  0xa7   : > { %1506 = vmatpush.bf16.msra.mxu3 %v3494_v39  ;;  %v3602_v39 = vld [vmem:[%s6451_s1 + $0x540] sm:$0xf]  ;;  %v3679_v42 = vor.u32 %v4370_v34, %v3676_v35  ;;  %v3852_v34 = vld [vmem:[%s6451_s1 + $0x6f0] sm:$0xf]  ;;  %v4407_v35 = vld [vmem:[%s6451_s1 + $0x6f4] sm:$0xf0]  ;;  %v3789_v47 = vor.u32 %v4391_v32, %v3788_v31 }
  0xa8   : > { %v3603_v48 = vor.u32 %v4353_v40, %v3602_v39  ;;  %v4390_v40 = vld [vmem:[%s6451_s1 + $0x674] sm:$0xf]  ;;  %v3774_v8 = vld [vmem:[%s6451_s1 + $0x658] sm:$0xf0] }
  0xa9   : > { %1468 = vmatpush.bf16.msra.mxu0 %v3418_v45  ;;  %v3604_v45 = vld [vmem:[%s6451_s1 + $0x548] sm:$0xf0]  ;;  %v4386_v12 = vld [vmem:[%s6451_s1 + $0x654] sm:$0xf] }
  0xaa   : > { %1481 = vmatpush.bf16.msra.mxu1 %v3482_v51  ;;  %1494 = vmatpush.bf16.msra.mxu2 %v3422_v52  ;;  %v3607_v50 = vor.u32 %v4352_v44, %v3604_v45  ;;  %v3594_v51 = vld [vmem:[%s6451_s1 + $0x530] sm:$0xf]  ;;  %v4351_v52 = vld [vmem:[%s6451_s1 + $0x534] sm:$0xf0]  ;;  %v4406_v44 = vld [vmem:[%s6451_s1 + $0x6f4] sm:$0xf] }
  0xab   : > { %1507 = vmatpush.bf16.msra.mxu3 %v3486_v56  ;;  %v4350_v56 = vld [vmem:[%s6451_s1 + $0x534] sm:$0xf]  ;;  %v3595_v25 = vor.u32 %v4351_v52, %v3594_v51  ;;  %v3854_v45 = vld [vmem:[%s6451_s1 + $0x6f8] sm:$0xf0]  ;;  %v3853_v51 = vor.u32 %v4407_v35, %v3852_v34  ;;  %v3793_v52 = vor.u32 %v4390_v40, %v3790_v41  ;;  %v3756_v35 = vld [vmem:[%s6451_s1 + $0x630] sm:$0xf] }
  0xac   : > { %v3599_v61 = vor.u32 %v4350_v56, %v3596_v57  ;;  %v3857_v56 = vor.u32 %v4406_v44, %v3854_v45  ;;  %v4399_v41 = vld [vmem:[%s6451_s1 + $0x6b4] sm:$0xf0]  ;;  %v4398_v44 = vld [vmem:[%s6451_s1 + $0x6b4] sm:$0xf]  ;;  %v3822_v45 = vld [vmem:[%s6451_s1 + $0x6b8] sm:$0xf0] }
  0xad   : > { %1469 = vmatpush.bf16.msra.mxu0 %v3410_v28  ;;  %v3586_v28 = vld [vmem:[%s6451_s1 + $0x520] sm:$0xf] }
  0xae   : > { %1482 = vmatpush.bf16.msra.mxu1 %v3474_v1  ;;  %1495 = vmatpush.bf16.msra.mxu2 %v3414_v2  ;;  %v4365_v1 = vld [vmem:[%s6451_s1 + $0x5a4] sm:$0xf0]  ;;  %v4348_v2 = vld [vmem:[%s6451_s1 + $0x524] sm:$0xf]  ;;  %v3587_v6 = vor.u32 %v4349_v62, %v3586_v28  ;;  %v3772_v62 = vld [vmem:[%s6451_s1 + $0x650] sm:$0xf] }
  0xaf   : > { %1508 = vmatpush.bf16.msra.mxu3 %v3478_v7  ;;  %v3578_v7 = vld [vmem:[%s6451_s1 + $0x510] sm:$0xf] }
  0xb0   : > { %1470 = vmatmul.bf16.vlgmr.msra.gmra.mxu0 %v1293_v15 }
  0xb1   : > { %1720 = vmatpush.bf16.msrb.mxu0 %v3627_v9  ;;  %1483 = vmatmul.bf16.vlgmr.msra.gmra.mxu1 %v1299_v19  ;;  %v3651_v9 = vor.u32 %v4365_v1, %v3650_v63  ;;  %v4387_v1 = vld [vmem:[%s6451_s1 + $0x654] sm:$0xf0] }
  0xb2   : > { %1733 = vmatpush.bf16.msrb.mxu1 %v3691_v10  ;;  %1746 = vmatpush.bf16.msrb.mxu2 %v3631_v11  ;;  %v3591_v10 = vor.u32 %v4348_v2, %v3588_v3  ;;  %v4347_v11 = vld [vmem:[%s6451_s1 + $0x514] sm:$0xf0]  ;;  %v3836_v2 = vld [vmem:[%s6451_s1 + $0x6d0] sm:$0xf]  ;;  %v3773_v16 = vor.u32 %v4387_v1, %v3772_v62 }
  0xb3   : > { %1759 = vmatpush.bf16.msrb.mxu3 %v3695_v14  ;;  %1496 = vmatmul.bf16.vlgmr.msra.gmra.mxu2 %v1293_v15  ;;  %v4346_v14 = vld [vmem:[%s6451_s1 + $0x514] sm:$0xf]  ;;  %v3580_v15 = vld [vmem:[%s6451_s1 + $0x518] sm:$0xf0]  ;;  %v3579_v20 = vor.u32 %v4347_v11, %v3578_v7  ;;  %v4403_v3 = vld [vmem:[%s6451_s1 + $0x6d4] sm:$0xf0] }
  0xb4   : > { %1509 = vmatmul.bf16.vlgmr.msra.gmra.mxu3 %v1299_v19  ;;  %v4345_v19 = vld [vmem:[%s6451_s1 + $0x504] sm:$0xf0]  ;;  %v3583_v27 = vor.u32 %v4346_v14, %v3580_v15  ;;  %v4402_v14 = vld [vmem:[%s6451_s1 + $0x6d4] sm:$0xf]  ;;  %v3838_v15 = vld [vmem:[%s6451_s1 + $0x6d8] sm:$0xf0]  ;;  %v3837_v17 = vor.u32 %v4403_v3, %v3836_v2 }
  0xb5   : > { %1721 = vmatpush.bf16.msrb.mxu0 %v3619_v22  ;;  %v4361_v22 = vld [vmem:[%s6451_s1 + $0x584] sm:$0xf0]  ;;  %v3571_v39 = vor.u32 %v4345_v19, %v3570_v18  ;;  %v3777_v18 = vor.u32 %v4386_v12, %v3774_v8  ;;  %v3764_v19 = vld [vmem:[%s6451_s1 + $0x640] sm:$0xf]  ;;  %v3804_v1 = vld [vmem:[%s6451_s1 + $0x690] sm:$0xf] }
  0xb6   : > { %1734 = vmatpush.bf16.msrb.mxu1 %v3683_v23  ;;  %1747 = vmatpush.bf16.msrb.mxu2 %v3623_v24  ;;  %v4344_v23 = vld [vmem:[%s6451_s1 + $0x504] sm:$0xf]  ;;  %v3572_v24 = vld [vmem:[%s6451_s1 + $0x508] sm:$0xf0]  ;;  %v4394_v12 = vld [vmem:[%s6451_s1 + $0x694] sm:$0xf] }
  0xb7   : > { %1760 = vmatpush.bf16.msrb.mxu3 %v3687_v30  ;;  %v3636_v30 = vld [vmem:[%s6451_s1 + $0x588] sm:$0xf0]  ;;  %v3575_v43 = vor.u32 %v4344_v23, %v3572_v24  ;;  %v4401_v24 = vld [vmem:[%s6451_s1 + $0x6c4] sm:$0xf0]  ;;  %v3806_v8 = vld [vmem:[%s6451_s1 + $0x698] sm:$0xf0] }
  0xb8   : > { %v3639_v46 = vor.u32 %v4360_v29, %v3636_v30  ;;  %v4400_v29 = vld [vmem:[%s6451_s1 + $0x6c4] sm:$0xf]  ;;  %v3830_v30 = vld [vmem:[%s6451_s1 + $0x6c8] sm:$0xf0] }
  0xb9   : > { %1722 = vmatpush.bf16.msrb.mxu0 %v3611_v36  ;;  %v1552_v36 = vld.sshfl [vmem:[#allocation1] sm:$0xff pattern:$0x73625140]  ;;  %v3833_v40 = vor.u32 %v4400_v29, %v3830_v30  ;;  %v3949_v29 = vld [vmem:[%s6451_s1 + $0x770] sm:$0xf] }
  0xba   : > { %1735 = vmatpush.bf16.msrb.mxu1 %v3675_v37  ;;  %1748 = vmatpush.bf16.msrb.mxu2 %v3615_v38  ;;  %v1554_v37 = vld.sshfl [vmem:[#allocation1 + $0x8] sm:$0xff pattern:$0x73625140]  ;;  %v4423_v30 = vld [vmem:[%s6451_s1 + $0x774] sm:$0xf0] }
  0xbb   : > { %1761 = vmatpush.bf16.msrb.mxu3 %v3679_v42  ;;  %v3697_v38 = vld [vmem:[%s4891_s28 + $0x8] sm:$0x5]  ;;  %v3635_v42 = vor.u32 %v4361_v22, %v3634_v21  ;;  %v3828_v21 = vld [vmem:[%s6451_s1 + $0x6c0] sm:$0xf]  ;;  %v3841_v22 = vor.u32 %v4402_v14, %v3838_v15 }
  0xbc   : > { %1813 = vst [vmem:[#allocation1] ss:$4 sm:$0xff] %v3697_v38  ;;  %v473_v57 = vpop.f32.mrf.mxu0  ;;  %v3732_v15 = vld [vmem:[%s6451_s1 + $0x600] sm:$0xf] }
  0xbd   : > { %1723 = vmatpush.bf16.msrb.mxu0 %v3603_v48  ;;  %v1556_v48 = vrot.slane %v1552_v36, 1  ;;  %v486_v28 = vpop.f32.mrf.mxu1  ;;  %v4383_v36 = vld [vmem:[%s6451_s1 + $0x634] sm:$0xf0] }
  0xbe   : > { %1736 = vmatpush.bf16.msrb.mxu1 %v3667_v49  ;;  %1749 = vmatpush.bf16.msrb.mxu2 %v3607_v50  ;;  %v1557_v49 = vrot.slane %v1554_v37, 1  ;;  %v3858_v50 = vld [vmem:[%s4891_s28 + $0x8] sm:$0xf]  ;;  %v3820_v37 = vld [vmem:[%s6451_s1 + $0x6b0] sm:$0xf] }
  0xbf   : > { %1762 = vmatpush.bf16.msrb.mxu3 %v3671_v54  ;;  %v4389_v54 = vld [vmem:[%s6451_s1 + $0x664] sm:$0xf0] }
  0xc0   : > { %v3781_v63 = vor.u32 %v4389_v54, %v3780_v53  ;;  %v4397_v54 = vld [vmem:[%s6451_s1 + $0x6a4] sm:$0xf0] }
  0xc1   : > { %1724 = vmatpush.bf16.msrb.mxu0 %v3595_v25  ;;  %v3782_v25 = vld [vmem:[%s6451_s1 + $0x668] sm:$0xf0] }
  0xc2   : > { %1737 = vmatpush.bf16.msrb.mxu1 %v3659_v60  ;;  %1750 = vmatpush.bf16.msrb.mxu2 %v3599_v61  ;;  %v4404_v60 = vld [vmem:[%s6451_s1 + $0x6e4] sm:$0xf]  ;;  %v3846_v61 = vld [vmem:[%s6451_s1 + $0x6e8] sm:$0xf0]  ;;  %v3785_v5 = vor.u32 %v4388_v59, %v3782_v25 }
  0xc3   : > { %1763 = vmatpush.bf16.msrb.mxu3 %v3663_v0  ;;  %v5850_v0 = vadd.f32 %v486_v28, %v473_v57  ;;  %v5863_v7 = vld.sshfl [vmem:[#allocation1 + $0x8] sm:$0xff pattern:$0x73625140]  ;;  %v3849_v11 = vor.u32 %v4404_v60, %v3846_v61 }
  0xc4   : > { %v475_v23 = vpop.f32.mrf.mxu0  ;;  %v3814_v59 = vld [vmem:[%s6451_s1 + $0x6a8] sm:$0xf0] }
  0xc5   : > { %1725 = vmatpush.bf16.msrb.mxu0 %v3587_v6  ;;  %v5861_v6 = vld.sshfl [vmem:[#allocation1] sm:$0xff pattern:$0x73625140]  ;;  %v488_v31 = vpop.f32.mrf.mxu1  ;;  %v3734_v23 = vld [vmem:[%s6451_s1 + $0x608] sm:$0xf0] }
  0xc6   : > { %1738 = vmatpush.bf16.msrb.mxu1 %v3651_v9  ;;  %1751 = vmatpush.bf16.msrb.mxu2 %v3591_v10  ;;  %v499_v9 = vpop.f32.mrf.mxu2  ;;  %v512_v10 = vpop.f32.mrf.mxu3  ;;  %2067 = vst [vmem:[#allocation1] ss:$4 sm:$0xff] %v3858_v50  ;;  %v4381_v50 = vld [vmem:[%s6451_s1 + $0x624] sm:$0xf0]  ;;  %v4013_v31 = vld [vmem:[%s6451_s1 + $0x7f0] sm:$0xf] }
  0xc7   : > { %1764 = vmatpush.bf16.msrb.mxu3 %v3655_v13  ;;  %v5871_v13 = vadd.f32 %v512_v10, %v499_v9  ;;  %v4378_v9 = vld [vmem:[%s6451_s1 + $0x614] sm:$0xf]  ;;  %v3742_v10 = vld [vmem:[%s6451_s1 + $0x618] sm:$0xf0] }
  0xc9   : > { %1726 = vmatpush.bf16.msrb.mxu0 %v3579_v20  ;;  %v4385_v20 = vld [vmem:[%s6451_s1 + $0x644] sm:$0xf0] }
  0xca   : > { %1739 = vmatpush.bf16.msrb.mxu1 %v3643_v26  ;;  %1752 = vmatpush.bf16.msrb.mxu2 %v3583_v27  ;;  %v4384_v26 = vld [vmem:[%s6451_s1 + $0x644] sm:$0xf]  ;;  %v3766_v27 = vld [vmem:[%s6451_s1 + $0x648] sm:$0xf0]  ;;  %v3765_v32 = vor.u32 %v4385_v20, %v3764_v19  ;;  %v3796_v19 = vld [vmem:[%s6451_s1 + $0x680] sm:$0xf] }
  0xcb   : > { %1765 = vmatpush.bf16.msrb.mxu3 %v3647_v33  ;;  %v3829_v33 = vor.u32 %v4401_v24, %v3828_v21  ;;  %v3769_v34 = vor.u32 %v4384_v26, %v3766_v27  ;;  %v4393_v20 = vld [vmem:[%s6451_s1 + $0x684] sm:$0xf0]  ;;  %v4376_v21 = vld [vmem:[%s6451_s1 + $0x604] sm:$0xf]  ;;  %v3798_v26 = vld [vmem:[%s6451_s1 + $0x688] sm:$0xf0] }
  0xcc   : > { %v4392_v24 = vld [vmem:[%s6451_s1 + $0x684] sm:$0xf] }
  0xcd   : > { %1727 = vmatpush.bf16.msrb.mxu0 %v3571_v39  ;;  %v691_v53 = vpop.f32.mrf.mxu0 }
  0xce   : > { %1740 = vmatpush.bf16.msrb.mxu1 %v3635_v42  ;;  %1753 = vmatpush.bf16.msrb.mxu2 %v3575_v43  ;;  %v501_v38 = vpop.f32.mrf.mxu2  ;;  %v514_v39 = vpop.f32.mrf.mxu3  ;;  %v4382_v42 = vld [vmem:[%s6451_s1 + $0x634] sm:$0xf]  ;;  %v3758_v43 = vld [vmem:[%s6451_s1 + $0x638] sm:$0xf0]  ;;  %v692_v57 = vadd.f32 %v691_v53, %v5850_v0  ;;  %v4379_v0 = vld [vmem:[%s6451_s1 + $0x614] sm:$0xf0] }
  0xcf   : > { %1766 = vmatpush.bf16.msrb.mxu3 %v3639_v46  ;;  %v3757_v46 = vor.u32 %v4383_v36, %v3756_v35  ;;  %v3951_v35 = vld [vmem:[%s6451_s1 + $0x778] sm:$0xf0]  ;;  %v3737_v38 = vor.u32 %v4376_v21, %v3734_v23  ;;  %v4438_v39 = vld [vmem:[%s6451_s1 + $0x7f4] sm:$0xf]  ;;  %v4420_v53 = vld [vmem:[%s6451_s1 + $0x764] sm:$0xf] }
  0xd0   : > { %1728 = vmatmul.bf16.vlgmr.msrb.gmra.mxu0 %v1556_v48  ;;  %v704_v60 = vpop.f32.mrf.mxu1 }
  0xd1   : > { %1978 = vmatpush.bf16.msra.mxu0 %v3789_v47  ;;  %1741 = vmatmul.bf16.vlgmr.msrb.gmra.mxu1 %v1557_v49  ;;  %v3821_v47 = vor.u32 %v4399_v41, %v3820_v37  ;;  %v5952_v62 = vadd.f32 %v704_v60, %v692_v57  ;;  %v3797_v37 = vor.u32 %v4393_v20, %v3796_v19  ;;  %v4019_v41 = vld [vmem:[%s4891_s28 + $0x8] sm:$0xa]  ;;  %v3933_v57 = vld [vmem:[%s6451_s1 + $0x750] sm:$0xf]  ;;  %v3991_v19 = vld [vmem:[%s6451_s1 + $0x7c8] sm:$0xf0] }
  0xd2   : > { %1991 = vmatpush.bf16.msra.mxu1 %v3853_v51  ;;  %2004 = vmatpush.bf16.msra.mxu2 %v3793_v52  ;;  %v3812_v51 = vld [vmem:[%s6451_s1 + $0x6a0] sm:$0xf]  ;;  %v3825_v52 = vor.u32 %v4398_v44, %v3822_v45 }
  0xd3   : > { %2017 = vmatpush.bf16.msra.mxu3 %v3857_v56  ;;  %1754 = vmatmul.bf16.vlgmr.msrb.gmra.mxu2 %v1556_v48  ;;  %v3761_v48 = vor.u32 %v4382_v42, %v3758_v43  ;;  %v3750_v56 = vld [vmem:[%s6451_s1 + $0x628] sm:$0xf0]  ;;  %v3813_v61 = vor.u32 %v4397_v54, %v3812_v51  ;;  %v3801_v42 = vor.u32 %v4392_v24, %v3798_v26  ;;  %v3917_v26 = vld [vmem:[%s6451_s1 + $0x730] sm:$0xf] }
  0xd4   : > { %1767 = vmatmul.bf16.vlgmr.msrb.gmra.mxu3 %v1557_v49  ;;  %v3748_v49 = vld [vmem:[%s6451_s1 + $0x620] sm:$0xf]  ;;  %v3753_v28 = vor.u32 %v4380_v55, %v3750_v56  ;;  %v3950_v43 = vor.u32 %v4423_v30, %v3949_v29  ;;  %v3943_v54 = vld [vmem:[%s6451_s1 + $0x768] sm:$0xf0]  ;;  %v4436_v55 = vld [vmem:[%s6451_s1 + $0x7e4] sm:$0xf] }
  0xd5   : > { %1979 = vmatpush.bf16.msra.mxu0 %v3781_v63  ;;  %v3749_v25 = vor.u32 %v4381_v50, %v3748_v49  ;;  %v3740_v63 = vld [vmem:[%s6451_s1 + $0x610] sm:$0xf]  ;;  %v693_v27 = vpop.f32.mrf.mxu0  ;;  %v4421_v49 = vld [vmem:[%s6451_s1 + $0x764] sm:$0xf0]  ;;  %v4005_v50 = vld [vmem:[%s6451_s1 + $0x7e0] sm:$0xf] }
  0xd6   : > { %1992 = vmatpush.bf16.msra.mxu1 %v3845_v4  ;;  %2005 = vmatpush.bf16.msra.mxu2 %v3785_v5  ;;  %v717_v2 = vpop.f32.mrf.mxu2  ;;  %v3817_v4 = vor.u32 %v4396_v58, %v3814_v59  ;;  %v4395_v5 = vld [vmem:[%s6451_s1 + $0x694] sm:$0xf0]  ;;  %v3741_v14 = vor.u32 %v4379_v0, %v3740_v63  ;;  %v4007_v56 = vld [vmem:[%s6451_s1 + $0x7e8] sm:$0xf0]  ;;  %v3997_v63 = vld [vmem:[%s6451_s1 + $0x7d0] sm:$0xf] }
  0xd7   : > { %2018 = vmatpush.bf16.msra.mxu3 %v3849_v11  ;;  %v730_v3 = vpop.f32.mrf.mxu3  ;;  %v718_v11 = vadd.f32 %v717_v2, %v5871_v13  ;;  %v3805_v13 = vor.u32 %v4395_v5, %v3804_v1  ;;  %v6057_v59 = vld.sshfl [vmem:[#allocation1] sm:$0xff pattern:$0x73625140]  ;;  %v4010_v0 = vor.u32 %v4436_v55, %v4007_v56  ;;  %v4435_v1 = vld [vmem:[%s6451_s1 + $0x7d4] sm:$0xf0] }
  0xd8   : > { %v706_v36 = vpop.f32.mrf.mxu1  ;;  %v4418_v2 = vld [vmem:[%s6451_s1 + $0x754] sm:$0xf]  ;;  %v3999_v5 = vld [vmem:[%s6451_s1 + $0x7d8] sm:$0xf0]  ;;  %v4415_v27 = vld [vmem:[%s6451_s1 + $0x734] sm:$0xf0] }
  0xd9   : > { %1980 = vmatpush.bf16.msra.mxu0 %v3773_v16  ;;  %v4377_v16 = vld [vmem:[%s6451_s1 + $0x604] sm:$0xf0]  ;;  %v3981_v29 = vld [vmem:[%s6451_s1 + $0x7b0] sm:$0xf]  ;;  %v3983_v36 = vld [vmem:[%s6451_s1 + $0x7b8] sm:$0xf0] }
  0xda   : > { %1993 = vmatpush.bf16.msra.mxu1 %v3837_v17  ;;  %2006 = vmatpush.bf16.msra.mxu2 %v3777_v18  ;;  %v5985_v17 = vadd.f32 %v730_v3, %v718_v11  ;;  %v3745_v18 = vor.u32 %v4378_v9, %v3742_v10  ;;  %v3935_v3 = vld [vmem:[%s6451_s1 + $0x758] sm:$0xf0]  ;;  %v3998_v10 = vor.u32 %v4435_v1, %v3997_v63  ;;  %v4410_v63 = vld [vmem:[%s6451_s1 + $0x714] sm:$0xf] }
  0xdb   : > { %2019 = vmatpush.bf16.msra.mxu3 %v3841_v22  ;;  %v3809_v22 = vor.u32 %v4394_v12, %v3806_v8  ;;  %v3938_v11 = vor.u32 %v4418_v2, %v3935_v3  ;;  %v4417_v12 = vld [vmem:[%s6451_s1 + $0x744] sm:$0xf0]  ;;  %v3989_v8 = vld [vmem:[%s6451_s1 + $0x7c0] sm:$0xf]  ;;  %v4426_v1 = vld [vmem:[%s6451_s1 + $0x794] sm:$0xf] }
  0xdc   : > { %v3967_v2 = vld [vmem:[%s6451_s1 + $0x798] sm:$0xf0]  ;;  %v4409_v3 = vld [vmem:[%s6451_s1 + $0x704] sm:$0xf0] }
  0xdd   : > { %1981 = vmatpush.bf16.msra.mxu0 %v3765_v32  ;;  %v3733_v32 = vor.u32 %v4377_v16, %v3732_v15  ;;  %v4416_v15 = vld [vmem:[%s6451_s1 + $0x744] sm:$0xf]  ;;  %v3927_v16 = vld [vmem:[%s6451_s1 + $0x748] sm:$0xf0] }
  0xde   : > { %1994 = vmatpush.bf16.msra.mxu1 %v3829_v33  ;;  %2007 = vmatpush.bf16.msra.mxu2 %v3769_v34  ;;  %v4439_v33 = vld [vmem:[%s6451_s1 + $0x7f4] sm:$0xf0]  ;;  %v4422_v34 = vld [vmem:[%s6451_s1 + $0x774] sm:$0xf]  ;;  %v719_v44 = vpop.f32.mrf.mxu2  ;;  %v3930_v24 = vor.u32 %v4416_v15, %v3927_v16  ;;  %v4424_v15 = vld [vmem:[%s6451_s1 + $0x784] sm:$0xf] }
  0xdf   : > { %2020 = vmatpush.bf16.msra.mxu3 %v3833_v40  ;;  %v4015_v40 = vld [vmem:[%s6451_s1 + $0x7f8] sm:$0xf0]  ;;  %v732_v45 = vpop.f32.mrf.mxu3  ;;  %v4429_v44 = vld [vmem:[%s6451_s1 + $0x7a4] sm:$0xf0]  ;;  %v3959_v16 = vld [vmem:[%s6451_s1 + $0x788] sm:$0xf0] }
  0xe0   : > { %v4018_v51 = vor.u32 %v4438_v39, %v4015_v40  ;;  %v3909_v40 = vld [vmem:[%s6451_s1 + $0x720] sm:$0xf]  ;;  %v4412_v45 = vld [vmem:[%s6451_s1 + $0x724] sm:$0xf] }
  0xe1   : > { %1982 = vmatpush.bf16.msra.mxu0 %v3757_v46  ;;  %v4014_v46 = vor.u32 %v4439_v33, %v4013_v31  ;;  %v4431_v31 = vld [vmem:[%s6451_s1 + $0x7b4] sm:$0xf0]  ;;  %v3919_v33 = vld [vmem:[%s6451_s1 + $0x738] sm:$0xf0] }
  0xe2   : > { %1995 = vmatpush.bf16.msra.mxu1 %v3821_v47  ;;  %2008 = vmatpush.bf16.msra.mxu2 %v3761_v48  ;;  %v3954_v47 = vor.u32 %v4422_v34, %v3951_v35  ;;  %v3941_v48 = vld [vmem:[%s6451_s1 + $0x760] sm:$0xf]  ;;  %v4430_v35 = vld [vmem:[%s6451_s1 + $0x7b4] sm:$0xf] }
  0xe3   : > { %2021 = vmatpush.bf16.msra.mxu3 %v3825_v52  ;;  %v4437_v52 = vld [vmem:[%s6451_s1 + $0x7e4] sm:$0xf0]  ;;  %v3942_v58 = vor.u32 %v4421_v49, %v3941_v48  ;;  %v4428_v48 = vld [vmem:[%s6451_s1 + $0x7a4] sm:$0xf]  ;;  %v3975_v49 = vld [vmem:[%s6451_s1 + $0x7a8] sm:$0xf0] }
  0xe4   : > { %v4006_v60 = vor.u32 %v4437_v52, %v4005_v50 }
  0xe5   : > { %1983 = vmatpush.bf16.msra.mxu0 %v3749_v25  ;;  %v6059_v25 = vld.sshfl [vmem:[#allocation1 + $0x8] sm:$0xff pattern:$0x73625140] }
  0xe6   : > { %1996 = vmatpush.bf16.msra.mxu1 %v3813_v61  ;;  %2009 = vmatpush.bf16.msra.mxu2 %v3753_v28  ;;  %v3946_v61 = vor.u32 %v4420_v53, %v3943_v54  ;;  %v4419_v28 = vld [vmem:[%s6451_s1 + $0x754] sm:$0xf0]  ;;  %2333 = vst [vmem:[#allocation1] ss:$4 sm:$0xff] %v4019_v41  ;;  %v3973_v41 = vld [vmem:[%s6451_s1 + $0x7a0] sm:$0xf] }
  0xe7   : > { %2022 = vmatpush.bf16.msra.mxu3 %v3817_v4  ;;  %v4434_v4 = vld [vmem:[%s6451_s1 + $0x7d4] sm:$0xf]  ;;  %v3934_v9 = vor.u32 %v4419_v28, %v3933_v57  ;;  %v3901_v53 = vld [vmem:[%s6451_s1 + $0x710] sm:$0xf]  ;;  %v3974_v55 = vor.u32 %v4429_v44, %v3973_v41  ;;  %v4411_v57 = vld [vmem:[%s6451_s1 + $0x714] sm:$0xf0]  ;;  %v3978_v28 = vor.u32 %v4428_v48, %v3975_v49 }
  0xe8   : > { %v4166_v41 = vld [vmem:[%s6451_s1 + $0x8e0] sm:$0xf]  ;;  %v4452_v44 = vld [vmem:[%s6451_s1 + $0x864] sm:$0xf]  ;;  %v4168_v48 = vld [vmem:[%s6451_s1 + $0x8e8] sm:$0xf0] }
  0xe9   : > { %1984 = vmatpush.bf16.msra.mxu0 %v3741_v14  ;;  %v4433_v14 = vld [vmem:[%s6451_s1 + $0x7c4] sm:$0xf0] }
  0xea   : > { %1997 = vmatpush.bf16.msra.mxu1 %v3805_v13  ;;  %2010 = vmatpush.bf16.msra.mxu2 %v3745_v18  ;;  %v4432_v18 = vld [vmem:[%s6451_s1 + $0x7c4] sm:$0xf]  ;;  %v3990_v23 = vor.u32 %v4433_v14, %v3989_v8  ;;  %v3895_v8 = vld [vmem:[%s6451_s1 + $0x708] sm:$0xf0]  ;;  %v3970_v14 = vor.u32 %v4426_v1, %v3967_v2  ;;  %v4086_v2 = vld [vmem:[%s6451_s1 + $0x840] sm:$0xf] }
  0xeb   : > { %2023 = vmatpush.bf16.msra.mxu3 %v3809_v22  ;;  %v3994_v30 = vor.u32 %v4432_v18, %v3991_v19  ;;  %v4455_v19 = vld [vmem:[%s6451_s1 + $0x874] sm:$0xf0] }
  0xed   : > { %1985 = vmatpush.bf16.msra.mxu0 %v3733_v32  ;;  %v947_v13 = vpop.f32.mrf.mxu0  ;;  %v4414_v32 = vld [vmem:[%s6451_s1 + $0x734] sm:$0xf] }
  0xee   : > { %1998 = vmatpush.bf16.msra.mxu1 %v3797_v37  ;;  %2011 = vmatpush.bf16.msra.mxu2 %v3737_v38  ;;  %v960_v20 = vpop.f32.mrf.mxu1  ;;  %v3918_v37 = vor.u32 %v4415_v27, %v3917_v26  ;;  %v3982_v38 = vor.u32 %v4431_v31, %v3981_v29  ;;  %v3922_v39 = vor.u32 %v4414_v32, %v3919_v33  ;;  %v4112_v26 = vld [vmem:[%s6451_s1 + $0x878] sm:$0xf0]  ;;  %v2070_v27 = vshrl.u32 %v6057_v59, 16  ;;  %v4470_v32 = vld [vmem:[%s6451_s1 + $0x8f4] sm:$0xf] }
  0xef   : > { %2024 = vmatpush.bf16.msra.mxu3 %v3801_v42  ;;  %v961_v22 = vadd.f32 %v960_v20, %v947_v13  ;;  %v3986_v42 = vor.u32 %v4430_v35, %v3983_v36  ;;  %v4110_v13 = vld [vmem:[%s6451_s1 + $0x870] sm:$0xf]  ;;  %v4176_v33 = vld [vmem:[%s6451_s1 + $0x8f8] sm:$0xf0]  ;;  %v2076_v35 = vshrl.u32 %v6059_v25, 16 }
  0xf0   : > { %1986 = vmatmul.bf16.vlgmr.msra.gmra.mxu0 %v5861_v6  ;;  %v4174_v20 = vld [vmem:[%s6451_s1 + $0x8f0] sm:$0xf] }
  0xf1   : > { %2244 = vmatpush.bf16.msrb.mxu0 %v3950_v43  ;;  %1999 = vmatmul.bf16.vlgmr.msra.gmra.mxu1 %v5863_v7  ;;  %v6129_v34 = vadd.f32 %v961_v22, %v5952_v62  ;;  %v4413_v62 = vld [vmem:[%s6451_s1 + $0x724] sm:$0xf0] }
  0xf2   : > { %2257 = vmatpush.bf16.msrb.mxu1 %v4014_v46  ;;  %2270 = vmatpush.bf16.msrb.mxu2 %v3954_v47  ;;  %v3911_v46 = vld [vmem:[%s6451_s1 + $0x728] sm:$0xf0]  ;;  %v3910_v52 = vor.u32 %v4413_v62, %v3909_v40  ;;  %v4102_v40 = vld [vmem:[%s6451_s1 + $0x860] sm:$0xf]  ;;  %v4453_v62 = vld [vmem:[%s6451_s1 + $0x864] sm:$0xf0] }
  0xf3   : > { %2283 = vmatpush.bf16.msrb.mxu3 %v4018_v51  ;;  %2012 = vmatmul.bf16.vlgmr.msra.gmra.mxu2 %v5861_v6  ;;  %v3925_v6 = vld [vmem:[%s6451_s1 + $0x740] sm:$0xf]  ;;  %v3914_v56 = vor.u32 %v4412_v45, %v3911_v46  ;;  %v4104_v45 = vld [vmem:[%s6451_s1 + $0x868] sm:$0xf0]  ;;  %v4103_v49 = vor.u32 %v4453_v62, %v4102_v40  ;;  %v4460_v40 = vld [vmem:[%s6451_s1 + $0x8a4] sm:$0xf] }
  0xf4   : > { %2025 = vmatmul.bf16.vlgmr.msra.gmra.mxu3 %v5863_v7  ;;  %v4002_v7 = vor.u32 %v4434_v4, %v3999_v5  ;;  %v3926_v21 = vor.u32 %v4417_v12, %v3925_v6  ;;  %v3902_v4 = vor.u32 %v4411_v57, %v3901_v53  ;;  %v3957_v5 = vld [vmem:[%s6451_s1 + $0x780] sm:$0xf]  ;;  %v4408_v12 = vld [vmem:[%s6451_s1 + $0x704] sm:$0xf]  ;;  %v4451_v53 = vld [vmem:[%s6451_s1 + $0x854] sm:$0xf0] }
  0xf5   : > { %2245 = vmatpush.bf16.msrb.mxu0 %v3942_v58  ;;  %v949_v50 = vpop.f32.mrf.mxu0  ;;  %v3965_v58 = vld [vmem:[%s6451_s1 + $0x790] sm:$0xf]  ;;  %v3898_v31 = vor.u32 %v4408_v12, %v3895_v8  ;;  %v4450_v57 = vld [vmem:[%s6451_s1 + $0x854] sm:$0xf]  ;;  %v4152_v12 = vld [vmem:[%s6451_s1 + $0x8c8] sm:$0xf0] }
  0xf6   : > { %2258 = vmatpush.bf16.msrb.mxu1 %v4006_v60  ;;  %2271 = vmatpush.bf16.msrb.mxu2 %v3946_v61  ;;  %v973_v43 = vpop.f32.mrf.mxu2  ;;  %v962_v54 = vpop.f32.mrf.mxu1  ;;  %v4427_v60 = vld [vmem:[%s6451_s1 + $0x794] sm:$0xf0]  ;;  %v4136_v62 = vld [vmem:[%s6451_s1 + $0x8a8] sm:$0xf0] }
  0xf7   : > { %2284 = vmatpush.bf16.msrb.mxu3 %v4010_v0  ;;  %v986_v47 = vpop.f32.mrf.mxu3  ;;  %v3903_v0 = vld [vmem:[%s6451_s1 + $0x718] sm:$0xf0]  ;;  %v4158_v54 = vld [vmem:[%s6451_s1 + $0x8d0] sm:$0xf] }
  0xf8   : > { %v987_v51 = vadd.f32 %v986_v47, %v973_v43  ;;  %v3906_v6 = vor.u32 %v4410_v63, %v3903_v0  ;;  %v4469_v43 = vld [vmem:[%s6451_s1 + $0x8e4] sm:$0xf0]  ;;  %v4468_v47 = vld [vmem:[%s6451_s1 + $0x8e4] sm:$0xf] }
  0xf9   : > { %2246 = vmatpush.bf16.msrb.mxu0 %v3934_v9  ;;  %v4425_v9 = vld [vmem:[%s6451_s1 + $0x784] sm:$0xf0]  ;;  %v4167_v50 = vor.u32 %v4469_v43, %v4166_v41 }
  0xfa   : > { %2259 = vmatpush.bf16.msrb.mxu1 %v3998_v10  ;;  %2272 = vmatpush.bf16.msrb.mxu2 %v3938_v11  ;;  %v6174_v61 = vadd.f32 %v987_v51, %v5985_v17  ;;  %v3893_v17 = vld [vmem:[%s6451_s1 + $0x700] sm:$0xf]  ;;  %v2072_v10 = vshll.u32 %v6057_v59, 16  ;;  %v3966_v11 = vor.u32 %v4427_v60, %v3965_v58  ;;  %v4107_v51 = vor.u32 %v4452_v44, %v4104_v45  ;;  %v4096_v58 = vld [vmem:[%s6451_s1 + $0x858] sm:$0xf0] }
  0xfb   : > { %2285 = vmatpush.bf16.msrb.mxu3 %v4002_v7  ;;  %v2078_v7 = vshll.u32 %v6059_v25, 16  ;;  %v4179_v25 = vor.u32 %v4470_v32, %v4176_v33  ;;  %v4466_v60 = vld [vmem:[%s6451_s1 + $0x8d4] sm:$0xf]  ;;  %v4099_v1 = vor.u32 %v4450_v57, %v4096_v58  ;;  %v4070_v32 = vld [vmem:[%s6451_s1 + $0x820] sm:$0xf] }
  0xfc   : > { %v2074_v29 = vrot.slane %v2072_v10, 1  ;;  %v4088_v10 = vld [vmem:[%s6451_s1 + $0x848] sm:$0xf0]  ;;  %v4134_v33 = vld [vmem:[%s6451_s1 + $0x8a0] sm:$0xf] }
  0xfd   : > { %2247 = vmatpush.bf16.msrb.mxu0 %v3926_v21  ;;  %v4471_v21 = vld [vmem:[%s6451_s1 + $0x8f4] sm:$0xf0]  ;;  %v2080_v36 = vrot.slane %v2078_v7, 1  ;;  %v4054_v58 = vld [vmem:[%s6451_s1 + $0x800] sm:$0xf] }
  0xfe   : > { %2260 = vmatpush.bf16.msrb.mxu1 %v3990_v23  ;;  %2273 = vmatpush.bf16.msrb.mxu2 %v3930_v24  ;;  %v975_v18 = vpop.f32.mrf.mxu2  ;;  %v3894_v23 = vor.u32 %v4409_v3, %v3893_v17  ;;  %v4454_v24 = vld [vmem:[%s6451_s1 + $0x874] sm:$0xf]  ;;  %v4175_v59 = vor.u32 %v4471_v21, %v4174_v20  ;;  %v4449_v17 = vld [vmem:[%s6451_s1 + $0x844] sm:$0xf0]  ;;  %v4150_v3 = vld [vmem:[%s6451_s1 + $0x8c0] sm:$0xf] }
  0xff   : > { %2286 = vmatpush.bf16.msrb.mxu3 %v3994_v30  ;;  %v988_v22 = vpop.f32.mrf.mxu3  ;;  %v3958_v30 = vor.u32 %v4425_v9, %v3957_v5  ;;  %v2081_v46 = vor.u32 %v2080_v36, %v2076_v35  ;;  %v4465_v5 = vld [vmem:[%s6451_s1 + $0x8c4] sm:$0xf0]  ;;  %v4448_v9 = vld [vmem:[%s6451_s1 + $0x844] sm:$0xf]  ;;  %v4087_v7 = vor.u32 %v4449_v17, %v4086_v2  ;;  %v4447_v18 = vld [vmem:[%s6451_s1 + $0x834] sm:$0xf0] }
 0x100   : > { %v4463_v21 = vld [vmem:[%s6451_s1 + $0x8b4] sm:$0xf0]  ;;  %v4446_v22 = vld [vmem:[%s6451_s1 + $0x834] sm:$0xf]  ;;  %v4056_v2 = vld [vmem:[%s6451_s1 + $0x808] sm:$0xf0] }
 0x101   : > { %2248 = vmatpush.bf16.msrb.mxu0 %v3918_v37  ;;  %v3962_v37 = vor.u32 %v4424_v15, %v3959_v16  ;;  %v4151_v15 = vor.u32 %v4465_v5, %v4150_v3  ;;  %v4091_v16 = vor.u32 %v4448_v9, %v4088_v10  ;;  %v4456_v3 = vld [vmem:[%s6451_s1 + $0x884] sm:$0xf] }
 0x102   : > { %2261 = vmatpush.bf16.msrb.mxu1 %v3982_v38  ;;  %2274 = vmatpush.bf16.msrb.mxu2 %v3922_v39  ;;  %v4111_v38 = vor.u32 %v4455_v19, %v4110_v13  ;;  %v4115_v39 = vor.u32 %v4454_v24, %v4112_v26  ;;  %v4078_v13 = vld [vmem:[%s6451_s1 + $0x830] sm:$0xf]  ;;  %v4462_v26 = vld [vmem:[%s6451_s1 + $0x8b4] sm:$0xf] }
 0x103   : > { %2287 = vmatpush.bf16.msrb.mxu3 %v3986_v42  ;;  %v2075_v42 = vor.u32 %v2074_v29, %v2070_v27  ;;  %v4142_v19 = vld [vmem:[%s6451_s1 + $0x8b0] sm:$0xf]  ;;  %v4144_v27 = vld [vmem:[%s6451_s1 + $0x8b8] sm:$0xf0]  ;;  %v4079_v29 = vor.u32 %v4447_v18, %v4078_v13 }
 0x104   : > { %v4147_v35 = vor.u32 %v4462_v26, %v4144_v27  ;;  %v2334_v10 = vld.sshfl [vmem:[#allocation1] sm:$0xff pattern:$0x73625140] }
 0x105   : > { %2249 = vmatpush.bf16.msrb.mxu0 %v3910_v52  ;;  %v4094_v52 = vld [vmem:[%s6451_s1 + $0x850] sm:$0xf] }
 0x106   : > { %2262 = vmatpush.bf16.msrb.mxu1 %v3974_v55  ;;  %2275 = vmatpush.bf16.msrb.mxu2 %v3914_v56  ;;  %v4171_v55 = vor.u32 %v4468_v47, %v4168_v48  ;;  %v4467_v56 = vld [vmem:[%s6451_s1 + $0x8d4] sm:$0xf0]  ;;  %v4095_v63 = vor.u32 %v4451_v53, %v4094_v52  ;;  %v4126_v48 = vld [vmem:[%s6451_s1 + $0x890] sm:$0xf]  ;;  %v4442_v52 = vld [vmem:[%s6451_s1 + $0x814] sm:$0xf] }
 0x107   : > { %2288 = vmatpush.bf16.msrb.mxu3 %v3978_v28  ;;  %v4160_v28 = vld [vmem:[%s6451_s1 + $0x8d8] sm:$0xf0]  ;;  %v4159_v0 = vor.u32 %v4467_v56, %v4158_v54  ;;  %v4443_v47 = vld [vmem:[%s6451_s1 + $0x814] sm:$0xf0]  ;;  %v4458_v54 = vld [vmem:[%s6451_s1 + $0x894] sm:$0xf] }
 0x108   : > { %v4064_v53 = vld [vmem:[%s6451_s1 + $0x818] sm:$0xf0] }
 0x109   : > { %2250 = vmatpush.bf16.msrb.mxu0 %v3902_v4  ;;  %v4163_v4 = vor.u32 %v4466_v60, %v4160_v28  ;;  %v4067_v57 = vor.u32 %v4442_v52, %v4064_v53  ;;  %v4441_v60 = vld [vmem:[%s6451_s1 + $0x804] sm:$0xf0]  ;;  %v4118_v28 = vld [vmem:[%s6451_s1 + $0x880] sm:$0xf] }
 0x10a   : > { %2263 = vmatpush.bf16.msrb.mxu1 %v3966_v11  ;;  %2276 = vmatpush.bf16.msrb.mxu2 %v3906_v6  ;;  %v4464_v6 = vld [vmem:[%s6451_s1 + $0x8c4] sm:$0xf]  ;;  %v4055_v9 = vor.u32 %v4441_v60, %v4054_v58 }
 0x10b   : > { %2289 = vmatpush.bf16.msrb.mxu3 %v3970_v14  ;;  %v4155_v20 = vor.u32 %v4464_v6, %v4152_v12  ;;  %v2336_v12 = vld.sshfl [vmem:[#allocation1 + $0x8] sm:$0xff pattern:$0x73625140] }
 0x10d   : > { %2251 = vmatpush.bf16.msrb.mxu0 %v3894_v23  ;;  %v1205_v11 = vpop.f32.mrf.mxu0  ;;  %v4080_v23 = vld [vmem:[%s6451_s1 + $0x838] sm:$0xf0] }
 0x10e   : > { %2264 = vmatpush.bf16.msrb.mxu1 %v3958_v30  ;;  %2277 = vmatpush.bf16.msrb.mxu2 %v3898_v31  ;;  %v1218_v8 = vpop.f32.mrf.mxu1  ;;  %v4143_v30 = vor.u32 %v4463_v21, %v4142_v19  ;;  %v4083_v31 = vor.u32 %v4446_v22, %v4080_v23 }
 0x10f   : > { %2290 = vmatpush.bf16.msrb.mxu3 %v3962_v37  ;;  %v1219_v14 = vadd.f32 %v1218_v8, %v1205_v11  ;;  %v4461_v37 = vld [vmem:[%s6451_s1 + $0x8a4] sm:$0xf0] }
 0x110   : > { %2252 = vmatmul.bf16.vlgmr.msrb.gmra.mxu0 %v2075_v42  ;;  %v4135_v44 = vor.u32 %v4461_v37, %v4134_v33 }
 0x111   : > { %2502 = vmatpush.bf16.msra.mxu0 %v4111_v38  ;;  %2265 = vmatmul.bf16.vlgmr.msrb.gmra.mxu1 %v2081_v46  ;;  %v6331_v24 = vadd.f32 %v1219_v14, %v6129_v34  ;;  %v4445_v34 = vld [vmem:[%s6451_s1 + $0x824] sm:$0xf0]  ;;  %v4444_v38 = vld [vmem:[%s6451_s1 + $0x824] sm:$0xf]  ;;  %v2339_v14 = vrot.slane %v2336_v12, 1 }
 0x112   : > { %2515 = vmatpush.bf16.msra.mxu1 %v4175_v59  ;;  %2528 = vmatpush.bf16.msra.mxu2 %v4115_v39  ;;  %v4072_v59 = vld [vmem:[%s6451_s1 + $0x828] sm:$0xf0] }
 0x113   : > { %2541 = vmatpush.bf16.msra.mxu3 %v4179_v25  ;;  %2278 = vmatmul.bf16.vlgmr.msrb.gmra.mxu2 %v2075_v42  ;;  %v4071_v42 = vor.u32 %v4445_v34, %v4070_v32  ;;  %v4075_v45 = vor.u32 %v4444_v38, %v4072_v59 }
 0x114   : > { %2291 = vmatmul.bf16.vlgmr.msrb.gmra.mxu3 %v2081_v46  ;;  %v4062_v46 = vld [vmem:[%s6451_s1 + $0x810] sm:$0xf] }
 0x115   : > { %2503 = vmatpush.bf16.msra.mxu0 %v4103_v49  ;;  %v1207_v41 = vpop.f32.mrf.mxu0 }
 0x116   : > { %2516 = vmatpush.bf16.msra.mxu1 %v4167_v50  ;;  %2529 = vmatpush.bf16.msra.mxu2 %v4107_v51  ;;  %v1231_v36 = vpop.f32.mrf.mxu2  ;;  %v1220_v43 = vpop.f32.mrf.mxu1  ;;  %v4139_v50 = vor.u32 %v4460_v40, %v4136_v62  ;;  %v4459_v51 = vld [vmem:[%s6451_s1 + $0x894] sm:$0xf0] }
 0x117   : > { %2542 = vmatpush.bf16.msra.mxu3 %v4171_v55  ;;  %v1244_v39 = vpop.f32.mrf.mxu3  ;;  %v4063_v55 = vor.u32 %v4443_v47, %v4062_v46  ;;  %v4127_v56 = vor.u32 %v4459_v51, %v4126_v48 }
 0x118   : > { %v1245_v25 = vadd.f32 %v1244_v39, %v1231_v36 }
 0x119   : > { %2504 = vmatpush.bf16.msra.mxu0 %v4095_v63 }
 0x11a   : > { %2517 = vmatpush.bf16.msra.mxu1 %v4159_v0  ;;  %2530 = vmatpush.bf16.msra.mxu2 %v4099_v1  ;;  %v1249_v49 = vadd.f32 %v1245_v25, %v6174_v61  ;;  %v4128_v61 = vld [vmem:[%s6451_s1 + $0x898] sm:$0xf0]  ;;  %v4457_v0 = vld [vmem:[%s6451_s1 + $0x884] sm:$0xf0]  ;;  %v4440_v1 = vld [vmem:[%s6451_s1 + $0x804] sm:$0xf] }
 0x11b   : > { %2543 = vmatpush.bf16.msra.mxu3 %v4163_v4  ;;  %v4131_v63 = vor.u32 %v4458_v54, %v4128_v61  ;;  %v4120_v4 = vld [vmem:[%s6451_s1 + $0x888] sm:$0xf0]  ;;  %v4119_v11 = vor.u32 %v4457_v0, %v4118_v28  ;;  %v4059_v6 = vor.u32 %v4440_v1, %v4056_v2 }
 0x11c   : > { %v4123_v8 = vor.u32 %v4456_v3, %v4120_v4 }
 0x11d   : > { %2505 = vmatpush.bf16.msra.mxu0 %v4087_v7  ;;  %v2338_v7 = vrot.slane %v2334_v10, 1 }
 0x11e   : > { %2518 = vmatpush.bf16.msra.mxu1 %v4151_v15  ;;  %2531 = vmatpush.bf16.msra.mxu2 %v4091_v16  ;;  %v1233_v17 = vpop.f32.mrf.mxu2 }
 0x11f   : > { %2544 = vmatpush.bf16.msra.mxu3 %v4155_v20  ;;  %v1246_v5 = vpop.f32.mrf.mxu3 }
 0x121   : > { %2506 = vmatpush.bf16.msra.mxu0 %v4079_v29 }
 0x122   : > { %2519 = vmatpush.bf16.msra.mxu1 %v4143_v30  ;;  %2532 = vmatpush.bf16.msra.mxu2 %v4083_v31 }
 0x123   : > { %2545 = vmatpush.bf16.msra.mxu3 %v4147_v35 }
 0x125   : > { %2507 = vmatpush.bf16.msra.mxu0 %v4071_v42 }
 0x126   : > { %2520 = vmatpush.bf16.msra.mxu1 %v4135_v44  ;;  %2533 = vmatpush.bf16.msra.mxu2 %v4075_v45 }
 0x127   : > { %2546 = vmatpush.bf16.msra.mxu3 %v4139_v50 }
 0x129   : > { %2508 = vmatpush.bf16.msra.mxu0 %v4063_v55 }
 0x12a   : > { %2521 = vmatpush.bf16.msra.mxu1 %v4127_v56  ;;  %2534 = vmatpush.bf16.msra.mxu2 %v4067_v57 }
 0x12b   : > { %2547 = vmatpush.bf16.msra.mxu3 %v4131_v63 }
 0x12d   : > { %2509 = vmatpush.bf16.msra.mxu0 %v4055_v9  ;;  %v1471_v15 = vpop.f32.mrf.mxu0 }
 0x12e   : > { %2522 = vmatpush.bf16.msra.mxu1 %v4119_v11  ;;  %2535 = vmatpush.bf16.msra.mxu2 %v4059_v6  ;;  %v1484_v16 = vpop.f32.mrf.mxu1 }
 0x12f   : > { %2548 = vmatpush.bf16.msra.mxu3 %v4123_v8  ;;  %v1485_v13 = vadd.f32 %v1484_v16, %v1471_v15 }
 0x130   : > { %2510 = vmatmul.bf16.vlgmr.msra.gmra.mxu0 %v2338_v7 }
 0x131   : > { %2523 = vmatmul.bf16.vlgmr.msra.gmra.mxu1 %v2339_v14  ;;  %2536 = vmatmul.bf16.vlgmr.msra.gmra.mxu2 %v2338_v7  ;;  %v1514_v18 = vadd.f32 %v1485_v13, %v6331_v24 }
 0x132   : > { %2549 = vmatmul.bf16.vlgmr.msra.gmra.mxu3 %v2339_v14 }
 0x135   : > { %v1473_v21 = vpop.f32.mrf.mxu0 }
 0x136   : > { %v1497_v19 = vpop.f32.mrf.mxu2  ;;  %v1486_v23 = vpop.f32.mrf.mxu1 }
 0x137   : > { %v1510_v20 = vpop.f32.mrf.mxu3 }
 0x138   : > { %v1511_v22 = vadd.f32 %v1510_v20, %v1497_v19 }
 0x13a   : > { %v1515_v26 = vadd.f32 %v1511_v22, %v1249_v49 }
 0x13e   : > { %v1499_v27 = vpop.f32.mrf.mxu2 }
 0x13f   : > { %v1512_v29 = vpop.f32.mrf.mxu3 }
 0x14d   : > { %v1729_v30 = vpop.f32.mrf.mxu0 }
 0x14e   : > { %v1742_v31 = vpop.f32.mrf.mxu1 }
 0x14f   : > { %v1743_v32 = vadd.f32 %v1742_v31, %v1729_v30 }
 0x151   : > { %v1772_v34 = vadd.f32 %v1743_v32, %v1514_v18 }
 0x155   : > { %v1731_v36 = vpop.f32.mrf.mxu0 }
 0x156   : > { %v1755_v33 = vpop.f32.mrf.mxu2  ;;  %v1744_v38 = vpop.f32.mrf.mxu1 }
 0x157   : > { %v1768_v35 = vpop.f32.mrf.mxu3 }
 0x158   : > { %v1769_v37 = vadd.f32 %v1768_v35, %v1755_v33 }
 0x15a   : > { %v1773_v59 = vadd.f32 %v1769_v37, %v1515_v26 }
 0x15e   : > { %v1757_v39 = vpop.f32.mrf.mxu2 }
 0x15f   : > { %v1770_v24 = vpop.f32.mrf.mxu3 }
 0x16d   : > { %v1987_v40 = vpop.f32.mrf.mxu0 }
 0x16e   : > { %v2000_v62 = vpop.f32.mrf.mxu1 }
 0x16f   : > { %v2001_v41 = vadd.f32 %v2000_v62, %v1987_v40 }
 0x171   : > { %v2030_v25 = vadd.f32 %v2001_v41, %v1772_v34 }
 0x175   : > { %v1989_v44 = vpop.f32.mrf.mxu0 }
 0x176   : > { %v2013_v42 = vpop.f32.mrf.mxu2  ;;  %v2002_v45 = vpop.f32.mrf.mxu1 }
 0x177   : > { %v2026_v43 = vpop.f32.mrf.mxu3 }
 0x178   : > { %v2027_v28 = vadd.f32 %v2026_v43, %v2013_v42 }
 0x17a   : > { %v2031_v17 = vadd.f32 %v2027_v28, %v1773_v59 }
 0x17e   : > { %v2015_v46 = vpop.f32.mrf.mxu2 }
 0x17f   : > { %v2028_v47 = vpop.f32.mrf.mxu3 }
 0x18d   : > { %v2253_v48 = vpop.f32.mrf.mxu0 }
 0x18e   : > { %v2266_v49 = vpop.f32.mrf.mxu1 }
 0x18f   : > { %v2267_v55 = vadd.f32 %v2266_v49, %v2253_v48 }
 0x191   : > { %v2296_v58 = vadd.f32 %v2267_v55, %v2030_v25 }
 0x195   : > { %v2255_v52 = vpop.f32.mrf.mxu0 }
 0x196   : > { %v2279_v50 = vpop.f32.mrf.mxu2  ;;  %v2268_v53 = vpop.f32.mrf.mxu1 }
 0x197   : > { %v2292_v51 = vpop.f32.mrf.mxu3 }
 0x198   : > { %v2293_v0 = vadd.f32 %v2292_v51, %v2279_v50 }
 0x19a   : > { %v2297_v10 = vadd.f32 %v2293_v0, %v2031_v17 }
 0x19e   : > { %v2281_v54 = vpop.f32.mrf.mxu2 }
 0x19f   : > { %v2294_v61 = vpop.f32.mrf.mxu3 }
 0x1ad   : > { %v2511_v56 = vpop.f32.mrf.mxu0 }
 0x1ae   : > { %v2524_v57 = vpop.f32.mrf.mxu1 }
 0x1af   : > { %v2525_v60 = vadd.f32 %v2524_v57, %v2511_v56 }
 0x1b1   : > { %v2554_v63 = vadd.f32 %v2525_v60, %v2296_v58 }
 0x1b3   : > { %v2563_v1 = vsel %vm2559_vm0, %v2554_v63, 0.0  ;;  %v2577_v2 = vmul.f32 %v2554_v63, %v2554_v63 }
 0x1b4   : > { %v2537_v3 = vpop.f32.mrf.mxu2  ;;  %v2564_v11 = vrot.slane %v2563_v1, 4 }
 0x1b5   : > { %v2579_v4 = vsel %vm2559_vm0, %v2577_v2, 0.0  ;;  %v2550_v5 = vpop.f32.mrf.mxu3  ;;  %v2513_v9 = vpop.f32.mrf.mxu0 }
 0x1b6   : > { %v2580_v6 = vrot.slane %v2579_v4, 4  ;;  %v2551_v12 = vadd.f32 %v2550_v5, %v2537_v3  ;;  %v2526_v8 = vpop.f32.mrf.mxu1  ;;  %v2565_v15 = vadd.f32 %v2564_v11, %v2563_v1 }
 0x1b8   : > { %v2581_v7 = vadd.f32 %v2580_v6, %v2579_v4  ;;  %v2555_v14 = vadd.f32 %v2551_v12, %v2297_v10  ;;  %v2566_v29 = vrot.slane %v2565_v15, 2 }
 0x1ba   : > { %v2558_v16 = vrot.slane %v2555_v14, 6  ;;  %v2570_v13 = vsel %vm2559_vm0, %v2555_v14, 0.0  ;;  %v2578_v19 = vmul.f32 %v2555_v14, %v2555_v14  ;;  %v2582_v20 = vrot.slane %v2581_v7, 2 }
 0x1bb   : > { %v2571_v18 = vrot.slane %v2570_v13, 4  ;;  %v2567_v35 = vadd.f32 %v2566_v29, %v2565_v15 }
 0x1bc   : > { %v2560_v21 = vsel %vm2559_vm0, %v2554_v63, %v2558_v16  ;;  %v2539_v22 = vpop.f32.mrf.mxu2  ;;  %v2586_v26 = vsel %vm2559_vm0, %v2578_v19, 0.0  ;;  %v2583_v32 = vadd.f32 %v2582_v20, %v2581_v7 }
 0x1bd   : > { %2562 = vst [vmem:[%s206_s19] sm:$0xf] %v2560_v21  ;;  %v2572_v23 = vadd.f32 %v2571_v18, %v2570_v13  ;;  %v2552_v27 = vpop.f32.mrf.mxu3  ;;  %v2587_v30 = vrot.slane %v2586_v26, 4  ;;  %v2568_v39 = vrot.slane %v2567_v35, 1 }
 0x1be   : > { %v2584_v37 = vrot.slane %v2583_v32, 1 }
 0x1bf   : > { %v2573_v31 = vrot.slane %v2572_v23, 2  ;;  %v2588_v34 = vadd.f32 %v2587_v30, %v2586_v26  ;;  %v2569_v25 = vadd.f32 %v2568_v39, %v2567_v35 }
 0x1c0   : > { %v2585_v40 = vadd.f32 %v2584_v37, %v2583_v32 }
 0x1c1   : > { %v2574_v33 = vadd.f32 %v2573_v31, %v2572_v23  ;;  %v2589_v36 = vrot.slane %v2588_v34, 2 }
 0x1c2   : > { %v2594_v44 = vsel %vm2593_vm1, %v2569_v25, %v2585_v40 }
 0x1c3   : > { %v2575_v38 = vrot.slane %v2574_v33, 1  ;;  %v2590_v59 = vadd.f32 %v2589_v36, %v2588_v34 }
 0x1c5   : > { %v2591_v24 = vrot.slane %v2590_v59, 1  ;;  %v2576_v62 = vadd.f32 %v2575_v38, %v2574_v33 }
 0x1c7   : > { %v2592_v41 = vadd.f32 %v2591_v24, %v2590_v59 }
 0x1c9   : > { %v2595_v42 = vsel %vm2593_vm1, %v2576_v62, %v2592_v41 }
 0x1ca   : > { %v2598_v43 = vrot.slane %v2595_v42, 6 }
 0x1cc   : > { %v2599_v45 = vsel %vm2559_vm0, %v2594_v44, %v2598_v43 }
 0x1cd   : > { %2601 = vst [vmem:[%s215_s21] sm:$0xf] %v2599_v45 }
 0x1ce PF: > { %s14_s16 = sadd.s32 1, %s4550_s16   ;;  %s6454_s12 = smov %s4542_s14 }
 0x1cf   : > { %p11_p7 = scmp.ge.s32.totalorder %s14_s16, 6   ;;  %s6455_s13 = smov %s4546_s15 }
 0x1d0   : > { %s6456_s14 = smov %s6459_s17  ;;  %s6457_s15 = smov %s6463_s18 }
 0x1d1   :  { %13 = sbr.rel (!%p11_p7) target bundleno = 3 (0x3), region = 81 }

</bundles_post_ra>
